<compile_context>
chip_gen: v7x
topology: tpu7x:2x2x1
jax: 0.10.0
libtpu: 0.0.40
codegen_flags: <defaults>
</compile_context>

<pallas_src>
import jax
import jax.numpy as jnp
from jax import lax
from jax.experimental import pallas as pl
from jax.experimental.pallas import tpu as pltpu

N, C_IN, H, W = 1, 896, 7, 7
C_MID, C_OUT = 128, 32
WP = 8                       # W padded 7 -> 8: flat spatial index = 8*h + w
HW = H * W                   # 49 real pixels
COLS = H * WP                # 56 padded spatial columns (lane axis)
HALO = 9                     # zero lane-halo per side for the 3x3 im2col taps
EPS = 1e-5


def _bn_relu_conv_kernel(x_ref, g1_ref, b1_ref, w1_ref, g2_ref, b2_ref,
                         w2_ref, out_ref):
    inv_n = 1.0 / float(HW)

    # Lane-validity mask: columns with w == 7 are padding.
    col = lax.broadcasted_iota(jnp.int32, (1, COLS), 1)
    valid = (col % WP) < W                                      # (1, 56)

    # ---- BatchNorm2d(896) (training mode, batch stats) + ReLU --------------
    # One-pass stats: the pad columns are zero, so plain sums over all 56
    # lanes equal the sums over the 49 valid pixels.
    x = x_ref[...]                                              # (896, 56) f32
    mean1 = jnp.sum(x, axis=1, keepdims=True) * inv_n           # (896, 1)
    var1 = jnp.sum(x * x, axis=1, keepdims=True) * inv_n - mean1 * mean1
    scale1 = lax.rsqrt(var1 + EPS) * g1_ref[...]
    shift1 = b1_ref[...] - mean1 * scale1
    xh = jnp.where(valid, jnp.maximum(x * scale1 + shift1, 0.0), 0.0)

    # ---- Conv2d 1x1 (896 -> 128): one bf16 MXU matmul, f32 accumulation ----
    y1 = jnp.dot(w1_ref[...], xh.astype(jnp.bfloat16),
                 preferred_element_type=jnp.float32)            # (128, 56)

    # ---- BatchNorm2d(128), batch stats (one pass) + ReLU --------------------
    mean2 = jnp.sum(y1, axis=1, keepdims=True) * inv_n
    var2 = jnp.sum(y1 * y1, axis=1, keepdims=True) * inv_n - mean2 * mean2
    scale2 = lax.rsqrt(var2 + EPS) * g2_ref[...]
    shift2 = b2_ref[...] - mean2 * scale2
    a2 = jnp.where(valid, jnp.maximum(y1 * scale2 + shift2, 0.0), 0.0)  # (128,56)

    # ---- Conv2d 3x3, stride 1, pad 1 (128 -> 32) as one im2col matmul ------
    # Zero lane-halo of HALO columns per side; every tap (dy, dx) is a static
    # lane slice.  The zeroed w == 7 columns supply the horizontal boundary
    # zeros, the halo supplies the vertical ones; junk only lands in the
    # discarded w == 7 output columns.
    zpad = jnp.zeros((C_MID, HALO), jnp.float32)
    a2p = jnp.concatenate([zpad, a2, zpad], axis=1)             # (128, 74)
    taps = []
    for dy in (-1, 0, 1):
        for dx in (-1, 0, 1):
            off = HALO + WP * dy + dx
            taps.append(a2p[:, off:off + COLS])
    lhs = jnp.concatenate(taps, axis=0).astype(jnp.bfloat16)    # (1152, 56)

    out_ref[...] = jnp.dot(w2_ref[...], lhs,
                           preferred_element_type=jnp.float32)  # (32, 56)


def prepare_params(g1, b1, w1_oihw, g2, b2, w2_oihw):
    """One-time weight prep, hoisted out of the per-call path."""
    # 1x1 weight used untransposed as (128, 896); 3x3 weight in im2col order
    # ((kh, kw, cin) flattened, cout-major rows) as (32, 1152).  bf16 halves
    # the weight DMA and matches the MXU operand dtype.
    w1_k = w1_oihw[:, :, 0, 0].astype(jnp.bfloat16)                      # (128, 896)
    w2_k = jnp.transpose(w2_oihw, (0, 2, 3, 1)).reshape(
        C_OUT, 9 * C_MID).astype(jnp.bfloat16)                           # (32, 1152)
    return (g1.reshape(C_IN, 1), b1.reshape(C_IN, 1), w1_k,
            g2.reshape(C_MID, 1), b2.reshape(C_MID, 1), w2_k)


@jax.jit
def fused_forward(x_nchw, g1c, b1c, w1_k, g2c, b2c, w2_k):
    # Channel-major: (1, 896, 7, 7) -> (896, 7, 8) -> (896, 56).  Only a pad
    # and reshapes around the kernel; no transposes.
    x_cm = jnp.pad(x_nchw.reshape(C_IN, H, W),
                   ((0, 0), (0, 0), (0, WP - W))).reshape(C_IN, COLS)

    vmem = pl.BlockSpec(memory_space=pltpu.MemorySpace.VMEM)
    out2d = pl.pallas_call(
        _bn_relu_conv_kernel,
        out_shape=jax.ShapeDtypeStruct((C_OUT, COLS), jnp.float32),
        in_specs=[vmem] * 7,
        out_specs=vmem,
    )(x_cm, g1c, b1c, w1_k, g2c, b2c, w2_k)

    # (32, 56) -> (1, 32, 7, 7): drop the zero pad column, no transpose.
    return out2d.reshape(C_OUT, H, WP)[:, :, :W][None]


def ref_forward(x, g1, b1, w1_oihw, g2, b2, w2_oihw):
    # Pure-JAX reference.  Convolutions use bf16 operands with f32
    # accumulation, mirroring the kernel's MXU usage; BN math is f32.
    def bn(v, g, b):
        mean = v.mean(axis=(0, 2, 3), keepdims=True)
        var = ((v - mean) ** 2).mean(axis=(0, 2, 3), keepdims=True)
        return ((v - mean) * lax.rsqrt(var + EPS) * g.reshape(1, -1, 1, 1)
                + b.reshape(1, -1, 1, 1))

    v = jnp.maximum(bn(x, g1, b1), 0.0)
    v = lax.conv_general_dilated(
        v.astype(jnp.bfloat16), w1_oihw.astype(jnp.bfloat16), (1, 1), 'VALID',
        dimension_numbers=('NCHW', 'OIHW', 'NCHW'),
        preferred_element_type=jnp.float32)
    v = jnp.maximum(bn(v, g2, b2), 0.0)
    v = lax.conv_general_dilated(
        v.astype(jnp.bfloat16), w2_oihw.astype(jnp.bfloat16), (1, 1),
        ((1, 1), (1, 1)), dimension_numbers=('NCHW', 'OIHW', 'NCHW'),
        preferred_element_type=jnp.float32)
    return v


if __name__ == "__main__":
    key = jax.random.PRNGKey(0)
    kx, kg1, kb1, kw1, kg2, kb2, kw2 = jax.random.split(key, 7)

    x = jax.random.normal(kx, (N, C_IN, H, W), jnp.float32)
    g1 = 1.0 + 0.1 * jax.random.normal(kg1, (C_IN,), jnp.float32)
    b1 = 0.1 * jax.random.normal(kb1, (C_IN,), jnp.float32)
    w1 = 0.05 * jax.random.normal(kw1, (C_MID, C_IN, 1, 1), jnp.float32)
    g2 = 1.0 + 0.1 * jax.random.normal(kg2, (C_MID,), jnp.float32)
    b2 = 0.1 * jax.random.normal(kb2, (C_MID,), jnp.float32)
    w2 = 0.05 * jax.random.normal(kw2, (C_OUT, C_MID, 3, 3), jnp.float32)

    # Hoisted, one-time weight/param preparation (not in the per-call path).
    params = jax.block_until_ready(prepare_params(g1, b1, w1, g2, b2, w2))

    out = fused_forward(x, *params)
    out = jax.block_until_ready(out)
    assert out.shape == (N, C_OUT, H, W), out.shape

    ref = ref_forward(x, g1, b1, w1, g2, b2, w2)
    if not jnp.allclose(out, ref, atol=5e-3, rtol=5e-3):
        raise AssertionError(
            f"mismatch, max abs err = {jnp.max(jnp.abs(out - ref))}")

    print("KERNEL_OK")
</pallas_src>

<mosaic_0001>
module attributes {stable_mosaic.version = 11 : i64} {
  func.func @_bn_relu_conv_kernel(%arg0: memref<896x56xf32, #tpu.memory_space<vmem>>, %arg1: memref<896x1xf32, #tpu.memory_space<vmem>>, %arg2: memref<896x1xf32, #tpu.memory_space<vmem>>, %arg3: memref<128x896xbf16, #tpu.memory_space<vmem>>, %arg4: memref<128x1xf32, #tpu.memory_space<vmem>>, %arg5: memref<128x1xf32, #tpu.memory_space<vmem>>, %arg6: memref<32x1152xbf16, #tpu.memory_space<vmem>>, %arg7: memref<32x56xf32, #tpu.memory_space<vmem>>) attributes {dimension_semantics = [], scalar_prefetch = 0 : i64, scratch_operands = 0 : i64, tpu.core_type = #tpu.core_type<tc>} {
    %0 = tpu.iota {dimensions = array<i32: 1>} : vector<1x56xi32>
    %c8_i32 = arith.constant 8 : i32
    %c0_i32 = arith.constant 0 : i32
    %1 = arith.cmpi eq, %c8_i32, %c0_i32 : i32
    %c1_i32 = arith.constant 1 : i32
    %2 = arith.select %1, %c1_i32, %c8_i32 : i32
    %3 = vector.broadcast %2 : i32 to vector<1x56xi32>
    %4 = arith.remsi %0, %3 : vector<1x56xi32>
    %c0_i32_0 = arith.constant 0 : i32
    %5 = vector.broadcast %c0_i32_0 : i32 to vector<1x56xi32>
    %6 = arith.cmpi ne, %4, %5 : vector<1x56xi32>
    %c0_i32_1 = arith.constant 0 : i32
    %7 = vector.broadcast %c0_i32_1 : i32 to vector<1x56xi32>
    %8 = arith.cmpi slt, %4, %7 : vector<1x56xi32>
    %c0_i32_2 = arith.constant 0 : i32
    %9 = arith.cmpi slt, %2, %c0_i32_2 : i32
    %10 = vector.broadcast %9 : i1 to vector<1x56xi1>
    %11 = vector.broadcast %10 : vector<1x56xi1> to vector<1x56xi1>
    %12 = arith.xori %8, %11 : vector<1x56xi1>
    %13 = arith.andi %12, %6 : vector<1x56xi1>
    %14 = vector.broadcast %2 : i32 to vector<1x56xi32>
    %15 = arith.addi %4, %14 : vector<1x56xi32>
    %16 = arith.select %13, %15, %4 : vector<1x56xi1>, vector<1x56xi32>
    %c7_i32 = arith.constant 7 : i32
    %17 = vector.broadcast %c7_i32 : i32 to vector<1x56xi32>
    %18 = arith.cmpi slt, %16, %17 : vector<1x56xi32>
    %c0 = arith.constant 0 : index
    %c0_3 = arith.constant 0 : index
    %19 = vector.load %arg0[%c0, %c0_3] : memref<896x56xf32, #tpu.memory_space<vmem>>, vector<896x56xf32>
    %cst = arith.constant dense<0.000000e+00> : vector<896xf32>
    %20 = vector.multi_reduction <add>, %19, %cst [1] : vector<896x56xf32> to vector<896xf32>
    %21 = vector.shape_cast %20 : vector<896xf32> to vector<896x1xf32>
    %cst_4 = arith.constant 0.0204081628 : f32
    %22 = vector.broadcast %cst_4 : f32 to vector<896x1xf32>
    %23 = arith.mulf %21, %22 : vector<896x1xf32>
    %24 = arith.mulf %19, %19 : vector<896x56xf32>
    %cst_5 = arith.constant dense<0.000000e+00> : vector<896xf32>
    %25 = vector.multi_reduction <add>, %24, %cst_5 [1] : vector<896x56xf32> to vector<896xf32>
    %26 = vector.shape_cast %25 : vector<896xf32> to vector<896x1xf32>
    %cst_6 = arith.constant 0.0204081628 : f32
    %27 = vector.broadcast %cst_6 : f32 to vector<896x1xf32>
    %28 = arith.mulf %26, %27 : vector<896x1xf32>
    %29 = arith.mulf %23, %23 : vector<896x1xf32>
    %30 = arith.subf %28, %29 : vector<896x1xf32>
    %cst_7 = arith.constant 9.99999974E-6 : f32
    %31 = vector.broadcast %cst_7 : f32 to vector<896x1xf32>
    %32 = arith.addf %30, %31 : vector<896x1xf32>
    %33 = math.rsqrt %32 : vector<896x1xf32>
    %c0_8 = arith.constant 0 : index
    %c0_9 = arith.constant 0 : index
    %34 = vector.load %arg1[%c0_8, %c0_9] : memref<896x1xf32, #tpu.memory_space<vmem>>, vector<896x1xf32>
    %35 = arith.mulf %33, %34 : vector<896x1xf32>
    %c0_10 = arith.constant 0 : index
    %c0_11 = arith.constant 0 : index
    %36 = vector.load %arg2[%c0_10, %c0_11] : memref<896x1xf32, #tpu.memory_space<vmem>>, vector<896x1xf32>
    %37 = arith.mulf %23, %35 : vector<896x1xf32>
    %38 = arith.subf %36, %37 : vector<896x1xf32>
    %39 = vector.broadcast %35 : vector<896x1xf32> to vector<896x56xf32>
    %40 = arith.mulf %19, %39 : vector<896x56xf32>
    %41 = vector.broadcast %38 : vector<896x1xf32> to vector<896x56xf32>
    %42 = arith.addf %40, %41 : vector<896x56xf32>
    %cst_12 = arith.constant 0.000000e+00 : f32
    %43 = vector.broadcast %cst_12 : f32 to vector<896x56xf32>
    %44 = arith.maximumf %42, %43 : vector<896x56xf32>
    %cst_13 = arith.constant 0.000000e+00 : f32
    %45 = vector.shape_cast %18 : vector<1x56xi1> to vector<1x56xi1>
    %46 = vector.broadcast %45 : vector<1x56xi1> to vector<896x56xi1>
    %47 = vector.broadcast %cst_13 : f32 to vector<896x56xf32>
    %48 = arith.select %46, %44, %47 : vector<896x56xi1>, vector<896x56xf32>
    %c0_14 = arith.constant 0 : index
    %c0_15 = arith.constant 0 : index
    %49 = vector.load %arg3[%c0_14, %c0_15] : memref<128x896xbf16, #tpu.memory_space<vmem>>, vector<128x896xbf16>
    %50 = arith.truncf %48 : vector<896x56xf32> to vector<896x56xbf16>
    %cst_16 = arith.constant dense<0.000000e+00> : vector<128x56xf32>
    %51 = tpu.matmul %49, %50, %cst_16 {dimension_numbers = #tpu.dot_dimension_numbers<[1], [0], [0], [1], [0, 0, 1, 1], [], []>} : vector<128x896xbf16>, vector<896x56xbf16>, vector<128x56xf32> -> vector<128x56xf32>
    %cst_17 = arith.constant dense<0.000000e+00> : vector<128xf32>
    %52 = vector.multi_reduction <add>, %51, %cst_17 [1] : vector<128x56xf32> to vector<128xf32>
    %53 = vector.shape_cast %52 : vector<128xf32> to vector<128x1xf32>
    %cst_18 = arith.constant 0.0204081628 : f32
    %54 = vector.broadcast %cst_18 : f32 to vector<128x1xf32>
    %55 = arith.mulf %53, %54 : vector<128x1xf32>
    %56 = arith.mulf %51, %51 : vector<128x56xf32>
    %cst_19 = arith.constant dense<0.000000e+00> : vector<128xf32>
    %57 = vector.multi_reduction <add>, %56, %cst_19 [1] : vector<128x56xf32> to vector<128xf32>
    %58 = vector.shape_cast %57 : vector<128xf32> to vector<128x1xf32>
    %cst_20 = arith.constant 0.0204081628 : f32
    %59 = vector.broadcast %cst_20 : f32 to vector<128x1xf32>
    %60 = arith.mulf %58, %59 : vector<128x1xf32>
    %61 = arith.mulf %55, %55 : vector<128x1xf32>
    %62 = arith.subf %60, %61 : vector<128x1xf32>
    %cst_21 = arith.constant 9.99999974E-6 : f32
    %63 = vector.broadcast %cst_21 : f32 to vector<128x1xf32>
    %64 = arith.addf %62, %63 : vector<128x1xf32>
    %65 = math.rsqrt %64 : vector<128x1xf32>
    %c0_22 = arith.constant 0 : index
    %c0_23 = arith.constant 0 : index
    %66 = vector.load %arg4[%c0_22, %c0_23] : memref<128x1xf32, #tpu.memory_space<vmem>>, vector<128x1xf32>
    %67 = arith.mulf %65, %66 : vector<128x1xf32>
    %c0_24 = arith.constant 0 : index
    %c0_25 = arith.constant 0 : index
    %68 = vector.load %arg5[%c0_24, %c0_25] : memref<128x1xf32, #tpu.memory_space<vmem>>, vector<128x1xf32>
    %69 = arith.mulf %55, %67 : vector<128x1xf32>
    %70 = arith.subf %68, %69 : vector<128x1xf32>
    %71 = vector.broadcast %67 : vector<128x1xf32> to vector<128x56xf32>
    %72 = arith.mulf %51, %71 : vector<128x56xf32>
    %73 = vector.broadcast %70 : vector<128x1xf32> to vector<128x56xf32>
    %74 = arith.addf %72, %73 : vector<128x56xf32>
    %cst_26 = arith.constant 0.000000e+00 : f32
    %75 = vector.broadcast %cst_26 : f32 to vector<128x56xf32>
    %76 = arith.maximumf %74, %75 : vector<128x56xf32>
    %cst_27 = arith.constant 0.000000e+00 : f32
    %77 = vector.shape_cast %18 : vector<1x56xi1> to vector<1x56xi1>
    %78 = vector.broadcast %77 : vector<1x56xi1> to vector<128x56xi1>
    %79 = vector.broadcast %cst_27 : f32 to vector<128x56xf32>
    %80 = arith.select %78, %76, %79 : vector<128x56xi1>, vector<128x56xf32>
    %cst_28 = arith.constant 0.000000e+00 : f32
    %81 = vector.broadcast %cst_28 : f32 to vector<128x9xf32>
    %82 = tpu.concatenate %81, %80, %81 in 1 : vector<128x9xf32>, vector<128x56xf32>, vector<128x9xf32> -> vector<128x74xf32>
    %83 = vector.extract_strided_slice %82 {offsets = [0, 0], sizes = [128, 56], strides = [1, 1]} : vector<128x74xf32> to vector<128x56xf32>
    %84 = vector.extract_strided_slice %82 {offsets = [0, 1], sizes = [128, 56], strides = [1, 1]} : vector<128x74xf32> to vector<128x56xf32>
    %85 = vector.extract_strided_slice %82 {offsets = [0, 2], sizes = [128, 56], strides = [1, 1]} : vector<128x74xf32> to vector<128x56xf32>
    %86 = vector.extract_strided_slice %82 {offsets = [0, 8], sizes = [128, 56], strides = [1, 1]} : vector<128x74xf32> to vector<128x56xf32>
    %87 = vector.extract_strided_slice %82 {offsets = [0, 9], sizes = [128, 56], strides = [1, 1]} : vector<128x74xf32> to vector<128x56xf32>
    %88 = vector.extract_strided_slice %82 {offsets = [0, 10], sizes = [128, 56], strides = [1, 1]} : vector<128x74xf32> to vector<128x56xf32>
    %89 = vector.extract_strided_slice %82 {offsets = [0, 16], sizes = [128, 56], strides = [1, 1]} : vector<128x74xf32> to vector<128x56xf32>
    %90 = vector.extract_strided_slice %82 {offsets = [0, 17], sizes = [128, 56], strides = [1, 1]} : vector<128x74xf32> to vector<128x56xf32>
    %91 = vector.extract_strided_slice %82 {offsets = [0, 18], sizes = [128, 56], strides = [1, 1]} : vector<128x74xf32> to vector<128x56xf32>
    %92 = tpu.concatenate %83, %84, %85, %86, %87, %88, %89, %90, %91 in 0 : vector<128x56xf32>, vector<128x56xf32>, vector<128x56xf32>, vector<128x56xf32>, vector<128x56xf32>, vector<128x56xf32>, vector<128x56xf32>, vector<128x56xf32>, vector<128x56xf32> -> vector<1152x56xf32>
    %93 = arith.truncf %92 : vector<1152x56xf32> to vector<1152x56xbf16>
    %c0_29 = arith.constant 0 : index
    %c0_30 = arith.constant 0 : index
    %94 = vector.load %arg6[%c0_29, %c0_30] : memref<32x1152xbf16, #tpu.memory_space<vmem>>, vector<32x1152xbf16>
    %cst_31 = arith.constant dense<0.000000e+00> : vector<32x56xf32>
    %95 = tpu.matmul %94, %93, %cst_31 {dimension_numbers = #tpu.dot_dimension_numbers<[1], [0], [0], [1], [0, 0, 1, 1], [], []>} : vector<32x1152xbf16>, vector<1152x56xbf16>, vector<32x56xf32> -> vector<32x56xf32>
    %c0_32 = arith.constant 0 : index
    %c0_33 = arith.constant 0 : index
    %96 = vector.load %arg7[%c0_32, %c0_33] : memref<32x56xf32, #tpu.memory_space<vmem>>, vector<32x56xf32>
    tpu.vector_store %arg7[%c0_32, %c0_33], %95 {strides = array<i32>} : memref<32x56xf32, #tpu.memory_space<vmem>>, vector<32x56xf32>,
    return
  }
}

</mosaic_0001>

<bundles_post_ra>
// kernel: fused_forward.1
= control target key start
LH: loop header
LB: loop body
LE: loop exit
PB: predicated region body
PF: predicated region fallthrough
CT: control target
= control target key end

     0   :  { %vm154_vm0 = vcmask 457728   ;;  %vm5113_vm3 = vcmask 72704   ;;  %vm5130_vm4 = vcmask 531456   ;;  %s7481_s11 = smov 120   ;;  %s7482_s12 = smov 126   ;;  %s12794_s0 = inlined_call_operand.vmem [shape: f32[896,56], index: 0, kind: input, shape index: {}]   ;;  %s12795_s1 = inlined_call_operand.vmem [shape: f32[896,1], index: 1, kind: input, shape index: {}]   ;;  %s12796_s2 = inlined_call_operand.vmem [shape: f32[896,1], index: 2, kind: input, shape index: {}]   ;;  %s12797_s3 = inlined_call_operand.vmem [shape: bf16[128,896], index: 3, kind: input, shape index: {}]   ;;  %s12798_s4 = inlined_call_operand.vmem [shape: f32[128,1], index: 4, kind: input, shape index: {}]   ;;  %s12799_s5 = inlined_call_operand.vmem [shape: f32[128,1], index: 5, kind: input, shape index: {}]   ;;  %s12800_s6 = inlined_call_operand.vmem [shape: bf16[32,1152], index: 6, kind: input, shape index: {}]   ;;  %s12801_s7 = inlined_call_operand.vmem [shape: f32[32,56], index: 7, kind: output, shape index: {}]  }
   0x1   :  { %v7531_v0 = vld [vmem:[%s12794_s0 + $0x10] sm:$0xff]  ;;  %v7536_v1 = vld [vmem:[%s12794_s0] sm:$0xff]  ;;  %v7541_v2 = vld [vmem:[%s12794_s0 + $0x18] sm:$0xff]  ;;  %s7483_s14 = smov 118   ;;  %s7484_s15 = smov 119  }
   0x2   :  { %v161_v3 = vsel %vm154_vm0, %v7531_v0, 0.0  ;;  %v155_v4 = vsel %vm154_vm0, %v7536_v1, 0.0  ;;  %v7550_v5 = vld [vmem:[%s12794_s0 + $0x8] sm:$0xff]  ;;  %v164_v6 = vsel %vm154_vm0, %v7541_v2, 0.0  ;;  %v7564_v9 = vld [vmem:[%s12794_s0 + $0x20] sm:$0xff]  ;;  %v7573_v12 = vld [vmem:[%s12794_s0 + $0x38] sm:$0xff] }
   0x3   :  { %162 = vadd.xlane.f32.xlu1 %v161_v3  ;;  %156 = vadd.xlane.f32.xlu0 %v155_v4  ;;  %v158_v7 = vsel %vm154_vm0, %v7550_v5, 0.0  ;;  %v7559_v8 = vld [vmem:[%s12794_s0 + $0x28] sm:$0xff]  ;;  %v167_v11 = vsel %vm154_vm0, %v7564_v9, 0.0  ;;  %v7578_v13 = vld [vmem:[%s12794_s0 + $0x30] sm:$0xff]  ;;  %v176_v14 = vsel %vm154_vm0, %v7573_v12, 0.0  ;;  %v7592_v17 = vld [vmem:[%s12794_s0 + $0x40] sm:$0xff] }
   0x4   :  { %v170_v10 = vsel %vm154_vm0, %v7559_v8, 0.0  ;;  %v173_v15 = vsel %vm154_vm0, %v7578_v13, 0.0  ;;  %v7587_v16 = vld [vmem:[%s12794_s0 + $0x48] sm:$0xff]  ;;  %v179_v19 = vsel %vm154_vm0, %v7592_v17, 0.0  ;;  %v7601_v20 = vld [vmem:[%s12794_s0 + $0x58] sm:$0xff]  ;;  %v7606_v21 = vld [vmem:[%s12794_s0 + $0x50] sm:$0xff] }
   0x5   :  { %v182_v18 = vsel %vm154_vm0, %v7587_v16, 0.0  ;;  %v188_v22 = vsel %vm154_vm0, %v7601_v20, 0.0  ;;  %v185_v23 = vsel %vm154_vm0, %v7606_v21, 0.0  ;;  %v7615_v24 = vld [vmem:[%s12794_s0 + $0x68] sm:$0xff]  ;;  %v7620_v25 = vld [vmem:[%s12794_s0 + $0x60] sm:$0xff]  ;;  %v7629_v28 = vld [vmem:[%s12794_s0 + $0x78] sm:$0xff] }
   0x6   :  { %v194_v26 = vsel %vm154_vm0, %v7615_v24, 0.0  ;;  %v191_v27 = vsel %vm154_vm0, %v7620_v25, 0.0  ;;  %v7634_v29 = vld [vmem:[%s12794_s0 + $0x70] sm:$0xff]  ;;  %v200_v30 = vsel %vm154_vm0, %v7629_v28, 0.0  ;;  %v7643_v32 = vld [vmem:[%s12794_s0 + $0x88] sm:$0xff]  ;;  %v7648_v33 = vld [vmem:[%s12794_s0 + $0x80] sm:$0xff] }
   0x7   :  { %165 = vadd.xlane.f32.xlu1 %v164_v6  ;;  %159 = vadd.xlane.f32.xlu0 %v158_v7  ;;  %v197_v31 = vsel %vm154_vm0, %v7634_v29, 0.0  ;;  %v206_v34 = vsel %vm154_vm0, %v7643_v32, 0.0  ;;  %v203_v35 = vsel %vm154_vm0, %v7648_v33, 0.0  ;;  %v7657_v36 = vld [vmem:[%s12794_s0 + $0x98] sm:$0xff]  ;;  %v7662_v37 = vld [vmem:[%s12794_s0 + $0x90] sm:$0xff]  ;;  %v7671_v40 = vld [vmem:[%s12794_s0 + $0xa8] sm:$0xff] }
   0x8   :  { %v212_v38 = vsel %vm154_vm0, %v7657_v36, 0.0  ;;  %v209_v39 = vsel %vm154_vm0, %v7662_v37, 0.0  ;;  %v7676_v41 = vld [vmem:[%s12794_s0 + $0xa0] sm:$0xff]  ;;  %v218_v42 = vsel %vm154_vm0, %v7671_v40, 0.0  ;;  %v7685_v44 = vld [vmem:[%s12794_s0 + $0xb8] sm:$0xff]  ;;  %v7690_v45 = vld [vmem:[%s12794_s0 + $0xb0] sm:$0xff] }
   0x9   :  { %v215_v43 = vsel %vm154_vm0, %v7676_v41, 0.0  ;;  %v224_v46 = vsel %vm154_vm0, %v7685_v44, 0.0  ;;  %v221_v47 = vsel %vm154_vm0, %v7690_v45, 0.0  ;;  %v7699_v48 = vld [vmem:[%s12794_s0 + $0xc8] sm:$0xff]  ;;  %v7704_v49 = vld [vmem:[%s12794_s0 + $0xc0] sm:$0xff]  ;;  %v7713_v52 = vld [vmem:[%s12794_s0 + $0xd8] sm:$0xff] }
   0xa   :  { %v230_v50 = vsel %vm154_vm0, %v7699_v48, 0.0  ;;  %v227_v51 = vsel %vm154_vm0, %v7704_v49, 0.0  ;;  %v7718_v53 = vld [vmem:[%s12794_s0 + $0xd0] sm:$0xff]  ;;  %v236_v54 = vsel %vm154_vm0, %v7713_v52, 0.0  ;;  %v7727_v56 = vld [vmem:[%s12794_s0 + $0xe8] sm:$0xff]  ;;  %v7732_v57 = vld [vmem:[%s12794_s0 + $0xe0] sm:$0xff] }
   0xb   :  { %171 = vadd.xlane.f32.xlu1 %v170_v10  ;;  %168 = vadd.xlane.f32.xlu0 %v167_v11  ;;  %v233_v55 = vsel %vm154_vm0, %v7718_v53, 0.0  ;;  %v242_v58 = vsel %vm154_vm0, %v7727_v56, 0.0  ;;  %v239_v59 = vsel %vm154_vm0, %v7732_v57, 0.0  ;;  %v7741_v60 = vld [vmem:[%s12794_s0 + $0xf8] sm:$0xff]  ;;  %v7746_v61 = vld [vmem:[%s12794_s0 + $0xf0] sm:$0xff]  ;;  %v7755_v3 = vld [vmem:[%s12794_s0 + $0x108] sm:$0xff] }
   0xc   :  { %v248_v62 = vsel %vm154_vm0, %v7741_v60, 0.0  ;;  %v245_v63 = vsel %vm154_vm0, %v7746_v61, 0.0  ;;  %v7760_v4 = vld [vmem:[%s12794_s0 + $0x100] sm:$0xff]  ;;  %v254_v6 = vsel %vm154_vm0, %v7755_v3, 0.0  ;;  %v7769_v10 = vld [vmem:[%s12794_s0 + $0x118] sm:$0xff]  ;;  %v7774_v11 = vld [vmem:[%s12794_s0 + $0x110] sm:$0xff] }
   0xd   :  { %v251_v7 = vsel %vm154_vm0, %v7760_v4, 0.0  ;;  %s7485_s18 = smov 111   ;;  %s7486_s19 = smov 112   ;;  %vm12644_vm5 = vmpackc.low %vm5130_vm4, %vm5130_vm4 }
   0xe   :  { %s7487_s20 = smov 110  }
   0xf   :  { %177 = vadd.xlane.f32.xlu1 %v176_v14  ;;  %174 = vadd.xlane.f32.xlu0 %v173_v15  ;;  %v260_v14 = vsel %vm154_vm0, %v7769_v10, 0.0  ;;  %v257_v15 = vsel %vm154_vm0, %v7774_v11, 0.0 }
  0x13   :  { %183 = vadd.xlane.f32.xlu1 %v182_v18  ;;  %180 = vadd.xlane.f32.xlu0 %v179_v19  ;;  %v7783_v18 = vld [vmem:[%s12794_s0 + $0x128] sm:$0xff]  ;;  %v7788_v19 = vld [vmem:[%s12794_s0 + $0x120] sm:$0xff] }
  0x17   :  { %189 = vadd.xlane.f32.xlu1 %v188_v22  ;;  %186 = vadd.xlane.f32.xlu0 %v185_v23  ;;  %v266_v22 = vsel %vm154_vm0, %v7783_v18, 0.0  ;;  %v263_v23 = vsel %vm154_vm0, %v7788_v19, 0.0 }
  0x1b   :  { %195 = vadd.xlane.f32.xlu1 %v194_v26  ;;  %192 = vadd.xlane.f32.xlu0 %v191_v27  ;;  %v7797_v26 = vld [vmem:[%s12794_s0 + $0x138] sm:$0xff]  ;;  %v7802_v27 = vld [vmem:[%s12794_s0 + $0x130] sm:$0xff] }
  0x1f   :  { %201 = vadd.xlane.f32.xlu1 %v200_v30  ;;  %198 = vadd.xlane.f32.xlu0 %v197_v31  ;;  %v272_v30 = vsel %vm154_vm0, %v7797_v26, 0.0  ;;  %v269_v31 = vsel %vm154_vm0, %v7802_v27, 0.0 }
  0x23   :  { %207 = vadd.xlane.f32.xlu1 %v206_v34  ;;  %204 = vadd.xlane.f32.xlu0 %v203_v35  ;;  %v7811_v34 = vld [vmem:[%s12794_s0 + $0x148] sm:$0xff]  ;;  %v7816_v35 = vld [vmem:[%s12794_s0 + $0x140] sm:$0xff] }
  0x27   :  { %213 = vadd.xlane.f32.xlu1 %v212_v38  ;;  %210 = vadd.xlane.f32.xlu0 %v209_v39  ;;  %v278_v38 = vsel %vm154_vm0, %v7811_v34, 0.0  ;;  %v275_v39 = vsel %vm154_vm0, %v7816_v35, 0.0 }
  0x2b   :  { %219 = vadd.xlane.f32.xlu1 %v218_v42  ;;  %216 = vadd.xlane.f32.xlu0 %v215_v43  ;;  %v7825_v42 = vld [vmem:[%s12794_s0 + $0x158] sm:$0xff]  ;;  %v7830_v43 = vld [vmem:[%s12794_s0 + $0x150] sm:$0xff] }
  0x2f   :  { %225 = vadd.xlane.f32.xlu1 %v224_v46  ;;  %222 = vadd.xlane.f32.xlu0 %v221_v47  ;;  %v284_v46 = vsel %vm154_vm0, %v7825_v42, 0.0  ;;  %v281_v47 = vsel %vm154_vm0, %v7830_v43, 0.0 }
  0x33   :  { %231 = vadd.xlane.f32.xlu1 %v230_v50  ;;  %228 = vadd.xlane.f32.xlu0 %v227_v51  ;;  %v7839_v50 = vld [vmem:[%s12794_s0 + $0x168] sm:$0xff]  ;;  %v7844_v51 = vld [vmem:[%s12794_s0 + $0x160] sm:$0xff] }
  0x37   :  { %237 = vadd.xlane.f32.xlu1 %v236_v54  ;;  %234 = vadd.xlane.f32.xlu0 %v233_v55  ;;  %v290_v54 = vsel %vm154_vm0, %v7839_v50, 0.0  ;;  %v287_v55 = vsel %vm154_vm0, %v7844_v51, 0.0 }
  0x3b   :  { %243 = vadd.xlane.f32.xlu1 %v242_v58  ;;  %240 = vadd.xlane.f32.xlu0 %v239_v59  ;;  %v7853_v58 = vld [vmem:[%s12794_s0 + $0x178] sm:$0xff]  ;;  %v7858_v59 = vld [vmem:[%s12794_s0 + $0x170] sm:$0xff] }
  0x3f   :  { %249 = vadd.xlane.f32.xlu1 %v248_v62  ;;  %246 = vadd.xlane.f32.xlu0 %v245_v63  ;;  %v296_v62 = vsel %vm154_vm0, %v7853_v58, 0.0  ;;  %v293_v63 = vsel %vm154_vm0, %v7858_v59, 0.0 }
  0x43   :  { %255 = vadd.xlane.f32.xlu1 %v254_v6  ;;  %252 = vadd.xlane.f32.xlu0 %v251_v7  ;;  %v7867_v6 = vld [vmem:[%s12794_s0 + $0x188] sm:$0xff]  ;;  %v7872_v7 = vld [vmem:[%s12794_s0 + $0x180] sm:$0xff] }
  0x47   :  { %261 = vadd.xlane.f32.xlu1 %v260_v14  ;;  %258 = vadd.xlane.f32.xlu0 %v257_v15  ;;  %v302_v14 = vsel %vm154_vm0, %v7867_v6, 0.0  ;;  %v299_v15 = vsel %vm154_vm0, %v7872_v7, 0.0 }
  0x4b   :  { %267 = vadd.xlane.f32.xlu1 %v266_v22  ;;  %264 = vadd.xlane.f32.xlu0 %v263_v23  ;;  %v7881_v22 = vld [vmem:[%s12794_s0 + $0x198] sm:$0xff]  ;;  %v7886_v23 = vld [vmem:[%s12794_s0 + $0x190] sm:$0xff] }
  0x4f   :  { %273 = vadd.xlane.f32.xlu1 %v272_v30  ;;  %270 = vadd.xlane.f32.xlu0 %v269_v31  ;;  %v308_v30 = vsel %vm154_vm0, %v7881_v22, 0.0  ;;  %v305_v31 = vsel %vm154_vm0, %v7886_v23, 0.0 }
  0x53   :  { %279 = vadd.xlane.f32.xlu1 %v278_v38  ;;  %276 = vadd.xlane.f32.xlu0 %v275_v39  ;;  %v7895_v38 = vld [vmem:[%s12794_s0 + $0x1a8] sm:$0xff]  ;;  %v7900_v39 = vld [vmem:[%s12794_s0 + $0x1a0] sm:$0xff] }
  0x57   :  { %285 = vadd.xlane.f32.xlu1 %v284_v46  ;;  %282 = vadd.xlane.f32.xlu0 %v281_v47  ;;  %v314_v46 = vsel %vm154_vm0, %v7895_v38, 0.0  ;;  %v311_v47 = vsel %vm154_vm0, %v7900_v39, 0.0 }
  0x5b   :  { %291 = vadd.xlane.f32.xlu1 %v290_v54  ;;  %288 = vadd.xlane.f32.xlu0 %v287_v55  ;;  %v7909_v54 = vld [vmem:[%s12794_s0 + $0x1b8] sm:$0xff]  ;;  %v7914_v55 = vld [vmem:[%s12794_s0 + $0x1b0] sm:$0xff] }
  0x5c   :  { %13017 = vst [vmem:[#allocation2_spill] sm:$0xff] %v7909_v54  ;;  %13018 = vst [vmem:[#allocation3_spill] sm:$0xff] %v7914_v55 }
  0x5f   :  { %297 = vadd.xlane.f32.xlu1 %v296_v62  ;;  %294 = vadd.xlane.f32.xlu0 %v293_v63  ;;  %v320_v62 = vsel %vm154_vm0, %v7909_v54, 0.0  ;;  %v317_v63 = vsel %vm154_vm0, %v7914_v55, 0.0  ;;  %v8053_v55 = vld [vmem:[%s12794_s0 + $0x258] sm:$0xff]  ;;  %v603_v54 = vmul.f32 %v7536_v1, %v7536_v1 }
  0x60   :  { %13039 = vst [vmem:[#allocation24_spill] sm:$0xff] %v8053_v55 }
  0x63   :  { %303 = vadd.xlane.f32.xlu1 %v302_v14  ;;  %300 = vadd.xlane.f32.xlu0 %v299_v15  ;;  %v7923_v14 = vld [vmem:[%s12794_s0 + $0x1c8] sm:$0xff]  ;;  %v7928_v15 = vld [vmem:[%s12794_s0 + $0x1c0] sm:$0xff] }
  0x64   :  { %13019 = vst [vmem:[#allocation4_spill] sm:$0xff] %v7923_v14  ;;  %13020 = vst [vmem:[#allocation5_spill] sm:$0xff] %v7928_v15 }
  0x67   :  { %309 = vadd.xlane.f32.xlu1 %v308_v30  ;;  %306 = vadd.xlane.f32.xlu0 %v305_v31  ;;  %v326_v30 = vsel %vm154_vm0, %v7923_v14, 0.0  ;;  %v323_v31 = vsel %vm154_vm0, %v7928_v15, 0.0  ;;  %v7951_v15 = vld [vmem:[%s12794_s0 + $0x1e8] sm:$0xff]  ;;  %v7956_v14 = vld [vmem:[%s12794_s0 + $0x1e0] sm:$0xff] }
  0x68   :  { %13023 = vst [vmem:[#allocation8_spill] sm:$0xff] %v7951_v15  ;;  %13024 = vst [vmem:[#allocation9_spill] sm:$0xff] %v7956_v14 }
  0x6b   :  { %315 = vadd.xlane.f32.xlu1 %v314_v46  ;;  %312 = vadd.xlane.f32.xlu0 %v311_v47  ;;  %v7937_v46 = vld [vmem:[%s12794_s0 + $0x1d8] sm:$0xff]  ;;  %v7942_v47 = vld [vmem:[%s12794_s0 + $0x1d0] sm:$0xff] }
  0x6c   :  { %13021 = vst [vmem:[#allocation6_spill] sm:$0xff] %v7937_v46  ;;  %13022 = vst [vmem:[#allocation7_spill] sm:$0xff] %v7942_v47 }
  0x6f   :  { %321 = vadd.xlane.f32.xlu1 %v320_v62  ;;  %318 = vadd.xlane.f32.xlu0 %v317_v63  ;;  %v332_v62 = vsel %vm154_vm0, %v7937_v46, 0.0  ;;  %v329_v63 = vsel %vm154_vm0, %v7942_v47, 0.0  ;;  %v7965_v47 = vld [vmem:[%s12794_s0 + $0x1f8] sm:$0xff]  ;;  %v7970_v46 = vld [vmem:[%s12794_s0 + $0x1f0] sm:$0xff] }
  0x70   :  { %13025 = vst [vmem:[#allocation10_spill] sm:$0xff] %v7965_v47  ;;  %13026 = vst [vmem:[#allocation11_spill] sm:$0xff] %v7970_v46 }
  0x73   :  { %327 = vadd.xlane.f32.xlu1 %v326_v30  ;;  %324 = vadd.xlane.f32.xlu0 %v323_v31  ;;  %v338_v30 = vsel %vm154_vm0, %v7951_v15, 0.0  ;;  %v335_v31 = vsel %vm154_vm0, %v7956_v14, 0.0  ;;  %v7979_v14 = vld [vmem:[%s12794_s0 + $0x208] sm:$0xff]  ;;  %v7984_v15 = vld [vmem:[%s12794_s0 + $0x200] sm:$0xff] }
  0x74   :  { %13027 = vst [vmem:[#allocation12_spill] sm:$0xff] %v7979_v14  ;;  %13028 = vst [vmem:[#allocation13_spill] sm:$0xff] %v7984_v15 }
  0x77   :  { %333 = vadd.xlane.f32.xlu1 %v332_v62  ;;  %330 = vadd.xlane.f32.xlu0 %v329_v63  ;;  %v344_v62 = vsel %vm154_vm0, %v7965_v47, 0.0  ;;  %v341_v63 = vsel %vm154_vm0, %v7970_v46, 0.0  ;;  %v7993_v46 = vld [vmem:[%s12794_s0 + $0x218] sm:$0xff]  ;;  %v7998_v47 = vld [vmem:[%s12794_s0 + $0x210] sm:$0xff] }
  0x78   :  { %13029 = vst [vmem:[#allocation14_spill] sm:$0xff] %v7993_v46  ;;  %13030 = vst [vmem:[#allocation15_spill] sm:$0xff] %v7998_v47 }
  0x7b   :  { %339 = vadd.xlane.f32.xlu1 %v338_v30  ;;  %336 = vadd.xlane.f32.xlu0 %v335_v31  ;;  %v350_v30 = vsel %vm154_vm0, %v7979_v14, 0.0  ;;  %v347_v31 = vsel %vm154_vm0, %v7984_v15, 0.0  ;;  %v8007_v15 = vld [vmem:[%s12794_s0 + $0x228] sm:$0xff]  ;;  %v8012_v14 = vld [vmem:[%s12794_s0 + $0x220] sm:$0xff] }
  0x7c   :  { %13031 = vst [vmem:[#allocation16_spill] sm:$0xff] %v8007_v15  ;;  %13032 = vst [vmem:[#allocation17_spill] sm:$0xff] %v8012_v14 }
  0x7f   :  { %345 = vadd.xlane.f32.xlu1 %v344_v62  ;;  %342 = vadd.xlane.f32.xlu0 %v341_v63  ;;  %v356_v62 = vsel %vm154_vm0, %v7993_v46, 0.0  ;;  %v353_v63 = vsel %vm154_vm0, %v7998_v47, 0.0  ;;  %v8021_v47 = vld [vmem:[%s12794_s0 + $0x238] sm:$0xff]  ;;  %v8026_v46 = vld [vmem:[%s12794_s0 + $0x230] sm:$0xff] }
  0x80   :  { %13033 = vst [vmem:[#allocation18_spill] sm:$0xff] %v8021_v47  ;;  %13034 = vst [vmem:[#allocation19_spill] sm:$0xff] %v8026_v46 }
  0x83   :  { %351 = vadd.xlane.f32.xlu1 %v350_v30  ;;  %348 = vadd.xlane.f32.xlu0 %v347_v31  ;;  %v362_v30 = vsel %vm154_vm0, %v8007_v15, 0.0  ;;  %v359_v31 = vsel %vm154_vm0, %v8012_v14, 0.0  ;;  %v8035_v14 = vld [vmem:[%s12794_s0 + $0x248] sm:$0xff]  ;;  %v8040_v15 = vld [vmem:[%s12794_s0 + $0x240] sm:$0xff] }
  0x84   :  { %13035 = vst [vmem:[#allocation20_spill] sm:$0xff] %v8035_v14  ;;  %13036 = vst [vmem:[#allocation21_spill] sm:$0xff] %v8040_v15 }
  0x87   :  { %357 = vadd.xlane.f32.xlu1 %v356_v62  ;;  %354 = vadd.xlane.f32.xlu0 %v353_v63  ;;  %v368_v62 = vsel %vm154_vm0, %v8021_v47, 0.0  ;;  %v365_v63 = vsel %vm154_vm0, %v8026_v46, 0.0  ;;  %v374_v47 = vsel %vm154_vm0, %v8035_v14, 0.0  ;;  %v371_v46 = vsel %vm154_vm0, %v8040_v15, 0.0  ;;  %v8071_v14 = vld [vmem:[%s12794_s0 + $0x268] sm:$0xff] }
  0x88   :  { %13043 = vst [vmem:[#allocation28_spill] sm:$0xff] %v8071_v14 }
  0x8b   :  { %363 = vadd.xlane.f32.xlu1 %v362_v30  ;;  %360 = vadd.xlane.f32.xlu0 %v359_v31 }
  0x8f   :  { %369 = vadd.xlane.f32.xlu1 %v368_v62  ;;  %366 = vadd.xlane.f32.xlu0 %v365_v63  ;;  %v8058_v62 = vld [vmem:[%s12794_s0 + $0x250] sm:$0xff] }
  0x90   :  { %v8042_v30 = vpop.xlane.xlu1 %162  ;;  %v8044_v31 = vpop.xlane.xlu0 %156  ;;  %13040 = vst [vmem:[#allocation25_spill] sm:$0xff] %v8058_v62  ;;  %v377_v15 = vsel %vm154_vm0, %v8058_v62, 0.0 }
  0x91   :  { %13037 = vst [vmem:[#allocation22_spill] sm:$0xff] %v8042_v30  ;;  %13038 = vst [vmem:[#allocation23_spill] sm:$0xff] %v8044_v31  ;;  %v380_v30 = vsel %vm154_vm0, %v8053_v55, 0.0  ;;  %v8089_v55 = vld [vmem:[%s12794_s0 + $0x278] sm:$0xff] }
  0x92   :  { %13047 = vst [vmem:[#allocation32_spill] sm:$0xff] %v8089_v55 }
  0x93   :  { %375 = vadd.xlane.f32.xlu1 %v374_v47  ;;  %372 = vadd.xlane.f32.xlu0 %v371_v46  ;;  %v8076_v47 = vld [vmem:[%s12794_s0 + $0x260] sm:$0xff] }
  0x94   :  { %v8060_v63 = vpop.xlane.xlu1 %165  ;;  %v8062_v31 = vpop.xlane.xlu0 %159  ;;  %13044 = vst [vmem:[#allocation29_spill] sm:$0xff] %v8076_v47  ;;  %v383_v62 = vsel %vm154_vm0, %v8076_v47, 0.0 }
  0x95   :  { %13041 = vst [vmem:[#allocation26_spill] sm:$0xff] %v8060_v63  ;;  %13042 = vst [vmem:[#allocation27_spill] sm:$0xff] %v8062_v31  ;;  %v386_v31 = vsel %vm154_vm0, %v8071_v14, 0.0  ;;  %v8107_v14 = vld [vmem:[%s12794_s0 + $0x288] sm:$0xff] }
  0x96   :  { %13051 = vst [vmem:[#allocation36_spill] sm:$0xff] %v8107_v14 }
  0x97   :  { %381 = vadd.xlane.f32.xlu1 %v380_v30  ;;  %378 = vadd.xlane.f32.xlu0 %v377_v15  ;;  %v8094_v30 = vld [vmem:[%s12794_s0 + $0x270] sm:$0xff] }
  0x98   :  { %v8078_v46 = vpop.xlane.xlu1 %171  ;;  %v8080_v63 = vpop.xlane.xlu0 %168  ;;  %13048 = vst [vmem:[#allocation33_spill] sm:$0xff] %v8094_v30  ;;  %v389_v47 = vsel %vm154_vm0, %v8094_v30, 0.0 }
  0x99   :  { %13045 = vst [vmem:[#allocation30_spill] sm:$0xff] %v8078_v46  ;;  %13046 = vst [vmem:[#allocation31_spill] sm:$0xff] %v8080_v63  ;;  %v392_v63 = vsel %vm154_vm0, %v8089_v55, 0.0  ;;  %v8125_v55 = vld [vmem:[%s12794_s0 + $0x298] sm:$0xff] }
  0x9a   :  { %13055 = vst [vmem:[#allocation40_spill] sm:$0xff] %v8125_v55 }
  0x9b   :  { %387 = vadd.xlane.f32.xlu1 %v386_v31  ;;  %384 = vadd.xlane.f32.xlu0 %v383_v62  ;;  %v8112_v31 = vld [vmem:[%s12794_s0 + $0x280] sm:$0xff] }
  0x9c   :  { %v8096_v15 = vpop.xlane.xlu1 %177  ;;  %v8098_v46 = vpop.xlane.xlu0 %174  ;;  %13052 = vst [vmem:[#allocation37_spill] sm:$0xff] %v8112_v31  ;;  %v395_v30 = vsel %vm154_vm0, %v8112_v31, 0.0 }
  0x9d   :  { %13049 = vst [vmem:[#allocation34_spill] sm:$0xff] %v8096_v15  ;;  %13050 = vst [vmem:[#allocation35_spill] sm:$0xff] %v8098_v46  ;;  %v398_v46 = vsel %vm154_vm0, %v8107_v14, 0.0  ;;  %v8143_v14 = vld [vmem:[%s12794_s0 + $0x2a8] sm:$0xff] }
  0x9e   :  { %13059 = vst [vmem:[#allocation44_spill] sm:$0xff] %v8143_v14 }
  0x9f   :  { %393 = vadd.xlane.f32.xlu1 %v392_v63  ;;  %390 = vadd.xlane.f32.xlu0 %v389_v47  ;;  %v8130_v63 = vld [vmem:[%s12794_s0 + $0x290] sm:$0xff] }
  0xa0   :  { %v8114_v62 = vpop.xlane.xlu1 %183  ;;  %v8116_v15 = vpop.xlane.xlu0 %180  ;;  %13056 = vst [vmem:[#allocation41_spill] sm:$0xff] %v8130_v63  ;;  %v401_v31 = vsel %vm154_vm0, %v8130_v63, 0.0 }
  0xa1   :  { %13053 = vst [vmem:[#allocation38_spill] sm:$0xff] %v8114_v62  ;;  %13054 = vst [vmem:[#allocation39_spill] sm:$0xff] %v8116_v15  ;;  %v404_v62 = vsel %vm154_vm0, %v8125_v55, 0.0  ;;  %v8161_v55 = vld [vmem:[%s12794_s0 + $0x2b8] sm:$0xff] }
  0xa2   :  { %13063 = vst [vmem:[#allocation48_spill] sm:$0xff] %v8161_v55 }
  0xa3   :  { %399 = vadd.xlane.f32.xlu1 %v398_v46  ;;  %396 = vadd.xlane.f32.xlu0 %v395_v30  ;;  %v8148_v46 = vld [vmem:[%s12794_s0 + $0x2a0] sm:$0xff] }
  0xa4   :  { %v8132_v47 = vpop.xlane.xlu1 %189  ;;  %v8134_v15 = vpop.xlane.xlu0 %186  ;;  %13060 = vst [vmem:[#allocation45_spill] sm:$0xff] %v8148_v46  ;;  %v407_v63 = vsel %vm154_vm0, %v8148_v46, 0.0 }
  0xa5   :  { %13057 = vst [vmem:[#allocation42_spill] sm:$0xff] %v8132_v47  ;;  %13058 = vst [vmem:[#allocation43_spill] sm:$0xff] %v8134_v15  ;;  %v410_v47 = vsel %vm154_vm0, %v8143_v14, 0.0  ;;  %v8179_v14 = vld [vmem:[%s12794_s0 + $0x2c8] sm:$0xff] }
  0xa6   :  { %13067 = vst [vmem:[#allocation52_spill] sm:$0xff] %v8179_v14 }
  0xa7   :  { %405 = vadd.xlane.f32.xlu1 %v404_v62  ;;  %402 = vadd.xlane.f32.xlu0 %v401_v31  ;;  %v8166_v62 = vld [vmem:[%s12794_s0 + $0x2b0] sm:$0xff] }
  0xa8   :  { %v8150_v30 = vpop.xlane.xlu1 %195  ;;  %v8152_v15 = vpop.xlane.xlu0 %192  ;;  %13064 = vst [vmem:[#allocation49_spill] sm:$0xff] %v8166_v62  ;;  %v413_v46 = vsel %vm154_vm0, %v8166_v62, 0.0 }
  0xa9   :  { %13061 = vst [vmem:[#allocation46_spill] sm:$0xff] %v8150_v30  ;;  %13062 = vst [vmem:[#allocation47_spill] sm:$0xff] %v8152_v15  ;;  %v416_v30 = vsel %vm154_vm0, %v8161_v55, 0.0  ;;  %v8197_v55 = vld [vmem:[%s12794_s0 + $0x2d8] sm:$0xff] }
  0xaa   :  { %13071 = vst [vmem:[#allocation56_spill] sm:$0xff] %v8197_v55 }
  0xab   :  { %411 = vadd.xlane.f32.xlu1 %v410_v47  ;;  %408 = vadd.xlane.f32.xlu0 %v407_v63  ;;  %v8184_v47 = vld [vmem:[%s12794_s0 + $0x2c0] sm:$0xff] }
  0xac   :  { %v8168_v31 = vpop.xlane.xlu1 %201  ;;  %v8170_v15 = vpop.xlane.xlu0 %198  ;;  %13068 = vst [vmem:[#allocation53_spill] sm:$0xff] %v8184_v47  ;;  %v419_v62 = vsel %vm154_vm0, %v8184_v47, 0.0 }
  0xad   :  { %13065 = vst [vmem:[#allocation50_spill] sm:$0xff] %v8168_v31  ;;  %13066 = vst [vmem:[#allocation51_spill] sm:$0xff] %v8170_v15  ;;  %v422_v31 = vsel %vm154_vm0, %v8179_v14, 0.0  ;;  %v8215_v14 = vld [vmem:[%s12794_s0 + $0x2e8] sm:$0xff] }
  0xae   :  { %13075 = vst [vmem:[#allocation60_spill] sm:$0xff] %v8215_v14 }
  0xaf   :  { %417 = vadd.xlane.f32.xlu1 %v416_v30  ;;  %414 = vadd.xlane.f32.xlu0 %v413_v46  ;;  %v8202_v30 = vld [vmem:[%s12794_s0 + $0x2d0] sm:$0xff] }
  0xb0   :  { %v8186_v63 = vpop.xlane.xlu1 %207  ;;  %v8188_v15 = vpop.xlane.xlu0 %204  ;;  %13072 = vst [vmem:[#allocation57_spill] sm:$0xff] %v8202_v30  ;;  %v425_v47 = vsel %vm154_vm0, %v8202_v30, 0.0 }
  0xb1   :  { %13069 = vst [vmem:[#allocation54_spill] sm:$0xff] %v8186_v63  ;;  %13070 = vst [vmem:[#allocation55_spill] sm:$0xff] %v8188_v15  ;;  %v428_v63 = vsel %vm154_vm0, %v8197_v55, 0.0  ;;  %v8233_v55 = vld [vmem:[%s12794_s0 + $0x2f8] sm:$0xff] }
  0xb2   :  { %13079 = vst [vmem:[#allocation64_spill] sm:$0xff] %v8233_v55 }
  0xb3   :  { %423 = vadd.xlane.f32.xlu1 %v422_v31  ;;  %420 = vadd.xlane.f32.xlu0 %v419_v62  ;;  %v8220_v31 = vld [vmem:[%s12794_s0 + $0x2e0] sm:$0xff] }
  0xb4   :  { %v8204_v46 = vpop.xlane.xlu1 %213  ;;  %v8206_v15 = vpop.xlane.xlu0 %210  ;;  %13076 = vst [vmem:[#allocation61_spill] sm:$0xff] %v8220_v31  ;;  %v431_v30 = vsel %vm154_vm0, %v8220_v31, 0.0 }
  0xb5   :  { %13073 = vst [vmem:[#allocation58_spill] sm:$0xff] %v8204_v46  ;;  %13074 = vst [vmem:[#allocation59_spill] sm:$0xff] %v8206_v15  ;;  %v434_v46 = vsel %vm154_vm0, %v8215_v14, 0.0  ;;  %v8251_v14 = vld [vmem:[%s12794_s0 + $0x308] sm:$0xff] }
  0xb6   :  { %13083 = vst [vmem:[#allocation68_spill] sm:$0xff] %v8251_v14 }
  0xb7   :  { %429 = vadd.xlane.f32.xlu1 %v428_v63  ;;  %426 = vadd.xlane.f32.xlu0 %v425_v47  ;;  %v8238_v63 = vld [vmem:[%s12794_s0 + $0x2f0] sm:$0xff] }
  0xb8   :  { %v8222_v62 = vpop.xlane.xlu1 %219  ;;  %v8224_v15 = vpop.xlane.xlu0 %216  ;;  %13080 = vst [vmem:[#allocation65_spill] sm:$0xff] %v8238_v63  ;;  %v437_v31 = vsel %vm154_vm0, %v8238_v63, 0.0 }
  0xb9   :  { %13077 = vst [vmem:[#allocation62_spill] sm:$0xff] %v8222_v62  ;;  %13078 = vst [vmem:[#allocation63_spill] sm:$0xff] %v8224_v15  ;;  %v440_v62 = vsel %vm154_vm0, %v8233_v55, 0.0  ;;  %v8269_v55 = vld [vmem:[%s12794_s0 + $0x318] sm:$0xff] }
  0xba   :  { %13087 = vst [vmem:[#allocation72_spill] sm:$0xff] %v8269_v55 }
  0xbb   :  { %435 = vadd.xlane.f32.xlu1 %v434_v46  ;;  %432 = vadd.xlane.f32.xlu0 %v431_v30  ;;  %v8256_v46 = vld [vmem:[%s12794_s0 + $0x300] sm:$0xff] }
  0xbc   :  { %v8240_v47 = vpop.xlane.xlu1 %225  ;;  %v8242_v15 = vpop.xlane.xlu0 %222  ;;  %13084 = vst [vmem:[#allocation69_spill] sm:$0xff] %v8256_v46  ;;  %v443_v63 = vsel %vm154_vm0, %v8256_v46, 0.0 }
  0xbd   :  { %13081 = vst [vmem:[#allocation66_spill] sm:$0xff] %v8240_v47  ;;  %13082 = vst [vmem:[#allocation67_spill] sm:$0xff] %v8242_v15  ;;  %v446_v47 = vsel %vm154_vm0, %v8251_v14, 0.0  ;;  %v8287_v14 = vld [vmem:[%s12794_s0 + $0x328] sm:$0xff] }
  0xbe   :  { %13091 = vst [vmem:[#allocation76_spill] sm:$0xff] %v8287_v14 }
  0xbf   :  { %441 = vadd.xlane.f32.xlu1 %v440_v62  ;;  %438 = vadd.xlane.f32.xlu0 %v437_v31  ;;  %v8274_v62 = vld [vmem:[%s12794_s0 + $0x310] sm:$0xff] }
  0xc0   :  { %v8258_v30 = vpop.xlane.xlu1 %231  ;;  %v8260_v15 = vpop.xlane.xlu0 %228  ;;  %13088 = vst [vmem:[#allocation73_spill] sm:$0xff] %v8274_v62  ;;  %v449_v46 = vsel %vm154_vm0, %v8274_v62, 0.0 }
  0xc1   :  { %13085 = vst [vmem:[#allocation70_spill] sm:$0xff] %v8258_v30  ;;  %13086 = vst [vmem:[#allocation71_spill] sm:$0xff] %v8260_v15  ;;  %v452_v30 = vsel %vm154_vm0, %v8269_v55, 0.0  ;;  %v8305_v55 = vld [vmem:[%s12794_s0 + $0x338] sm:$0xff] }
  0xc2   :  { %13095 = vst [vmem:[#allocation80_spill] sm:$0xff] %v8305_v55 }
  0xc3   :  { %447 = vadd.xlane.f32.xlu1 %v446_v47  ;;  %444 = vadd.xlane.f32.xlu0 %v443_v63  ;;  %v8292_v47 = vld [vmem:[%s12794_s0 + $0x320] sm:$0xff] }
  0xc4   :  { %v8276_v31 = vpop.xlane.xlu1 %237  ;;  %v8278_v15 = vpop.xlane.xlu0 %234  ;;  %13092 = vst [vmem:[#allocation77_spill] sm:$0xff] %v8292_v47  ;;  %v455_v62 = vsel %vm154_vm0, %v8292_v47, 0.0 }
  0xc5   :  { %13089 = vst [vmem:[#allocation74_spill] sm:$0xff] %v8276_v31  ;;  %13090 = vst [vmem:[#allocation75_spill] sm:$0xff] %v8278_v15  ;;  %v458_v31 = vsel %vm154_vm0, %v8287_v14, 0.0  ;;  %v8323_v14 = vld [vmem:[%s12794_s0 + $0x348] sm:$0xff] }
  0xc6   :  { %13099 = vst [vmem:[#allocation84_spill] sm:$0xff] %v8323_v14 }
  0xc7   :  { %453 = vadd.xlane.f32.xlu1 %v452_v30  ;;  %450 = vadd.xlane.f32.xlu0 %v449_v46  ;;  %v8310_v30 = vld [vmem:[%s12794_s0 + $0x330] sm:$0xff] }
  0xc8   :  { %v8294_v63 = vpop.xlane.xlu1 %243  ;;  %v8296_v15 = vpop.xlane.xlu0 %240  ;;  %13096 = vst [vmem:[#allocation81_spill] sm:$0xff] %v8310_v30  ;;  %v461_v47 = vsel %vm154_vm0, %v8310_v30, 0.0 }
  0xc9   :  { %13093 = vst [vmem:[#allocation78_spill] sm:$0xff] %v8294_v63  ;;  %13094 = vst [vmem:[#allocation79_spill] sm:$0xff] %v8296_v15  ;;  %v464_v63 = vsel %vm154_vm0, %v8305_v55, 0.0  ;;  %v8341_v55 = vld [vmem:[%s12794_s0 + $0x358] sm:$0xff] }
  0xca   :  { %13103 = vst [vmem:[#allocation88_spill] sm:$0xff] %v8341_v55 }
  0xcb   :  { %459 = vadd.xlane.f32.xlu1 %v458_v31  ;;  %456 = vadd.xlane.f32.xlu0 %v455_v62  ;;  %v8328_v31 = vld [vmem:[%s12794_s0 + $0x340] sm:$0xff] }
  0xcc   :  { %v8312_v46 = vpop.xlane.xlu1 %249  ;;  %v8314_v15 = vpop.xlane.xlu0 %246  ;;  %13100 = vst [vmem:[#allocation85_spill] sm:$0xff] %v8328_v31  ;;  %v467_v30 = vsel %vm154_vm0, %v8328_v31, 0.0 }
  0xcd   :  { %13097 = vst [vmem:[#allocation82_spill] sm:$0xff] %v8312_v46  ;;  %13098 = vst [vmem:[#allocation83_spill] sm:$0xff] %v8314_v15  ;;  %v470_v46 = vsel %vm154_vm0, %v8323_v14, 0.0  ;;  %v8359_v14 = vld [vmem:[%s12794_s0 + $0x368] sm:$0xff] }
  0xce   :  { %13107 = vst [vmem:[#allocation92_spill] sm:$0xff] %v8359_v14 }
  0xcf   :  { %465 = vadd.xlane.f32.xlu1 %v464_v63  ;;  %462 = vadd.xlane.f32.xlu0 %v461_v47  ;;  %v8346_v63 = vld [vmem:[%s12794_s0 + $0x350] sm:$0xff] }
  0xd0   :  { %v8330_v62 = vpop.xlane.xlu1 %255  ;;  %v8332_v15 = vpop.xlane.xlu0 %252  ;;  %13104 = vst [vmem:[#allocation89_spill] sm:$0xff] %v8346_v63  ;;  %v473_v31 = vsel %vm154_vm0, %v8346_v63, 0.0 }
  0xd1   :  { %13101 = vst [vmem:[#allocation86_spill] sm:$0xff] %v8330_v62  ;;  %13102 = vst [vmem:[#allocation87_spill] sm:$0xff] %v8332_v15  ;;  %v476_v62 = vsel %vm154_vm0, %v8341_v55, 0.0  ;;  %v8377_v55 = vld [vmem:[%s12794_s0 + $0x378] sm:$0xff] }
  0xd2   :  { %13111 = vst [vmem:[#allocation96_spill] sm:$0xff] %v8377_v55 }
  0xd3   :  { %471 = vadd.xlane.f32.xlu1 %v470_v46  ;;  %468 = vadd.xlane.f32.xlu0 %v467_v30  ;;  %v8364_v46 = vld [vmem:[%s12794_s0 + $0x360] sm:$0xff] }
  0xd4   :  { %v8348_v47 = vpop.xlane.xlu1 %261  ;;  %v8350_v15 = vpop.xlane.xlu0 %258  ;;  %13108 = vst [vmem:[#allocation93_spill] sm:$0xff] %v8364_v46  ;;  %v479_v63 = vsel %vm154_vm0, %v8364_v46, 0.0 }
  0xd5   :  { %13105 = vst [vmem:[#allocation90_spill] sm:$0xff] %v8348_v47  ;;  %13106 = vst [vmem:[#allocation91_spill] sm:$0xff] %v8350_v15  ;;  %v482_v47 = vsel %vm154_vm0, %v8359_v14, 0.0  ;;  %v604_v14 = vmul.f32 %v7550_v5, %v7550_v5 }
  0xd7   :  { %477 = vadd.xlane.f32.xlu1 %v476_v62  ;;  %474 = vadd.xlane.f32.xlu0 %v473_v31  ;;  %v8382_v62 = vld [vmem:[%s12794_s0 + $0x370] sm:$0xff] }
  0xd8   :  { %v8366_v30 = vpop.xlane.xlu1 %267  ;;  %v8368_v15 = vpop.xlane.xlu0 %264  ;;  %13112 = vst [vmem:[#allocation97_spill] sm:$0xff] %v8382_v62  ;;  %v485_v46 = vsel %vm154_vm0, %v8382_v62, 0.0  ;;  %v605_v62 = vmul.f32 %v7531_v0, %v7531_v0 }
  0xd9   :  { %13109 = vst [vmem:[#allocation94_spill] sm:$0xff] %v8366_v30  ;;  %13110 = vst [vmem:[#allocation95_spill] sm:$0xff] %v8368_v15  ;;  %v488_v30 = vsel %vm154_vm0, %v8377_v55, 0.0  ;;  %v606_v55 = vmul.f32 %v7541_v2, %v7541_v2 }
  0xdb   :  { %483 = vadd.xlane.f32.xlu1 %v482_v47  ;;  %480 = vadd.xlane.f32.xlu0 %v479_v63 }
  0xdc   :  { %v8384_v31 = vpop.xlane.xlu1 %273  ;;  %v8386_v15 = vpop.xlane.xlu0 %270 }
  0xdd   :  { %13113 = vst [vmem:[#allocation98_spill] sm:$0xff] %v8384_v31  ;;  %13114 = vst [vmem:[#allocation99_spill] sm:$0xff] %v8386_v15  ;;  %v718_v15 = vsel %vm154_vm0, %v604_v14, 0.0  ;;  %v715_v31 = vsel %vm154_vm0, %v603_v54, 0.0  ;;  %v608_v14 = vmul.f32 %v7559_v8, %v7559_v8  ;;  %v607_v54 = vmul.f32 %v7564_v9, %v7564_v9 }
  0xdf   :  { %489 = vadd.xlane.f32.xlu1 %v488_v30  ;;  %486 = vadd.xlane.f32.xlu0 %v485_v46  ;;  %v724_v46 = vsel %vm154_vm0, %v606_v55, 0.0  ;;  %v721_v30 = vsel %vm154_vm0, %v605_v62, 0.0  ;;  %v610_v55 = vmul.f32 %v7573_v12, %v7573_v12  ;;  %v609_v62 = vmul.f32 %v7578_v13, %v7578_v13 }
  0xe0   :  { %v8396_v47 = vpop.xlane.xlu1 %279  ;;  %v8398_v63 = vpop.xlane.xlu0 %276 }
  0xe3   :  { %719 = vadd.xlane.f32.xlu1 %v718_v15  ;;  %716 = vadd.xlane.f32.xlu0 %v715_v31  ;;  %v730_v15 = vsel %vm154_vm0, %v608_v14, 0.0  ;;  %v727_v31 = vsel %vm154_vm0, %v607_v54, 0.0  ;;  %v612_v14 = vmul.f32 %v7587_v16, %v7587_v16  ;;  %v611_v54 = vmul.f32 %v7592_v17, %v7592_v17 }
  0xe4   :  { %v8406_v5 = vpop.xlane.xlu1 %285  ;;  %v8408_v1 = vpop.xlane.xlu0 %282 }
  0xe5   :  { %13115 = vst [vmem:[#allocation100_spill] sm:$0xff] %v8408_v1 }
  0xe7   :  { %725 = vadd.xlane.f32.xlu1 %v724_v46  ;;  %722 = vadd.xlane.f32.xlu0 %v721_v30  ;;  %v736_v46 = vsel %vm154_vm0, %v610_v55, 0.0  ;;  %v733_v30 = vsel %vm154_vm0, %v609_v62, 0.0  ;;  %v614_v55 = vmul.f32 %v7601_v20, %v7601_v20  ;;  %v613_v62 = vmul.f32 %v7606_v21, %v7606_v21 }
  0xe8   :  { %v8416_v2 = vpop.xlane.xlu1 %291  ;;  %v8418_v0 = vpop.xlane.xlu0 %288 }
  0xe9   :  { %13116 = vst [vmem:[#allocation101_spill] sm:$0xff] %v8418_v0 }
  0xeb   :  { %731 = vadd.xlane.f32.xlu1 %v730_v15  ;;  %728 = vadd.xlane.f32.xlu0 %v727_v31  ;;  %v742_v15 = vsel %vm154_vm0, %v612_v14, 0.0  ;;  %v739_v31 = vsel %vm154_vm0, %v611_v54, 0.0  ;;  %v616_v14 = vmul.f32 %v7615_v24, %v7615_v24  ;;  %v615_v54 = vmul.f32 %v7620_v25, %v7620_v25 }
  0xec   :  { %v8426_v8 = vpop.xlane.xlu1 %297  ;;  %v8428_v9 = vpop.xlane.xlu0 %294 }
  0xed   :  { %13117 = vst [vmem:[#allocation102_spill] sm:$0xff] %v8428_v9 }
  0xef   :  { %737 = vadd.xlane.f32.xlu1 %v736_v46  ;;  %734 = vadd.xlane.f32.xlu0 %v733_v30  ;;  %v748_v46 = vsel %vm154_vm0, %v614_v55, 0.0  ;;  %v745_v30 = vsel %vm154_vm0, %v613_v62, 0.0  ;;  %v618_v55 = vmul.f32 %v7629_v28, %v7629_v28  ;;  %v617_v62 = vmul.f32 %v7634_v29, %v7634_v29 }
  0xf0   :  { %v8436_v12 = vpop.xlane.xlu1 %303  ;;  %v8438_v13 = vpop.xlane.xlu0 %300 }
  0xf1   :  { %13118 = vst [vmem:[#allocation103_spill] sm:$0xff] %v8438_v13  ;;  %v13242_v13 = vld [vmem:[#allocation96_spill] sm:$0xff] }
  0xf3   :  { %743 = vadd.xlane.f32.xlu1 %v742_v15  ;;  %740 = vadd.xlane.f32.xlu0 %v739_v31  ;;  %v754_v15 = vsel %vm154_vm0, %v616_v14, 0.0  ;;  %v751_v31 = vsel %vm154_vm0, %v615_v54, 0.0  ;;  %v620_v14 = vmul.f32 %v7643_v32, %v7643_v32  ;;  %v619_v54 = vmul.f32 %v7648_v33, %v7648_v33 }
  0xf4   :  { %v8446_v16 = vpop.xlane.xlu1 %309  ;;  %v8448_v17 = vpop.xlane.xlu0 %306 }
  0xf5   :  { %13119 = vst [vmem:[#allocation104_spill] sm:$0xff] %v8448_v17  ;;  %v13237_v17 = vld [vmem:[#allocation93_spill] sm:$0xff] }
  0xf7   :  { %749 = vadd.xlane.f32.xlu1 %v748_v46  ;;  %746 = vadd.xlane.f32.xlu0 %v745_v30  ;;  %v760_v46 = vsel %vm154_vm0, %v618_v55, 0.0  ;;  %v757_v30 = vsel %vm154_vm0, %v617_v62, 0.0  ;;  %v622_v55 = vmul.f32 %v7657_v36, %v7657_v36  ;;  %v621_v62 = vmul.f32 %v7662_v37, %v7662_v37 }
  0xf8   :  { %v8456_v20 = vpop.xlane.xlu1 %315  ;;  %v8458_v21 = vpop.xlane.xlu0 %312 }
  0xf9   :  { %13120 = vst [vmem:[#allocation105_spill] sm:$0xff] %v8456_v20  ;;  %13121 = vst [vmem:[#allocation106_spill] sm:$0xff] %v8458_v21  ;;  %v13248_v20 = vld [vmem:[#allocation31_spill] sm:$0xff] }
  0xfb   :  { %755 = vadd.xlane.f32.xlu1 %v754_v15  ;;  %752 = vadd.xlane.f32.xlu0 %v751_v31  ;;  %v766_v15 = vsel %vm154_vm0, %v620_v14, 0.0  ;;  %v763_v31 = vsel %vm154_vm0, %v619_v54, 0.0  ;;  %v624_v14 = vmul.f32 %v7671_v40, %v7671_v40  ;;  %v623_v54 = vmul.f32 %v7676_v41, %v7676_v41 }
  0xfc   :  { %v8466_v24 = vpop.xlane.xlu1 %321  ;;  %v8468_v25 = vpop.xlane.xlu0 %318 }
  0xfd   :  { %13122 = vst [vmem:[#allocation107_spill] sm:$0xff] %v8466_v24  ;;  %13123 = vst [vmem:[#allocation108_spill] sm:$0xff] %v8468_v25  ;;  %v13232_v25 = vld [vmem:[#allocation88_spill] sm:$0xff] }
  0xff   :  { %761 = vadd.xlane.f32.xlu1 %v760_v46  ;;  %758 = vadd.xlane.f32.xlu0 %v757_v30  ;;  %v772_v46 = vsel %vm154_vm0, %v622_v55, 0.0  ;;  %v769_v30 = vsel %vm154_vm0, %v621_v62, 0.0  ;;  %v626_v55 = vmul.f32 %v7685_v44, %v7685_v44  ;;  %v625_v62 = vmul.f32 %v7690_v45, %v7690_v45 }
 0x100   :  { %v8476_v28 = vpop.xlane.xlu1 %327  ;;  %v8478_v29 = vpop.xlane.xlu0 %324 }
 0x101   :  { %13124 = vst [vmem:[#allocation109_spill] sm:$0xff] %v8476_v28  ;;  %13125 = vst [vmem:[#allocation110_spill] sm:$0xff] %v8478_v29  ;;  %v13230_v29 = vld [vmem:[#allocation84_spill] sm:$0xff] }
 0x103   :  { %767 = vadd.xlane.f32.xlu1 %v766_v15  ;;  %764 = vadd.xlane.f32.xlu0 %v763_v31  ;;  %v778_v15 = vsel %vm154_vm0, %v624_v14, 0.0  ;;  %v775_v31 = vsel %vm154_vm0, %v623_v54, 0.0  ;;  %v628_v14 = vmul.f32 %v7699_v48, %v7699_v48  ;;  %v627_v54 = vmul.f32 %v7704_v49, %v7704_v49 }
 0x104   :  { %v8486_v32 = vpop.xlane.xlu1 %333  ;;  %v8488_v33 = vpop.xlane.xlu0 %330 }
 0x105   :  { %13126 = vst [vmem:[#allocation111_spill] sm:$0xff] %v8486_v32  ;;  %13127 = vst [vmem:[#allocation112_spill] sm:$0xff] %v8488_v33  ;;  %v13228_v33 = vld [vmem:[#allocation80_spill] sm:$0xff] }
 0x107   :  { %773 = vadd.xlane.f32.xlu1 %v772_v46  ;;  %770 = vadd.xlane.f32.xlu0 %v769_v30  ;;  %v784_v46 = vsel %vm154_vm0, %v626_v55, 0.0  ;;  %v781_v30 = vsel %vm154_vm0, %v625_v62, 0.0  ;;  %v630_v55 = vmul.f32 %v7713_v52, %v7713_v52  ;;  %v629_v62 = vmul.f32 %v7718_v53, %v7718_v53 }
 0x108   :  { %v8496_v36 = vpop.xlane.xlu1 %339  ;;  %v8498_v37 = vpop.xlane.xlu0 %336 }
 0x109   :  { %13128 = vst [vmem:[#allocation113_spill] sm:$0xff] %v8496_v36  ;;  %13129 = vst [vmem:[#allocation114_spill] sm:$0xff] %v8498_v37  ;;  %v13226_v37 = vld [vmem:[#allocation76_spill] sm:$0xff] }
 0x10b   :  { %779 = vadd.xlane.f32.xlu1 %v778_v15  ;;  %776 = vadd.xlane.f32.xlu0 %v775_v31  ;;  %v790_v15 = vsel %vm154_vm0, %v628_v14, 0.0  ;;  %v787_v31 = vsel %vm154_vm0, %v627_v54, 0.0  ;;  %v632_v14 = vmul.f32 %v7727_v56, %v7727_v56  ;;  %v631_v54 = vmul.f32 %v7732_v57, %v7732_v57 }
 0x10c   :  { %v8506_v40 = vpop.xlane.xlu1 %345  ;;  %v8508_v41 = vpop.xlane.xlu0 %342 }
 0x10d   :  { %13130 = vst [vmem:[#allocation115_spill] sm:$0xff] %v8506_v40  ;;  %13131 = vst [vmem:[#allocation116_spill] sm:$0xff] %v8508_v41  ;;  %v13224_v41 = vld [vmem:[#allocation72_spill] sm:$0xff] }
 0x10f   :  { %785 = vadd.xlane.f32.xlu1 %v784_v46  ;;  %782 = vadd.xlane.f32.xlu0 %v781_v30  ;;  %v796_v46 = vsel %vm154_vm0, %v630_v55, 0.0  ;;  %v793_v30 = vsel %vm154_vm0, %v629_v62, 0.0  ;;  %v634_v55 = vmul.f32 %v7741_v60, %v7741_v60  ;;  %v633_v62 = vmul.f32 %v7746_v61, %v7746_v61 }
 0x110   :  { %v8516_v44 = vpop.xlane.xlu1 %351  ;;  %v8518_v45 = vpop.xlane.xlu0 %348 }
 0x111   :  { %13132 = vst [vmem:[#allocation117_spill] sm:$0xff] %v8516_v44  ;;  %13133 = vst [vmem:[#allocation118_spill] sm:$0xff] %v8518_v45  ;;  %v13222_v45 = vld [vmem:[#allocation68_spill] sm:$0xff] }
 0x113   :  { %791 = vadd.xlane.f32.xlu1 %v790_v15  ;;  %788 = vadd.xlane.f32.xlu0 %v787_v31  ;;  %v802_v15 = vsel %vm154_vm0, %v632_v14, 0.0  ;;  %v799_v31 = vsel %vm154_vm0, %v631_v54, 0.0  ;;  %v636_v14 = vmul.f32 %v7755_v3, %v7755_v3  ;;  %v635_v54 = vmul.f32 %v7760_v4, %v7760_v4 }
 0x114   :  { %v8526_v48 = vpop.xlane.xlu1 %357  ;;  %v8528_v49 = vpop.xlane.xlu0 %354 }
 0x115   :  { %13134 = vst [vmem:[#allocation119_spill] sm:$0xff] %v8526_v48  ;;  %13135 = vst [vmem:[#allocation120_spill] sm:$0xff] %v8528_v49  ;;  %v13220_v49 = vld [vmem:[#allocation64_spill] sm:$0xff] }
 0x117   :  { %797 = vadd.xlane.f32.xlu1 %v796_v46  ;;  %794 = vadd.xlane.f32.xlu0 %v793_v30  ;;  %v808_v46 = vsel %vm154_vm0, %v634_v55, 0.0  ;;  %v805_v30 = vsel %vm154_vm0, %v633_v62, 0.0  ;;  %v638_v55 = vmul.f32 %v7769_v10, %v7769_v10  ;;  %v637_v62 = vmul.f32 %v7774_v11, %v7774_v11 }
 0x118   :  { %v8536_v52 = vpop.xlane.xlu1 %363  ;;  %v8538_v53 = vpop.xlane.xlu0 %360 }
 0x119   :  { %13136 = vst [vmem:[#allocation121_spill] sm:$0xff] %v8536_v52  ;;  %13137 = vst [vmem:[#allocation122_spill] sm:$0xff] %v8538_v53  ;;  %v13218_v53 = vld [vmem:[#allocation60_spill] sm:$0xff] }
 0x11b   :  { %803 = vadd.xlane.f32.xlu1 %v802_v15  ;;  %800 = vadd.xlane.f32.xlu0 %v799_v31  ;;  %v814_v15 = vsel %vm154_vm0, %v636_v14, 0.0  ;;  %v811_v31 = vsel %vm154_vm0, %v635_v54, 0.0  ;;  %v640_v14 = vmul.f32 %v7783_v18, %v7783_v18  ;;  %v639_v54 = vmul.f32 %v7788_v19, %v7788_v19 }
 0x11c   :  { %v8546_v56 = vpop.xlane.xlu1 %369  ;;  %v8548_v57 = vpop.xlane.xlu0 %366 }
 0x11d   :  { %13138 = vst [vmem:[#allocation123_spill] sm:$0xff] %v8546_v56  ;;  %13139 = vst [vmem:[#allocation124_spill] sm:$0xff] %v8548_v57  ;;  %v13216_v57 = vld [vmem:[#allocation56_spill] sm:$0xff] }
 0x11f   :  { %809 = vadd.xlane.f32.xlu1 %v808_v46  ;;  %806 = vadd.xlane.f32.xlu0 %v805_v30  ;;  %v820_v46 = vsel %vm154_vm0, %v638_v55, 0.0  ;;  %v817_v30 = vsel %vm154_vm0, %v637_v62, 0.0  ;;  %v642_v55 = vmul.f32 %v7797_v26, %v7797_v26  ;;  %v641_v62 = vmul.f32 %v7802_v27, %v7802_v27 }
 0x120   :  { %v8556_v60 = vpop.xlane.xlu1 %375  ;;  %v8558_v61 = vpop.xlane.xlu0 %372 }
 0x121   :  { %13140 = vst [vmem:[#allocation125_spill] sm:$0xff] %v8556_v60  ;;  %13141 = vst [vmem:[#allocation126_spill] sm:$0xff] %v8558_v61  ;;  %v13214_v61 = vld [vmem:[#allocation52_spill] sm:$0xff] }
 0x123   :  { %815 = vadd.xlane.f32.xlu1 %v814_v15  ;;  %812 = vadd.xlane.f32.xlu0 %v811_v31  ;;  %v826_v15 = vsel %vm154_vm0, %v640_v14, 0.0  ;;  %v823_v31 = vsel %vm154_vm0, %v639_v54, 0.0  ;;  %v644_v14 = vmul.f32 %v7811_v34, %v7811_v34  ;;  %v643_v54 = vmul.f32 %v7816_v35, %v7816_v35 }
 0x124   :  { %v8566_v3 = vpop.xlane.xlu1 %381  ;;  %v8568_v4 = vpop.xlane.xlu0 %378 }
 0x125   :  { %13142 = vst [vmem:[#allocation127_spill] sm:$0xff] %v8566_v3  ;;  %13143 = vst [vmem:[#allocation128_spill] sm:$0xff] %v8568_v4  ;;  %v13212_v4 = vld [vmem:[#allocation48_spill] sm:$0xff] }
 0x127   :  { %821 = vadd.xlane.f32.xlu1 %v820_v46  ;;  %818 = vadd.xlane.f32.xlu0 %v817_v30  ;;  %v832_v46 = vsel %vm154_vm0, %v642_v55, 0.0  ;;  %v829_v30 = vsel %vm154_vm0, %v641_v62, 0.0  ;;  %v646_v55 = vmul.f32 %v7825_v42, %v7825_v42  ;;  %v645_v62 = vmul.f32 %v7830_v43, %v7830_v43 }
 0x128   :  { %v8576_v10 = vpop.xlane.xlu1 %387  ;;  %v8578_v11 = vpop.xlane.xlu0 %384 }
 0x129   :  { %13144 = vst [vmem:[#allocation129_spill] sm:$0xff] %v8576_v10  ;;  %13145 = vst [vmem:[#allocation130_spill] sm:$0xff] %v8578_v11  ;;  %v13210_v11 = vld [vmem:[#allocation44_spill] sm:$0xff] }
 0x12b   :  { %827 = vadd.xlane.f32.xlu1 %v826_v15  ;;  %824 = vadd.xlane.f32.xlu0 %v823_v31  ;;  %v838_v15 = vsel %vm154_vm0, %v644_v14, 0.0  ;;  %v835_v31 = vsel %vm154_vm0, %v643_v54, 0.0  ;;  %v648_v14 = vmul.f32 %v7839_v50, %v7839_v50  ;;  %v647_v54 = vmul.f32 %v7844_v51, %v7844_v51 }
 0x12c   :  { %v8586_v18 = vpop.xlane.xlu1 %393  ;;  %v8588_v19 = vpop.xlane.xlu0 %390 }
 0x12d   :  { %13146 = vst [vmem:[#allocation131_spill] sm:$0xff] %v8586_v18  ;;  %13147 = vst [vmem:[#allocation132_spill] sm:$0xff] %v8588_v19  ;;  %v13208_v19 = vld [vmem:[#allocation40_spill] sm:$0xff] }
 0x12f   :  { %833 = vadd.xlane.f32.xlu1 %v832_v46  ;;  %830 = vadd.xlane.f32.xlu0 %v829_v30  ;;  %v844_v46 = vsel %vm154_vm0, %v646_v55, 0.0  ;;  %v841_v30 = vsel %vm154_vm0, %v645_v62, 0.0  ;;  %v650_v55 = vmul.f32 %v7853_v58, %v7853_v58  ;;  %v649_v62 = vmul.f32 %v7858_v59, %v7858_v59 }
 0x130   :  { %v8596_v26 = vpop.xlane.xlu1 %399  ;;  %v8598_v27 = vpop.xlane.xlu0 %396 }
 0x131   :  { %13148 = vst [vmem:[#allocation133_spill] sm:$0xff] %v8596_v26  ;;  %13149 = vst [vmem:[#allocation134_spill] sm:$0xff] %v8598_v27  ;;  %v13206_v27 = vld [vmem:[#allocation36_spill] sm:$0xff] }
 0x133   :  { %839 = vadd.xlane.f32.xlu1 %v838_v15  ;;  %836 = vadd.xlane.f32.xlu0 %v835_v31  ;;  %v850_v15 = vsel %vm154_vm0, %v648_v14, 0.0  ;;  %v847_v31 = vsel %vm154_vm0, %v647_v54, 0.0  ;;  %v652_v14 = vmul.f32 %v7867_v6, %v7867_v6  ;;  %v651_v54 = vmul.f32 %v7872_v7, %v7872_v7 }
 0x134   :  { %v8606_v34 = vpop.xlane.xlu1 %405  ;;  %v8608_v35 = vpop.xlane.xlu0 %402 }
 0x135   :  { %13150 = vst [vmem:[#allocation135_spill] sm:$0xff] %v8606_v34  ;;  %13151 = vst [vmem:[#allocation136_spill] sm:$0xff] %v8608_v35  ;;  %v13204_v35 = vld [vmem:[#allocation32_spill] sm:$0xff] }
 0x137   :  { %845 = vadd.xlane.f32.xlu1 %v844_v46  ;;  %842 = vadd.xlane.f32.xlu0 %v841_v30  ;;  %v856_v46 = vsel %vm154_vm0, %v650_v55, 0.0  ;;  %v853_v30 = vsel %vm154_vm0, %v649_v62, 0.0  ;;  %v654_v55 = vmul.f32 %v7881_v22, %v7881_v22  ;;  %v653_v62 = vmul.f32 %v7886_v23, %v7886_v23 }
 0x138   :  { %v8616_v42 = vpop.xlane.xlu1 %411  ;;  %v8618_v43 = vpop.xlane.xlu0 %408 }
 0x139   :  { %13152 = vst [vmem:[#allocation137_spill] sm:$0xff] %v8616_v42  ;;  %13153 = vst [vmem:[#allocation138_spill] sm:$0xff] %v8618_v43  ;;  %v13202_v43 = vld [vmem:[#allocation28_spill] sm:$0xff] }
 0x13b   :  { %851 = vadd.xlane.f32.xlu1 %v850_v15  ;;  %848 = vadd.xlane.f32.xlu0 %v847_v31  ;;  %v862_v15 = vsel %vm154_vm0, %v652_v14, 0.0  ;;  %v859_v31 = vsel %vm154_vm0, %v651_v54, 0.0  ;;  %v656_v14 = vmul.f32 %v7895_v38, %v7895_v38  ;;  %v655_v54 = vmul.f32 %v7900_v39, %v7900_v39 }
 0x13c   :  { %v8626_v50 = vpop.xlane.xlu1 %417  ;;  %v8628_v51 = vpop.xlane.xlu0 %414 }
 0x13d   :  { %13154 = vst [vmem:[#allocation139_spill] sm:$0xff] %v8626_v50  ;;  %13155 = vst [vmem:[#allocation140_spill] sm:$0xff] %v8628_v51 }
 0x13f   :  { %857 = vadd.xlane.f32.xlu1 %v856_v46  ;;  %854 = vadd.xlane.f32.xlu0 %v853_v30  ;;  %v868_v46 = vsel %vm154_vm0, %v654_v55, 0.0  ;;  %v865_v30 = vsel %vm154_vm0, %v653_v62, 0.0  ;;  %v13163_v62 = vld [vmem:[#allocation3_spill] sm:$0xff] }
 0x140   :  { %v8636_v58 = vpop.xlane.xlu1 %423  ;;  %v8638_v59 = vpop.xlane.xlu0 %420 }
 0x141   :  { %13156 = vst [vmem:[#allocation141_spill] sm:$0xff] %v8636_v58  ;;  %13157 = vst [vmem:[#allocation142_spill] sm:$0xff] %v8638_v59  ;;  %v657_v59 = vmul.f32 %v13163_v62, %v13163_v62 }
 0x143   :  { %863 = vadd.xlane.f32.xlu1 %v862_v15  ;;  %860 = vadd.xlane.f32.xlu0 %v859_v31  ;;  %v874_v15 = vsel %vm154_vm0, %v656_v14, 0.0  ;;  %v871_v31 = vsel %vm154_vm0, %v655_v54, 0.0  ;;  %v13167_v54 = vld [vmem:[#allocation5_spill] sm:$0xff] }
 0x144   :  { %v8646_v6 = vpop.xlane.xlu1 %429  ;;  %v8648_v7 = vpop.xlane.xlu0 %426  ;;  %v659_v51 = vmul.f32 %v13167_v54, %v13167_v54 }
 0x145   :  { %13158 = vst [vmem:[#allocation143_spill] sm:$0xff] %v8646_v6  ;;  %13159 = vst [vmem:[#allocation144_spill] sm:$0xff] %v8648_v7  ;;  %v13162_v7 = vld [vmem:[#allocation2_spill] sm:$0xff] }
 0x146   :  { %v658_v55 = vmul.f32 %v13162_v7, %v13162_v7  ;;  %v883_v62 = vsel %vm154_vm0, %v659_v51, 0.0  ;;  %v13174_v51 = vld [vmem:[#allocation8_spill] sm:$0xff] }
 0x147   :  { %869 = vadd.xlane.f32.xlu1 %v868_v46  ;;  %866 = vadd.xlane.f32.xlu0 %v865_v30  ;;  %v877_v30 = vsel %vm154_vm0, %v657_v59, 0.0  ;;  %v13171_v59 = vld [vmem:[#allocation7_spill] sm:$0xff] }
 0x148   :  { %v8656_v22 = vpop.xlane.xlu1 %435  ;;  %v8658_v23 = vpop.xlane.xlu0 %432  ;;  %v880_v46 = vsel %vm154_vm0, %v658_v55, 0.0 }
 0x149   :  { %13160 = vst [vmem:[#allocation145_spill] sm:$0xff] %v8656_v22  ;;  %13161 = vst [vmem:[#allocation146_spill] sm:$0xff] %v8658_v23  ;;  %v13166_v23 = vld [vmem:[#allocation4_spill] sm:$0xff] }
 0x14a   :  { %v660_v14 = vmul.f32 %v13166_v23, %v13166_v23  ;;  %v7478_v23 = vmov 0  }
 0x14b   :  { %875 = vadd.xlane.f32.xlu1 %v874_v15  ;;  %872 = vadd.xlane.f32.xlu0 %v871_v31 }
 0x14c   :  { %v8666_v38 = vpop.xlane.xlu1 %441  ;;  %v8668_v39 = vpop.xlane.xlu0 %438  ;;  %v886_v31 = vsel %vm154_vm0, %v660_v14, 0.0  ;;  %6643 = vset.pattern.permute.xlu1 %v7478_v23  ;;  %6642 = vset.pattern.permute.xlu0 %v7478_v23 }
 0x14d   :  { %13164 = vst [vmem:[#allocation2_spill] sm:$0xff] %v8666_v38  ;;  %13165 = vst [vmem:[#allocation3_spill] sm:$0xff] %v8668_v39  ;;  %v13170_v39 = vld [vmem:[#allocation6_spill] sm:$0xff]  ;;  %v661_v38 = vmul.f32 %v13171_v59, %v13171_v59 }
 0x14e   :  { %v662_v55 = vmul.f32 %v13170_v39, %v13170_v39  ;;  %v13175_v39 = vld [vmem:[#allocation9_spill] sm:$0xff] }
 0x14f   :  { %881 = vadd.xlane.f32.xlu1 %v880_v46  ;;  %878 = vadd.xlane.f32.xlu0 %v877_v30  ;;  %v889_v14 = vsel %vm154_vm0, %v661_v38, 0.0  ;;  %v13179_v38 = vld [vmem:[#allocation11_spill] sm:$0xff] }
 0x150   :  { %v8676_v7 = vpop.xlane.xlu1 %447  ;;  %v8678_v15 = vpop.xlane.xlu0 %444  ;;  %v892_v54 = vsel %vm154_vm0, %v662_v55, 0.0 }
 0x151   :  { %13168 = vst [vmem:[#allocation4_spill] sm:$0xff] %v8676_v7  ;;  %13169 = vst [vmem:[#allocation5_spill] sm:$0xff] %v8678_v15  ;;  %v664_v15 = vmul.f32 %v13174_v51, %v13174_v51  ;;  %v663_v7 = vmul.f32 %v13175_v39, %v13175_v39 }
 0x153   :  { %887 = vadd.xlane.f32.xlu1 %v886_v31  ;;  %884 = vadd.xlane.f32.xlu0 %v883_v62  ;;  %v898_v62 = vsel %vm154_vm0, %v664_v15, 0.0  ;;  %v895_v23 = vsel %vm154_vm0, %v663_v7, 0.0  ;;  %v13183_v7 = vld [vmem:[#allocation13_spill] sm:$0xff] }
 0x154   :  { %v8686_v46 = vpop.xlane.xlu1 %453  ;;  %v8688_v30 = vpop.xlane.xlu0 %450 }
 0x155   :  { %13172 = vst [vmem:[#allocation6_spill] sm:$0xff] %v8686_v46  ;;  %13173 = vst [vmem:[#allocation7_spill] sm:$0xff] %v8688_v30  ;;  %v13178_v30 = vld [vmem:[#allocation10_spill] sm:$0xff]  ;;  %v665_v46 = vmul.f32 %v13179_v38, %v13179_v38 }
 0x156   :  { %v666_v55 = vmul.f32 %v13178_v30, %v13178_v30 }
 0x157   :  { %893 = vadd.xlane.f32.xlu1 %v892_v54  ;;  %890 = vadd.xlane.f32.xlu0 %v889_v14  ;;  %v901_v39 = vsel %vm154_vm0, %v665_v46, 0.0  ;;  %v13187_v46 = vld [vmem:[#allocation15_spill] sm:$0xff] }
 0x158   :  { %v8696_v59 = vpop.xlane.xlu1 %459  ;;  %v8698_v31 = vpop.xlane.xlu0 %456  ;;  %v904_v14 = vsel %vm154_vm0, %v666_v55, 0.0 }
 0x159   :  { %13176 = vst [vmem:[#allocation8_spill] sm:$0xff] %v8696_v59  ;;  %13177 = vst [vmem:[#allocation9_spill] sm:$0xff] %v8698_v31  ;;  %v13182_v31 = vld [vmem:[#allocation12_spill] sm:$0xff]  ;;  %v667_v59 = vmul.f32 %v13183_v7, %v13183_v7 }
 0x15a   :  { %v668_v15 = vmul.f32 %v13182_v31, %v13182_v31 }
 0x15b   :  { %899 = vadd.xlane.f32.xlu1 %v898_v62  ;;  %896 = vadd.xlane.f32.xlu0 %v895_v23  ;;  %v907_v38 = vsel %vm154_vm0, %v667_v59, 0.0  ;;  %v13191_v59 = vld [vmem:[#allocation17_spill] sm:$0xff] }
 0x15c   :  { %v8706_v51 = vpop.xlane.xlu1 %465  ;;  %v8708_v54 = vpop.xlane.xlu0 %462  ;;  %v910_v23 = vsel %vm154_vm0, %v668_v15, 0.0 }
 0x15d   :  { %13180 = vst [vmem:[#allocation10_spill] sm:$0xff] %v8706_v51  ;;  %13181 = vst [vmem:[#allocation11_spill] sm:$0xff] %v8708_v54  ;;  %v13186_v54 = vld [vmem:[#allocation14_spill] sm:$0xff]  ;;  %v669_v51 = vmul.f32 %v13187_v46, %v13187_v46 }
 0x15e   :  { %v670_v55 = vmul.f32 %v13186_v54, %v13186_v54 }
 0x15f   :  { %905 = vadd.xlane.f32.xlu1 %v904_v14  ;;  %902 = vadd.xlane.f32.xlu0 %v901_v39  ;;  %v913_v7 = vsel %vm154_vm0, %v669_v51, 0.0  ;;  %v13195_v51 = vld [vmem:[#allocation19_spill] sm:$0xff] }
 0x160   :  { %v8716_v30 = vpop.xlane.xlu1 %471  ;;  %v8718_v62 = vpop.xlane.xlu0 %468  ;;  %v916_v39 = vsel %vm154_vm0, %v670_v55, 0.0 }
 0x161   :  { %13184 = vst [vmem:[#allocation12_spill] sm:$0xff] %v8716_v30  ;;  %13185 = vst [vmem:[#allocation13_spill] sm:$0xff] %v8718_v62  ;;  %v13190_v62 = vld [vmem:[#allocation16_spill] sm:$0xff]  ;;  %v671_v30 = vmul.f32 %v13191_v59, %v13191_v59 }
 0x162   :  { %v672_v15 = vmul.f32 %v13190_v62, %v13190_v62 }
 0x163   :  { %911 = vadd.xlane.f32.xlu1 %v910_v23  ;;  %908 = vadd.xlane.f32.xlu0 %v907_v38  ;;  %v919_v46 = vsel %vm154_vm0, %v671_v30, 0.0  ;;  %v13199_v30 = vld [vmem:[#allocation21_spill] sm:$0xff] }
 0x164   :  { %v8726_v31 = vpop.xlane.xlu1 %477  ;;  %v8728_v14 = vpop.xlane.xlu0 %474  ;;  %v922_v38 = vsel %vm154_vm0, %v672_v15, 0.0 }
 0x165   :  { %13188 = vst [vmem:[#allocation14_spill] sm:$0xff] %v8726_v31  ;;  %13189 = vst [vmem:[#allocation15_spill] sm:$0xff] %v8728_v14  ;;  %v13194_v14 = vld [vmem:[#allocation18_spill] sm:$0xff]  ;;  %v673_v31 = vmul.f32 %v13195_v51, %v13195_v51 }
 0x166   :  { %v674_v55 = vmul.f32 %v13194_v14, %v13194_v14 }
 0x167   :  { %917 = vadd.xlane.f32.xlu1 %v916_v39  ;;  %914 = vadd.xlane.f32.xlu0 %v913_v7  ;;  %v925_v59 = vsel %vm154_vm0, %v673_v31, 0.0  ;;  %v13201_v31 = vld [vmem:[#allocation25_spill] sm:$0xff] }
 0x168   :  { %v8736_v54 = vpop.xlane.xlu1 %483  ;;  %v8738_v23 = vpop.xlane.xlu0 %480  ;;  %v928_v7 = vsel %vm154_vm0, %v674_v55, 0.0 }
 0x169   :  { %13192 = vst [vmem:[#allocation16_spill] sm:$0xff] %v8736_v54  ;;  %13193 = vst [vmem:[#allocation17_spill] sm:$0xff] %v8738_v23  ;;  %v13198_v23 = vld [vmem:[#allocation20_spill] sm:$0xff]  ;;  %v675_v54 = vmul.f32 %v13199_v30, %v13199_v30 }
 0x16a   :  { %v676_v15 = vmul.f32 %v13198_v23, %v13198_v23 }
 0x16b   :  { %923 = vadd.xlane.f32.xlu1 %v922_v38  ;;  %920 = vadd.xlane.f32.xlu0 %v919_v46  ;;  %v931_v51 = vsel %vm154_vm0, %v675_v54, 0.0  ;;  %v13203_v54 = vld [vmem:[#allocation29_spill] sm:$0xff] }
 0x16c   :  { %v8746_v62 = vpop.xlane.xlu1 %489  ;;  %v8748_v39 = vpop.xlane.xlu0 %486  ;;  %v934_v46 = vsel %vm154_vm0, %v676_v15, 0.0  ;;  %v680_v15 = vmul.f32 %v13202_v43, %v13202_v43  ;;  %v679_v22 = vmul.f32 %v13203_v54, %v13203_v54 }
 0x16d   :  { %13196 = vst [vmem:[#allocation18_spill] sm:$0xff] %v8746_v62  ;;  %13197 = vst [vmem:[#allocation19_spill] sm:$0xff] %v8748_v39  ;;  %v13200_v39 = vld [vmem:[#allocation24_spill] sm:$0xff]  ;;  %v677_v62 = vmul.f32 %v13201_v31, %v13201_v31 }
 0x16e   :  { %v678_v55 = vmul.f32 %v13200_v39, %v13200_v39  ;;  %v943_v31 = vsel %vm154_vm0, %v679_v22, 0.0  ;;  %v13207_v22 = vld [vmem:[#allocation37_spill] sm:$0xff] }
 0x16f   :  { %929 = vadd.xlane.f32.xlu1 %v928_v7  ;;  %926 = vadd.xlane.f32.xlu0 %v925_v59  ;;  %v937_v30 = vsel %vm154_vm0, %v677_v62, 0.0  ;;  %v13205_v62 = vld [vmem:[#allocation33_spill] sm:$0xff]  ;;  %v683_v58 = vmul.f32 %v13207_v22, %v13207_v22 }
 0x170   :  { %v8756_v14 = vpop.xlane.xlu1 %719  ;;  %v8758_v38 = vpop.xlane.xlu0 %716  ;;  %v940_v59 = vsel %vm154_vm0, %v678_v55, 0.0  ;;  %v682_v55 = vmul.f32 %v13204_v35, %v13204_v35  ;;  %v681_v6 = vmul.f32 %v13205_v62, %v13205_v62 }
 0x171   :  { %v955_v62 = vsel %vm154_vm0, %v683_v58, 0.0  ;;  %v13211_v58 = vld [vmem:[#allocation45_spill] sm:$0xff] }
 0x172   :  { %v949_v54 = vsel %vm154_vm0, %v681_v6, 0.0  ;;  %v13209_v6 = vld [vmem:[#allocation41_spill] sm:$0xff]  ;;  %v687_v42 = vmul.f32 %v13211_v58, %v13211_v58 }
 0x173   :  { %935 = vadd.xlane.f32.xlu1 %v934_v46  ;;  %932 = vadd.xlane.f32.xlu0 %v931_v51  ;;  %v946_v51 = vsel %vm154_vm0, %v680_v15, 0.0  ;;  %v684_v15 = vmul.f32 %v13206_v27, %v13206_v27  ;;  %v685_v50 = vmul.f32 %v13209_v6, %v13209_v6 }
 0x174   :  { %v8766_v23 = vpop.xlane.xlu1 %725  ;;  %v8768_v7 = vpop.xlane.xlu0 %722  ;;  %v967_v6 = vsel %vm154_vm0, %v687_v42, 0.0  ;;  %v13215_v42 = vld [vmem:[#allocation53_spill] sm:$0xff] }
 0x175   :  { %v961_v22 = vsel %vm154_vm0, %v685_v50, 0.0  ;;  %v13213_v50 = vld [vmem:[#allocation49_spill] sm:$0xff]  ;;  %v691_v26 = vmul.f32 %v13215_v42, %v13215_v42  ;;  %v1053_v28 = vmul.f32 0.020408163, %v8768_v7 }
 0x176   :  { %v689_v34 = vmul.f32 %v13213_v50, %v13213_v50 }
 0x177   :  { %941 = vadd.xlane.f32.xlu1 %v940_v59  ;;  %938 = vadd.xlane.f32.xlu0 %v937_v30  ;;  %v952_v30 = vsel %vm154_vm0, %v682_v55, 0.0  ;;  %v686_v55 = vmul.f32 %v13208_v19, %v13208_v19  ;;  %v979_v50 = vsel %vm154_vm0, %v691_v26, 0.0  ;;  %v13219_v26 = vld [vmem:[#allocation61_spill] sm:$0xff] }
 0x178   :  { %v8776_v39 = vpop.xlane.xlu1 %731  ;;  %v8778_v46 = vpop.xlane.xlu0 %728  ;;  %v973_v58 = vsel %vm154_vm0, %v689_v34, 0.0  ;;  %v13217_v34 = vld [vmem:[#allocation57_spill] sm:$0xff]  ;;  %v695_v10 = vmul.f32 %v13219_v26, %v13219_v26 }
 0x179   :  { %v693_v18 = vmul.f32 %v13217_v34, %v13217_v34 }
 0x17a   :  { %v991_v34 = vsel %vm154_vm0, %v695_v10, 0.0  ;;  %v13223_v10 = vld [vmem:[#allocation69_spill] sm:$0xff] }
 0x17b   :  { %947 = vadd.xlane.f32.xlu1 %v946_v51  ;;  %944 = vadd.xlane.f32.xlu0 %v943_v31  ;;  %v958_v31 = vsel %vm154_vm0, %v684_v15, 0.0  ;;  %v688_v15 = vmul.f32 %v13210_v11, %v13210_v11  ;;  %v985_v42 = vsel %vm154_vm0, %v693_v18, 0.0  ;;  %v13221_v18 = vld [vmem:[#allocation65_spill] sm:$0xff]  ;;  %v699_v60 = vmul.f32 %v13223_v10, %v13223_v10 }
 0x17c   :  { %v8786_v43 = vpop.xlane.xlu1 %737  ;;  %v8788_v59 = vpop.xlane.xlu0 %734  ;;  %v697_v3 = vmul.f32 %v13221_v18, %v13221_v18 }
 0x17d   :  { %v1003_v18 = vsel %vm154_vm0, %v699_v60, 0.0  ;;  %v13227_v60 = vld [vmem:[#allocation77_spill] sm:$0xff] }
 0x17e   :  { %v997_v26 = vsel %vm154_vm0, %v697_v3, 0.0  ;;  %v13225_v3 = vld [vmem:[#allocation73_spill] sm:$0xff]  ;;  %v703_v52 = vmul.f32 %v13227_v60, %v13227_v60 }
 0x17f   :  { %953 = vadd.xlane.f32.xlu1 %v952_v30  ;;  %950 = vadd.xlane.f32.xlu0 %v949_v54  ;;  %v964_v54 = vsel %vm154_vm0, %v686_v55, 0.0  ;;  %v690_v55 = vmul.f32 %v13212_v4, %v13212_v4  ;;  %v701_v56 = vmul.f32 %v13225_v3, %v13225_v3 }
 0x180   :  { %v8796_v35 = vpop.xlane.xlu1 %743  ;;  %v8798_v51 = vpop.xlane.xlu0 %740  ;;  %v1015_v3 = vsel %vm154_vm0, %v703_v52, 0.0  ;;  %v13231_v52 = vld [vmem:[#allocation85_spill] sm:$0xff] }
 0x181   :  { %v1009_v10 = vsel %vm154_vm0, %v701_v56, 0.0  ;;  %v13229_v56 = vld [vmem:[#allocation81_spill] sm:$0xff]  ;;  %v707_v44 = vmul.f32 %v13231_v52, %v13231_v52  ;;  %v1052_v52 = vmul.f32 0.020408163, %v8756_v14 }
 0x182   :  { %v705_v48 = vmul.f32 %v13229_v56, %v13229_v56 }
 0x183   :  { %959 = vadd.xlane.f32.xlu1 %v958_v31  ;;  %956 = vadd.xlane.f32.xlu0 %v955_v62  ;;  %v970_v62 = vsel %vm154_vm0, %v688_v15, 0.0  ;;  %v692_v15 = vmul.f32 %v13214_v61, %v13214_v61  ;;  %v1027_v56 = vsel %vm154_vm0, %v707_v44, 0.0 }
 0x184   :  { %v8806_v27 = vpop.xlane.xlu1 %749  ;;  %v8808_v30 = vpop.xlane.xlu0 %746  ;;  %v1021_v60 = vsel %vm154_vm0, %v705_v48, 0.0  ;;  %v13233_v48 = vld [vmem:[#allocation89_spill] sm:$0xff] }
 0x185   :  { %v709_v40 = vmul.f32 %v13233_v48, %v13233_v48  ;;  %v711_v48 = vmul.f32 %v13237_v17, %v13237_v17 }
 0x187   :  { %965 = vadd.xlane.f32.xlu1 %v964_v54  ;;  %962 = vadd.xlane.f32.xlu0 %v961_v22  ;;  %v976_v22 = vsel %vm154_vm0, %v690_v55, 0.0  ;;  %v694_v55 = vmul.f32 %v13216_v57, %v13216_v57  ;;  %v1039_v9 = vsel %vm154_vm0, %v711_v48, 0.0 }
 0x188   :  { %v8816_v19 = vpop.xlane.xlu1 %755  ;;  %v8818_v31 = vpop.xlane.xlu0 %752 }
 0x18b   :  { %971 = vadd.xlane.f32.xlu1 %v970_v62  ;;  %968 = vadd.xlane.f32.xlu0 %v967_v6  ;;  %v982_v6 = vsel %vm154_vm0, %v692_v15, 0.0  ;;  %v696_v15 = vmul.f32 %v13218_v53, %v13218_v53 }
 0x18c   :  { %v8826_v11 = vpop.xlane.xlu1 %761  ;;  %v8828_v54 = vpop.xlane.xlu0 %758 }
 0x18f   :  { %977 = vadd.xlane.f32.xlu1 %v976_v22  ;;  %974 = vadd.xlane.f32.xlu0 %v973_v58  ;;  %v988_v58 = vsel %vm154_vm0, %v694_v55, 0.0  ;;  %v698_v55 = vmul.f32 %v13220_v49, %v13220_v49 }
 0x190   :  { %v8836_v4 = vpop.xlane.xlu1 %767  ;;  %v8838_v62 = vpop.xlane.xlu0 %764 }
 0x193   :  { %983 = vadd.xlane.f32.xlu1 %v982_v6  ;;  %980 = vadd.xlane.f32.xlu0 %v979_v50  ;;  %v994_v50 = vsel %vm154_vm0, %v696_v15, 0.0  ;;  %v700_v15 = vmul.f32 %v13222_v45, %v13222_v45 }
 0x194   :  { %v8846_v61 = vpop.xlane.xlu1 %773  ;;  %v8848_v22 = vpop.xlane.xlu0 %770 }
 0x197   :  { %989 = vadd.xlane.f32.xlu1 %v988_v58  ;;  %986 = vadd.xlane.f32.xlu0 %v985_v42  ;;  %v1000_v42 = vsel %vm154_vm0, %v698_v55, 0.0  ;;  %v702_v55 = vmul.f32 %v13224_v41, %v13224_v41 }
 0x198   :  { %v8856_v57 = vpop.xlane.xlu1 %779  ;;  %v8858_v6 = vpop.xlane.xlu0 %776 }
 0x19b   :  { %995 = vadd.xlane.f32.xlu1 %v994_v50  ;;  %992 = vadd.xlane.f32.xlu0 %v991_v34  ;;  %v1006_v34 = vsel %vm154_vm0, %v700_v15, 0.0  ;;  %v704_v15 = vmul.f32 %v13226_v37, %v13226_v37 }
 0x19c   :  { %v8866_v53 = vpop.xlane.xlu1 %785  ;;  %v8868_v58 = vpop.xlane.xlu0 %782 }
 0x19f   :  { %1001 = vadd.xlane.f32.xlu1 %v1000_v42  ;;  %998 = vadd.xlane.f32.xlu0 %v997_v26  ;;  %v1012_v26 = vsel %vm154_vm0, %v702_v55, 0.0  ;;  %v706_v55 = vmul.f32 %v13228_v33, %v13228_v33 }
 0x1a0   :  { %v8876_v49 = vpop.xlane.xlu1 %791  ;;  %v8878_v50 = vpop.xlane.xlu0 %788 }
 0x1a3   :  { %1007 = vadd.xlane.f32.xlu1 %v1006_v34  ;;  %1004 = vadd.xlane.f32.xlu0 %v1003_v18  ;;  %v1018_v18 = vsel %vm154_vm0, %v704_v15, 0.0  ;;  %v708_v15 = vmul.f32 %v13230_v29, %v13230_v29  ;;  %v13234_v29 = vld [vmem:[#allocation27_spill] sm:$0xff] }
 0x1a4   :  { %v8886_v45 = vpop.xlane.xlu1 %797  ;;  %v8888_v42 = vpop.xlane.xlu0 %794  ;;  %v8927_v21 = vmul.f32 0.020408163, %v13234_v29  ;;  %v13238_v29 = vld [vmem:[#allocation22_spill] sm:$0xff] }
 0x1a5   :  { %v8941_v32 = vmul.f32 0.020408163, %v13238_v29 }
 0x1a6   :  { %13235 = vst [vmem:[#allocation20_spill] sm:$0xff] %v8927_v21 }
 0x1a7   :  { %1013 = vadd.xlane.f32.xlu1 %v1012_v26  ;;  %1010 = vadd.xlane.f32.xlu0 %v1009_v10  ;;  %v1024_v10 = vsel %vm154_vm0, %v706_v55, 0.0  ;;  %v710_v55 = vmul.f32 %v13232_v25, %v13232_v25  ;;  %v1033_v25 = vsel %vm154_vm0, %v709_v40, 0.0  ;;  %13239 = vst [vmem:[#allocation21_spill] sm:$0xff] %v8941_v32 }
 0x1a8   :  { %v8896_v41 = vpop.xlane.xlu1 %803  ;;  %v8898_v34 = vpop.xlane.xlu0 %800 }
 0x1a9   :  { %v1036_v44 = vsel %vm154_vm0, %v710_v55, 0.0  ;;  %v714_v55 = vmul.f32 %v13242_v13, %v13242_v13  ;;  %v1051_v13 = vmul.f32 0.020408163, %v8758_v38 }
 0x1ab   :  { %1019 = vadd.xlane.f32.xlu1 %v1018_v18  ;;  %1016 = vadd.xlane.f32.xlu0 %v1015_v3  ;;  %v1030_v3 = vsel %vm154_vm0, %v708_v15, 0.0  ;;  %v1048_v48 = vsel %vm154_vm0, %v714_v55, 0.0 }
 0x1ac   :  { %v8906_v37 = vpop.xlane.xlu1 %809  ;;  %v8908_v26 = vpop.xlane.xlu0 %806 }
 0x1af   :  { %1025 = vadd.xlane.f32.xlu1 %v1024_v10  ;;  %1022 = vadd.xlane.f32.xlu0 %v1021_v60  ;;  %v13236_v10 = vld [vmem:[#allocation92_spill] sm:$0xff] }
 0x1b0   :  { %v8916_v33 = vpop.xlane.xlu1 %815  ;;  %v8918_v18 = vpop.xlane.xlu0 %812  ;;  %v712_v60 = vmul.f32 %v13236_v10, %v13236_v10 }
 0x1b2   :  { %v1042_v14 = vsel %vm154_vm0, %v712_v60, 0.0 }
 0x1b3   :  { %1031 = vadd.xlane.f32.xlu1 %v1030_v3  ;;  %1028 = vadd.xlane.f32.xlu0 %v1027_v56  ;;  %v1164_v3 = vmul.f32 %v8927_v21, %v8927_v21  ;;  %v13240_v56 = vld [vmem:[#allocation23_spill] sm:$0xff]  ;;  %v13243_v21 = vld [vmem:[#allocation97_spill] sm:$0xff] }
 0x1b4   :  { %v8932_v36 = vpop.xlane.xlu1 %821  ;;  %v8934_v15 = vpop.xlane.xlu0 %818  ;;  %v8946_v10 = vmul.f32 0.020408163, %v13240_v56  ;;  %v713_v56 = vmul.f32 %v13243_v21, %v13243_v21  ;;  %v1054_v21 = vmul.f32 0.020408163, %v8766_v23  ;;  %v13250_v23 = vld [vmem:[#allocation42_spill] sm:$0xff] }
 0x1b5   :  { %v1276_v40 = vsub.f32 %v1052_v52, %v1164_v3  ;;  %v13246_v52 = vld [vmem:[#allocation38_spill] sm:$0xff] }
 0x1b6   :  { %13241 = vst [vmem:[#allocation24_spill] sm:$0xff] %v8946_v10  ;;  %v1163_v7 = vmul.f32 %v8946_v10, %v8946_v10  ;;  %v8968_v3 = vmul.f32 0.020408163, %v13246_v52  ;;  %v1045_v38 = vsel %vm154_vm0, %v713_v56, 0.0  ;;  %v8980_v52 = vmul.f32 0.020408163, %v13248_v20 }
 0x1b7   :  { %1037 = vadd.xlane.f32.xlu1 %v1036_v44  ;;  %1034 = vadd.xlane.f32.xlu0 %v1033_v25  ;;  %v1165_v44 = vmul.f32 %v8941_v32, %v8941_v32  ;;  %v13244_v25 = vld [vmem:[#allocation26_spill] sm:$0xff]  ;;  %v1388_v24 = vadd.f32 1e-05, %v1276_v40 }
 0x1b8   :  { %v8952_v17 = vpop.xlane.xlu1 %827  ;;  %v8954_v29 = vpop.xlane.xlu0 %824  ;;  %v8962_v60 = vmul.f32 0.020408163, %v13244_v25  ;;  %13247 = vst [vmem:[#allocation28_spill] sm:$0xff] %v8968_v3  ;;  %13249 = vst [vmem:[#allocation29_spill] sm:$0xff] %v8980_v52  ;;  %v1172_v55 = vmul.f32 %v8968_v3, %v8968_v3 }
 0x1b9   :  { %v1277_v0 = vsub.f32 %v1053_v28, %v1165_v44  ;;  %v8986_v28 = vmul.f32 0.020408163, %v13250_v23  ;;  %7110 = vrsqrt.f32 %v1388_v24  ;;  %v1055_v44 = vmul.f32 0.020408163, %v8778_v46 }
 0x1ba   :  { %13245 = vst [vmem:[#allocation25_spill] sm:$0xff] %v8962_v60  ;;  %v1166_v10 = vmul.f32 %v8962_v60, %v8962_v60 }
 0x1bb   :  { %1043 = vadd.xlane.f32.xlu1 %v1042_v14  ;;  %1040 = vadd.xlane.f32.xlu0 %v1039_v9  ;;  %v1275_v14 = vsub.f32 %v1051_v13, %v1163_v7  ;;  %v1060_v9 = vmul.f32 0.020408163, %v8796_v35  ;;  %13251 = vst [vmem:[#allocation32_spill] sm:$0xff] %v8986_v28  ;;  %v1389_v56 = vadd.f32 1e-05, %v1277_v0  ;;  %v13252_v13 = vld [vmem:[#allocation30_spill] sm:$0xff]  ;;  %v1167_v35 = vmul.f32 %v8980_v52, %v8980_v52 }
 0x1bc   :  { %v8972_v32 = vpop.xlane.xlu1 %833  ;;  %v8974_v25 = vpop.xlane.xlu0 %830  ;;  %v1278_v40 = vsub.f32 %v1054_v21, %v1166_v10  ;;  %v8994_v7 = vmul.f32 0.020408163, %v13252_v13  ;;  %v1174_v24 = vmul.f32 %v8986_v28, %v8986_v28  ;;  %v13254_v0 = vld [vmem:[#allocation46_spill] sm:$0xff]  ;;  %v1056_v21 = vmul.f32 0.020408163, %v8776_v39 }
 0x1bd   :  { %v1387_v3 = vadd.f32 1e-05, %v1275_v14  ;;  %v1284_v23 = vsub.f32 %v1060_v9, %v1172_v55  ;;  %v9002_v10 = vmul.f32 0.020408163, %v13254_v0  ;;  %7112 = vrsqrt.f32 %v1389_v56  ;;  %v13256_v9 = vld [vmem:[#allocation35_spill] sm:$0xff]  ;;  %v13258_v39 = vld [vmem:[#allocation50_spill] sm:$0xff] }
 0x1be   :  { %13253 = vst [vmem:[#allocation33_spill] sm:$0xff] %v8994_v7  ;;  %v1390_v46 = vadd.f32 1e-05, %v1278_v40  ;;  %v1168_v14 = vmul.f32 %v8994_v7, %v8994_v7  ;;  %v1064_v0 = vmul.f32 0.020408163, %v8816_v19 }
 0x1bf   :  { %1049 = vadd.xlane.f32.xlu1 %v1048_v48  ;;  %1046 = vadd.xlane.f32.xlu0 %v1045_v38  ;;  %v1062_v48 = vmul.f32 0.020408163, %v8806_v27  ;;  %13255 = vst [vmem:[#allocation36_spill] sm:$0xff] %v9002_v10  ;;  %v1279_v38 = vsub.f32 %v1055_v44, %v1167_v35  ;;  %v9012_v27 = vmul.f32 0.020408163, %v13256_v9  ;;  %7114 = vrsqrt.f32 %v1387_v3  ;;  %v13261_v3 = vld [vmem:[#allocation34_spill] sm:$0xff] }
 0x1c0   :  { %v8989_v60 = vpop.xlane.xlu1 %839  ;;  %v8991_v20 = vpop.xlane.xlu0 %836  ;;  %v1396_v55 = vadd.f32 1e-05, %v1284_v23  ;;  %v1176_v40 = vmul.f32 %v9002_v10, %v9002_v10  ;;  %v9018_v56 = vmul.f32 0.020408163, %v13258_v39  ;;  %7116 = vrsqrt.f32 %v1390_v46 }
 0x1c1   :  { %13257 = vst [vmem:[#allocation37_spill] sm:$0xff] %v9012_v27  ;;  %v1286_v28 = vsub.f32 %v1062_v48, %v1174_v24  ;;  %v1280_v44 = vsub.f32 %v1056_v21, %v1168_v14  ;;  %v1391_v35 = vadd.f32 1e-05, %v1279_v38  ;;  %v1057_v52 = vmul.f32 0.020408163, %v8788_v59  ;;  %v1612_v59 = vld [vmem:[%s12795_s1 + $0x8] sm:$0xff] }
 0x1c2   :  { %13259 = vst [vmem:[#allocation40_spill] sm:$0xff] %v9018_v56  ;;  %v9026_v23 = vmul.f32 0.020408163, %v13261_v3  ;;  %v1169_v19 = vmul.f32 %v9012_v27, %v9012_v27  ;;  %7118 = vrsqrt.f32 %v1396_v55  ;;  %v1288_v39 = vsub.f32 %v1064_v0, %v1176_v40  ;;  %v13263_v38 = vld [vmem:[#allocation54_spill] sm:$0xff]  ;;  %v13266_v0 = vld [vmem:[#allocation39_spill] sm:$0xff] }
 0x1c3   :  { %v7111_v48 = vpop.eup %7110  ;;  %v1398_v24 = vadd.f32 1e-05, %v1286_v28  ;;  %v1066_v46 = vmul.f32 0.020408163, %v8826_v11  ;;  %v1178_v21 = vmul.f32 %v9018_v56, %v9018_v56  ;;  %v9037_v14 = vmul.f32 0.020408163, %v13263_v38 }
 0x1c4   :  { %v9005_v13 = vpop.xlane.xlu1 %845  ;;  %v9007_v1 = vpop.xlane.xlu0 %842  ;;  %13262 = vst [vmem:[#allocation44_spill] sm:$0xff] %v9026_v23  ;;  %v1392_v3 = vadd.f32 1e-05, %v1280_v44  ;;  %7120 = vrsqrt.f32 %v1391_v35  ;;  %v1058_v10 = vmul.f32 0.020408163, %v8786_v43  ;;  %v1281_v27 = vsub.f32 %v1057_v52, %v1169_v19  ;;  %v1613_v43 = vld [vmem:[%s12795_s1 + $0x10] sm:$0xff] }
 0x1c5   :  { %13264 = vst [vmem:[#allocation45_spill] sm:$0xff] %v9037_v14  ;;  %v1170_v11 = vmul.f32 %v9026_v23, %v9026_v23  ;;  %v9047_v40 = vmul.f32 0.020408163, %v13266_v0  ;;  %7122 = vrsqrt.f32 %v1398_v24  ;;  %v1400_v38 = vadd.f32 1e-05, %v1288_v39  ;;  %v13269_v19 = vld [vmem:[#allocation58_spill] sm:$0xff] }
 0x1c6   :  { %v1290_v44 = vsub.f32 %v1066_v46, %v1178_v21  ;;  %v1068_v35 = vmul.f32 0.020408163, %v8836_v4  ;;  %v1180_v52 = vmul.f32 %v9037_v14, %v9037_v14  ;;  %v9058_v23 = vmul.f32 0.020408163, %v13269_v19  ;;  %v1611_v46 = vld [vmem:[%s12795_s1] sm:$0xff]  ;;  %v13272_v19 = vld [vmem:[#allocation43_spill] sm:$0xff] }
 0x1c7   :  { %13267 = vst [vmem:[#allocation49_spill] sm:$0xff] %v9047_v40  ;;  %v7113_v56 = vpop.eup %7112  ;;  %7124 = vrsqrt.f32 %v1392_v3  ;;  %v1059_v24 = vmul.f32 0.020408163, %v8798_v51  ;;  %v1171_v21 = vmul.f32 %v9047_v40, %v9047_v40  ;;  %v9072_v14 = vmul.f32 0.020408163, %v13272_v19 }
 0x1c8   :  { %v9021_v7 = vpop.xlane.xlu1 %851  ;;  %v9023_v9 = vpop.xlane.xlu0 %848  ;;  %13270 = vst [vmem:[#allocation53_spill] sm:$0xff] %v9058_v23  ;;  %7126 = vrsqrt.f32 %v1400_v38  ;;  %v1402_v51 = vadd.f32 1e-05, %v1290_v44  ;;  %v1292_v3 = vsub.f32 %v1068_v35, %v1180_v52  ;;  %v1061_v44 = vmul.f32 0.020408163, %v8808_v30  ;;  %v1620_v52 = vld [vmem:[%s12795_s1 + $0x48] sm:$0xff] }
 0x1c9   :  { %13260 = vst [vmem:[#allocation41_spill] sm:$0xff] %v9023_v9  ;;  %v9049_v9 = vmul.f32 %v7111_v48, %v1612_v59  ;;  %v7115_v0 = vpop.eup %7114  ;;  %v1282_v48 = vsub.f32 %v1058_v10, %v1170_v11  ;;  %v1393_v59 = vadd.f32 1e-05, %v1281_v27  ;;  %13273 = vst [vmem:[#allocation57_spill] sm:$0xff] %v9072_v14  ;;  %v9074_v10 = vmul.f32 %v7113_v56, %v1613_v43 }
 0x1ca   :  { %v7117_v27 = vpop.eup %7116  ;;  %v1070_v11 = vmul.f32 0.020408163, %v8846_v61  ;;  %v9085_v19 = vmul.f32 %v7115_v0, %v1611_v46  ;;  %v1283_v38 = vsub.f32 %v1059_v24, %v1171_v21  ;;  %v13279_v0 = vld [vmem:[#allocation47_spill] sm:$0xff]  ;;  %v1072_v21 = vmul.f32 0.020408163, %v8856_v57 }
 0x1cb   :  { %13268 = vst [vmem:[#allocation52_spill] sm:$0xff] %v9049_v9  ;;  %13274 = vst [vmem:[#allocation60_spill] sm:$0xff] %v9074_v10  ;;  %v1394_v43 = vadd.f32 1e-05, %v1282_v48  ;;  %7128 = vrsqrt.f32 %v1393_v59  ;;  %v9099_v46 = vmul.f32 0.020408163, %v13279_v0 }
 0x1cc   :  { %v9040_v55 = vpop.xlane.xlu1 %857  ;;  %v9042_v28 = vpop.xlane.xlu0 %854  ;;  %13277 = vst [vmem:[#allocation64_spill] sm:$0xff] %v9085_v19  ;;  %7130 = vrsqrt.f32 %v1402_v51  ;;  %v1404_v59 = vadd.f32 1e-05, %v1292_v3 }
 0x1cd   :  { %13265 = vst [vmem:[#allocation48_spill] sm:$0xff] %v9042_v28  ;;  %v13275_v28 = vld [vmem:[#allocation62_spill] sm:$0xff]  ;;  %v7119_v56 = vpop.eup %7118  ;;  %13280 = vst [vmem:[#allocation68_spill] sm:$0xff] %v9099_v46  ;;  %7132 = vrsqrt.f32 %v1394_v43 }
 0x1ce   :  { %v9083_v40 = vmul.f32 0.020408163, %v13275_v28  ;;  %v1173_v28 = vmul.f32 %v9072_v14, %v9072_v14  ;;  %v7121_v30 = vpop.eup %7120  ;;  %7134 = vrsqrt.f32 %v1404_v59 }
 0x1d0   :  { %v9061_v39 = vpop.xlane.xlu1 %863  ;;  %2178 = vperm.xlu1 %6643, %v9049_v9   ;;  %v9064_v4 = vpop.xlane.xlu0 %860  ;;  %v1614_v9 = vld [vmem:[%s12795_s1 + $0x18] sm:$0xff]  ;;  %13276 = vst [vmem:[#allocation61_spill] sm:$0xff] %v9083_v40  ;;  %v1184_v14 = vmul.f32 %v9083_v40, %v9083_v40  ;;  %v1285_v51 = vsub.f32 %v1061_v44, %v1173_v28  ;;  %v1074_v28 = vmul.f32 0.020408163, %v8866_v53  ;;  %v13288_v40 = vld [vmem:[#allocation70_spill] sm:$0xff] }
 0x1d1   :  { %13271 = vst [vmem:[#allocation56_spill] sm:$0xff] %v9064_v4  ;;  %v1182_v4 = vmul.f32 %v9058_v23, %v9058_v23  ;;  %v9102_v48 = vmul.f32 %v7117_v27, %v1614_v9  ;;  %v13282_v23 = vld [vmem:[#allocation66_spill] sm:$0xff]  ;;  %v7123_v9 = vpop.eup %7122  ;;  %v1395_v27 = vadd.f32 1e-05, %v1283_v38 }
 0x1d2   :  { %v9111_v0 = vmul.f32 0.020408163, %v13282_v23  ;;  %v1175_v23 = vmul.f32 %v9099_v46, %v9099_v46  ;;  %v1296_v44 = vsub.f32 %v1072_v21, %v1184_v14  ;;  %v1065_v14 = vmul.f32 0.020408163, %v8828_v54  ;;  %v1624_v21 = vld [vmem:[%s12795_s1 + $0x68] sm:$0xff] }
 0x1d3   :  { %13281 = vst [vmem:[#allocation69_spill] sm:$0xff] %v9102_v48  ;;  %v1294_v24 = vsub.f32 %v1070_v11, %v1182_v4  ;;  %v1063_v4 = vmul.f32 0.020408163, %v8818_v31  ;;  %v1622_v11 = vld [vmem:[%s12795_s1 + $0x58] sm:$0xff]  ;;  %v7125_v31 = vpop.eup %7124  ;;  %7136 = vrsqrt.f32 %v1395_v27 }
 0x1d4   :  { %v9088_v35 = vpop.xlane.xlu1 %869  ;;  %2183 = vperm.xlu1 %6643, %v9074_v10   ;;  %v9091_v61 = vpop.xlane.xlu0 %866  ;;  %v1615_v10 = vld [vmem:[%s12795_s1 + $0x20] sm:$0xff]  ;;  %13283 = vst [vmem:[#allocation72_spill] sm:$0xff] %v9111_v0  ;;  %v1186_v46 = vmul.f32 %v9111_v0, %v9111_v0 }
 0x1d5   :  { %13278 = vst [vmem:[#allocation65_spill] sm:$0xff] %v9091_v61  ;;  %2173 = vperm.xlu0 %6642, %v9085_v19   ;;  %v9113_v61 = vmul.f32 %v7119_v56, %v1620_v52  ;;  %v13285_v56 = vld [vmem:[#allocation51_spill] sm:$0xff]  ;;  %v9130_v43 = vmul.f32 %v7121_v30, %v1615_v10  ;;  %v1406_v38 = vadd.f32 1e-05, %v1294_v24  ;;  %v7127_v10 = vpop.eup %7126  ;;  %v1397_v30 = vadd.f32 1e-05, %v1285_v51 }
 0x1d6   :  { %v9127_v52 = vmul.f32 0.020408163, %v13285_v56  ;;  %v1616_v19 = vld [vmem:[%s12795_s1 + $0x28] sm:$0xff]  ;;  %v9139_v56 = vmul.f32 0.020408163, %v13288_v40  ;;  %v1287_v59 = vsub.f32 %v1063_v4, %v1175_v23  ;;  %v7129_v54 = vpop.eup %7128  ;;  %v1298_v4 = vsub.f32 %v1074_v28, %v1186_v46  ;;  %v1626_v28 = vld [vmem:[%s12795_s1 + $0x78] sm:$0xff] }
 0x1d7   :  { %13284 = vst [vmem:[#allocation73_spill] sm:$0xff] %v9113_v61  ;;  %13287 = vst [vmem:[#allocation77_spill] sm:$0xff] %v9130_v43  ;;  %v9158_v27 = vmul.f32 %v7125_v31, %v1616_v19  ;;  %7138 = vrsqrt.f32 %v1406_v38  ;;  %v1408_v51 = vadd.f32 1e-05, %v1296_v44  ;;  %v1076_v23 = vmul.f32 0.020408163, %v8876_v49  ;;  %v7131_v19 = vpop.eup %7130 }
 0x1d8   :  { %v9116_v3 = vpop.xlane.xlu1 %875  ;;  %2188 = vperm.xlu1 %6643, %v9102_v48   ;;  %v9119_v57 = vpop.xlane.xlu0 %872  ;;  %13286 = vst [vmem:[#allocation76_spill] sm:$0xff] %v9127_v52  ;;  %13289 = vst [vmem:[#allocation80_spill] sm:$0xff] %v9139_v56  ;;  %v9141_v48 = vmul.f32 %v7123_v9, %v1622_v11  ;;  %v1177_v40 = vmul.f32 %v9127_v52, %v9127_v52  ;;  %v13291_v9 = vld [vmem:[#allocation55_spill] sm:$0xff]  ;;  %v1188_v52 = vmul.f32 %v9139_v56, %v9139_v56 }
 0x1d9   :  { %2218 = vperm.xlu0 %6642, %v9113_v61   ;;  %v9155_v11 = vmul.f32 0.020408163, %v13291_v9  ;;  %13293 = vst [vmem:[#allocation85_spill] sm:$0xff] %v9158_v27  ;;  %v13294_v61 = vld [vmem:[#allocation74_spill] sm:$0xff]  ;;  %v9169_v0 = vmul.f32 %v7127_v10, %v1624_v21  ;;  %7140 = vrsqrt.f32 %v1397_v30  ;;  %v1399_v31 = vadd.f32 1e-05, %v1287_v59 }
 0x1da   :  { %13290 = vst [vmem:[#allocation81_spill] sm:$0xff] %v9141_v48  ;;  %v9167_v9 = vmul.f32 0.020408163, %v13294_v61  ;;  %v1289_v38 = vsub.f32 %v1065_v14, %v1177_v40  ;;  %v1067_v46 = vmul.f32 0.020408163, %v8838_v62  ;;  %v13297_v10 = vld [vmem:[#allocation59_spill] sm:$0xff]  ;;  %v7133_v62 = vpop.eup %7132  ;;  %7142 = vrsqrt.f32 %v1408_v51 }
 0x1db   :  { %13292 = vst [vmem:[#allocation84_spill] sm:$0xff] %v9155_v11  ;;  %13296 = vst [vmem:[#allocation89_spill] sm:$0xff] %v9169_v0  ;;  %v1179_v61 = vmul.f32 %v9155_v11, %v9155_v11  ;;  %v9183_v21 = vmul.f32 0.020408163, %v13297_v10  ;;  %v1410_v59 = vadd.f32 1e-05, %v1298_v4  ;;  %v1300_v14 = vsub.f32 %v1076_v23, %v1188_v52 }
 0x1dc   :  { %v9144_v24 = vpop.xlane.xlu1 %881  ;;  %2193 = vperm.xlu1 %6643, %v9130_v43   ;;  %v9147_v53 = vpop.xlane.xlu0 %878  ;;  %v1617_v43 = vld [vmem:[%s12795_s1 + $0x30] sm:$0xff]  ;;  %13295 = vst [vmem:[#allocation88_spill] sm:$0xff] %v9167_v9  ;;  %v1078_v40 = vmul.f32 0.020408163, %v8886_v45  ;;  %v1190_v56 = vmul.f32 %v9167_v9, %v9167_v9  ;;  %v9197_v11 = vmul.f32 %v7131_v19, %v1626_v28  ;;  %7144 = vrsqrt.f32 %v1399_v31  ;;  %v1628_v23 = vld [vmem:[%s12795_s1 + $0x88] sm:$0xff]  ;;  %v13306_v9 = vld [vmem:[#allocation82_spill] sm:$0xff] }
 0x1dd   :  { %2228 = vperm.xlu0 %6642, %v9141_v48   ;;  %13298 = vst [vmem:[#allocation27_spill] sm:$0xff] %v9183_v21  ;;  %v9186_v30 = vmul.f32 %v7129_v54, %v1617_v43  ;;  %v1618_v48 = vld [vmem:[%s12795_s1 + $0x38] sm:$0xff]  ;;  %v7135_v43 = vpop.eup %7134  ;;  %v1401_v54 = vadd.f32 1e-05, %v1289_v38  ;;  %v1291_v51 = vsub.f32 %v1067_v46, %v1179_v61  ;;  %v1069_v52 = vmul.f32 0.020408163, %v8848_v22 }
 0x1de   :  { %13302 = vst [vmem:[#allocation22_spill] sm:$0xff] %v9197_v11  ;;  %v13303_v19 = vld [vmem:[#allocation63_spill] sm:$0xff]  ;;  %v9214_v31 = vmul.f32 %v7133_v62, %v1618_v48  ;;  %v7137_v22 = vpop.eup %7136  ;;  %7146 = vrsqrt.f32 %v1410_v59  ;;  %v1412_v38 = vadd.f32 1e-05, %v1300_v14  ;;  %v1302_v46 = vsub.f32 %v1078_v40, %v1190_v56  ;;  %v1630_v40 = vld [vmem:[%s12795_s1 + $0x98] sm:$0xff] }
 0x1df   :  { %13299 = vst [vmem:[#allocation92_spill] sm:$0xff] %v9186_v30  ;;  %v9211_v28 = vmul.f32 0.020408163, %v13303_v19  ;;  %v1080_v61 = vmul.f32 0.020408163, %v8896_v41  ;;  %7148 = vrsqrt.f32 %v1401_v54 }
 0x1e0   :  { %v9172_v44 = vpop.xlane.xlu1 %887  ;;  %2198 = vperm.xlu1 %6643, %v9158_v27   ;;  %v9175_v49 = vpop.xlane.xlu0 %884  ;;  %v13300_v27 = vld [vmem:[#allocation78_spill] sm:$0xff]  ;;  %13305 = vst [vmem:[#allocation96_spill] sm:$0xff] %v9214_v31  ;;  %v9223_v19 = vmul.f32 0.020408163, %v13306_v9  ;;  %v1403_v62 = vadd.f32 1e-05, %v1291_v51  ;;  %7150 = vrsqrt.f32 %v1412_v38 }
 0x1e1   :  { %2238 = vperm.xlu0 %6642, %v9169_v0   ;;  %v9195_v10 = vmul.f32 0.020408163, %v13300_v27  ;;  %v1181_v27 = vmul.f32 %v9183_v21, %v9183_v21  ;;  %13304 = vst [vmem:[#allocation23_spill] sm:$0xff] %v9211_v28  ;;  %v1619_v0 = vld [vmem:[%s12795_s1 + $0x40] sm:$0xff]  ;;  %v9225_v21 = vmul.f32 %v7135_v43, %v1628_v23  ;;  %v7139_v48 = vpop.eup %7138  ;;  %v1071_v56 = vmul.f32 0.020408163, %v8858_v6 }
 0x1e2   :  { %13307 = vst [vmem:[#allocation97_spill] sm:$0xff] %v9223_v19  ;;  %v1183_v9 = vmul.f32 %v9211_v28, %v9211_v28  ;;  %v13309_v43 = vld [vmem:[#allocation67_spill] sm:$0xff]  ;;  %v9242_v54 = vmul.f32 %v7137_v22, %v1619_v0  ;;  %v1414_v51 = vadd.f32 1e-05, %v1302_v46  ;;  %v13312_v28 = vld [vmem:[#allocation86_spill] sm:$0xff]  ;;  %7152 = vrsqrt.f32 %v1403_v62 }
 0x1e3   :  { %13301 = vst [vmem:[#allocation93_spill] sm:$0xff] %v9195_v10  ;;  %13308 = vst [vmem:[#allocation26_spill] sm:$0xff] %v9225_v21  ;;  %v1293_v59 = vsub.f32 %v1069_v52, %v1181_v27  ;;  %v9239_v23 = vmul.f32 0.020408163, %v13309_v43  ;;  %v7141_v6 = vpop.eup %7140  ;;  %v1082_v27 = vmul.f32 0.020408163, %v8906_v37 }
 0x1e4   :  { %v9200_v4 = vpop.xlane.xlu1 %893  ;;  %2203 = vperm.xlu1 %6643, %v9186_v30   ;;  %v9203_v45 = vpop.xlane.xlu0 %890  ;;  %v1192_v30 = vmul.f32 %v9195_v10, %v9195_v10  ;;  %13311 = vst [vmem:[#allocation31_spill] sm:$0xff] %v9242_v54  ;;  %v1194_v10 = vmul.f32 %v9223_v19, %v9223_v19  ;;  %v9251_v43 = vmul.f32 0.020408163, %v13312_v28  ;;  %v1295_v38 = vsub.f32 %v1071_v56, %v1183_v9  ;;  %v1623_v19 = vld [vmem:[%s12795_s1 + $0x60] sm:$0xff] }
 0x1e5   :  { %2248 = vperm.xlu0 %6642, %v9197_v11   ;;  %13310 = vst [vmem:[#allocation38_spill] sm:$0xff] %v9239_v23  ;;  %v1621_v11 = vld [vmem:[%s12795_s1 + $0x50] sm:$0xff]  ;;  %v7143_v0 = vpop.eup %7142  ;;  %v1405_v22 = vadd.f32 1e-05, %v1293_v59  ;;  %v1185_v28 = vmul.f32 %v9239_v23, %v9239_v23  ;;  %7154 = vrsqrt.f32 %v1414_v51  ;;  %v1084_v9 = vmul.f32 0.020408163, %v8916_v33 }
 0x1e6   :  { %v1304_v52 = vsub.f32 %v1080_v61, %v1192_v30  ;;  %13313 = vst [vmem:[#allocation42_spill] sm:$0xff] %v9251_v43  ;;  %v1073_v30 = vmul.f32 0.020408163, %v8868_v58  ;;  %v1632_v61 = vld [vmem:[%s12795_s1 + $0xa8] sm:$0xff]  ;;  %v9270_v62 = vmul.f32 %v7141_v6, %v1621_v11  ;;  %v7145_v58 = vpop.eup %7144  ;;  %v1306_v56 = vsub.f32 %v1082_v27, %v1194_v10  ;;  %v13318_v23 = vld [vmem:[#allocation90_spill] sm:$0xff]  ;;  %v1634_v27 = vld [vmem:[%s12795_s1 + $0xb8] sm:$0xff] }
 0x1e7   :  { %7156 = vrsqrt.f32 %v1405_v22  ;;  %v1407_v6 = vadd.f32 1e-05, %v1295_v38  ;;  %v1075_v10 = vmul.f32 0.020408163, %v8878_v50  ;;  %v9298_v22 = vmul.f32 %v7145_v58, %v1623_v19 }
 0x1e8   :  { %v9228_v14 = vpop.xlane.xlu1 %899  ;;  %2208 = vperm.xlu1 %6643, %v9214_v31   ;;  %v9231_v41 = vpop.xlane.xlu0 %896  ;;  %v9253_v31 = vmul.f32 %v7139_v48, %v1630_v40  ;;  %v13315_v48 = vld [vmem:[#allocation71_spill] sm:$0xff]  ;;  %13317 = vst [vmem:[#allocation35_spill] sm:$0xff] %v9270_v62  ;;  %v1416_v59 = vadd.f32 1e-05, %v1304_v52  ;;  %v1297_v51 = vsub.f32 %v1073_v30, %v1185_v28  ;;  %v1418_v38 = vadd.f32 1e-05, %v1306_v56 }
 0x1e9   :  { %2258 = vperm.xlu0 %6642, %v9225_v21   ;;  %v9267_v40 = vmul.f32 0.020408163, %v13315_v48  ;;  %v9279_v48 = vmul.f32 0.020408163, %v13318_v23  ;;  %v9281_v21 = vmul.f32 %v7143_v0, %v1632_v61  ;;  %v7147_v11 = vpop.eup %7146  ;;  %v13321_v0 = vld [vmem:[#allocation75_spill] sm:$0xff]  ;;  %13323 = vst [vmem:[#allocation39_spill] sm:$0xff] %v9298_v22 }
 0x1ea   :  { %13314 = vst [vmem:[#allocation30_spill] sm:$0xff] %v9253_v31  ;;  %v9295_v61 = vmul.f32 0.020408163, %v13321_v0  ;;  %v7149_v50 = vpop.eup %7148  ;;  %7158 = vrsqrt.f32 %v1416_v59  ;;  %v1086_v28 = vmul.f32 0.020408163, %v8932_v36 }
 0x1eb   :  { %13316 = vst [vmem:[#allocation46_spill] sm:$0xff] %v9267_v40  ;;  %13319 = vst [vmem:[#allocation50_spill] sm:$0xff] %v9279_v48  ;;  %v1187_v23 = vmul.f32 %v9267_v40, %v9267_v40  ;;  %v13324_v40 = vld [vmem:[#allocation94_spill] sm:$0xff]  ;;  %v7151_v19 = vpop.eup %7150  ;;  %7160 = vrsqrt.f32 %v1407_v6  ;;  %v1409_v58 = vadd.f32 1e-05, %v1297_v51 }
 0x1ec   :  { %v9256_v46 = vpop.xlane.xlu1 %905  ;;  %2213 = vperm.xlu1 %6643, %v9242_v54   ;;  %v9259_v37 = vpop.xlane.xlu0 %902  ;;  %v1196_v54 = vmul.f32 %v9251_v43, %v9251_v43  ;;  %13320 = vst [vmem:[#allocation34_spill] sm:$0xff] %v9281_v21  ;;  %13322 = vst [vmem:[#allocation54_spill] sm:$0xff] %v9295_v61  ;;  %v1625_v43 = vld [vmem:[%s12795_s1 + $0x70] sm:$0xff]  ;;  %v9307_v0 = vmul.f32 0.020408163, %v13324_v40  ;;  %v1189_v40 = vmul.f32 %v9295_v61, %v9295_v61  ;;  %7162 = vrsqrt.f32 %v1418_v38  ;;  %v13329_v61 = vld [vmem:[#allocation98_spill] sm:$0xff] }
 0x1ed   :  { %2268 = vperm.xlu0 %6642, %v9253_v31   ;;  %v9309_v31 = vmul.f32 %v7147_v11, %v1634_v27  ;;  %v1299_v59 = vsub.f32 %v1075_v10, %v1187_v23  ;;  %v13326_v11 = vld [vmem:[#allocation79_spill] sm:$0xff]  ;;  %v9326_v6 = vmul.f32 %v7149_v50, %v1625_v43  ;;  %v1088_v23 = vmul.f32 0.020408163, %v8952_v17 }
 0x1ee   :  { %v1308_v30 = vsub.f32 %v1084_v9, %v1196_v54  ;;  %13325 = vst [vmem:[#allocation58_spill] sm:$0xff] %v9307_v0  ;;  %v1077_v54 = vmul.f32 0.020408163, %v8888_v42  ;;  %v1636_v9 = vld [vmem:[%s12795_s1 + $0xc8] sm:$0xff]  ;;  %v9323_v27 = vmul.f32 0.020408163, %v13326_v11  ;;  %v7153_v42 = vpop.eup %7152  ;;  %7164 = vrsqrt.f32 %v1409_v58 }
 0x1ef   :  { %13328 = vst [vmem:[#allocation62_spill] sm:$0xff] %v9326_v6  ;;  %v9335_v11 = vmul.f32 0.020408163, %v13329_v61  ;;  %v7155_v43 = vpop.eup %7154  ;;  %v1411_v50 = vadd.f32 1e-05, %v1299_v59 }
 0x1f0   :  { %v9284_v52 = vpop.xlane.xlu1 %911  ;;  %2223 = vperm.xlu1 %6643, %v9270_v62   ;;  %v9287_v33 = vpop.xlane.xlu0 %908  ;;  %v1198_v62 = vmul.f32 %v9279_v48, %v9279_v48  ;;  %13327 = vst [vmem:[#allocation43_spill] sm:$0xff] %v9323_v27  ;;  %v1420_v51 = vadd.f32 1e-05, %v1308_v30  ;;  %v1627_v48 = vld [vmem:[%s12795_s1 + $0x80] sm:$0xff]  ;;  %v1301_v38 = vsub.f32 %v1077_v54, %v1189_v40  ;;  %v1191_v61 = vmul.f32 %v9323_v27, %v9323_v27 }
 0x1f1   :  { %2278 = vperm.xlu0 %6642, %v9281_v21   ;;  %13330 = vst [vmem:[#allocation47_spill] sm:$0xff] %v9335_v11  ;;  %v9337_v21 = vmul.f32 %v7151_v19, %v1636_v9  ;;  %v13332_v19 = vld [vmem:[#allocation83_spill] sm:$0xff]  ;;  %v9354_v58 = vmul.f32 %v7153_v42, %v1627_v48  ;;  %v1090_v40 = vmul.f32 0.020408163, %v8972_v32 }
 0x1f2   :  { %v1310_v10 = vsub.f32 %v1086_v28, %v1198_v62  ;;  %v1079_v62 = vmul.f32 0.020408163, %v8898_v34  ;;  %v1638_v28 = vld [vmem:[%s12795_s1 + $0xd8] sm:$0xff]  ;;  %v9351_v9 = vmul.f32 0.020408163, %v13332_v19  ;;  %v7157_v34 = vpop.eup %7156  ;;  %7166 = vrsqrt.f32 %v1420_v51 }
 0x1f3   :  { %13331 = vst [vmem:[#allocation66_spill] sm:$0xff] %v9337_v21  ;;  %v9363_v19 = vmul.f32 0.020408163, %v8396_v47  ;;  %v9365_v27 = vmul.f32 %v7155_v43, %v1638_v28  ;;  %7168 = vrsqrt.f32 %v1411_v50  ;;  %v1413_v42 = vadd.f32 1e-05, %v1301_v38  ;;  %v13336_v43 = vld [vmem:[#allocation87_spill] sm:$0xff] }
 0x1f4   :  { %v9312_v56 = vpop.xlane.xlu1 %917  ;;  %2233 = vperm.xlu1 %6643, %v9298_v22   ;;  %v9315_v36 = vpop.xlane.xlu0 %914  ;;  %v1200_v22 = vmul.f32 %v9307_v0, %v9307_v0  ;;  %13333 = vst [vmem:[#allocation51_spill] sm:$0xff] %v9351_v9  ;;  %v1422_v59 = vadd.f32 1e-05, %v1310_v10  ;;  %v1629_v0 = vld [vmem:[%s12795_s1 + $0x90] sm:$0xff]  ;;  %v1303_v51 = vsub.f32 %v1079_v62, %v1191_v61  ;;  %v1193_v47 = vmul.f32 %v9351_v9, %v9351_v9 }
 0x1f5   :  { %2288 = vperm.xlu0 %6642, %v9309_v31   ;;  %13334 = vst [vmem:[#allocation70_spill] sm:$0xff] %v9363_v19  ;;  %13335 = vst [vmem:[#allocation55_spill] sm:$0xff] %v9365_v27  ;;  %v7159_v48 = vpop.eup %7158  ;;  %v9379_v28 = vmul.f32 0.020408163, %v13336_v43  ;;  %v9382_v50 = vmul.f32 %v7157_v34, %v1629_v0  ;;  %v1092_v61 = vmul.f32 0.020408163, %v8989_v60  ;;  %v1204_v9 = vmul.f32 %v9363_v19, %v9363_v19 }
 0x1f6   :  { %v1312_v54 = vsub.f32 %v1088_v23, %v1200_v22  ;;  %v1081_v22 = vmul.f32 0.020408163, %v8908_v26  ;;  %v1640_v23 = vld [vmem:[%s12795_s1 + $0xe8] sm:$0xff]  ;;  %v7161_v26 = vpop.eup %7160  ;;  %7170 = vrsqrt.f32 %v1422_v59  ;;  %v9391_v43 = vmul.f32 0.020408163, %v8406_v5  ;;  %v1633_v19 = vld [vmem:[%s12795_s1 + $0xb0] sm:$0xff] }
 0x1f7   :  { %13337 = vst [vmem:[#allocation74_spill] sm:$0xff] %v9379_v28  ;;  %v7163_v0 = vpop.eup %7162  ;;  %7172 = vrsqrt.f32 %v1413_v42  ;;  %v1415_v34 = vadd.f32 1e-05, %v1303_v51  ;;  %v1195_v5 = vmul.f32 %v9379_v28, %v9379_v28 }
 0x1f8   :  { %v9340_v30 = vpop.xlane.xlu1 %923  ;;  %2243 = vperm.xlu1 %6643, %v9326_v6   ;;  %v9343_v17 = vpop.xlane.xlu0 %920  ;;  %v1202_v6 = vmul.f32 %v9335_v11, %v9335_v11  ;;  %v1424_v38 = vadd.f32 1e-05, %v1312_v54  ;;  %v1631_v11 = vld [vmem:[%s12795_s1 + $0xa0] sm:$0xff]  ;;  %13338 = vst [vmem:[#allocation59_spill] sm:$0xff] %v9391_v43  ;;  %v1305_v59 = vsub.f32 %v1081_v22, %v1193_v47  ;;  %v1316_v22 = vsub.f32 %v1092_v61, %v1204_v9  ;;  %v1644_v61 = vld [vmem:[%s12795_s1 + $0x108] sm:$0xff] }
 0x1f9   :  { %2298 = vperm.xlu0 %6642, %v9337_v21   ;;  %v9393_v21 = vmul.f32 %v7159_v48, %v1640_v23  ;;  %v13340_v48 = vld [vmem:[#allocation91_spill] sm:$0xff]  ;;  %v9410_v42 = vmul.f32 %v7161_v26, %v1631_v11  ;;  %v1094_v47 = vmul.f32 0.020408163, %v9005_v13  ;;  %v1206_v28 = vmul.f32 %v9391_v43, %v9391_v43  ;;  %v1635_v43 = vld [vmem:[%s12795_s1 + $0xc0] sm:$0xff] }
 0x1fa   :  { %v1314_v62 = vsub.f32 %v1090_v40, %v1202_v6  ;;  %v1083_v6 = vmul.f32 0.020408163, %v8918_v18  ;;  %v1642_v40 = vld [vmem:[%s12795_s1 + $0xf8] sm:$0xff]  ;;  %v9407_v23 = vmul.f32 0.020408163, %v13340_v48  ;;  %v7165_v18 = vpop.eup %7164  ;;  %7174 = vrsqrt.f32 %v1424_v38 }
 0x1fb   :  { %13339 = vst [vmem:[#allocation78_spill] sm:$0xff] %v9393_v21  ;;  %13342 = vst [vmem:[#allocation82_spill] sm:$0xff] %v9410_v42  ;;  %v9419_v48 = vmul.f32 0.020408163, %v8416_v2  ;;  %7176 = vrsqrt.f32 %v1415_v34  ;;  %v1417_v26 = vadd.f32 1e-05, %v1305_v59  ;;  %v9438_v34 = vmul.f32 %v7165_v18, %v1633_v19 }
 0x1fc   :  { %v9368_v10 = vpop.xlane.xlu1 %929  ;;  %2253 = vperm.xlu1 %6643, %v9354_v58   ;;  %v9371_v32 = vpop.xlane.xlu0 %926  ;;  %13341 = vst [vmem:[#allocation63_spill] sm:$0xff] %v9407_v23  ;;  %v1426_v51 = vadd.f32 1e-05, %v1314_v62  ;;  %v1307_v38 = vsub.f32 %v1083_v6, %v1195_v5  ;;  %v1085_v9 = vmul.f32 0.020408163, %v8934_v15  ;;  %v1197_v2 = vmul.f32 %v9407_v23, %v9407_v23 }
 0x1fd   :  { %2308 = vperm.xlu0 %6642, %v9365_v27   ;;  %13343 = vst [vmem:[#allocation67_spill] sm:$0xff] %v9419_v48  ;;  %v9421_v27 = vmul.f32 %v7163_v0, %v1642_v40  ;;  %v7167_v11 = vpop.eup %7166  ;;  %v13345_v0 = vld [vmem:[#allocation95_spill] sm:$0xff]  ;;  %13347 = vst [vmem:[#allocation90_spill] sm:$0xff] %v9438_v34  ;;  %v1428_v59 = vadd.f32 1e-05, %v1316_v22  ;;  %v1318_v6 = vsub.f32 %v1094_v47, %v1206_v28  ;;  %v1646_v47 = vld [vmem:[%s12795_s1 + $0x118] sm:$0xff] }
 0x1fe   :  { %v9435_v40 = vmul.f32 0.020408163, %v13345_v0  ;;  %v7169_v15 = vpop.eup %7168  ;;  %7178 = vrsqrt.f32 %v1426_v51  ;;  %v1096_v5 = vmul.f32 0.020408163, %v9021_v7  ;;  %v1208_v23 = vmul.f32 %v9419_v48, %v9419_v48  ;;  %v1637_v48 = vld [vmem:[%s12795_s1 + $0xd0] sm:$0xff] }
 0x1ff   :  { %13344 = vst [vmem:[#allocation86_spill] sm:$0xff] %v9421_v27  ;;  %v9447_v0 = vmul.f32 0.020408163, %v8426_v8  ;;  %7180 = vrsqrt.f32 %v1417_v26  ;;  %v1419_v18 = vadd.f32 1e-05, %v1307_v38  ;;  %v1309_v51 = vsub.f32 %v1085_v9, %v1197_v2 }
 0x200   :  { %v9396_v54 = vpop.xlane.xlu1 %935  ;;  %2263 = vperm.xlu1 %6643, %v9382_v50   ;;  %v9399_v60 = vpop.xlane.xlu0 %932  ;;  %13346 = vst [vmem:[#allocation71_spill] sm:$0xff] %v9435_v40  ;;  %v1087_v28 = vmul.f32 0.020408163, %v8954_v29  ;;  %v1199_v8 = vmul.f32 %v9435_v40, %v9435_v40  ;;  %v9466_v26 = vmul.f32 %v7169_v15, %v1635_v43  ;;  %7182 = vrsqrt.f32 %v1428_v59 }
 0x201   :  { %2318 = vperm.xlu0 %6642, %v9393_v21   ;;  %13348 = vst [vmem:[#allocation75_spill] sm:$0xff] %v9447_v0  ;;  %v9449_v21 = vmul.f32 %v7167_v11, %v1644_v61  ;;  %v7171_v19 = vpop.eup %7170  ;;  %v13350_v11 = vld [vmem:[#allocation99_spill] sm:$0xff]  ;;  %v1430_v38 = vadd.f32 1e-05, %v1318_v6  ;;  %v1320_v9 = vsub.f32 %v1096_v5, %v1208_v23  ;;  %v1098_v2 = vmul.f32 0.020408163, %v9040_v55 }
 0x202   :  { %v9463_v61 = vmul.f32 0.020408163, %v13350_v11  ;;  %13352 = vst [vmem:[#allocation98_spill] sm:$0xff] %v9466_v26  ;;  %v7173_v29 = vpop.eup %7172  ;;  %v1210_v40 = vmul.f32 %v9447_v0, %v9447_v0  ;;  %v9475_v11 = vmul.f32 0.020408163, %v8436_v12  ;;  %7184 = vrsqrt.f32 %v1419_v18  ;;  %v1648_v5 = vld [vmem:[%s12795_s1 + $0x128] sm:$0xff] }
 0x203   :  { %13349 = vst [vmem:[#allocation94_spill] sm:$0xff] %v9449_v21  ;;  %v1421_v15 = vadd.f32 1e-05, %v1309_v51  ;;  %v1311_v59 = vsub.f32 %v1087_v28, %v1199_v8  ;;  %v1089_v23 = vmul.f32 0.020408163, %v8974_v25  ;;  %v9494_v18 = vmul.f32 %v7173_v29, %v1637_v48  ;;  %v1639_v8 = vld [vmem:[%s12795_s1 + $0xe0] sm:$0xff] }
 0x204   :  { %v9424_v62 = vpop.xlane.xlu1 %941  ;;  %2273 = vperm.xlu1 %6643, %v9410_v42   ;;  %v9427_v13 = vpop.xlane.xlu0 %938  ;;  %13351 = vst [vmem:[#allocation79_spill] sm:$0xff] %v9463_v61  ;;  %13353 = vst [vmem:[#allocation83_spill] sm:$0xff] %v9475_v11  ;;  %v1201_v12 = vmul.f32 %v9463_v61, %v9463_v61  ;;  %7186 = vrsqrt.f32 %v1430_v38  ;;  %v1432_v51 = vadd.f32 1e-05, %v1320_v9  ;;  %v1322_v28 = vsub.f32 %v1098_v2, %v1210_v40  ;;  %v1650_v2 = vld [vmem:[%s12795_s1 + $0x138] sm:$0xff] }
 0x205   :  { %2328 = vperm.xlu0 %6642, %v9421_v27   ;;  %v9477_v27 = vmul.f32 %v7171_v19, %v1646_v47  ;;  %v7175_v43 = vpop.eup %7174  ;;  %v9491_v19 = vmul.f32 0.020408163, %v8398_v63  ;;  %13356 = vst [vmem:[#allocation95_spill] sm:$0xff] %v9494_v18  ;;  %v1100_v47 = vmul.f32 0.020408163, %v9061_v39  ;;  %v1212_v0 = vmul.f32 %v9475_v11, %v9475_v11 }
 0x206   :  { %v7177_v25 = vpop.eup %7176  ;;  %v9503_v63 = vmul.f32 0.020408163, %v8446_v16  ;;  %v9505_v61 = vmul.f32 %v7175_v43, %v1648_v5  ;;  %7188 = vrsqrt.f32 %v1421_v15  ;;  %v1423_v29 = vadd.f32 1e-05, %v1311_v59  ;;  %v13359_v43 = vld [vmem:[#allocation100_spill] sm:$0xff] }
 0x207   :  { %13354 = vst [vmem:[#allocation87_spill] sm:$0xff] %v9477_v27  ;;  %13355 = vst [vmem:[#allocation91_spill] sm:$0xff] %v9491_v19  ;;  %v1313_v38 = vsub.f32 %v1089_v23, %v1201_v12  ;;  %v1091_v40 = vmul.f32 0.020408163, %v8991_v20  ;;  %v1203_v16 = vmul.f32 %v9491_v19, %v9491_v19  ;;  %v9519_v5 = vmul.f32 0.020408163, %v13359_v43 }
 0x208   :  { %v9452_v22 = vpop.xlane.xlu1 %947  ;;  %2283 = vperm.xlu1 %6643, %v9438_v34   ;;  %v9455_v7 = vpop.xlane.xlu0 %944  ;;  %13357 = vst [vmem:[#allocation99_spill] sm:$0xff] %v9503_v63  ;;  %13358 = vst [vmem:[#allocation147_spill] sm:$0xff] %v9505_v61  ;;  %v9522_v15 = vmul.f32 %v7177_v25, %v1639_v8  ;;  %7190 = vrsqrt.f32 %v1432_v51  ;;  %v1434_v59 = vadd.f32 1e-05, %v1322_v28  ;;  %v1324_v23 = vsub.f32 %v1100_v47, %v1212_v0  ;;  %v1652_v47 = vld [vmem:[%s12795_s1 + $0x148] sm:$0xff] }
 0x209   :  { %2338 = vperm.xlu0 %6642, %v9449_v21   ;;  %v7179_v48 = vpop.eup %7178  ;;  %13360 = vst [vmem:[#allocation100_spill] sm:$0xff] %v9519_v5  ;;  %v1102_v12 = vmul.f32 0.020408163, %v9088_v35  ;;  %v1214_v19 = vmul.f32 %v9503_v63, %v9503_v63  ;;  %v13362_v21 = vld [vmem:[#allocation105_spill] sm:$0xff]  ;;  %7192 = vrsqrt.f32 %v1423_v29  ;;  %v1425_v8 = vadd.f32 1e-05, %v1313_v38 }
 0x20a   :  { %13361 = vst [vmem:[#allocation148_spill] sm:$0xff] %v9522_v15  ;;  %v7181_v20 = vpop.eup %7180  ;;  %v9531_v43 = vmul.f32 0.020408163, %v13362_v21  ;;  %v9533_v11 = vmul.f32 %v7179_v48, %v1650_v2  ;;  %v1315_v51 = vsub.f32 %v1091_v40, %v1203_v16  ;;  %v1093_v0 = vmul.f32 0.020408163, %v9007_v1  ;;  %v13365_v48 = vld [vmem:[#allocation101_spill] sm:$0xff] }
 0x20b   :  { %v7183_v25 = vpop.eup %7182  ;;  %v1205_v21 = vmul.f32 %v9519_v5, %v9519_v5  ;;  %v9547_v2 = vmul.f32 0.020408163, %v13365_v48  ;;  %7194 = vrsqrt.f32 %v1434_v59  ;;  %v1436_v38 = vadd.f32 1e-05, %v1324_v23  ;;  %v13368_v63 = vld [vmem:[#allocation107_spill] sm:$0xff]  ;;  %v13371_v23 = vld [vmem:[#allocation41_spill] sm:$0xff] }
 0x20c   :  { %v9480_v6 = vpop.xlane.xlu1 %953  ;;  %2293 = vperm.xlu1 %6643, %v9466_v26   ;;  %v9483_v55 = vpop.xlane.xlu0 %950  ;;  %13363 = vst [vmem:[#allocation105_spill] sm:$0xff] %v9531_v43  ;;  %13364 = vst [vmem:[#allocation149_spill] sm:$0xff] %v9533_v11  ;;  %v1326_v40 = vsub.f32 %v1102_v12, %v1214_v19  ;;  %v1104_v16 = vmul.f32 0.020408163, %v9116_v3  ;;  %v1216_v5 = vmul.f32 %v9531_v43, %v9531_v43  ;;  %v9559_v48 = vmul.f32 0.020408163, %v13368_v63 }
 0x20d   :  { %2348 = vperm.xlu0 %6642, %v9477_v27   ;;  %v1641_v27 = vld [vmem:[%s12795_s1 + $0xf0] sm:$0xff]  ;;  %13366 = vst [vmem:[#allocation101_spill] sm:$0xff] %v9547_v2  ;;  %v7185_v1 = vpop.eup %7184  ;;  %7196 = vrsqrt.f32 %v1425_v8  ;;  %v1317_v59 = vsub.f32 %v1093_v0, %v1205_v21  ;;  %v1095_v19 = vmul.f32 0.020408163, %v13371_v23  ;;  %v1207_v63 = vmul.f32 %v9547_v2, %v9547_v2 }
 0x20e   :  { %v9550_v29 = vmul.f32 %v7181_v20, %v1641_v27  ;;  %13369 = vst [vmem:[#allocation107_spill] sm:$0xff] %v9559_v48  ;;  %v7187_v27 = vpop.eup %7186  ;;  %v1427_v20 = vadd.f32 1e-05, %v1315_v51  ;;  %7198 = vrsqrt.f32 %v1436_v38  ;;  %v1438_v0 = vadd.f32 1e-05, %v1326_v40  ;;  %v1645_v43 = vld [vmem:[%s12795_s1 + $0x110] sm:$0xff] }
 0x20f   :  { %v1328_v21 = vsub.f32 %v1104_v16, %v1216_v5  ;;  %v1106_v23 = vmul.f32 0.020408163, %v9144_v24  ;;  %v1218_v2 = vmul.f32 %v9559_v48, %v9559_v48  ;;  %v1319_v38 = vsub.f32 %v1095_v19, %v1207_v63  ;;  %v13378_v40 = vld [vmem:[#allocation48_spill] sm:$0xff]  ;;  %v1647_v48 = vld [vmem:[%s12795_s1 + $0x120] sm:$0xff] }
 0x210   :  { %v9508_v9 = vpop.xlane.xlu1 %959  ;;  %2303 = vperm.xlu1 %6643, %v9494_v18   ;;  %v9511_v39 = vpop.xlane.xlu0 %956  ;;  %13367 = vst [vmem:[#allocation150_spill] sm:$0xff] %v9550_v29  ;;  %7200 = vrsqrt.f32 %v1427_v20  ;;  %v1097_v5 = vmul.f32 0.020408163, %v13378_v40  ;;  %v1108_v40 = vmul.f32 0.020408163, %v9172_v44 }
 0x211   :  { %2358 = vperm.xlu0 %6642, %v9505_v61   ;;  %v1643_v61 = vld [vmem:[%s12795_s1 + $0x100] sm:$0xff]  ;;  %v7189_v51 = vpop.eup %7188  ;;  %7202 = vrsqrt.f32 %v1438_v0  ;;  %v1440_v19 = vadd.f32 1e-05, %v1328_v21  ;;  %v1330_v63 = vsub.f32 %v1106_v23, %v1218_v2  ;;  %v13385_v21 = vld [vmem:[#allocation56_spill] sm:$0xff] }
 0x212   :  { %v9578_v8 = vmul.f32 %v7185_v1, %v1643_v61  ;;  %v7191_v61 = vpop.eup %7190  ;;  %v1429_v1 = vadd.f32 1e-05, %v1317_v59  ;;  %v9606_v20 = vmul.f32 %v7189_v51, %v1645_v43  ;;  %v1431_v51 = vadd.f32 1e-05, %v1319_v38 }
 0x213   :  { %v7193_v59 = vpop.eup %7192  ;;  %v1099_v2 = vmul.f32 0.020408163, %v13385_v21  ;;  %v1110_v21 = vmul.f32 0.020408163, %v9200_v4 }
 0x214   :  { %v9536_v28 = vpop.xlane.xlu1 %965  ;;  %2313 = vperm.xlu1 %6643, %v9522_v15   ;;  %v9539_v35 = vpop.xlane.xlu0 %962  ;;  %v9561_v15 = vmul.f32 %v7183_v25, %v1652_v47  ;;  %v13372_v25 = vld [vmem:[#allocation102_spill] sm:$0xff]  ;;  %7204 = vrsqrt.f32 %v1429_v1  ;;  %v9634_v1 = vmul.f32 %v7193_v59, %v1647_v48 }
 0x215   :  { %2368 = vperm.xlu0 %6642, %v9533_v11   ;;  %v1654_v11 = vld [vmem:[%s12795_s1 + $0x158] sm:$0xff]  ;;  %v9575_v47 = vmul.f32 0.020408163, %v13372_v25  ;;  %13374 = vst [vmem:[#allocation102_spill] sm:$0xff] %v9578_v8  ;;  %v7195_v43 = vpop.eup %7194  ;;  %7206 = vrsqrt.f32 %v1440_v19 }
 0x216   :  { %13370 = vst [vmem:[#allocation151_spill] sm:$0xff] %v9561_v15  ;;  %v9589_v18 = vmul.f32 %v7187_v27, %v1654_v11  ;;  %7208 = vrsqrt.f32 %v1431_v51 }
 0x217   :  { %13373 = vst [vmem:[#allocation41_spill] sm:$0xff] %v9575_v47  ;;  %v1209_v11 = vmul.f32 %v9575_v47, %v9575_v47  ;;  %v7197_v38 = vpop.eup %7196 }
 0x218   :  { %v9564_v12 = vpop.xlane.xlu1 %971  ;;  %2323 = vperm.xlu1 %6643, %v9550_v29   ;;  %v9567_v3 = vpop.xlane.xlu0 %968  ;;  %v13375_v29 = vld [vmem:[#allocation109_spill] sm:$0xff]  ;;  %13377 = vst [vmem:[#allocation152_spill] sm:$0xff] %v9589_v18 }
 0x219   :  { %2378 = vperm.xlu0 %6642, %v9561_v15   ;;  %v9587_v25 = vmul.f32 0.020408163, %v13375_v29  ;;  %v1656_v15 = vld [vmem:[%s12795_s1 + $0x168] sm:$0xff]  ;;  %v1321_v0 = vsub.f32 %v1097_v5, %v1209_v11  ;;  %v1442_v5 = vadd.f32 1e-05, %v1330_v63  ;;  %v7199_v48 = vpop.eup %7198  ;;  %v13392_v63 = vld [vmem:[#allocation65_spill] sm:$0xff] }
 0x21a   :  { %v13379_v29 = vld [vmem:[#allocation103_spill] sm:$0xff]  ;;  %v9617_v26 = vmul.f32 %v7191_v61, %v1656_v15 }
 0x21b   :  { %13376 = vst [vmem:[#allocation109_spill] sm:$0xff] %v9587_v25  ;;  %v9603_v27 = vmul.f32 0.020408163, %v13379_v29  ;;  %13381 = vst [vmem:[#allocation103_spill] sm:$0xff] %v9606_v20  ;;  %v1220_v47 = vmul.f32 %v9587_v25, %v9587_v25  ;;  %v1649_v25 = vld [vmem:[%s12795_s1 + $0x130] sm:$0xff]  ;;  %7210 = vrsqrt.f32 %v1442_v5 }
 0x21c   :  { %v9592_v16 = vpop.xlane.xlu1 %977  ;;  %2333 = vperm.xlu1 %6643, %v9578_v8   ;;  %v9595_v24 = vpop.xlane.xlu0 %974  ;;  %v13382_v8 = vld [vmem:[#allocation111_spill] sm:$0xff]  ;;  %13384 = vst [vmem:[#allocation153_spill] sm:$0xff] %v9617_v26  ;;  %v1433_v59 = vadd.f32 1e-05, %v1321_v0  ;;  %v9662_v51 = vmul.f32 %v7197_v38, %v1649_v25 }
 0x21d   :  { %13380 = vst [vmem:[#allocation48_spill] sm:$0xff] %v9603_v27  ;;  %2388 = vperm.xlu0 %6642, %v9589_v18   ;;  %v9615_v29 = vmul.f32 0.020408163, %v13382_v8  ;;  %v1658_v18 = vld [vmem:[%s12795_s1 + $0x178] sm:$0xff]  ;;  %v1211_v15 = vmul.f32 %v9603_v27, %v9603_v27  ;;  %v13386_v8 = vld [vmem:[#allocation104_spill] sm:$0xff]  ;;  %v1332_v11 = vsub.f32 %v1108_v40, %v1220_v47  ;;  %v7201_v0 = vpop.eup %7200 }
 0x21e   :  { %v9631_v61 = vmul.f32 0.020408163, %v13386_v8  ;;  %13388 = vst [vmem:[#allocation104_spill] sm:$0xff] %v9634_v1  ;;  %v13389_v27 = vld [vmem:[#allocation113_spill] sm:$0xff]  ;;  %v9645_v34 = vmul.f32 %v7195_v43, %v1658_v18  ;;  %v1101_v47 = vmul.f32 0.020408163, %v13392_v63  ;;  %v7203_v25 = vpop.eup %7202  ;;  %7212 = vrsqrt.f32 %v1433_v59 }
 0x21f   :  { %13383 = vst [vmem:[#allocation111_spill] sm:$0xff] %v9615_v29  ;;  %v9643_v8 = vmul.f32 0.020408163, %v13389_v27  ;;  %v1323_v19 = vsub.f32 %v1099_v2, %v1211_v15  ;;  %v13393_v27 = vld [vmem:[#allocation106_spill] sm:$0xff]  ;;  %v1444_v2 = vadd.f32 1e-05, %v1332_v11 }
 0x220   :  { %v9620_v23 = vpop.xlane.xlu1 %983  ;;  %2343 = vperm.xlu1 %6643, %v9606_v20   ;;  %v9623_v44 = vpop.xlane.xlu0 %980  ;;  %13387 = vst [vmem:[#allocation56_spill] sm:$0xff] %v9631_v61  ;;  %v1222_v20 = vmul.f32 %v9615_v29, %v9615_v29  ;;  %13391 = vst [vmem:[#allocation154_spill] sm:$0xff] %v9645_v34  ;;  %v1213_v18 = vmul.f32 %v9631_v61, %v9631_v61  ;;  %v9659_v43 = vmul.f32 0.020408163, %v13393_v27  ;;  %v1112_v63 = vmul.f32 0.020408163, %v9228_v14 }
 0x221   :  { %2398 = vperm.xlu0 %6642, %v9617_v26   ;;  %13390 = vst [vmem:[#allocation113_spill] sm:$0xff] %v9643_v8  ;;  %v1660_v26 = vld [vmem:[%s12795_s1 + $0x188] sm:$0xff]  ;;  %13395 = vst [vmem:[#allocation106_spill] sm:$0xff] %v9662_v51  ;;  %v1651_v29 = vld [vmem:[%s12795_s1 + $0x140] sm:$0xff]  ;;  %v1435_v38 = vadd.f32 1e-05, %v1323_v19  ;;  %7214 = vrsqrt.f32 %v1444_v2 }
 0x222   :  { %13394 = vst [vmem:[#allocation65_spill] sm:$0xff] %v9659_v43  ;;  %v1334_v15 = vsub.f32 %v1110_v21, %v1222_v20  ;;  %v13396_v61 = vld [vmem:[#allocation115_spill] sm:$0xff]  ;;  %v9673_v42 = vmul.f32 %v7199_v48, %v1660_v26  ;;  %v1325_v5 = vsub.f32 %v1101_v47, %v1213_v18  ;;  %v1103_v20 = vmul.f32 0.020408163, %v9119_v57  ;;  %v1662_v21 = vld [vmem:[%s12795_s1 + $0x198] sm:$0xff]  ;;  %v7205_v57 = vpop.eup %7204 }
 0x223   :  { %v9671_v27 = vmul.f32 0.020408163, %v13396_v61  ;;  %v1215_v26 = vmul.f32 %v9659_v43, %v9659_v43  ;;  %v13399_v61 = vld [vmem:[#allocation108_spill] sm:$0xff]  ;;  %v9690_v59 = vmul.f32 %v7201_v0, %v1651_v29  ;;  %v1114_v18 = vmul.f32 0.020408163, %v9256_v46  ;;  %v7207_v29 = vpop.eup %7206 }
 0x224   :  { %v9648_v40 = vpop.xlane.xlu1 %989  ;;  %2353 = vperm.xlu1 %6643, %v9634_v1   ;;  %v9651_v4 = vpop.xlane.xlu0 %986  ;;  %v1224_v1 = vmul.f32 %v9643_v8, %v9643_v8  ;;  %13398 = vst [vmem:[#allocation155_spill] sm:$0xff] %v9673_v42  ;;  %v9687_v48 = vmul.f32 0.020408163, %v13399_v61  ;;  %v1446_v19 = vadd.f32 1e-05, %v1334_v15  ;;  %v9701_v43 = vmul.f32 %v7203_v25, %v1662_v21  ;;  %v13405_v25 = vld [vmem:[#allocation110_spill] sm:$0xff] }
 0x225   :  { %2408 = vperm.xlu0 %6642, %v9645_v34   ;;  %13397 = vst [vmem:[#allocation115_spill] sm:$0xff] %v9671_v27  ;;  %13401 = vst [vmem:[#allocation156_spill] sm:$0xff] %v9690_v59  ;;  %v1653_v34 = vld [vmem:[%s12795_s1 + $0x150] sm:$0xff]  ;;  %v1226_v8 = vmul.f32 %v9671_v27, %v9671_v27  ;;  %7216 = vrsqrt.f32 %v1435_v38  ;;  %v1437_v0 = vadd.f32 1e-05, %v1325_v5  ;;  %v1327_v2 = vsub.f32 %v1103_v20, %v1215_v26  ;;  %v1655_v27 = vld [vmem:[%s12795_s1 + $0x160] sm:$0xff] }
 0x226   :  { %13400 = vst [vmem:[#allocation108_spill] sm:$0xff] %v9687_v48  ;;  %v1336_v47 = vsub.f32 %v1112_v63, %v1224_v1  ;;  %13404 = vst [vmem:[#allocation157_spill] sm:$0xff] %v9701_v43  ;;  %v1105_v1 = vmul.f32 0.020408163, %v9147_v53  ;;  %v1664_v63 = vld [vmem:[%s12795_s1 + $0x1a8] sm:$0xff]  ;;  %v9718_v38 = vmul.f32 %v7205_v57, %v1653_v34  ;;  %v7209_v53 = vpop.eup %7208  ;;  %7218 = vrsqrt.f32 %v1446_v19 }
 0x227   :  { %v9715_v21 = vmul.f32 0.020408163, %v13405_v25  ;;  %v1338_v20 = vsub.f32 %v1114_v18, %v1226_v8  ;;  %v1116_v26 = vmul.f32 0.020408163, %v9284_v52  ;;  %v7211_v34 = vpop.eup %7210  ;;  %7220 = vrsqrt.f32 %v1437_v0  ;;  %v1666_v18 = vld [vmem:[%s12795_s1 + $0x1b8] sm:$0xff] }
 0x228   :  { %v9676_v11 = vpop.xlane.xlu1 %995  ;;  %2363 = vperm.xlu1 %6643, %v9662_v51   ;;  %v9679_v14 = vpop.xlane.xlu0 %992  ;;  %v13402_v51 = vld [vmem:[#allocation117_spill] sm:$0xff]  ;;  %13407 = vst [vmem:[#allocation158_spill] sm:$0xff] %v9718_v38  ;;  %v1448_v5 = vadd.f32 1e-05, %v1336_v47  ;;  %v1439_v57 = vadd.f32 1e-05, %v1327_v2  ;;  %v9746_v0 = vmul.f32 %v7209_v53, %v1655_v27 }
 0x229   :  { %2418 = vperm.xlu0 %6642, %v9673_v42   ;;  %v9699_v61 = vmul.f32 0.020408163, %v13402_v51  ;;  %v1217_v51 = vmul.f32 %v9687_v48, %v9687_v48  ;;  %13406 = vst [vmem:[#allocation110_spill] sm:$0xff] %v9715_v21  ;;  %v13408_v48 = vld [vmem:[#allocation119_spill] sm:$0xff]  ;;  %v9729_v42 = vmul.f32 %v7207_v29, %v1664_v63  ;;  %v1107_v8 = vmul.f32 0.020408163, %v9175_v49  ;;  %v7213_v49 = vpop.eup %7212 }
 0x22a   :  { %v9727_v25 = vmul.f32 0.020408163, %v13408_v48  ;;  %v1219_v48 = vmul.f32 %v9715_v21, %v9715_v21  ;;  %v13410_v29 = vld [vmem:[#allocation112_spill] sm:$0xff]  ;;  %7222 = vrsqrt.f32 %v1448_v5  ;;  %v1450_v2 = vadd.f32 1e-05, %v1338_v20  ;;  %v13412_v21 = vld [vmem:[#allocation121_spill] sm:$0xff] }
 0x22b   :  { %13403 = vst [vmem:[#allocation117_spill] sm:$0xff] %v9699_v61  ;;  %v1329_v19 = vsub.f32 %v1105_v1, %v1217_v51  ;;  %v9743_v63 = vmul.f32 0.020408163, %v13410_v29  ;;  %13411 = vst [vmem:[#allocation112_spill] sm:$0xff] %v9746_v0  ;;  %v1118_v51 = vmul.f32 0.020408163, %v9312_v56  ;;  %v7215_v27 = vpop.eup %7214  ;;  %7224 = vrsqrt.f32 %v1439_v57 }
 0x22c   :  { %v9704_v15 = vpop.xlane.xlu1 %1001  ;;  %2373 = vperm.xlu1 %6643, %v9690_v59   ;;  %v9707_v46 = vpop.xlane.xlu0 %998  ;;  %v1228_v59 = vmul.f32 %v9699_v61, %v9699_v61  ;;  %13409 = vst [vmem:[#allocation119_spill] sm:$0xff] %v9727_v25  ;;  %v1657_v61 = vld [vmem:[%s12795_s1 + $0x170] sm:$0xff]  ;;  %v9755_v29 = vmul.f32 0.020408163, %v13412_v21  ;;  %v1331_v5 = vsub.f32 %v1107_v8, %v1219_v48  ;;  %7226 = vrsqrt.f32 %v1450_v2 }
 0x22d   :  { %2428 = vperm.xlu0 %6642, %v9701_v43   ;;  %v9757_v43 = vmul.f32 %v7211_v34, %v1666_v18  ;;  %v1441_v53 = vadd.f32 1e-05, %v1329_v19  ;;  %v1221_v21 = vmul.f32 %v9743_v63, %v9743_v63  ;;  %v13416_v34 = vld [vmem:[#allocation114_spill] sm:$0xff]  ;;  %v9774_v57 = vmul.f32 %v7213_v49, %v1657_v61 }
 0x22e   :  { %v1340_v1 = vsub.f32 %v1116_v26, %v1228_v59  ;;  %13413 = vst [vmem:[#allocation121_spill] sm:$0xff] %v9755_v29  ;;  %v1109_v59 = vmul.f32 0.020408163, %v9203_v45  ;;  %v1668_v26 = vld [vmem:[%s12795_s1 + $0x1c8] sm:$0xff]  ;;  %v9771_v18 = vmul.f32 0.020408163, %v13416_v34 }
 0x22f   :  { %13417 = vst [vmem:[#allocation114_spill] sm:$0xff] %v9774_v57  ;;  %v7217_v45 = vpop.eup %7216  ;;  %v1120_v48 = vmul.f32 0.020408163, %v9340_v30  ;;  %7228 = vrsqrt.f32 %v1441_v53  ;;  %v1443_v49 = vadd.f32 1e-05, %v1331_v5 }
 0x230   :  { %v9732_v47 = vpop.xlane.xlu1 %1007  ;;  %2383 = vperm.xlu1 %6643, %v9718_v38   ;;  %v9735_v52 = vpop.xlane.xlu0 %1004  ;;  %v1230_v38 = vmul.f32 %v9727_v25, %v9727_v25  ;;  %v1452_v19 = vadd.f32 1e-05, %v1340_v1  ;;  %v13418_v25 = vld [vmem:[#allocation123_spill] sm:$0xff]  ;;  %v1333_v2 = vsub.f32 %v1109_v59, %v1221_v21  ;;  %v1122_v21 = vmul.f32 0.020408163, %v9368_v10 }
 0x231   :  { %2438 = vperm.xlu0 %6642, %v9729_v42   ;;  %v9783_v34 = vmul.f32 0.020408163, %v13418_v25  ;;  %v7219_v61 = vpop.eup %7218  ;;  %v1223_v25 = vmul.f32 %v9771_v18, %v9771_v18 }
 0x232   :  { %v1342_v8 = vsub.f32 %v1118_v51, %v1230_v38  ;;  %v1111_v38 = vmul.f32 0.020408163, %v9231_v41  ;;  %v1670_v51 = vld [vmem:[%s12795_s1 + $0x1d8] sm:$0xff]  ;;  %v7221_v41 = vpop.eup %7220  ;;  %7230 = vrsqrt.f32 %v1452_v19 }
 0x233   :  { %13419 = vst [vmem:[#allocation123_spill] sm:$0xff] %v9783_v34  ;;  %7232 = vrsqrt.f32 %v1443_v49 }
 0x234   :  { %v9760_v20 = vpop.xlane.xlu1 %1013  ;;  %2393 = vperm.xlu1 %6643, %v9746_v0   ;;  %v9763_v56 = vpop.xlane.xlu0 %1010  ;;  %v9785_v0 = vmul.f32 %v7215_v27, %v1668_v26  ;;  %v13422_v27 = vld [vmem:[#allocation116_spill] sm:$0xff]  ;;  %v1454_v5 = vadd.f32 1e-05, %v1342_v8  ;;  %v1335_v19 = vsub.f32 %v1111_v38, %v1223_v25  ;;  %v1124_v25 = vmul.f32 0.020408163, %v9396_v54 }
 0x235   :  { %13414 = vst [vmem:[#allocation159_spill] sm:$0xff] %v9760_v20  ;;  %13415 = vst [vmem:[#allocation160_spill] sm:$0xff] %v9763_v56  ;;  %2448 = vperm.xlu0 %6642, %v9757_v43   ;;  %v1659_v56 = vld [vmem:[%s12795_s1 + $0x180] sm:$0xff]  ;;  %v1232_v20 = vmul.f32 %v9755_v29, %v9755_v29  ;;  %v9799_v26 = vmul.f32 0.020408163, %v13422_v27  ;;  %v13424_v29 = vld [vmem:[#allocation125_spill] sm:$0xff] }
 0x236   :  { %v9802_v53 = vmul.f32 %v7217_v45, %v1659_v56  ;;  %v9811_v27 = vmul.f32 0.020408163, %v13424_v29  ;;  %v7223_v56 = vpop.eup %7222  ;;  %v1445_v45 = vadd.f32 1e-05, %v1333_v2  ;;  %7234 = vrsqrt.f32 %v1454_v5 }
 0x237   :  { %13423 = vst [vmem:[#allocation116_spill] sm:$0xff] %v9799_v26  ;;  %v1344_v59 = vsub.f32 %v1120_v48, %v1232_v20  ;;  %v1113_v20 = vmul.f32 0.020408163, %v9259_v37  ;;  %v1672_v48 = vld [vmem:[%s12795_s1 + $0x1e8] sm:$0xff]  ;;  %v1225_v29 = vmul.f32 %v9799_v26, %v9799_v26  ;;  %v7225_v37 = vpop.eup %7224 }
 0x238   :  { %v9788_v1 = vpop.xlane.xlu1 %1019  ;;  %2403 = vperm.xlu1 %6643, %v9774_v57   ;;  %v9791_v30 = vpop.xlane.xlu0 %1016  ;;  %13425 = vst [vmem:[#allocation125_spill] sm:$0xff] %v9811_v27  ;;  %v9813_v57 = vmul.f32 %v7219_v61, %v1670_v51  ;;  %v13428_v61 = vld [vmem:[#allocation118_spill] sm:$0xff]  ;;  %v9841_v26 = vmul.f32 %v7223_v56, %v1672_v48  ;;  %7236 = vrsqrt.f32 %v1445_v45  ;;  %v13434_v56 = vld [vmem:[#allocation120_spill] sm:$0xff] }
 0x239   :  { %13420 = vst [vmem:[#allocation161_spill] sm:$0xff] %v9788_v1  ;;  %13421 = vst [vmem:[#allocation162_spill] sm:$0xff] %v9791_v30  ;;  %2458 = vperm.xlu0 %6642, %v9785_v0   ;;  %v1661_v30 = vld [vmem:[%s12795_s1 + $0x190] sm:$0xff]  ;;  %v1234_v1 = vmul.f32 %v9783_v34, %v9783_v34  ;;  %v9827_v51 = vmul.f32 0.020408163, %v13428_v61  ;;  %v13430_v34 = vld [vmem:[#allocation127_spill] sm:$0xff]  ;;  %v1337_v5 = vsub.f32 %v1113_v20, %v1225_v29 }
 0x23a   :  { %v9830_v49 = vmul.f32 %v7221_v41, %v1661_v30  ;;  %v1456_v2 = vadd.f32 1e-05, %v1344_v59  ;;  %v9839_v61 = vmul.f32 0.020408163, %v13430_v34  ;;  %v7227_v30 = vpop.eup %7226  ;;  %v1447_v41 = vadd.f32 1e-05, %v1335_v19 }
 0x23b   :  { %13429 = vst [vmem:[#allocation118_spill] sm:$0xff] %v9827_v51  ;;  %v1346_v38 = vsub.f32 %v1122_v21, %v1234_v1  ;;  %v1115_v1 = vmul.f32 0.020408163, %v9287_v33  ;;  %v1674_v21 = vld [vmem:[%s12795_s1 + $0x1f8] sm:$0xff]  ;;  %v1227_v34 = vmul.f32 %v9827_v51, %v9827_v51  ;;  %v9855_v48 = vmul.f32 0.020408163, %v13434_v56  ;;  %v7229_v33 = vpop.eup %7228 }
 0x23c   :  { %v9816_v8 = vpop.xlane.xlu1 %1025  ;;  %2413 = vperm.xlu1 %6643, %v9802_v53   ;;  %v9819_v10 = vpop.xlane.xlu0 %1022  ;;  %13431 = vst [vmem:[#allocation127_spill] sm:$0xff] %v9839_v61  ;;  %7238 = vrsqrt.f32 %v1456_v2  ;;  %v1126_v29 = vmul.f32 0.020408163, %v9424_v62  ;;  %v9869_v51 = vmul.f32 %v7227_v30, %v1674_v21  ;;  %v13440_v30 = vld [vmem:[#allocation122_spill] sm:$0xff] }
 0x23d   :  { %13426 = vst [vmem:[#allocation163_spill] sm:$0xff] %v9816_v8  ;;  %13427 = vst [vmem:[#allocation164_spill] sm:$0xff] %v9819_v10  ;;  %2468 = vperm.xlu0 %6642, %v9813_v57   ;;  %v1663_v10 = vld [vmem:[%s12795_s1 + $0x1a0] sm:$0xff]  ;;  %v1236_v8 = vmul.f32 %v9811_v27, %v9811_v27  ;;  %v1458_v19 = vadd.f32 1e-05, %v1346_v38  ;;  %v13436_v27 = vld [vmem:[#allocation129_spill] sm:$0xff]  ;;  %7240 = vrsqrt.f32 %v1447_v41  ;;  %v1339_v2 = vsub.f32 %v1115_v1, %v1227_v34 }
 0x23e   :  { %13435 = vst [vmem:[#allocation120_spill] sm:$0xff] %v9855_v48  ;;  %v9858_v45 = vmul.f32 %v7225_v37, %v1663_v10  ;;  %v9867_v56 = vmul.f32 0.020408163, %v13436_v27  ;;  %v7231_v10 = vpop.eup %7230  ;;  %v1449_v37 = vadd.f32 1e-05, %v1337_v5  ;;  %v1229_v27 = vmul.f32 %v9855_v48, %v9855_v48 }
 0x23f   :  { %v1348_v20 = vsub.f32 %v1124_v25, %v1236_v8  ;;  %v1117_v8 = vmul.f32 0.020408163, %v9315_v36  ;;  %v1676_v25 = vld [vmem:[%s12795_s1 + $0x208] sm:$0xff]  ;;  %v9883_v21 = vmul.f32 0.020408163, %v13440_v30  ;;  %v7233_v36 = vpop.eup %7232  ;;  %7242 = vrsqrt.f32 %v1458_v19 }
 0x240   :  { %v9844_v59 = vpop.xlane.xlu1 %1031  ;;  %2423 = vperm.xlu1 %6643, %v9830_v49   ;;  %v9847_v54 = vpop.xlane.xlu0 %1028  ;;  %13437 = vst [vmem:[#allocation129_spill] sm:$0xff] %v9867_v56  ;;  %v1128_v34 = vmul.f32 0.020408163, %v9452_v22  ;;  %v9897_v48 = vmul.f32 %v7231_v10, %v1676_v25  ;;  %7244 = vrsqrt.f32 %v1449_v37  ;;  %v1678_v22 = vld [vmem:[%s12795_s1 + $0x218] sm:$0xff]  ;;  %v1130_v25 = vmul.f32 0.020408163, %v9480_v6 }
 0x241   :  { %13432 = vst [vmem:[#allocation165_spill] sm:$0xff] %v9844_v59  ;;  %13433 = vst [vmem:[#allocation166_spill] sm:$0xff] %v9847_v54  ;;  %2478 = vperm.xlu0 %6642, %v9841_v26   ;;  %v1665_v54 = vld [vmem:[%s12795_s1 + $0x1b0] sm:$0xff]  ;;  %v1238_v59 = vmul.f32 %v9839_v61, %v9839_v61  ;;  %v1460_v5 = vadd.f32 1e-05, %v1348_v20  ;;  %v13442_v61 = vld [vmem:[#allocation131_spill] sm:$0xff]  ;;  %v1341_v19 = vsub.f32 %v1117_v8, %v1229_v27 }
 0x242   :  { %13441 = vst [vmem:[#allocation122_spill] sm:$0xff] %v9883_v21  ;;  %v9886_v41 = vmul.f32 %v7229_v33, %v1665_v54  ;;  %v9895_v30 = vmul.f32 0.020408163, %v13442_v61  ;;  %13444 = vst [vmem:[#allocation169_spill] sm:$0xff] %v9897_v48  ;;  %v7235_v54 = vpop.eup %7234  ;;  %v1451_v33 = vadd.f32 1e-05, %v1339_v2  ;;  %v1231_v61 = vmul.f32 %v9883_v21, %v9883_v21 }
 0x243   :  { %v1350_v1 = vsub.f32 %v1126_v29, %v1238_v59  ;;  %v1119_v59 = vmul.f32 0.020408163, %v9343_v17  ;;  %v13446_v29 = vld [vmem:[#allocation124_spill] sm:$0xff]  ;;  %v7237_v2 = vpop.eup %7236  ;;  %7246 = vrsqrt.f32 %v1460_v5  ;;  %v9923_v21 = vmul.f32 %v7235_v54, %v1678_v22  ;;  %v13452_v54 = vld [vmem:[#allocation126_spill] sm:$0xff] }
 0x244   :  { %v9872_v38 = vpop.xlane.xlu1 %1037  ;;  %2433 = vperm.xlu1 %6643, %v9858_v45   ;;  %v9875_v62 = vpop.xlane.xlu0 %1034  ;;  %13443 = vst [vmem:[#allocation131_spill] sm:$0xff] %v9895_v30  ;;  %v9909_v10 = vmul.f32 0.020408163, %v13446_v29  ;;  %v1242_v29 = vmul.f32 %v9895_v30, %v9895_v30  ;;  %7248 = vrsqrt.f32 %v1451_v33  ;;  %v9937_v22 = vmul.f32 0.020408163, %v13452_v54 }
 0x245   :  { %13438 = vst [vmem:[#allocation167_spill] sm:$0xff] %v9872_v38  ;;  %13439 = vst [vmem:[#allocation168_spill] sm:$0xff] %v9875_v62  ;;  %2488 = vperm.xlu0 %6642, %v9869_v51   ;;  %v1667_v62 = vld [vmem:[%s12795_s1 + $0x1c0] sm:$0xff]  ;;  %v1240_v38 = vmul.f32 %v9867_v56, %v9867_v56  ;;  %v1462_v17 = vadd.f32 1e-05, %v1350_v1  ;;  %v1343_v6 = vsub.f32 %v1119_v59, %v1231_v61 }
 0x246   :  { %13447 = vst [vmem:[#allocation124_spill] sm:$0xff] %v9909_v10  ;;  %v9912_v37 = vmul.f32 %v7233_v36, %v1667_v62  ;;  %v1121_v56 = vmul.f32 0.020408163, %v9371_v32  ;;  %13449 = vst [vmem:[#allocation172_spill] sm:$0xff] %v9923_v21  ;;  %v7239_v62 = vpop.eup %7238  ;;  %v13450_v36 = vld [vmem:[#allocation133_spill] sm:$0xff]  ;;  %v1233_v32 = vmul.f32 %v9909_v10, %v9909_v10  ;;  %v1354_v59 = vsub.f32 %v1130_v25, %v1242_v29  ;;  %v13457_v25 = vld [vmem:[#allocation128_spill] sm:$0xff] }
 0x247   :  { %v1352_v8 = vsub.f32 %v1128_v34, %v1240_v38  ;;  %v9926_v5 = vmul.f32 0.020408163, %v13450_v36  ;;  %v1453_v38 = vadd.f32 1e-05, %v1341_v19  ;;  %v1680_v34 = vld [vmem:[%s12795_s1 + $0x228] sm:$0xff]  ;;  %13453 = vst [vmem:[#allocation126_spill] sm:$0xff] %v9937_v22  ;;  %v7241_v33 = vpop.eup %7240  ;;  %7250 = vrsqrt.f32 %v1462_v17 }
 0x248   :  { %v9900_v20 = vpop.xlane.xlu1 %1043  ;;  %2443 = vperm.xlu1 %6643, %v9886_v41   ;;  %v9915_v27 = vpop.xlane.xlu0 %1040  ;;  %v1132_v61 = vmul.f32 0.020408163, %v9508_v9  ;;  %v1123_v30 = vmul.f32 0.020408163, %v9399_v60  ;;  %v9947_v10 = vmul.f32 %v7239_v62, %v1680_v34  ;;  %v1455_v17 = vadd.f32 1e-05, %v1343_v6 }
 0x249   :  { %13445 = vst [vmem:[#allocation170_spill] sm:$0xff] %v9900_v20  ;;  %2498 = vperm.xlu0 %6642, %v9897_v48   ;;  %13448 = vst [vmem:[#allocation171_spill] sm:$0xff] %v9915_v27  ;;  %v1669_v20 = vld [vmem:[%s12795_s1 + $0x1d0] sm:$0xff]  ;;  %v1464_v19 = vadd.f32 1e-05, %v1352_v8  ;;  %v1671_v27 = vld [vmem:[%s12795_s1 + $0x1e0] sm:$0xff]  ;;  %v7243_v54 = vpop.eup %7242  ;;  %7252 = vrsqrt.f32 %v1453_v38 }
 0x24a   :  { %v9940_v36 = vmul.f32 %v7237_v2, %v1669_v20  ;;  %v1244_v20 = vmul.f32 %v9926_v5, %v9926_v5  ;;  %v13454_v2 = vld [vmem:[#allocation135_spill] sm:$0xff]  ;;  %v1682_v60 = vld [vmem:[%s12795_s1 + $0x238] sm:$0xff]  ;;  %v9965_v29 = vmul.f32 0.020408163, %v13457_v25  ;;  %v9968_v62 = vmul.f32 %v7241_v33, %v1671_v27  ;;  %v7245_v38 = vpop.eup %7244 }
 0x24b   :  { %7254 = vrsqrt.f32 %v1464_v19  ;;  %v1466_v6 = vadd.f32 1e-05, %v1354_v59  ;;  %v9975_v25 = vmul.f32 %v7243_v54, %v1682_v60  ;;  %v13460_v33 = vld [vmem:[#allocation137_spill] sm:$0xff] }
 0x24c   :  { %v9928_v1 = vpop.xlane.xlu1 %1049  ;;  %2453 = vperm.xlu1 %6643, %v9912_v37   ;;  %v9954_v8 = vpop.xlane.xlu0 %1046  ;;  %13458 = vst [vmem:[#allocation128_spill] sm:$0xff] %v9965_v29  ;;  %v1356_v34 = vsub.f32 %v1132_v61, %v1244_v20  ;;  %v9980_v19 = vmul.f32 0.020408163, %v13460_v33  ;;  %7256 = vrsqrt.f32 %v1455_v17  ;;  %v1675_v33 = vld [vmem:[%s12795_s1 + $0x200] sm:$0xff] }
 0x24d   :  { %13451 = vst [vmem:[#allocation133_spill] sm:$0xff] %v9928_v1  ;;  %2508 = vperm.xlu0 %6642, %v9923_v21   ;;  %v1345_v1 = vsub.f32 %v1121_v56, %v1233_v32  ;;  %v9952_v21 = vmul.f32 0.020408163, %v13454_v2  ;;  %13455 = vst [vmem:[#allocation135_spill] sm:$0xff] %v9954_v8  ;;  %v1235_v56 = vmul.f32 %v9937_v22, %v9937_v22  ;;  %v1134_v32 = vmul.f32 0.020408163, %v9536_v28  ;;  %v7247_v48 = vpop.eup %7246 }
 0x24e   :  { %v1673_v2 = vld [vmem:[%s12795_s1 + $0x1f0] sm:$0xff]  ;;  %v1125_v22 = vmul.f32 0.020408163, %v9427_v13  ;;  %13459 = vst [vmem:[#allocation174_spill] sm:$0xff] %v9975_v25  ;;  %v1684_v13 = vld [vmem:[%s12795_s1 + $0x248] sm:$0xff]  ;;  %v7249_v20 = vpop.eup %7248  ;;  %7258 = vrsqrt.f32 %v1466_v6 }
 0x24f   :  { %v1457_v8 = vadd.f32 1e-05, %v1345_v1  ;;  %v1246_v27 = vmul.f32 %v9952_v21, %v9952_v21  ;;  %v13463_v1 = vld [vmem:[#allocation130_spill] sm:$0xff]  ;;  %v9996_v54 = vmul.f32 %v7245_v38, %v1673_v2  ;;  %v1468_v17 = vadd.f32 1e-05, %v1356_v34  ;;  %v13466_v2 = vld [vmem:[#allocation139_spill] sm:$0xff] }
 0x250   :  { %v9956_v9 = vpop.permute.xlu1 %2178  ;;  %2463 = vperm.xlu1 %6643, %v9940_v36   ;;  %v9993_v61 = vmul.f32 0.020408163, %v13463_v1  ;;  %v1248_v38 = vmul.f32 %v9980_v19, %v9980_v19 }
 0x251   :  { %13456 = vst [vmem:[#allocation173_spill] sm:$0xff] %v9956_v9  ;;  %2518 = vperm.xlu0 %6642, %v9947_v10   ;;  %v1347_v9 = vsub.f32 %v1123_v30, %v1235_v56  ;;  %v1237_v30 = vmul.f32 %v9965_v29, %v9965_v29  ;;  %v1358_v60 = vsub.f32 %v1134_v32, %v1246_v27  ;;  %v1136_v56 = vmul.f32 0.020408163, %v9564_v12  ;;  %v7251_v1 = vpop.eup %7250 }
 0x252   :  { %13464 = vst [vmem:[#allocation130_spill] sm:$0xff] %v9993_v61  ;;  %7260 = vrsqrt.f32 %v1457_v8  ;;  %v1686_v8 = vld [vmem:[%s12795_s1 + $0x258] sm:$0xff] }
 0x253   :  { %v1349_v29 = vsub.f32 %v1125_v22, %v1237_v30  ;;  %v1127_v22 = vmul.f32 0.020408163, %v9455_v7  ;;  %v7253_v34 = vpop.eup %7252  ;;  %7262 = vrsqrt.f32 %v1468_v17  ;;  %v1470_v32 = vadd.f32 1e-05, %v1358_v60  ;;  %v1677_v30 = vld [vmem:[%s12795_s1 + $0x210] sm:$0xff]  ;;  %v13472_v17 = vld [vmem:[#allocation141_spill] sm:$0xff] }
 0x254   :  { %v9982_v59 = vpop.permute.xlu1 %2183  ;;  %2473 = vperm.xlu1 %6643, %v9968_v62   ;;  %v9985_v28 = vpop.permute.xlu0 %2173  ;;  %v1360_v27 = vsub.f32 %v1136_v56, %v1248_v38  ;;  %v10030_v7 = vmul.f32 %v7251_v1, %v1686_v8  ;;  %v10035_v60 = vmul.f32 0.020408163, %v13472_v17  ;;  %v10047_v1 = vmul.f32 %v7253_v34, %v1677_v30 }
 0x255   :  { %13461 = vst [vmem:[#allocation137_spill] sm:$0xff] %v9982_v59  ;;  %13462 = vst [vmem:[#allocation175_spill] sm:$0xff] %v9985_v28  ;;  %2528 = vperm.xlu0 %6642, %v9975_v25   ;;  %v1459_v59 = vadd.f32 1e-05, %v1347_v9  ;;  %v10002_v28 = vmul.f32 %v7247_v48, %v1684_v13  ;;  %v10007_v25 = vmul.f32 0.020408163, %v13466_v2  ;;  %v1239_v48 = vmul.f32 %v9993_v61, %v9993_v61 }
 0x256   :  { %v10021_v9 = vmul.f32 %v7249_v20, %v1675_v33  ;;  %v1138_v13 = vmul.f32 0.020408163, %v9592_v16  ;;  %v13469_v2 = vld [vmem:[#allocation132_spill] sm:$0xff]  ;;  %v1461_v61 = vadd.f32 1e-05, %v1349_v29  ;;  %13471 = vst [vmem:[#allocation178_spill] sm:$0xff] %v10030_v7 }
 0x257   :  { %13465 = vst [vmem:[#allocation176_spill] sm:$0xff] %v10002_v28  ;;  %7264 = vrsqrt.f32 %v1459_v59  ;;  %v1250_v20 = vmul.f32 %v10007_v25, %v10007_v25  ;;  %v1688_v59 = vld [vmem:[%s12795_s1 + $0x268] sm:$0xff]  ;;  %v1351_v29 = vsub.f32 %v1127_v22, %v1239_v48  ;;  %v1129_v33 = vmul.f32 0.020408163, %v9483_v55  ;;  %v13475_v48 = vld [vmem:[#allocation134_spill] sm:$0xff] }
 0x258   :  { %v10009_v6 = vpop.permute.xlu1 %2188  ;;  %2483 = vperm.xlu1 %6643, %v9996_v54   ;;  %v10012_v12 = vpop.permute.xlu0 %2218  ;;  %7266 = vrsqrt.f32 %v1470_v32  ;;  %v1472_v8 = vadd.f32 1e-05, %v1360_v27  ;;  %v1140_v17 = vmul.f32 0.020408163, %v9620_v23  ;;  %v10056_v22 = vmul.f32 0.020408163, %v13475_v48 }
 0x259   :  { %13467 = vst [vmem:[#allocation139_spill] sm:$0xff] %v10009_v6  ;;  %13468 = vst [vmem:[#allocation177_spill] sm:$0xff] %v10012_v12  ;;  %2538 = vperm.xlu0 %6642, %v10002_v28   ;;  %v10028_v12 = vmul.f32 0.020408163, %v13469_v2  ;;  %v7255_v28 = vpop.eup %7254  ;;  %v1362_v2 = vsub.f32 %v1138_v13, %v1250_v20  ;;  %7268 = vrsqrt.f32 %v1461_v61  ;;  %v1252_v32 = vmul.f32 %v10035_v60, %v10035_v60  ;;  %v13477_v27 = vld [vmem:[#allocation143_spill] sm:$0xff]  ;;  %v1690_v20 = vld [vmem:[%s12795_s1 + $0x278] sm:$0xff] }
 0x25a   :  { %v7257_v38 = vpop.eup %7256  ;;  %v10058_v55 = vmul.f32 %v7255_v28, %v1688_v59  ;;  %v10063_v13 = vmul.f32 0.020408163, %v13477_v27  ;;  %v1463_v28 = vadd.f32 1e-05, %v1351_v29  ;;  %v1131_v48 = vmul.f32 0.020408163, %v9511_v39 }
 0x25b   :  { %13470 = vst [vmem:[#allocation132_spill] sm:$0xff] %v10028_v12  ;;  %v7259_v34 = vpop.eup %7258  ;;  %v1681_v27 = vld [vmem:[%s12795_s1 + $0x230] sm:$0xff]  ;;  %7270 = vrsqrt.f32 %v1472_v8  ;;  %v1243_v6 = vmul.f32 %v10056_v22, %v10056_v22 }
 0x25c   :  { %v10037_v56 = vpop.permute.xlu1 %2193  ;;  %2493 = vperm.xlu1 %6643, %v10021_v9   ;;  %v10040_v16 = vpop.permute.xlu0 %2228  ;;  %13476 = vst [vmem:[#allocation134_spill] sm:$0xff] %v10058_v55  ;;  %13478 = vst [vmem:[#allocation143_spill] sm:$0xff] %v10063_v13  ;;  %v13482_v29 = vld [vmem:[#allocation136_spill] sm:$0xff]  ;;  %v10086_v39 = vmul.f32 %v7259_v34, %v1690_v20  ;;  %7272 = vrsqrt.f32 %v1463_v28 }
 0x25d   :  { %13473 = vst [vmem:[#allocation141_spill] sm:$0xff] %v10037_v56  ;;  %13474 = vst [vmem:[#allocation179_spill] sm:$0xff] %v10040_v16  ;;  %2548 = vperm.xlu0 %6642, %v10030_v7   ;;  %v1679_v16 = vld [vmem:[%s12795_s1 + $0x220] sm:$0xff]  ;;  %v1241_v56 = vmul.f32 %v10028_v12, %v10028_v12  ;;  %v7261_v61 = vpop.eup %7260  ;;  %v1474_v7 = vadd.f32 1e-05, %v1362_v2  ;;  %v1355_v20 = vsub.f32 %v1131_v48, %v1243_v6 }
 0x25e   :  { %v10075_v12 = vmul.f32 %v7257_v38, %v1679_v16  ;;  %13483 = vst [vmem:[#allocation136_spill] sm:$0xff] %v10086_v39  ;;  %v1254_v16 = vmul.f32 %v10063_v13, %v10063_v13  ;;  %v13484_v38 = vld [vmem:[#allocation145_spill] sm:$0xff]  ;;  %v10098_v2 = vmul.f32 %v7261_v61, %v1681_v27  ;;  %v1144_v27 = vmul.f32 0.020408163, %v9676_v11  ;;  %v13489_v13 = vld [vmem:[#allocation138_spill] sm:$0xff] }
 0x25f   :  { %v1353_v59 = vsub.f32 %v1129_v33, %v1241_v56  ;;  %v10084_v56 = vmul.f32 0.020408163, %v13482_v29  ;;  %v7263_v33 = vpop.eup %7262  ;;  %v1133_v29 = vmul.f32 0.020408163, %v9539_v35  ;;  %7274 = vrsqrt.f32 %v1474_v7  ;;  %v13491_v48 = vld [vmem:[#allocation2_spill] sm:$0xff] }
 0x260   :  { %v10065_v23 = vpop.permute.xlu1 %2198  ;;  %2503 = vperm.xlu1 %6643, %v10047_v1   ;;  %v10068_v30 = vpop.permute.xlu0 %2238  ;;  %13481 = vst [vmem:[#allocation182_spill] sm:$0xff] %v10075_v12  ;;  %13488 = vst [vmem:[#allocation185_spill] sm:$0xff] %v10098_v2  ;;  %v10112_v28 = vmul.f32 0.020408163, %v13489_v13  ;;  %v1694_v13 = vld [vmem:[%s12795_s1 + $0x298] sm:$0xff] }
 0x261   :  { %13479 = vst [vmem:[#allocation180_spill] sm:$0xff] %v10065_v23  ;;  %13480 = vst [vmem:[#allocation181_spill] sm:$0xff] %v10068_v30  ;;  %2558 = vperm.xlu0 %6642, %v10058_v55   ;;  %v1364_v30 = vsub.f32 %v1140_v17, %v1252_v32  ;;  %v1142_v23 = vmul.f32 0.020408163, %v9648_v40  ;;  %v10091_v55 = vmul.f32 0.020408163, %v13484_v38  ;;  %v7265_v34 = vpop.eup %7264 }
 0x262   :  { %v1692_v17 = vld [vmem:[%s12795_s1 + $0x288] sm:$0xff]  ;;  %v1465_v32 = vadd.f32 1e-05, %v1353_v59  ;;  %v1683_v38 = vld [vmem:[%s12795_s1 + $0x240] sm:$0xff]  ;;  %13490 = vst [vmem:[#allocation138_spill] sm:$0xff] %v10112_v28  ;;  %v7267_v35 = vpop.eup %7266 }
 0x263   :  { %13485 = vst [vmem:[#allocation145_spill] sm:$0xff] %v10091_v55  ;;  %v1366_v61 = vsub.f32 %v1142_v23, %v1254_v16  ;;  %v10114_v6 = vmul.f32 %v7263_v33, %v1692_v17  ;;  %v1256_v59 = vmul.f32 %v10091_v55, %v10091_v55  ;;  %v10126_v23 = vmul.f32 %v7265_v34, %v1683_v38 }
 0x264   :  { %v10093_v8 = vpop.permute.xlu1 %2203  ;;  %2513 = vperm.xlu1 %6643, %v10075_v12   ;;  %v10096_v40 = vpop.permute.xlu0 %2248  ;;  %7276 = vrsqrt.f32 %v1465_v32  ;;  %v1467_v33 = vadd.f32 1e-05, %v1355_v20  ;;  %v1135_v17 = vmul.f32 0.020408163, %v9567_v3  ;;  %v1146_v38 = vmul.f32 0.020408163, %v9704_v15 }
 0x265   :  { %13486 = vst [vmem:[#allocation183_spill] sm:$0xff] %v10093_v8  ;;  %13487 = vst [vmem:[#allocation184_spill] sm:$0xff] %v10096_v40  ;;  %2568 = vperm.xlu0 %6642, %v10086_v39   ;;  %v1476_v40 = vadd.f32 1e-05, %v1364_v30  ;;  %v1245_v8 = vmul.f32 %v10084_v56, %v10084_v56  ;;  %v10119_v39 = vmul.f32 0.020408163, %v13491_v48  ;;  %v7269_v30 = vpop.eup %7268  ;;  %v1368_v34 = vsub.f32 %v1144_v27, %v1256_v59 }
 0x266   :  { %13494 = vst [vmem:[#allocation187_spill] sm:$0xff] %v10126_v23  ;;  %v1685_v48 = vld [vmem:[%s12795_s1 + $0x250] sm:$0xff]  ;;  %v1247_v55 = vmul.f32 %v10112_v28, %v10112_v28  ;;  %v7271_v3 = vpop.eup %7270  ;;  %v1137_v59 = vmul.f32 0.020408163, %v9595_v24  ;;  %v1687_v24 = vld [vmem:[%s12795_s1 + $0x260] sm:$0xff] }
 0x267   :  { %13492 = vst [vmem:[#allocation2_spill] sm:$0xff] %v10119_v39  ;;  %v1357_v16 = vsub.f32 %v1133_v29, %v1245_v8  ;;  %7278 = vrsqrt.f32 %v1476_v40  ;;  %v10142_v8 = vmul.f32 %v7267_v35, %v1694_v13  ;;  %v1258_v20 = vmul.f32 %v10119_v39, %v10119_v39  ;;  %v13497_v29 = vld [vmem:[#allocation4_spill] sm:$0xff]  ;;  %v7273_v39 = vpop.eup %7272 }
 0x268   :  { %v10121_v7 = vpop.permute.xlu1 %2208  ;;  %2523 = vperm.xlu1 %6643, %v10098_v2   ;;  %v10124_v11 = vpop.permute.xlu0 %2258  ;;  %v13495_v2 = vld [vmem:[#allocation140_spill] sm:$0xff]  ;;  %v10147_v12 = vmul.f32 0.020408163, %v13497_v29  ;;  %7280 = vrsqrt.f32 %v1467_v33  ;;  %v1359_v35 = vsub.f32 %v1135_v17, %v1247_v55  ;;  %v1480_v13 = vadd.f32 1e-05, %v1368_v34 }
 0x269   :  { %13493 = vst [vmem:[#allocation186_spill] sm:$0xff] %v10121_v7  ;;  %2578 = vperm.xlu0 %6642, %v10114_v6   ;;  %v1478_v7 = vadd.f32 1e-05, %v1366_v61  ;;  %v10140_v32 = vmul.f32 0.020408163, %v13495_v2  ;;  %v10154_v61 = vmul.f32 %v7269_v30, %v1685_v48  ;;  %v1696_v2 = vld [vmem:[%s12795_s1 + $0x2a8] sm:$0xff]  ;;  %v1370_v29 = vsub.f32 %v1146_v38, %v1258_v20  ;;  %v7275_v55 = vpop.eup %7274 }
 0x26a   :  { %13498 = vst [vmem:[#allocation4_spill] sm:$0xff] %v10147_v12  ;;  %v1469_v27 = vadd.f32 1e-05, %v1357_v16  ;;  %v13501_v48 = vld [vmem:[#allocation142_spill] sm:$0xff]  ;;  %v10167_v28 = vmul.f32 %v7271_v3, %v1696_v2  ;;  %v1698_v16 = vld [vmem:[%s12795_s1 + $0x2b8] sm:$0xff]  ;;  %v10184_v2 = vmul.f32 %v7273_v39, %v1687_v24 }
 0x26b   :  { %13496 = vst [vmem:[#allocation140_spill] sm:$0xff] %v10140_v32  ;;  %13500 = vst [vmem:[#allocation189_spill] sm:$0xff] %v10154_v61  ;;  %7282 = vrsqrt.f32 %v1478_v7  ;;  %v1249_v30 = vmul.f32 %v10140_v32, %v10140_v32  ;;  %v1260_v7 = vmul.f32 %v10147_v12, %v10147_v12  ;;  %v1471_v17 = vadd.f32 1e-05, %v1359_v35  ;;  %v13505_v12 = vld [vmem:[#allocation144_spill] sm:$0xff] }
 0x26c   :  { %v10149_v40 = vpop.permute.xlu1 %2213  ;;  %2533 = vperm.xlu1 %6643, %v10126_v23   ;;  %v10152_v15 = vpop.permute.xlu0 %2268  ;;  %v10165_v23 = vmul.f32 0.020408163, %v13501_v48  ;;  %7284 = vrsqrt.f32 %v1469_v27  ;;  %v1139_v38 = vmul.f32 0.020408163, %v9623_v44  ;;  %v1482_v3 = vadd.f32 1e-05, %v1370_v29 }
 0x26d   :  { %13499 = vst [vmem:[#allocation188_spill] sm:$0xff] %v10149_v40  ;;  %2588 = vperm.xlu0 %6642, %v10142_v8   ;;  %v1148_v40 = vmul.f32 0.020408163, %v9732_v47  ;;  %v1361_v34 = vsub.f32 %v1137_v59, %v1249_v30  ;;  %7286 = vrsqrt.f32 %v1480_v13  ;;  %13504 = vst [vmem:[#allocation191_spill] sm:$0xff] %v10184_v2  ;;  %v10191_v32 = vmul.f32 %v7275_v55, %v1698_v16  ;;  %v1689_v44 = vld [vmem:[%s12795_s1 + $0x270] sm:$0xff] }
 0x26e   :  { %13502 = vst [vmem:[#allocation142_spill] sm:$0xff] %v10165_v23  ;;  %v7277_v48 = vpop.eup %7276  ;;  %7288 = vrsqrt.f32 %v1471_v17  ;;  %v1141_v13 = vmul.f32 0.020408163, %v9651_v4 }
 0x26f   :  { %v1372_v20 = vsub.f32 %v1148_v40, %v1260_v7  ;;  %v1700_v40 = vld [vmem:[%s12795_s1 + $0x2c8] sm:$0xff]  ;;  %7290 = vrsqrt.f32 %v1482_v3  ;;  %v10206_v30 = vmul.f32 %v7277_v48, %v1689_v44  ;;  %v13509_v7 = vld [vmem:[#allocation146_spill] sm:$0xff]  ;;  %v1143_v48 = vmul.f32 0.020408163, %v9679_v14 }
 0x270   :  { %v10174_v33 = vpop.permute.xlu1 %2223  ;;  %2543 = vperm.xlu1 %6643, %v10154_v61   ;;  %v10177_v47 = vpop.permute.xlu0 %2278  ;;  %v10189_v61 = vmul.f32 0.020408163, %v13505_v12  ;;  %v1473_v12 = vadd.f32 1e-05, %v1361_v34  ;;  %v10211_v16 = vmul.f32 0.020408163, %v13509_v7 }
 0x271   :  { %13503 = vst [vmem:[#allocation190_spill] sm:$0xff] %v10174_v33  ;;  %2598 = vperm.xlu0 %6642, %v10167_v28   ;;  %v1251_v33 = vmul.f32 %v10165_v23, %v10165_v23  ;;  %v7279_v27 = vpop.eup %7278  ;;  %v1484_v29 = vadd.f32 1e-05, %v1372_v20  ;;  %13508 = vst [vmem:[#allocation193_spill] sm:$0xff] %v10206_v30  ;;  %v13513_v7 = vld [vmem:[#allocation3_spill] sm:$0xff] }
 0x272   :  { %13506 = vst [vmem:[#allocation144_spill] sm:$0xff] %v10189_v61  ;;  %v7281_v24 = vpop.eup %7280  ;;  %v1253_v55 = vmul.f32 %v10189_v61, %v10189_v61  ;;  %13510 = vst [vmem:[#allocation146_spill] sm:$0xff] %v10211_v16  ;;  %7292 = vrsqrt.f32 %v1473_v12  ;;  %v1693_v12 = vld [vmem:[%s12795_s1 + $0x290] sm:$0xff] }
 0x273   :  { %v1363_v59 = vsub.f32 %v1139_v38, %v1251_v33  ;;  %v1691_v33 = vld [vmem:[%s12795_s1 + $0x280] sm:$0xff]  ;;  %v1702_v38 = vld [vmem:[%s12795_s1 + $0x2d8] sm:$0xff]  ;;  %7294 = vrsqrt.f32 %v1484_v29  ;;  %v1704_v29 = vld [vmem:[%s12795_s1 + $0x2e8] sm:$0xff] }
 0x274   :  { %v10196_v35 = vpop.permute.xlu1 %2233  ;;  %2553 = vperm.xlu1 %6643, %v10184_v2   ;;  %v10199_v39 = vpop.permute.xlu0 %2288  ;;  %v1365_v20 = vsub.f32 %v1141_v13, %v1253_v55  ;;  %v10228_v44 = vmul.f32 %v7281_v24, %v1691_v33  ;;  %v1145_v33 = vmul.f32 0.020408163, %v9707_v46  ;;  %v13516_v2 = vld [vmem:[#allocation5_spill] sm:$0xff] }
 0x275   :  { %13507 = vst [vmem:[#allocation192_spill] sm:$0xff] %v10196_v35  ;;  %2608 = vperm.xlu0 %6642, %v10191_v32   ;;  %v10213_v35 = vmul.f32 %v7279_v27, %v1700_v40  ;;  %v7283_v4 = vpop.eup %7282  ;;  %v1475_v3 = vadd.f32 1e-05, %v1363_v59  ;;  %v1255_v40 = vmul.f32 %v10211_v16, %v10211_v16  ;;  %v10255_v16 = vmul.f32 0.020408163, %v13516_v2 }
 0x276   :  { %v7285_v27 = vpop.eup %7284  ;;  %v1477_v24 = vadd.f32 1e-05, %v1365_v20 }
 0x277   :  { %v7287_v59 = vpop.eup %7286  ;;  %7296 = vrsqrt.f32 %v1475_v3  ;;  %v1367_v55 = vsub.f32 %v1143_v48, %v1255_v40  ;;  %13517 = vst [vmem:[#allocation5_spill] sm:$0xff] %v10255_v16  ;;  %v1695_v3 = vld [vmem:[%s12795_s1 + $0x2a0] sm:$0xff] }
 0x278   :  { %v10218_v17 = vpop.permute.xlu1 %2243  ;;  %2563 = vperm.xlu1 %6643, %v10206_v30   ;;  %v10221_v34 = vpop.permute.xlu0 %2298  ;;  %v10235_v30 = vmul.f32 %v7283_v4, %v1702_v38  ;;  %v10250_v4 = vmul.f32 %v7285_v27, %v1693_v12  ;;  %v1706_v27 = vld [vmem:[%s12795_s1 + $0x2f8] sm:$0xff]  ;;  %7298 = vrsqrt.f32 %v1477_v24  ;;  %v1147_v12 = vmul.f32 0.020408163, %v9735_v52 }
 0x279   :  { %13511 = vst [vmem:[#allocation194_spill] sm:$0xff] %v10218_v17  ;;  %13512 = vst [vmem:[#allocation195_spill] sm:$0xff] %v10221_v34  ;;  %2618 = vperm.xlu0 %6642, %v10213_v35   ;;  %v10233_v17 = vmul.f32 0.020408163, %v13513_v7  ;;  %v7289_v38 = vpop.eup %7288  ;;  %v1479_v2 = vadd.f32 1e-05, %v1367_v55 }
 0x27a   :  { %v7291_v20 = vpop.eup %7290  ;;  %v1708_v55 = vld [vmem:[%s12795_s1 + $0x308] sm:$0xff] }
 0x27b   :  { %13514 = vst [vmem:[#allocation3_spill] sm:$0xff] %v10233_v17  ;;  %v1257_v7 = vmul.f32 %v10233_v17, %v10233_v17  ;;  %v1259_v17 = vmul.f32 %v10255_v16, %v10255_v16  ;;  %v10276_v61 = vmul.f32 %v7291_v20, %v1706_v27  ;;  %7300 = vrsqrt.f32 %v1479_v2  ;;  %v1699_v27 = vld [vmem:[%s12795_s1 + $0x2c0] sm:$0xff]  ;;  %v13523_v16 = vld [vmem:[#allocation45_spill] sm:$0xff] }
 0x27c   :  { %v10240_v14 = vpop.permute.xlu1 %2253  ;;  %2573 = vperm.xlu1 %6643, %v10228_v44   ;;  %v10243_v13 = vpop.permute.xlu0 %2308 }
 0x27d   :  { %13515 = vst [vmem:[#allocation196_spill] sm:$0xff] %v10243_v13  ;;  %2628 = vperm.xlu0 %6642, %v10235_v30   ;;  %v10257_v13 = vmul.f32 %v7287_v59, %v1704_v29  ;;  %v1369_v40 = vsub.f32 %v1145_v33, %v1257_v7  ;;  %v10272_v59 = vmul.f32 %v7289_v38, %v1695_v3  ;;  %v7293_v29 = vpop.eup %7292  ;;  %13520 = vst [vmem:[#allocation199_spill] sm:$0xff] %v10276_v61 }
 0x27e   :  { %v7295_v34 = vpop.eup %7294  ;;  %v1371_v38 = vsub.f32 %v1147_v12, %v1259_v17  ;;  %v1852_v17 = vld [vmem:[%s12796_s2 + $0x88] sm:$0xff] }
 0x27f   :  { %13518 = vst [vmem:[#allocation197_spill] sm:$0xff] %v10257_v13  ;;  %v1481_v33 = vadd.f32 1e-05, %v1369_v40  ;;  %v10292_v20 = vmul.f32 %v7295_v34, %v1708_v55 }
 0x280   :  { %v10262_v48 = vpop.permute.xlu1 %2263  ;;  %2583 = vperm.xlu1 %6643, %v10250_v4   ;;  %v10265_v46 = vpop.permute.xlu0 %2318  ;;  %v1483_v34 = vadd.f32 1e-05, %v1371_v38 }
 0x281   :  { %13519 = vst [vmem:[#allocation198_spill] sm:$0xff] %v10265_v46  ;;  %2638 = vperm.xlu0 %6642, %v10257_v13   ;;  %v1697_v46 = vld [vmem:[%s12795_s1 + $0x2b0] sm:$0xff]  ;;  %v7297_v3 = vpop.eup %7296  ;;  %13522 = vst [vmem:[#allocation201_spill] sm:$0xff] %v10292_v20  ;;  %7302 = vrsqrt.f32 %v1481_v33  ;;  %v1836_v33 = vld [vmem:[%s12796_s2 + $0x8] sm:$0xff] }
 0x282   :  { %v10290_v7 = vmul.f32 %v7293_v29, %v1697_v46  ;;  %v10308_v46 = vmul.f32 %v7297_v3, %v1699_v27  ;;  %v7299_v40 = vpop.eup %7298  ;;  %v13526_v29 = vld [vmem:[#allocation20_spill] sm:$0xff]  ;;  %7304 = vrsqrt.f32 %v1483_v34  ;;  %v1703_v27 = vld [vmem:[%s12795_s1 + $0x2e0] sm:$0xff]  ;;  %v1854_v34 = vld [vmem:[%s12796_s2 + $0x98] sm:$0xff] }
 0x284   :  { %v10281_v24 = vpop.permute.xlu1 %2273  ;;  %2593 = vperm.xlu1 %6643, %v10272_v59   ;;  %v10284_v52 = vpop.permute.xlu0 %2328 }
 0x285   :  { %13521 = vst [vmem:[#allocation200_spill] sm:$0xff] %v10284_v52  ;;  %2648 = vperm.xlu0 %6642, %v10276_v61   ;;  %v13524_v52 = vld [vmem:[#allocation26_spill] sm:$0xff]  ;;  %v7301_v38 = vpop.eup %7300 }
 0x286   :  { %v1964_v23 = vmul.f32 %v13524_v52, %v13523_v16  ;;  %v1701_v16 = vld [vmem:[%s12795_s1 + $0x2d0] sm:$0xff] }
 0x287   :  { %v13527_v52 = vld [vmem:[#allocation52_spill] sm:$0xff] }
 0x288   :  { %v10299_v13 = vpop.permute.xlu1 %2283  ;;  %2603 = vperm.xlu1 %6643, %v10290_v7   ;;  %v10302_v2 = vpop.permute.xlu0 %2338  ;;  %v2076_v12 = vsub.f32 %v1852_v17, %v1964_v23  ;;  %v1948_v55 = vmul.f32 %v13527_v52, %v13526_v29  ;;  %v10323_v23 = vmul.f32 %v7299_v40, %v1701_v16  ;;  %v13530_v17 = vld [vmem:[#allocation53_spill] sm:$0xff]  ;;  %v13531_v29 = vld [vmem:[#allocation30_spill] sm:$0xff]  ;;  %v10338_v40 = vmul.f32 %v7301_v38, %v1703_v27 }
 0x289   :  { %13525 = vst [vmem:[#allocation45_spill] sm:$0xff] %v10302_v2  ;;  %2658 = vperm.xlu0 %6642, %v10292_v20   ;;  %v1966_v52 = vmul.f32 %v13531_v29, %v13530_v17  ;;  %v13536_v17 = vld [vmem:[#allocation69_spill] sm:$0xff] }
 0x28a   :  { %13529 = vst [vmem:[#allocation20_spill] sm:$0xff] %v10323_v23  ;;  %v2060_v3 = vsub.f32 %v1836_v33, %v1948_v55  ;;  %13534 = vst [vmem:[#allocation30_spill] sm:$0xff] %v10338_v40  ;;  %v1705_v55 = vld [vmem:[%s12795_s1 + $0x2f0] sm:$0xff]  ;;  %v13535_v33 = vld [vmem:[#allocation25_spill] sm:$0xff] }
 0x28b   :  { %v2078_v16 = vsub.f32 %v1854_v34, %v1966_v52  ;;  %v1950_v29 = vmul.f32 %v13536_v17, %v13535_v33  ;;  %v1838_v38 = vld [vmem:[%s12796_s2 + $0x18] sm:$0xff]  ;;  %v1707_v34 = vld [vmem:[%s12795_s1 + $0x300] sm:$0xff] }
 0x28c   :  { %v10315_v2 = vpop.permute.xlu1 %2293  ;;  %2613 = vperm.xlu1 %6643, %v10308_v46   ;;  %v10318_v61 = vpop.permute.xlu0 %2348  ;;  %v13540_v33 = vld [vmem:[#allocation61_spill] sm:$0xff]  ;;  %v13541_v17 = vld [vmem:[#allocation34_spill] sm:$0xff] }
 0x28d   :  { %13528 = vst [vmem:[#allocation26_spill] sm:$0xff] %v10318_v61  ;;  %2930 = vperm.xlu0 %6642, %v2076_v12   ;;  %v7303_v12 = vpop.eup %7302  ;;  %v2062_v52 = vsub.f32 %v1838_v38, %v1950_v29 }
 0x28e   :  { %v7305_v27 = vpop.eup %7304 }
 0x290   :  { %v10330_v20 = vpop.permute.xlu1 %2303  ;;  %2623 = vperm.xlu1 %6643, %v10323_v23   ;;  %v10333_v61 = vpop.permute.xlu0 %2358 }
 0x291   :  { %13532 = vst [vmem:[#allocation52_spill] sm:$0xff] %v10330_v20  ;;  %13533 = vst [vmem:[#allocation53_spill] sm:$0xff] %v10333_v61  ;;  %2850 = vperm.xlu0 %6642, %v2060_v3   ;;  %v10353_v3 = vmul.f32 %v7303_v12, %v1705_v55  ;;  %v1856_v12 = vld [vmem:[%s12796_s2 + $0xa8] sm:$0xff]  ;;  %v13544_v55 = vld [vmem:[#allocation84_spill] sm:$0xff] }
 0x292   :  { %v1963_v29 = vmul.f32 %v9354_v58, %v13544_v55  ;;  %v13551_v55 = vld [vmem:[#allocation72_spill] sm:$0xff] }
 0x293   :  { %13539 = vst [vmem:[#allocation202_spill] sm:$0xff] %v10353_v3 }
 0x294   :  { %v10345_v20 = vpop.permute.xlu1 %2313  ;;  %2633 = vperm.xlu1 %6643, %v10338_v40   ;;  %v10348_v61 = vpop.permute.xlu0 %2368 }
 0x295   :  { %13537 = vst [vmem:[#allocation25_spill] sm:$0xff] %v10345_v20  ;;  %13538 = vst [vmem:[#allocation69_spill] sm:$0xff] %v10348_v61  ;;  %2940 = vperm.xlu0 %6642, %v2078_v16   ;;  %v1968_v20 = vmul.f32 %v13541_v17, %v13540_v33  ;;  %v10368_v16 = vmul.f32 %v7305_v27, %v1707_v34  ;;  %v1851_v33 = vld [vmem:[%s12796_s2 + $0x80] sm:$0xff]  ;;  %v13545_v17 = vld [vmem:[#allocation33_spill] sm:$0xff] }
 0x296   :  { %v1840_v27 = vld [vmem:[%s12796_s2 + $0x28] sm:$0xff]  ;;  %v2075_v58 = vsub.f32 %v1851_v33, %v1963_v29  ;;  %v1858_v29 = vld [vmem:[%s12796_s2 + $0xb8] sm:$0xff] }
 0x297   :  { %v2080_v38 = vsub.f32 %v1856_v12, %v1968_v20  ;;  %v13549_v20 = vld [vmem:[#allocation24_spill] sm:$0xff]  ;;  %v13554_v33 = vld [vmem:[#allocation27_spill] sm:$0xff] }
 0x298   :  { %v10360_v23 = vpop.permute.xlu1 %2323  ;;  %2643 = vperm.xlu1 %6643, %v10353_v3   ;;  %v10363_v61 = vpop.permute.xlu0 %2378 }
 0x299   :  { %13542 = vst [vmem:[#allocation61_spill] sm:$0xff] %v10360_v23  ;;  %13543 = vst [vmem:[#allocation34_spill] sm:$0xff] %v10363_v61  ;;  %2860 = vperm.xlu0 %6642, %v2062_v52   ;;  %v13546_v23 = vld [vmem:[#allocation85_spill] sm:$0xff]  ;;  %v13550_v52 = vld [vmem:[#allocation64_spill] sm:$0xff] }
 0x29a   :  { %v1952_v3 = vmul.f32 %v13546_v23, %v13545_v17  ;;  %v1947_v34 = vmul.f32 %v13550_v52, %v13549_v20  ;;  %v1835_v23 = vld [vmem:[%s12796_s2] sm:$0xff]  ;;  %v1970_v17 = vmul.f32 %v9309_v31, %v13551_v55  ;;  %v1853_v20 = vld [vmem:[%s12796_s2 + $0x90] sm:$0xff] }
 0x29b   :  { %v13555_v31 = vld [vmem:[#allocation44_spill] sm:$0xff] }
 0x29c   :  { %v10377_v40 = vpop.permute.xlu1 %2333  ;;  %2653 = vperm.xlu1 %6643, %v10368_v16   ;;  %v10380_v61 = vpop.permute.xlu0 %2388  ;;  %v2064_v12 = vsub.f32 %v1840_v27, %v1952_v3  ;;  %v1965_v3 = vmul.f32 %v9382_v50, %v13554_v33  ;;  %v2082_v27 = vsub.f32 %v1858_v29, %v1970_v17  ;;  %v13556_v52 = vld [vmem:[#allocation96_spill] sm:$0xff]  ;;  %v13559_v50 = vld [vmem:[#allocation21_spill] sm:$0xff] }
 0x29d   :  { %13547 = vst [vmem:[#allocation84_spill] sm:$0xff] %v10377_v40  ;;  %13548 = vst [vmem:[#allocation33_spill] sm:$0xff] %v10380_v61  ;;  %2950 = vperm.xlu0 %6642, %v2080_v38   ;;  %v2059_v38 = vsub.f32 %v1835_v23, %v1947_v34  ;;  %v1954_v55 = vmul.f32 %v13556_v52, %v13555_v31  ;;  %v1842_v34 = vld [vmem:[%s12796_s2 + $0x38] sm:$0xff]  ;;  %v13560_v23 = vld [vmem:[#allocation60_spill] sm:$0xff] }
 0x29e   :  { %v1949_v17 = vmul.f32 %v13560_v23, %v13559_v50  ;;  %v1837_v33 = vld [vmem:[%s12796_s2 + $0x10] sm:$0xff]  ;;  %v13562_v52 = vld [vmem:[#allocation66_spill] sm:$0xff] }
 0x29f   :  { %v2066_v29 = vsub.f32 %v1842_v34, %v1954_v55  ;;  %v13561_v31 = vld [vmem:[#allocation80_spill] sm:$0xff]  ;;  %v13565_v55 = vld [vmem:[#allocation82_spill] sm:$0xff] }
 0x2a0   :  { %v10392_v40 = vpop.permute.xlu1 %2343  ;;  %2925 = vperm.xlu1 %6643, %v2075_v58   ;;  %v10394_v61 = vpop.permute.xlu0 %2398  ;;  %v1855_v23 = vld [vmem:[%s12796_s2 + $0xa0] sm:$0xff] }
 0x2a1   :  { %13552 = vst [vmem:[#allocation85_spill] sm:$0xff] %v10392_v40  ;;  %13553 = vst [vmem:[#allocation24_spill] sm:$0xff] %v10394_v61  ;;  %2870 = vperm.xlu0 %6642, %v2064_v12   ;;  %v2077_v12 = vsub.f32 %v1853_v20, %v1965_v3  ;;  %v1860_v3 = vld [vmem:[%s12796_s2 + $0xc8] sm:$0xff] }
 0x2a2   :  { %v13564_v20 = vld [vmem:[#allocation23_spill] sm:$0xff] }
 0x2a3   :  { %v1967_v34 = vmul.f32 %v13565_v55, %v13564_v20  ;;  %v1839_v55 = vld [vmem:[%s12796_s2 + $0x20] sm:$0xff] }
 0x2a4   :  { %v10406_v58 = vpop.permute.xlu1 %2353  ;;  %2845 = vperm.xlu1 %6643, %v2059_v38   ;;  %v10408_v61 = vpop.permute.xlu0 %2408 }
 0x2a5   :  { %13557 = vst [vmem:[#allocation64_spill] sm:$0xff] %v10406_v58  ;;  %13558 = vst [vmem:[#allocation72_spill] sm:$0xff] %v10408_v61  ;;  %2960 = vperm.xlu0 %6642, %v2082_v27   ;;  %v1972_v58 = vmul.f32 %v13562_v52, %v13561_v31  ;;  %v2061_v27 = vsub.f32 %v1837_v33, %v1949_v17  ;;  %v13566_v31 = vld [vmem:[#allocation28_spill] sm:$0xff]  ;;  %v13567_v52 = vld [vmem:[#allocation73_spill] sm:$0xff] }
 0x2a6   :  { %v1844_v17 = vld [vmem:[%s12796_s2 + $0x48] sm:$0xff]  ;;  %v13570_v33 = vld [vmem:[#allocation29_spill] sm:$0xff] }
 0x2a7   :  { %v2084_v50 = vsub.f32 %v1860_v3, %v1972_v58  ;;  %v13571_v58 = vld [vmem:[#allocation77_spill] sm:$0xff] }
 0x2a8   :  { %v10420_v38 = vpop.permute.xlu1 %2363  ;;  %2935 = vperm.xlu1 %6643, %v2077_v12   ;;  %v10422_v61 = vpop.permute.xlu0 %2418  ;;  %v1951_v3 = vmul.f32 %v13571_v58, %v13570_v33  ;;  %v1857_v58 = vld [vmem:[%s12796_s2 + $0xb0] sm:$0xff] }
 0x2a9   :  { %13563 = vst [vmem:[#allocation27_spill] sm:$0xff] %v10420_v38  ;;  %2880 = vperm.xlu0 %6642, %v2066_v29   ;;  %v1956_v38 = vmul.f32 %v13567_v52, %v13566_v31  ;;  %v2079_v29 = vsub.f32 %v1855_v23, %v1967_v34  ;;  %v13572_v31 = vld [vmem:[#allocation88_spill] sm:$0xff]  ;;  %v13573_v52 = vld [vmem:[#allocation55_spill] sm:$0xff]  ;;  %v1862_v34 = vld [vmem:[%s12796_s2 + $0xd8] sm:$0xff] }
 0x2aa   :  { %v13576_v23 = vld [vmem:[#allocation38_spill] sm:$0xff] }
 0x2ab   :  { %v2068_v20 = vsub.f32 %v1844_v17, %v1956_v38  ;;  %v13577_v38 = vld [vmem:[#allocation90_spill] sm:$0xff] }
 0x2ac   :  { %v10434_v12 = vpop.permute.xlu1 %2373  ;;  %2855 = vperm.xlu1 %6643, %v2061_v27   ;;  %v10436_v40 = vpop.permute.xlu0 %2428  ;;  %v1969_v17 = vmul.f32 %v13577_v38, %v13576_v23  ;;  %v1841_v38 = vld [vmem:[%s12796_s2 + $0x30] sm:$0xff] }
 0x2ad   :  { %13568 = vst [vmem:[#allocation44_spill] sm:$0xff] %v10434_v12  ;;  %13569 = vst [vmem:[#allocation96_spill] sm:$0xff] %v10436_v40  ;;  %2970 = vperm.xlu0 %6642, %v2084_v50   ;;  %v1974_v12 = vmul.f32 %v13573_v52, %v13572_v31  ;;  %v2063_v50 = vsub.f32 %v1839_v55, %v1951_v3  ;;  %v13578_v31 = vld [vmem:[#allocation32_spill] sm:$0xff]  ;;  %v13579_v52 = vld [vmem:[#allocation81_spill] sm:$0xff] }
 0x2ae   :  { %v1846_v3 = vld [vmem:[%s12796_s2 + $0x58] sm:$0xff] }
 0x2af   :  { %v2086_v33 = vsub.f32 %v1862_v34, %v1974_v12  ;;  %v13582_v55 = vld [vmem:[#allocation37_spill] sm:$0xff]  ;;  %v13583_v12 = vld [vmem:[#allocation92_spill] sm:$0xff] }
 0x2b0   :  { %v10448_v27 = vpop.permute.xlu1 %2383  ;;  %2945 = vperm.xlu1 %6643, %v2079_v29   ;;  %v10450_v40 = vpop.permute.xlu0 %2438  ;;  %v1953_v34 = vmul.f32 %v13583_v12, %v13582_v55  ;;  %v1859_v12 = vld [vmem:[%s12796_s2 + $0xc0] sm:$0xff] }
 0x2b1   :  { %13574 = vst [vmem:[#allocation21_spill] sm:$0xff] %v10448_v27  ;;  %13575 = vst [vmem:[#allocation60_spill] sm:$0xff] %v10450_v40  ;;  %2890 = vperm.xlu0 %6642, %v2068_v20   ;;  %v1958_v27 = vmul.f32 %v13579_v52, %v13578_v31  ;;  %v2081_v20 = vsub.f32 %v1857_v58, %v1969_v17  ;;  %v13584_v31 = vld [vmem:[#allocation93_spill] sm:$0xff]  ;;  %v13585_v52 = vld [vmem:[#allocation78_spill] sm:$0xff] }
 0x2b2   :  { %v1864_v17 = vld [vmem:[%s12796_s2 + $0xe8] sm:$0xff]  ;;  %v13588_v58 = vld [vmem:[#allocation46_spill] sm:$0xff] }
 0x2b3   :  { %v2070_v23 = vsub.f32 %v1846_v3, %v1958_v27  ;;  %v13589_v27 = vld [vmem:[#allocation98_spill] sm:$0xff] }
 0x2b4   :  { %v10462_v29 = vpop.permute.xlu1 %2393  ;;  %2865 = vperm.xlu1 %6643, %v2063_v50   ;;  %v10464_v40 = vpop.permute.xlu0 %2448  ;;  %v1971_v3 = vmul.f32 %v13589_v27, %v13588_v58  ;;  %v1843_v27 = vld [vmem:[%s12796_s2 + $0x40] sm:$0xff] }
 0x2b5   :  { %13580 = vst [vmem:[#allocation80_spill] sm:$0xff] %v10462_v29  ;;  %13581 = vst [vmem:[#allocation66_spill] sm:$0xff] %v10464_v40  ;;  %2980 = vperm.xlu0 %6642, %v2086_v33   ;;  %v1976_v29 = vmul.f32 %v13585_v52, %v13584_v31  ;;  %v2065_v33 = vsub.f32 %v1841_v38, %v1953_v34  ;;  %v13590_v31 = vld [vmem:[#allocation36_spill] sm:$0xff]  ;;  %v13591_v52 = vld [vmem:[#allocation89_spill] sm:$0xff] }
 0x2b6   :  { %v1848_v34 = vld [vmem:[%s12796_s2 + $0x68] sm:$0xff]  ;;  %v13594_v38 = vld [vmem:[#allocation49_spill] sm:$0xff] }
 0x2b7   :  { %v2088_v55 = vsub.f32 %v1864_v17, %v1976_v29  ;;  %v13595_v29 = vld [vmem:[#allocation31_spill] sm:$0xff] }
 0x2b8   :  { %v10476_v50 = vpop.permute.xlu1 %2403  ;;  %2955 = vperm.xlu1 %6643, %v2081_v20   ;;  %v10478_v40 = vpop.permute.xlu0 %2458  ;;  %v1955_v17 = vmul.f32 %v13595_v29, %v13594_v38  ;;  %v1861_v29 = vld [vmem:[%s12796_s2 + $0xd0] sm:$0xff] }
 0x2b9   :  { %13586 = vst [vmem:[#allocation23_spill] sm:$0xff] %v10476_v50  ;;  %13587 = vst [vmem:[#allocation82_spill] sm:$0xff] %v10478_v40  ;;  %2900 = vperm.xlu0 %6642, %v2070_v23   ;;  %v1960_v50 = vmul.f32 %v13591_v52, %v13590_v31  ;;  %v2083_v23 = vsub.f32 %v1859_v12, %v1971_v3  ;;  %v13596_v31 = vld [vmem:[#allocation97_spill] sm:$0xff]  ;;  %v13597_v52 = vld [vmem:[#allocation86_spill] sm:$0xff] }
 0x2ba   :  { %v1866_v3 = vld [vmem:[%s12796_s2 + $0xf8] sm:$0xff]  ;;  %v13600_v12 = vld [vmem:[#allocation54_spill] sm:$0xff] }
 0x2bb   :  { %v2072_v58 = vsub.f32 %v1848_v34, %v1960_v50  ;;  %v13601_v50 = vld [vmem:[#allocation95_spill] sm:$0xff] }
 0x2bc   :  { %v10490_v20 = vpop.permute.xlu1 %2413  ;;  %2875 = vperm.xlu1 %6643, %v2065_v33   ;;  %v10492_v40 = vpop.permute.xlu0 %2468  ;;  %v1973_v34 = vmul.f32 %v13601_v50, %v13600_v12  ;;  %v1845_v50 = vld [vmem:[%s12796_s2 + $0x50] sm:$0xff] }
 0x2bd   :  { %13592 = vst [vmem:[#allocation28_spill] sm:$0xff] %v10490_v20  ;;  %13593 = vst [vmem:[#allocation73_spill] sm:$0xff] %v10492_v40  ;;  %2990 = vperm.xlu0 %6642, %v2088_v55   ;;  %v1978_v20 = vmul.f32 %v13597_v52, %v13596_v31  ;;  %v2067_v55 = vsub.f32 %v1843_v27, %v1955_v17  ;;  %v13602_v31 = vld [vmem:[#allocation40_spill] sm:$0xff]  ;;  %v13603_v52 = vld [vmem:[#allocation22_spill] sm:$0xff] }
 0x2be   :  { %v1850_v17 = vld [vmem:[%s12796_s2 + $0x78] sm:$0xff] }
 0x2bf   :  { %v2090_v38 = vsub.f32 %v1866_v3, %v1978_v20  ;;  %v13606_v27 = vld [vmem:[#allocation57_spill] sm:$0xff]  ;;  %v13607_v20 = vld [vmem:[#allocation35_spill] sm:$0xff] }
 0x2c0   :  { %v10504_v33 = vpop.permute.xlu1 %2423  ;;  %2965 = vperm.xlu1 %6643, %v2083_v23   ;;  %v10506_v40 = vpop.permute.xlu0 %2478  ;;  %v1957_v3 = vmul.f32 %v13607_v20, %v13606_v27  ;;  %v1863_v20 = vld [vmem:[%s12796_s2 + $0xe0] sm:$0xff] }
 0x2c1   :  { %13598 = vst [vmem:[#allocation29_spill] sm:$0xff] %v10504_v33  ;;  %13599 = vst [vmem:[#allocation77_spill] sm:$0xff] %v10506_v40  ;;  %2910 = vperm.xlu0 %6642, %v2072_v58   ;;  %v1962_v33 = vmul.f32 %v13603_v52, %v13602_v31  ;;  %v2085_v58 = vsub.f32 %v1861_v29, %v1973_v34  ;;  %v13608_v31 = vld [vmem:[#allocation83_spill] sm:$0xff] }
 0x2c2   :  { %v13609_v52 = vld [vmem:[#allocation155_spill] sm:$0xff] }
 0x2c3   :  { %v2074_v12 = vsub.f32 %v1850_v17, %v1962_v33  ;;  %v1884_v34 = vld [vmem:[%s12796_s2 + $0x188] sm:$0xff]  ;;  %v13613_v33 = vld [vmem:[#allocation148_spill] sm:$0xff] }
 0x2c4   :  { %v10518_v23 = vpop.permute.xlu1 %2433  ;;  %2885 = vperm.xlu1 %6643, %v2067_v55   ;;  %v10520_v40 = vpop.permute.xlu0 %2488  ;;  %v13612_v29 = vld [vmem:[#allocation43_spill] sm:$0xff] }
 0x2c5   :  { %13604 = vst [vmem:[#allocation88_spill] sm:$0xff] %v10518_v23  ;;  %13605 = vst [vmem:[#allocation55_spill] sm:$0xff] %v10520_v40  ;;  %3000 = vperm.xlu0 %6642, %v2090_v38   ;;  %v1996_v23 = vmul.f32 %v13609_v52, %v13608_v31  ;;  %v2069_v38 = vsub.f32 %v1845_v50, %v1957_v3  ;;  %v1975_v17 = vmul.f32 %v13613_v33, %v13612_v29  ;;  %v13614_v31 = vld [vmem:[#allocation42_spill] sm:$0xff]  ;;  %v1868_v3 = vld [vmem:[%s12796_s2 + $0x108] sm:$0xff] }
 0x2c6   :  { %v13615_v52 = vld [vmem:[#allocation94_spill] sm:$0xff]  ;;  %v13618_v50 = vld [vmem:[#allocation68_spill] sm:$0xff] }
 0x2c7   :  { %v2108_v27 = vsub.f32 %v1884_v34, %v1996_v23  ;;  %v13619_v23 = vld [vmem:[#allocation39_spill] sm:$0xff]  ;;  %v1847_v33 = vld [vmem:[%s12796_s2 + $0x60] sm:$0xff] }
 0x2c8   :  { %v10532_v55 = vpop.permute.xlu1 %2443  ;;  %2975 = vperm.xlu1 %6643, %v2085_v58   ;;  %v10534_v40 = vpop.permute.xlu0 %2498  ;;  %v1959_v34 = vmul.f32 %v13619_v23, %v13618_v50  ;;  %v1865_v23 = vld [vmem:[%s12796_s2 + $0xf0] sm:$0xff] }
 0x2c9   :  { %13610 = vst [vmem:[#allocation38_spill] sm:$0xff] %v10532_v55  ;;  %13611 = vst [vmem:[#allocation90_spill] sm:$0xff] %v10534_v40  ;;  %2920 = vperm.xlu0 %6642, %v2074_v12   ;;  %v1980_v55 = vmul.f32 %v13615_v52, %v13614_v31  ;;  %v2087_v12 = vsub.f32 %v1863_v20, %v1975_v17  ;;  %v13620_v31 = vld [vmem:[#allocation99_spill] sm:$0xff]  ;;  %v13621_v52 = vld [vmem:[#allocation157_spill] sm:$0xff] }
 0x2ca   :  { %v1886_v17 = vld [vmem:[%s12796_s2 + $0x198] sm:$0xff]  ;;  %v13624_v20 = vld [vmem:[#allocation51_spill] sm:$0xff] }
 0x2cb   :  { %v2092_v29 = vsub.f32 %v1868_v3, %v1980_v55  ;;  %v13625_v55 = vld [vmem:[#allocation150_spill] sm:$0xff] }
 0x2cc   :  { %v10546_v58 = vpop.permute.xlu1 %2453  ;;  %2895 = vperm.xlu1 %6643, %v2069_v38   ;;  %v10548_v40 = vpop.permute.xlu0 %2508  ;;  %v1977_v3 = vmul.f32 %v13625_v55, %v13624_v20  ;;  %v1849_v55 = vld [vmem:[%s12796_s2 + $0x70] sm:$0xff] }
 0x2cd   :  { %13616 = vst [vmem:[#allocation32_spill] sm:$0xff] %v10546_v58  ;;  %13617 = vst [vmem:[#allocation81_spill] sm:$0xff] %v10548_v40  ;;  %3090 = vperm.xlu0 %6642, %v2108_v27   ;;  %v1998_v58 = vmul.f32 %v13621_v52, %v13620_v31  ;;  %v2071_v27 = vsub.f32 %v1847_v33, %v1959_v34  ;;  %v13626_v31 = vld [vmem:[#allocation50_spill] sm:$0xff]  ;;  %v13627_v52 = vld [vmem:[#allocation87_spill] sm:$0xff] }
 0x2ce   :  { %v1870_v34 = vld [vmem:[%s12796_s2 + $0x118] sm:$0xff]  ;;  %v13629_v33 = vld [vmem:[#allocation76_spill] sm:$0xff] }
 0x2cf   :  { %v2110_v50 = vsub.f32 %v1886_v17, %v1998_v58  ;;  %v13630_v58 = vld [vmem:[#allocation62_spill] sm:$0xff] }
 0x2d0   :  { %v10560_v38 = vpop.permute.xlu1 %2463  ;;  %2985 = vperm.xlu1 %6643, %v2087_v12   ;;  %v10562_v40 = vpop.permute.xlu0 %2518  ;;  %v1961_v17 = vmul.f32 %v13630_v58, %v13629_v33  ;;  %v1883_v33 = vld [vmem:[%s12796_s2 + $0x180] sm:$0xff]  ;;  %v13635_v58 = vld [vmem:[#allocation147_spill] sm:$0xff] }
 0x2d1   :  { %13622 = vst [vmem:[#allocation37_spill] sm:$0xff] %v10560_v38  ;;  %13623 = vst [vmem:[#allocation92_spill] sm:$0xff] %v10562_v40  ;;  %3010 = vperm.xlu0 %6642, %v2092_v29   ;;  %v1982_v38 = vmul.f32 %v13627_v52, %v13626_v31  ;;  %v2089_v29 = vsub.f32 %v1865_v23, %v1977_v3  ;;  %v13631_v31 = vld [vmem:[#allocation105_spill] sm:$0xff]  ;;  %v1888_v3 = vld [vmem:[%s12796_s2 + $0x1a8] sm:$0xff] }
 0x2d2   :  { %v2000_v52 = vmul.f32 %v9729_v42, %v13631_v31  ;;  %v13633_v23 = vld [vmem:[#allocation48_spill] sm:$0xff]  ;;  %v13634_v42 = vld [vmem:[#allocation58_spill] sm:$0xff] }
 0x2d3   :  { %v2094_v20 = vsub.f32 %v1870_v34, %v1982_v38  ;;  %v1995_v38 = vmul.f32 %v9802_v53, %v13633_v23  ;;  %v1984_v31 = vmul.f32 %v13635_v58, %v13634_v42  ;;  %v13637_v53 = vld [vmem:[#allocation74_spill] sm:$0xff]  ;;  %v13639_v42 = vld [vmem:[#allocation107_spill] sm:$0xff] }
 0x2d4   :  { %v10574_v12 = vpop.permute.xlu1 %2473  ;;  %2905 = vperm.xlu1 %6643, %v2071_v27   ;;  %v10576_v40 = vpop.permute.xlu0 %2528  ;;  %v2112_v34 = vsub.f32 %v1888_v3, %v2000_v52  ;;  %v1867_v23 = vld [vmem:[%s12796_s2 + $0x100] sm:$0xff]  ;;  %v2002_v58 = vmul.f32 %v9757_v43, %v13639_v42  ;;  %v13642_v43 = vld [vmem:[#allocation47_spill] sm:$0xff] }
 0x2d5   :  { %13628 = vst [vmem:[#allocation93_spill] sm:$0xff] %v10576_v40  ;;  %3100 = vperm.xlu0 %6642, %v2110_v50   ;;  %v2073_v50 = vsub.f32 %v1849_v55, %v1961_v17  ;;  %v1872_v17 = vld [vmem:[%s12796_s2 + $0x128] sm:$0xff]  ;;  %v13638_v55 = vld [vmem:[#allocation102_spill] sm:$0xff] }
 0x2d6   :  { %v1979_v52 = vmul.f32 %v13638_v55, %v13637_v53  ;;  %v2096_v3 = vsub.f32 %v1872_v17, %v1984_v31  ;;  %v1885_v53 = vld [vmem:[%s12796_s2 + $0x190] sm:$0xff]  ;;  %v13643_v55 = vld [vmem:[#allocation149_spill] sm:$0xff] }
 0x2d7   :  { %v1986_v42 = vmul.f32 %v13643_v55, %v13642_v43  ;;  %v13647_v43 = vld [vmem:[#allocation109_spill] sm:$0xff] }
 0x2d8   :  { %v10588_v27 = vpop.permute.xlu1 %2483  ;;  %2995 = vperm.xlu1 %6643, %v2089_v29   ;;  %v10590_v40 = vpop.permute.xlu0 %2538  ;;  %v2004_v55 = vmul.f32 %v9785_v0, %v13647_v43  ;;  %v13650_v0 = vld [vmem:[#allocation70_spill] sm:$0xff] }
 0x2d9   :  { %13632 = vst [vmem:[#allocation78_spill] sm:$0xff] %v10590_v40  ;;  %3020 = vperm.xlu0 %6642, %v2094_v20   ;;  %v2107_v20 = vsub.f32 %v1883_v33, %v1995_v38  ;;  %v1890_v38 = vld [vmem:[%s12796_s2 + $0x1b8] sm:$0xff]  ;;  %v13641_v33 = vld [vmem:[#allocation56_spill] sm:$0xff] }
 0x2da   :  { %v1997_v31 = vmul.f32 %v9830_v49, %v13641_v33  ;;  %v2114_v17 = vsub.f32 %v1890_v38, %v2002_v58  ;;  %v13645_v49 = vld [vmem:[#allocation63_spill] sm:$0xff]  ;;  %v1869_v33 = vld [vmem:[%s12796_s2 + $0x110] sm:$0xff] }
 0x2dc   :  { %v10602_v29 = vpop.permute.xlu1 %2493  ;;  %2915 = vperm.xlu1 %6643, %v2073_v50   ;;  %v10604_v40 = vpop.permute.xlu0 %2548 }
 0x2dd   :  { %13636 = vst [vmem:[#allocation46_spill] sm:$0xff] %v10604_v40  ;;  %3110 = vperm.xlu0 %6642, %v2112_v34   ;;  %v2091_v34 = vsub.f32 %v1867_v23, %v1979_v52  ;;  %v1874_v52 = vld [vmem:[%s12796_s2 + $0x138] sm:$0xff]  ;;  %v13646_v23 = vld [vmem:[#allocation103_spill] sm:$0xff] }
 0x2de   :  { %v1981_v58 = vmul.f32 %v13646_v23, %v13645_v49  ;;  %v2098_v38 = vsub.f32 %v1874_v52, %v1986_v42  ;;  %v1887_v49 = vld [vmem:[%s12796_s2 + $0x1a0] sm:$0xff]  ;;  %v13651_v23 = vld [vmem:[#allocation151_spill] sm:$0xff] }
 0x2df   :  { %v1988_v43 = vmul.f32 %v13651_v23, %v13650_v0  ;;  %v13655_v0 = vld [vmem:[#allocation111_spill] sm:$0xff] }
 0x2e0   :  { %v10616_v50 = vpop.permute.xlu1 %2503  ;;  %3085 = vperm.xlu1 %6643, %v2107_v20   ;;  %v10618_v40 = vpop.permute.xlu0 %2558  ;;  %v2006_v23 = vmul.f32 %v9813_v57, %v13655_v0  ;;  %v13658_v57 = vld [vmem:[#allocation59_spill] sm:$0xff] }
 0x2e1   :  { %13640 = vst [vmem:[#allocation98_spill] sm:$0xff] %v10618_v40  ;;  %3030 = vperm.xlu0 %6642, %v2096_v3   ;;  %v2109_v3 = vsub.f32 %v1885_v53, %v1997_v31  ;;  %v1892_v31 = vld [vmem:[%s12796_s2 + $0x1c8] sm:$0xff]  ;;  %v13649_v53 = vld [vmem:[#allocation65_spill] sm:$0xff] }
 0x2e2   :  { %v1999_v42 = vmul.f32 %v9858_v45, %v13649_v53  ;;  %v2116_v52 = vsub.f32 %v1892_v31, %v2004_v55  ;;  %v13653_v45 = vld [vmem:[#allocation71_spill] sm:$0xff]  ;;  %v1871_v53 = vld [vmem:[%s12796_s2 + $0x120] sm:$0xff] }
 0x2e4   :  { %v10630_v20 = vpop.permute.xlu1 %2513  ;;  %3005 = vperm.xlu1 %6643, %v2091_v34   ;;  %v10632_v40 = vpop.permute.xlu0 %2568 }
 0x2e5   :  { %13644 = vst [vmem:[#allocation36_spill] sm:$0xff] %v10632_v40  ;;  %3120 = vperm.xlu0 %6642, %v2114_v17   ;;  %v2093_v17 = vsub.f32 %v1869_v33, %v1981_v58  ;;  %v1876_v58 = vld [vmem:[%s12796_s2 + $0x148] sm:$0xff]  ;;  %v13654_v33 = vld [vmem:[#allocation104_spill] sm:$0xff] }
 0x2e6   :  { %v1983_v55 = vmul.f32 %v13654_v33, %v13653_v45  ;;  %v2100_v31 = vsub.f32 %v1876_v58, %v1988_v43  ;;  %v1889_v45 = vld [vmem:[%s12796_s2 + $0x1b0] sm:$0xff] }
 0x2e7   :  { %v13659_v33 = vld [vmem:[#allocation152_spill] sm:$0xff] }
 0x2e8   :  { %v10644_v34 = vpop.permute.xlu1 %2523  ;;  %3095 = vperm.xlu1 %6643, %v2109_v3   ;;  %v10646_v40 = vpop.permute.xlu0 %2578  ;;  %v1990_v0 = vmul.f32 %v13659_v33, %v13658_v57  ;;  %v13663_v57 = vld [vmem:[#allocation113_spill] sm:$0xff] }
 0x2e9   :  { %13648 = vst [vmem:[#allocation89_spill] sm:$0xff] %v10644_v34  ;;  %3040 = vperm.xlu0 %6642, %v2098_v38   ;;  %v2111_v38 = vsub.f32 %v1887_v49, %v1999_v42  ;;  %v1894_v42 = vld [vmem:[%s12796_s2 + $0x1d8] sm:$0xff]  ;;  %v13657_v49 = vld [vmem:[#allocation108_spill] sm:$0xff]  ;;  %v2008_v33 = vmul.f32 %v9841_v26, %v13663_v57  ;;  %v13666_v26 = vld [vmem:[#allocation67_spill] sm:$0xff] }
 0x2ea   :  { %v2001_v43 = vmul.f32 %v9886_v41, %v13657_v49  ;;  %v2118_v58 = vsub.f32 %v1894_v42, %v2006_v23  ;;  %v13661_v41 = vld [vmem:[#allocation79_spill] sm:$0xff]  ;;  %v1873_v49 = vld [vmem:[%s12796_s2 + $0x130] sm:$0xff] }
 0x2ec   :  { %v10658_v3 = vpop.permute.xlu1 %2533  ;;  %3015 = vperm.xlu1 %6643, %v2093_v17   ;;  %v10660_v34 = vpop.permute.xlu0 %2588 }
 0x2ed   :  { %13652 = vst [vmem:[#allocation49_spill] sm:$0xff] %v10658_v3  ;;  %3130 = vperm.xlu0 %6642, %v2116_v52   ;;  %v2095_v52 = vsub.f32 %v1871_v53, %v1983_v55  ;;  %v1878_v55 = vld [vmem:[%s12796_s2 + $0x158] sm:$0xff]  ;;  %v13662_v53 = vld [vmem:[#allocation106_spill] sm:$0xff] }
 0x2ee   :  { %v1985_v23 = vmul.f32 %v13662_v53, %v13661_v41  ;;  %v2102_v42 = vsub.f32 %v1878_v55, %v1990_v0  ;;  %v1891_v41 = vld [vmem:[%s12796_s2 + $0x1c0] sm:$0xff]  ;;  %v13667_v53 = vld [vmem:[#allocation153_spill] sm:$0xff] }
 0x2ef   :  { %v1992_v57 = vmul.f32 %v13667_v53, %v13666_v26  ;;  %v13671_v26 = vld [vmem:[#allocation115_spill] sm:$0xff] }
 0x2f0   :  { %v10672_v17 = vpop.permute.xlu1 %2543  ;;  %3105 = vperm.xlu1 %6643, %v2111_v38   ;;  %v10674_v3 = vpop.permute.xlu0 %2598  ;;  %v2010_v53 = vmul.f32 %v9869_v51, %v13671_v26  ;;  %v13673_v51 = vld [vmem:[#allocation75_spill] sm:$0xff] }
 0x2f1   :  { %13656 = vst [vmem:[#allocation31_spill] sm:$0xff] %v10672_v17  ;;  %3050 = vperm.xlu0 %6642, %v2100_v31   ;;  %v2113_v31 = vsub.f32 %v1889_v45, %v2001_v43  ;;  %v1896_v43 = vld [vmem:[%s12796_s2 + $0x1e8] sm:$0xff]  ;;  %v13665_v45 = vld [vmem:[#allocation110_spill] sm:$0xff] }
 0x2f2   :  { %v2003_v0 = vmul.f32 %v9912_v37, %v13665_v45  ;;  %v2120_v55 = vsub.f32 %v1896_v43, %v2008_v33  ;;  %v13669_v37 = vld [vmem:[#allocation91_spill] sm:$0xff]  ;;  %v1875_v45 = vld [vmem:[%s12796_s2 + $0x140] sm:$0xff] }
 0x2f4   :  { %v10686_v38 = vpop.permute.xlu1 %2553  ;;  %3025 = vperm.xlu1 %6643, %v2095_v52   ;;  %v10688_v17 = vpop.permute.xlu0 %2608 }
 0x2f5   :  { %13660 = vst [vmem:[#allocation97_spill] sm:$0xff] %v10686_v38  ;;  %3140 = vperm.xlu0 %6642, %v2118_v58   ;;  %v2097_v58 = vsub.f32 %v1873_v49, %v1985_v23  ;;  %v1880_v23 = vld [vmem:[%s12796_s2 + $0x168] sm:$0xff]  ;;  %v13670_v49 = vld [vmem:[#allocation156_spill] sm:$0xff] }
 0x2f6   :  { %v1987_v33 = vmul.f32 %v13670_v49, %v13669_v37  ;;  %v2104_v43 = vsub.f32 %v1880_v23, %v1992_v57  ;;  %v1893_v23 = vld [vmem:[%s12796_s2 + $0x1d0] sm:$0xff]  ;;  %v13674_v37 = vld [vmem:[#allocation154_spill] sm:$0xff] }
 0x2f7   :  { %v1994_v49 = vmul.f32 %v13674_v37, %v13673_v51  ;;  %v2028_v51 = vmul.f32 %v10114_v6, %v9926_v5  ;;  %v13679_v5 = vld [vmem:[#allocation117_spill] sm:$0xff] }
 0x2f8   :  { %v10700_v52 = vpop.permute.xlu1 %2563  ;;  %3115 = vperm.xlu1 %6643, %v2113_v31   ;;  %v10702_v38 = vpop.permute.xlu0 %2618  ;;  %v13680_v6 = vld [vmem:[#allocation169_spill] sm:$0xff] }
 0x2f9   :  { %13664 = vst [vmem:[#allocation86_spill] sm:$0xff] %v10700_v52  ;;  %3060 = vperm.xlu0 %6642, %v2102_v42   ;;  %v2115_v42 = vsub.f32 %v1891_v41, %v2003_v0  ;;  %v1898_v0 = vld [vmem:[%s12796_s2 + $0x1f8] sm:$0xff]  ;;  %v2005_v41 = vmul.f32 %v9940_v36, %v9743_v63  ;;  %v13676_v63 = vld [vmem:[#allocation100_spill] sm:$0xff]  ;;  %v13677_v36 = vld [vmem:[#allocation158_spill] sm:$0xff] }
 0x2fa   :  { %v2122_v57 = vsub.f32 %v1898_v0, %v2010_v53  ;;  %v1877_v0 = vld [vmem:[%s12796_s2 + $0x150] sm:$0xff] }
 0x2fc   :  { %v10714_v31 = vpop.permute.xlu1 %2573  ;;  %3035 = vperm.xlu1 %6643, %v2097_v58   ;;  %v10716_v52 = vpop.permute.xlu0 %2628 }
 0x2fd   :  { %13668 = vst [vmem:[#allocation54_spill] sm:$0xff] %v10716_v52  ;;  %3150 = vperm.xlu0 %6642, %v2120_v55   ;;  %v2099_v55 = vsub.f32 %v1875_v45, %v1987_v33  ;;  %v1882_v33 = vld [vmem:[%s12796_s2 + $0x178] sm:$0xff]  ;;  %v1989_v45 = vmul.f32 %v13677_v36, %v13676_v63  ;;  %v2012_v63 = vmul.f32 %v13680_v6, %v13679_v5 }
 0x2fe   :  { %v2106_v53 = vsub.f32 %v1882_v33, %v1994_v49  ;;  %v1895_v33 = vld [vmem:[%s12796_s2 + $0x1e0] sm:$0xff]  ;;  %v2030_v5 = vmul.f32 %v10142_v8, %v9952_v21  ;;  %v13686_v21 = vld [vmem:[#allocation172_spill] sm:$0xff] }
 0x300   :  { %v10728_v58 = vpop.permute.xlu1 %2583  ;;  %3125 = vperm.xlu1 %6643, %v2115_v42   ;;  %v10730_v52 = vpop.permute.xlu0 %2638 }
 0x301   :  { %13672 = vst [vmem:[#allocation95_spill] sm:$0xff] %v10730_v52  ;;  %3070 = vperm.xlu0 %6642, %v2104_v43   ;;  %v2117_v43 = vsub.f32 %v1893_v23, %v2005_v41  ;;  %v1916_v41 = vld [vmem:[%s12796_s2 + $0x288] sm:$0xff]  ;;  %v2007_v23 = vmul.f32 %v9968_v62, %v9771_v18  ;;  %v13682_v18 = vld [vmem:[#allocation112_spill] sm:$0xff] }
 0x302   :  { %v2140_v49 = vsub.f32 %v1916_v41, %v2028_v51  ;;  %v1879_v41 = vld [vmem:[%s12796_s2 + $0x160] sm:$0xff] }
 0x304   :  { %v10742_v42 = vpop.permute.xlu1 %2593  ;;  %3045 = vperm.xlu1 %6643, %v2099_v55   ;;  %v10744_v26 = vpop.permute.xlu0 %2648 }
 0x305   :  { %13675 = vst [vmem:[#allocation40_spill] sm:$0xff] %v10744_v26  ;;  %3160 = vperm.xlu0 %6642, %v2122_v57   ;;  %v2101_v57 = vsub.f32 %v1877_v0, %v1989_v45  ;;  %v2119_v45 = vsub.f32 %v1895_v33, %v2007_v23  ;;  %v13681_v0 = vld [vmem:[#allocation101_spill] sm:$0xff]  ;;  %v13684_v33 = vld [vmem:[#allocation116_spill] sm:$0xff] }
 0x306   :  { %v1991_v62 = vmul.f32 %v13682_v18, %v13681_v0  ;;  %v1897_v0 = vld [vmem:[%s12796_s2 + $0x1f0] sm:$0xff]  ;;  %v13685_v18 = vld [vmem:[#allocation119_spill] sm:$0xff] }
 0x307   :  { %v2014_v8 = vmul.f32 %v13686_v21, %v13685_v18  ;;  %v1881_v18 = vld [vmem:[%s12796_s2 + $0x170] sm:$0xff] }
 0x308   :  { %v10756_v55 = vpop.permute.xlu1 %2603  ;;  %3135 = vperm.xlu1 %6643, %v2117_v43   ;;  %v10758_v37 = vpop.permute.xlu0 %2658  ;;  %v2103_v23 = vsub.f32 %v1879_v41, %v1991_v62  ;;  %v1902_v62 = vld [vmem:[%s12796_s2 + $0x218] sm:$0xff] }
 0x309   :  { %13678 = vst [vmem:[#allocation22_spill] sm:$0xff] %v10758_v37  ;;  %3080 = vperm.xlu0 %6642, %v2106_v53   ;;  %v1900_v53 = vld [vmem:[%s12796_s2 + $0x208] sm:$0xff]  ;;  %v13688_v41 = vld [vmem:[#allocation41_spill] sm:$0xff] }
 0x30a   :  { %v2124_v51 = vsub.f32 %v1900_v53, %v2012_v63  ;;  %v2009_v63 = vmul.f32 %v9996_v54, %v13684_v33  ;;  %v2126_v33 = vsub.f32 %v1902_v62, %v2014_v8  ;;  %v2027_v8 = vmul.f32 %v10228_v44, %v10056_v22  ;;  %v7366_v22 = vld [vmem:[%s12794_s0 + $0x88] sm:$0xff] }
 0x30b   :  { %v2748_v44 = vmul.f32 %v7366_v22, %v10124_v11  ;;  %v1899_v11 = vld [vmem:[%s12796_s2 + $0x200] sm:$0xff]  ;;  %v13698_v22 = vld [vmem:[#allocation123_spill] sm:$0xff] }
 0x30c   :  { %v10770_v43 = vpop.permute.xlu1 %2613  ;;  %3055 = vperm.xlu1 %6643, %v2101_v57   ;;  %v2931_v36 = vpop.permute.xlu0 %2930  ;;  %v2121_v54 = vsub.f32 %v1897_v0, %v2009_v63  ;;  %v1920_v63 = vld [vmem:[%s12796_s2 + $0x2a8] sm:$0xff] }
 0x30d   :  { %3250 = vperm.xlu0 %6642, %v2140_v49   ;;  %v1918_v49 = vld [vmem:[%s12796_s2 + $0x298] sm:$0xff] }
 0x30e   :  { %v2142_v53 = vsub.f32 %v1918_v49, %v2030_v5  ;;  %v13689_v5 = vld [vmem:[#allocation114_spill] sm:$0xff] }
 0x30f   :  { %v1993_v49 = vmul.f32 %v13689_v5, %v13688_v41 }
 0x310   :  { %v10782_v6 = vpop.permute.xlu1 %2623  ;;  %3145 = vperm.xlu1 %6643, %v2119_v45   ;;  %v2851_v57 = vpop.permute.xlu0 %2850 }
 0x311   :  { %13683 = vst [vmem:[#allocation57_spill] sm:$0xff] %v10782_v6  ;;  %3170 = vperm.xlu0 %6642, %v2124_v51   ;;  %v27_v51 = vlaneseq  ;;  %v2105_v0 = vsub.f32 %v1881_v18, %v1993_v49  ;;  %v13693_v18 = vld [vmem:[#allocation118_spill] sm:$0xff] }
 0x314   :  { %v10794_v37 = vpop.permute.xlu1 %2633  ;;  %3065 = vperm.xlu1 %6643, %v2103_v23   ;;  %v10796_v45 = vpop.permute.xlu0 %2940  ;;  %v2032_v23 = vmul.f32 %v10167_v28, %v9980_v19  ;;  %v1915_v19 = vld [vmem:[%s12796_s2 + $0x280] sm:$0xff]  ;;  %v13691_v28 = vld [vmem:[#allocation121_spill] sm:$0xff] }
 0x315   :  { %13687 = vst [vmem:[#allocation35_spill] sm:$0xff] %v10794_v37  ;;  %3260 = vperm.xlu0 %6642, %v2142_v53   ;;  %v28_v53 = vand.u32 127, %v27_v51  ;;  %v1904_v51 = vld [vmem:[%s12796_s2 + $0x228] sm:$0xff] }
 0x316   :  { %v2144_v62 = vsub.f32 %v1920_v63, %v2032_v23  ;;  %v2034_v23 = vmul.f32 %v10191_v32, %v10007_v25  ;;  %v7367_v63 = vld [vmem:[%s12794_s0 + $0x80] sm:$0xff]  ;;  %v7368_v25 = vld [vmem:[%s12794_s0 + $0x8] sm:$0xff]  ;;  %v13694_v32 = vld [vmem:[#allocation173_spill] sm:$0xff] }
 0x317   :  { %v33_v49 = vand.u32 7, %v28_v53  ;;  %v1922_v53 = vld [vmem:[%s12796_s2 + $0x2b8] sm:$0xff] }
 0x318   :  { %v10808_v21 = vpop.permute.xlu1 %2643  ;;  %3155 = vperm.xlu1 %6643, %v2121_v54   ;;  %v10810_v26 = vpop.permute.xlu0 %2860  ;;  %v2016_v54 = vmul.f32 %v9947_v10, %v13691_v28  ;;  %v2011_v10 = vmul.f32 %v10021_v9, %v13693_v18  ;;  %v3420_v28 = vadd.f32 %v2931_v36, %v2748_v44  ;;  %v13699_v44 = vld [vmem:[#allocation174_spill] sm:$0xff] }
 0x319   :  { %13690 = vst [vmem:[#allocation83_spill] sm:$0xff] %v10808_v21  ;;  %3180 = vperm.xlu0 %6642, %v2126_v33   ;;  %v2139_v33 = vsub.f32 %v1915_v19, %v2027_v8  ;;  %vm10853_vm1 = vcmp.lt.s32.totalorder %v33_v49, 7  ;;  %v7369_v18 = vld [vmem:[%s12794_s0] sm:$0xff] }
 0x31a   :  { %v2123_v19 = vsub.f32 %v1899_v11, %v2011_v10  ;;  %v1917_v10 = vld [vmem:[%s12796_s2 + $0x290] sm:$0xff]  ;;  %vm10876_vm2 = vmpackc.low %vm10853_vm1, %vm10853_vm1 }
 0x31b   :  { %v7081_v11 = vld [vmem:[%s12797_s3 + $0x130] ss:$28 sps:$4 sm:$0xff]  }
 0x31c   :  { %3075 = vperm.xlu1 %6643, %v2105_v0   ;;  %v10822_v41 = vpop.permute.xlu1 %2653  ;;  %v10824_v5 = vpop.permute.xlu0 %2950  ;;  %v2747_v0 = vmul.f32 %v7367_v63, %v10240_v14  ;;  %v2732_v14 = vmul.f32 %v7368_v25, %v13694_v32  ;;  %v13700_v63 = vld [vmem:[#allocation175_spill] sm:$0xff]  ;;  %v1901_v32 = vld [vmem:[%s12796_s2 + $0x210] sm:$0xff] }
 0x31d   :  { %13692 = vst [vmem:[#allocation155_spill] sm:$0xff] %v10822_v41  ;;  %3270 = vperm.xlu0 %6642, %v2144_v62   ;;  %v2128_v41 = vsub.f32 %v1904_v51, %v2016_v54  ;;  %v13695_v62 = vmov 0  ;;  %v2146_v54 = vsub.f32 %v1922_v53, %v2034_v23  ;;  %v2029_v51 = vmul.f32 %v10250_v4, %v10084_v56  ;;  %v1906_v56 = vld [vmem:[%s12796_s2 + $0x238] sm:$0xff] }
 0x31e   :  { %v13696_v62 = vsel %vm10853_vm1, 4294967295, %v13695_v62  ;;  %v2731_v25 = vmul.f32 %v7369_v18, %v13700_v63  ;;  %v7371_v18 = vld [vmem:[%s12794_s0 + $0x90] sm:$0xff] }
 0x31f   :  { %13697 = vst [vmem:[#allocation43_spill] sm:$0xff] %v13696_v62  ;;  %v2749_v63 = vmul.f32 %v7371_v18, %v10262_v48  ;;  %v13705_v48 = vld [vmem:[#allocation139_spill] sm:$0xff]  ;;  %v13709_v18 = vld [vmem:[#allocation137_spill] sm:$0xff] }
 0x320   :  { %3245 = vperm.xlu1 %6643, %v2139_v33   ;;  %v2926_v9 = vpop.permute.xlu1 %2925  ;;  %v10847_v8 = vpop.permute.xlu0 %2870  ;;  %v2018_v33 = vmul.f32 %v13699_v44, %v13698_v22  ;;  %v13703_v22 = vld [vmem:[#allocation120_spill] sm:$0xff] }
 0x321   :  { %v3419_v36 = vadd.f32 %v2926_v9, %v2747_v0  ;;  %3190 = vperm.xlu0 %6642, %v2128_v41   ;;  %v3532_v0 = vmax.f32 %v3420_v28, 0.0  ;;  %v3404_v41 = vadd.f32 %v2851_v57, %v2732_v14  ;;  %v7370_v57 = vld [vmem:[%s12794_s0 + $0x98] sm:$0xff]  ;;  %v7006_v14 = vld [vmem:[%s12797_s3 + $0x4] ss:$28 sps:$4 sm:$0xff]   ;;  %v2013_v44 = vmul.f32 %v10047_v1, %v13703_v22 }
 0x322   :  { %v2750_v28 = vmul.f32 %v7370_v57, %v10152_v15  ;;  %v1924_v15 = vld [vmem:[%s12796_s2 + $0x2c8] sm:$0xff]  ;;  %4181 = vmatprep.mubr.bf16.mxu0 %v7006_v14  ;;  %v13707_v14 = vld [vmem:[#allocation125_spill] sm:$0xff] }
 0x323   :  { %v3531_v49 = vmax.f32 %v3419_v36, 0.0  ;;  %v2141_v36 = vsub.f32 %v1917_v10, %v2029_v51  ;;  %v2125_v57 = vsub.f32 %v1901_v32, %v2013_v44  ;;  %v13710_v32 = vld [vmem:[#allocation7_spill] sm:$0xff] }
 0x324   :  { %3165 = vperm.xlu1 %6643, %v2123_v19   ;;  %v2846_v4 = vpop.permute.xlu1 %2845  ;;  %v10871_v23 = vpop.permute.xlu0 %2960  ;;  %v2130_v19 = vsub.f32 %v1906_v56, %v2018_v33  ;;  %v3422_v51 = vadd.f32 %v10796_v45, %v2750_v28  ;;  %v1919_v56 = vld [vmem:[%s12796_s2 + $0x2a0] sm:$0xff]  ;;  %v10931_v44 = vmul.f32 0.020408163, %v13710_v32 }
 0x325   :  { %v3403_v53 = vadd.f32 %v2846_v4, %v2731_v25  ;;  %3280 = vperm.xlu0 %6642, %v2146_v54   ;;  %v6065_v9 = vpack.c.bf16 %v3532_v0, %v3531_v49  ;;  %v2036_v54 = vmul.f32 %v10213_v35, %v10035_v60  ;;  %v3516_v25 = vmax.f32 %v3404_v41, 0.0  ;;  %v13704_v49 = vld [vmem:[#allocation6_spill] sm:$0xff]  ;;  %v7372_v35 = vld [vmem:[%s12794_s0 + $0x18] sm:$0xff]  ;;  %v1908_v4 = vld [vmem:[%s12796_s2 + $0x248] sm:$0xff] }
 0x326   :  { %v10907_v60 = vmul.f32 0.020408163, %v13704_v49  ;;  %v2734_v41 = vmul.f32 %v7372_v35, %v13705_v48  ;;  %v13711_v48 = vld [vmem:[#allocation122_spill] sm:$0xff] }
 0x327   :  { %v3515_v33 = vmax.f32 %v3403_v53, 0.0  ;;  %6250 = vmatprep.subr.msk.bf16.mxu0 %vm10876_vm2, %v6065_v9  ;;  %v2148_v28 = vsub.f32 %v1924_v15, %v2036_v54  ;;  %v13706_v53 = vld [vmem:[#allocation138_spill] sm:$0xff]  ;;  %v7374_v54 = vld [vmem:[%s12794_s0 + $0xa8] sm:$0xff] }
 0x328   :  { %3255 = vperm.xlu1 %6643, %v2141_v36   ;;  %v2936_v1 = vpop.permute.xlu1 %2935  ;;  %v10904_v0 = vpop.permute.xlu0 %2880  ;;  %v2031_v9 = vmul.f32 %v10272_v59, %v13706_v53  ;;  %v13708_v36 = vld [vmem:[#allocation176_spill] sm:$0xff]  ;;  %v2752_v49 = vmul.f32 %v7374_v54, %v10177_v47 }
 0x329   :  { %v3421_v10 = vadd.f32 %v2936_v1, %v2749_v63  ;;  %3200 = vperm.xlu0 %6642, %v2130_v19   ;;  %v6041_v45 = vpack.c.bf16 %v3516_v25, %v3515_v33  ;;  %v2020_v22 = vmul.f32 %v13708_v36, %v13707_v14  ;;  %v7373_v19 = vld [vmem:[%s12794_s0 + $0x10] sm:$0xff]  ;;  %v3534_v25 = vmax.f32 %v3422_v51, 0.0  ;;  %v1926_v36 = vld [vmem:[%s12796_s2 + $0x2d8] sm:$0xff] }
 0x32a   :  { %v2733_v63 = vmul.f32 %v7373_v19, %v13709_v18  ;;  %v3406_v33 = vadd.f32 %v10810_v26, %v2734_v41  ;;  %v1903_v26 = vld [vmem:[%s12796_s2 + $0x220] sm:$0xff]  ;;  %v2143_v53 = vsub.f32 %v1919_v56, %v2031_v9  ;;  %v13714_v19 = vld [vmem:[#allocation143_spill] sm:$0xff]  ;;  %v1262_v56 = vmul.f32 %v10907_v60, %v10907_v60 }
 0x32b   :  { %v3533_v1 = vmax.f32 %v3421_v10, 0.0  ;;  %6251 = vmatpush3.bf16.msk.msra.mxu0 %vm10876_vm2, %v6041_v45  ;;  %v13712_v41 = vld [vmem:[#allocation182_spill] sm:$0xff]  ;;  %v13713_v45 = vld [vmem:[#allocation159_spill] sm:$0xff]  ;;  %v2132_v14 = vsub.f32 %v1908_v4, %v2020_v22  ;;  %v2038_v47 = vmul.f32 %v10235_v30, %v13714_v19  ;;  %v13715_v4 = vld [vmem:[#allocation8_spill] sm:$0xff] }
 0x32c   :  { %3175 = vperm.xlu1 %6643, %v2125_v57   ;;  %v2856_v59 = vpop.permute.xlu1 %2855  ;;  %v10933_v15 = vpop.permute.xlu0 %2970  ;;  %v2015_v10 = vmul.f32 %v13712_v41, %v13711_v48  ;;  %v1150_v57 = vmul.f32 0.020408163, %v13713_v45  ;;  %v10960_v9 = vmul.f32 0.020408163, %v13715_v4  ;;  %v13719_v19 = vld [vmem:[#allocation140_spill] sm:$0xff]  ;;  %v7377_v4 = vld [vmem:[%s12794_s0 + $0x20] sm:$0xff] }
 0x32d   :  { %v6068_v51 = vpack.c.bf16 %v3534_v25, %v3533_v1  ;;  %v3405_v35 = vadd.f32 %v2856_v59, %v2733_v63  ;;  %3290 = vperm.xlu0 %6642, %v2148_v28   ;;  %v7375_v28 = vld [vmem:[%s12794_s0 + $0xa0] sm:$0xff]  ;;  %v3518_v63 = vmax.f32 %v3406_v33, 0.0  ;;  %v3424_v25 = vadd.f32 %v10824_v5, %v2752_v49  ;;  %v7376_v5 = vld [vmem:[%s12794_s0 + $0x28] sm:$0xff]  ;;  %v13716_v33 = vld [vmem:[#allocation180_spill] sm:$0xff] }
 0x32e   :  { %v2751_v18 = vmul.f32 %v7375_v28, %v10281_v24  ;;  %v1910_v24 = vld [vmem:[%s12796_s2 + $0x258] sm:$0xff]  ;;  %v2736_v32 = vmul.f32 %v7376_v5, %v13716_v33  ;;  %v1921_v49 = vld [vmem:[%s12796_s2 + $0x2b0] sm:$0xff]  ;;  %v1374_v41 = vsub.f32 %v1150_v57, %v1262_v56  ;;  %v2127_v45 = vsub.f32 %v1903_v26, %v2015_v10  ;;  %v13721_v5 = vld [vmem:[#allocation10_spill] sm:$0xff] }
 0x32f   :  { %v3517_v1 = vmax.f32 %v3405_v35, 0.0  ;;  %6252 = vmatprep.subr.msk.bf16.mxu0 %vm10876_vm2, %v6068_v51  ;;  %v13717_v51 = vld [vmem:[#allocation127_spill] sm:$0xff]  ;;  %v13718_v35 = vld [vmem:[#allocation178_spill] sm:$0xff]  ;;  %v2033_v28 = vmul.f32 %v10290_v7, %v13719_v19  ;;  %v10986_v57 = vmul.f32 0.020408163, %v13721_v5  ;;  %v13722_v7 = vld [vmem:[#allocation124_spill] sm:$0xff] }
 0x330   :  { %3265 = vperm.xlu1 %6643, %v2143_v53   ;;  %v2946_v30 = vpop.permute.xlu1 %2945  ;;  %v10962_v22 = vpop.permute.xlu0 %2890  ;;  %v2022_v48 = vmul.f32 %v13718_v35, %v13717_v51  ;;  %v2150_v53 = vsub.f32 %v1926_v36, %v2038_v47  ;;  %v13723_v36 = vld [vmem:[#allocation185_spill] sm:$0xff]  ;;  %v1486_v51 = vadd.f32 1e-05, %v1374_v41 }
 0x331   :  { %v6044_v59 = vpack.c.bf16 %v3518_v63, %v3517_v1  ;;  %v3423_v54 = vadd.f32 %v2946_v30, %v2751_v18  ;;  %3210 = vperm.xlu0 %6642, %v2132_v14   ;;  %v13720_v63 = vld [vmem:[#allocation141_spill] sm:$0xff]  ;;  %v3536_v14 = vmax.f32 %v3424_v25, 0.0  ;;  %v3408_v1 = vadd.f32 %v10847_v8, %v2736_v32 }
 0x332   :  { %v2735_v18 = vmul.f32 %v7377_v4, %v13720_v63  ;;  %v2017_v47 = vmul.f32 %v13723_v36, %v13722_v7  ;;  %v7378_v25 = vld [vmem:[%s12794_s0 + $0xb8] sm:$0xff]  ;;  %v2134_v32 = vsub.f32 %v1910_v24, %v2022_v48  ;;  %v2145_v19 = vsub.f32 %v1921_v49, %v2033_v28  ;;  %v1912_v7 = vld [vmem:[%s12796_s2 + $0x268] sm:$0xff] }
 0x333   :  { %v3535_v30 = vmax.f32 %v3423_v54, 0.0  ;;  %6253 = vmatpush3.bf16.msk.msra.mxu0 %vm10876_vm2, %v6044_v59  ;;  %v2754_v8 = vmul.f32 %v7378_v25, %v10199_v39  ;;  %v1905_v59 = vld [vmem:[%s12796_s2 + $0x230] sm:$0xff]  ;;  %v1928_v54 = vld [vmem:[%s12796_s2 + $0x2e8] sm:$0xff]  ;;  %v13724_v35 = vld [vmem:[#allocation161_spill] sm:$0xff]  ;;  %v3520_v48 = vmax.f32 %v3408_v1, 0.0  ;;  %v1264_v49 = vmul.f32 %v10960_v9, %v10960_v9 }
 0x334   :  { %3185 = vperm.xlu1 %6643, %v2127_v45   ;;  %v2866_v26 = vpop.permute.xlu1 %2865  ;;  %v10988_v10 = vpop.permute.xlu0 %2980  ;;  %v1152_v45 = vmul.f32 0.020408163, %v13724_v35  ;;  %v13725_v4 = vld [vmem:[#allocation145_spill] sm:$0xff]  ;;  %v7379_v39 = vld [vmem:[%s12794_s0 + $0xb0] sm:$0xff]  ;;  %v2129_v36 = vsub.f32 %v1905_v59, %v2017_v47  ;;  %v13730_v35 = vld [vmem:[#allocation134_spill] sm:$0xff]  ;;  %7306 = vrsqrt.f32 %v1486_v51 }
 0x335   :  { %v6071_v56 = vpack.c.bf16 %v3536_v14, %v3535_v30  ;;  %v3407_v33 = vadd.f32 %v2866_v26, %v2735_v18  ;;  %3300 = vperm.xlu0 %6642, %v2150_v53   ;;  %v13726_v63 = vld [vmem:[#allocation197_spill] sm:$0xff]  ;;  %v2753_v24 = vmul.f32 %v7379_v39, %v10299_v13  ;;  %v3426_v53 = vadd.f32 %v10871_v23, %v2754_v8  ;;  %v13727_v30 = vld [vmem:[#allocation186_spill] sm:$0xff] }
 0x336   :  { %v2040_v5 = vmul.f32 %v13726_v63, %v13725_v4  ;;  %v7380_v28 = vld [vmem:[%s12794_s0 + $0x38] sm:$0xff]  ;;  %v1923_v23 = vld [vmem:[%s12796_s2 + $0x2c0] sm:$0xff]  ;;  %v13731_v4 = vld [vmem:[#allocation183_spill] sm:$0xff]  ;;  %v1376_v47 = vsub.f32 %v1152_v45, %v1264_v49 }
 0x337   :  { %v3519_v18 = vmax.f32 %v3407_v33, 0.0  ;;  %6254 = vmatprep.subr.msk.bf16.mxu0 %vm10876_vm2, %v6071_v56  ;;  %v2738_v13 = vmul.f32 %v7380_v28, %v13727_v30  ;;  %v13728_v8 = vld [vmem:[#allocation142_spill] sm:$0xff]  ;;  %v13729_v33 = vld [vmem:[#allocation129_spill] sm:$0xff]  ;;  %v3538_v39 = vmax.f32 %v3426_v53, 0.0  ;;  %v13736_v49 = vld [vmem:[#allocation199_spill] sm:$0xff] }
 0x338   :  { %3275 = vperm.xlu1 %6643, %v2145_v19   ;;  %v2956_v41 = vpop.permute.xlu1 %2955  ;;  %v11012_v14 = vpop.permute.xlu0 %2900  ;;  %v2152_v25 = vsub.f32 %v1928_v54, %v2040_v5  ;;  %v2035_v56 = vmul.f32 %v10308_v46, %v13728_v8  ;;  %v2024_v19 = vmul.f32 %v13730_v35, %v13729_v33  ;;  %v7382_v54 = vld [vmem:[%s12794_s0 + $0xc8] sm:$0xff]  ;;  %v13733_v30 = vld [vmem:[#allocation126_spill] sm:$0xff] }
 0x339   :  { %v6047_v1 = vpack.c.bf16 %v3520_v48, %v3519_v18  ;;  %v3425_v26 = vadd.f32 %v2956_v41, %v2753_v24  ;;  %3220 = vperm.xlu0 %6642, %v2134_v32   ;;  %v7381_v32 = vld [vmem:[%s12794_s0 + $0x30] sm:$0xff]  ;;  %v3410_v24 = vadd.f32 %v10904_v0, %v2738_v13  ;;  %v13732_v5 = vld [vmem:[#allocation195_spill] sm:$0xff]  ;;  %v13735_v45 = vld [vmem:[#allocation2_spill] sm:$0xff] }
 0x33a   :  { %v2737_v63 = vmul.f32 %v7381_v32, %v13731_v4  ;;  %v2756_v18 = vmul.f32 %v7382_v54, %v13732_v5  ;;  %v2147_v0 = vsub.f32 %v1923_v23, %v2035_v56  ;;  %v2136_v28 = vsub.f32 %v1912_v7, %v2024_v19  ;;  %v13734_v13 = vld [vmem:[#allocation187_spill] sm:$0xff]  ;;  %v7383_v51 = vld [vmem:[%s12794_s0 + $0xc0] sm:$0xff]  ;;  %v1930_v7 = vld [vmem:[%s12796_s2 + $0x2f8] sm:$0xff] }
 0x33b   :  { %v3537_v48 = vmax.f32 %v3425_v26, 0.0  ;;  %6255 = vmatpush3.bf16.msk.msra.mxu0 %vm10876_vm2, %v6047_v1  ;;  %v2019_v1 = vmul.f32 %v13734_v13, %v13733_v30  ;;  %v2042_v26 = vmul.f32 %v13736_v49, %v13735_v45  ;;  %v3522_v8 = vmax.f32 %v3410_v24, 0.0  ;;  %v1907_v23 = vld [vmem:[%s12796_s2 + $0x240] sm:$0xff]  ;;  %v7384_v24 = vld [vmem:[%s12794_s0 + $0x48] sm:$0xff]  ;;  %v13741_v30 = vld [vmem:[#allocation20_spill] sm:$0xff] }
 0x33c   :  { %3195 = vperm.xlu1 %6643, %v2129_v36   ;;  %v2876_v59 = vpop.permute.xlu1 %2875  ;;  %v11037_v46 = vpop.permute.xlu0 %2990  ;;  %v2755_v36 = vmul.f32 %v7383_v51, %v10315_v2  ;;  %v3428_v33 = vadd.f32 %v10933_v15, %v2756_v18  ;;  %v13737_v2 = vld [vmem:[#allocation9_spill] sm:$0xff]  ;;  %v1266_v15 = vmul.f32 %v10986_v57, %v10986_v57  ;;  %v1488_v19 = vadd.f32 1e-05, %v1376_v47  ;;  %v13743_v13 = vld [vmem:[#allocation136_spill] sm:$0xff]  ;;  %v7385_v49 = vld [vmem:[%s12794_s0 + $0x40] sm:$0xff] }
 0x33d   :  { %v6074_v41 = vpack.c.bf16 %v3538_v39, %v3537_v48  ;;  %v3409_v53 = vadd.f32 %v2876_v59, %v2737_v63  ;;  %3310 = vperm.xlu0 %6642, %v2152_v25   ;;  %v11062_v25 = vmul.f32 %v10931_v44, %v10931_v44  ;;  %v11065_v56 = vmul.f32 0.020408163, %v13737_v2  ;;  %v13738_v63 = vld [vmem:[#allocation163_spill] sm:$0xff]  ;;  %v13739_v48 = vld [vmem:[#allocation177_spill] sm:$0xff]  ;;  %v13744_v51 = vld [vmem:[#allocation188_spill] sm:$0xff] }
 0x33e   :  { %v1154_v39 = vmul.f32 0.020408163, %v13738_v63  ;;  %v2740_v59 = vmul.f32 %v7384_v24, %v13739_v48  ;;  %v2131_v18 = vsub.f32 %v1907_v23, %v2019_v1  ;;  %v2739_v2 = vmul.f32 %v7385_v49, %v13744_v51  ;;  %v1914_v1 = vld [vmem:[%s12796_s2 + $0x278] sm:$0xff] }
 0x33f   :  { %v3521_v35 = vmax.f32 %v3409_v53, 0.0  ;;  %6256 = vmatprep.subr.msk.bf16.mxu0 %vm10876_vm2, %v6074_v41  ;;  %v2154_v41 = vsub.f32 %v1930_v7, %v2042_v26  ;;  %v13740_v53 = vld [vmem:[#allocation144_spill] sm:$0xff]  ;;  %v3540_v63 = vmax.f32 %v3428_v33, 0.0  ;;  %v11095_v26 = vmul.f32 %v11065_v56, %v11065_v56  ;;  %v7386_v48 = vld [vmem:[%s12794_s0 + $0xd8] sm:$0xff] }
 0x340   :  { %3285 = vperm.xlu1 %6643, %v2147_v0   ;;  %v2966_v32 = vpop.permute.xlu1 %2965  ;;  %v11069_v4 = vpop.permute.xlu0 %2910  ;;  %v2037_v47 = vmul.f32 %v13741_v30, %v13740_v53  ;;  %v13742_v0 = vld [vmem:[#allocation131_spill] sm:$0xff]  ;;  %v3412_v24 = vadd.f32 %v10962_v22, %v2740_v59  ;;  %v13746_v22 = vld [vmem:[#allocation160_spill] sm:$0xff]  ;;  %7308 = vrsqrt.f32 %v1488_v19  ;;  %v13749_v49 = vld [vmem:[#allocation189_spill] sm:$0xff] }
 0x341   :  { %v6050_v54 = vpack.c.bf16 %v3522_v8, %v3521_v35  ;;  %v3427_v5 = vadd.f32 %v2966_v32, %v2755_v36  ;;  %3230 = vperm.xlu0 %6642, %v2136_v28   ;;  %v2026_v45 = vmul.f32 %v13743_v13, %v13742_v0  ;;  %v1925_v28 = vld [vmem:[%s12796_s2 + $0x2d0] sm:$0xff]  ;;  %v1149_v35 = vmul.f32 0.020408163, %v13746_v22  ;;  %v7307_v22 = vpop.eup %7306 }
 0x342   :  { %v13745_v36 = vld [vmem:[#allocation12_spill] sm:$0xff]  ;;  %v1378_v32 = vsub.f32 %v1154_v39, %v1266_v15  ;;  %v2149_v30 = vsub.f32 %v1925_v28, %v2037_v47  ;;  %v3524_v21 = vmax.f32 %v3412_v24, 0.0  ;;  %v1932_v47 = vld [vmem:[%s12796_s2 + $0x308] sm:$0xff] }
 0x343   :  { %v3539_v8 = vmax.f32 %v3427_v5, 0.0  ;;  %6257 = vmatpush3.bf16.msk.msra.mxu0 %vm10876_vm2, %v6050_v54  ;;  %v11098_v33 = vmul.f32 0.020408163, %v13745_v36  ;;  %v13747_v59 = vld [vmem:[#allocation196_spill] sm:$0xff]  ;;  %v2138_v0 = vsub.f32 %v1914_v1, %v2026_v45  ;;  %v1710_v45 = vld [vmem:[%s12795_s1 + $0x318] sm:$0xff]  ;;  %v1373_v28 = vsub.f32 %v1149_v35, %v11062_v25  ;;  %v13757_v25 = vld [vmem:[#allocation30_spill] sm:$0xff] }
 0x344   :  { %3205 = vperm.xlu1 %6643, %v2131_v18   ;;  %v2886_v23 = vpop.permute.xlu1 %2885  ;;  %v11101_v7 = vpop.permute.xlu0 %3000  ;;  %v2758_v54 = vmul.f32 %v7386_v48, %v13747_v59  ;;  %v13748_v13 = vld [vmem:[#allocation128_spill] sm:$0xff]  ;;  %v13751_v18 = vld [vmem:[#allocation201_spill] sm:$0xff] }
 0x345   :  { %v6077_v5 = vpack.c.bf16 %v3540_v63, %v3539_v8  ;;  %v3411_v53 = vadd.f32 %v2886_v23, %v2739_v2  ;;  %3320 = vperm.xlu0 %6642, %v2154_v41   ;;  %v2021_v51 = vmul.f32 %v13749_v49, %v13748_v13  ;;  %v13750_v19 = vld [vmem:[#allocation4_spill] sm:$0xff]  ;;  %v13753_v8 = vld [vmem:[#allocation11_spill] sm:$0xff]  ;;  %v13754_v1 = vld [vmem:[#allocation165_spill] sm:$0xff] }
 0x346   :  { %v2044_v36 = vmul.f32 %v13751_v18, %v13750_v19  ;;  %v7387_v15 = vld [vmem:[%s12794_s0 + $0xd0] sm:$0xff]  ;;  %v3430_v63 = vadd.f32 %v10988_v10, %v2758_v54  ;;  %v11128_v24 = vmul.f32 0.020408163, %v13753_v8  ;;  %v1268_v10 = vmul.f32 %v11098_v33, %v11098_v33 }
 0x347   :  { %v13752_v39 = vld [vmem:[#allocation52_spill] sm:$0xff]  ;;  %v3523_v2 = vmax.f32 %v3411_v53, 0.0  ;;  %6258 = vmatprep.subr.msk.bf16.mxu0 %vm10876_vm2, %v6077_v5  ;;  %v1156_v23 = vmul.f32 0.020408163, %v13754_v1  ;;  %v1490_v54 = vadd.f32 1e-05, %v1378_v32  ;;  %v1822_v8 = vmul.f32 %v7307_v22, %v1710_v45 }
 0x348   :  { %v2757_v62 = vmul.f32 %v7387_v15, %v13752_v39  ;;  %v1909_v41 = vld [vmem:[%s12796_s2 + $0x250] sm:$0xff]  ;;  %3295 = vperm.xlu1 %6643, %v2149_v30   ;;  %v2976_v48 = vpop.permute.xlu1 %2975  ;;  %v11134_v59 = vpop.permute.xlu0 %2920  ;;  %v7388_v5 = vld [vmem:[%s12794_s0 + $0x58] sm:$0xff]  ;;  %v13755_v53 = vld [vmem:[#allocation179_spill] sm:$0xff]  ;;  %v2156_v15 = vsub.f32 %v1932_v47, %v2044_v36  ;;  %v3542_v37 = vmax.f32 %v3430_v63, 0.0 }
 0x349   :  { %v2742_v13 = vmul.f32 %v7388_v5, %v13755_v53  ;;  %v6053_v49 = vpack.c.bf16 %v3524_v21, %v3523_v2  ;;  %3240 = vperm.xlu0 %6642, %v2138_v0   ;;  %v2133_v18 = vsub.f32 %v1909_v41, %v2021_v51  ;;  %v13756_v39 = vld [vmem:[#allocation146_spill] sm:$0xff]  ;;  %v7389_v30 = vld [vmem:[%s12794_s0 + $0x50] sm:$0xff]  ;;  %v1485_v51 = vadd.f32 1e-05, %v1373_v28 }
 0x34a   :  { %v3429_v19 = vadd.f32 %v2976_v48, %v2757_v62  ;;  %v2039_v35 = vmul.f32 %v13757_v25, %v13756_v39  ;;  %v13758_v32 = vld [vmem:[#allocation190_spill] sm:$0xff]  ;;  %v1380_v2 = vsub.f32 %v1156_v23, %v1268_v10  ;;  %7310 = vrsqrt.f32 %v1490_v54  ;;  %v7309_v53 = vpop.eup %7308 }
 0x34b   :  { %v2741_v1 = vmul.f32 %v7389_v30, %v13758_v32  ;;  %v3414_v52 = vadd.f32 %v11012_v14, %v2742_v13  ;;  %6259 = vmatpush3.bf16.msk.msra.mxu0 %vm10876_vm2, %v6053_v49  ;;  %v1927_v21 = vld [vmem:[%s12796_s2 + $0x2e0] sm:$0xff]  ;;  %v7390_v14 = vld [vmem:[%s12794_s0 + $0xe8] sm:$0xff]  ;;  %v11164_v28 = vmul.f32 %v11128_v24, %v11128_v24  ;;  %v2046_v54 = vmul.f32 %v1822_v8, %v10907_v60  ;;  %v1934_v60 = vld [vmem:[%s12796_s2 + $0x318] sm:$0xff] }
 0x34c   :  { %v3541_v6 = vmax.f32 %v3429_v19, 0.0  ;;  %v13759_v62 = vld [vmem:[#allocation14_spill] sm:$0xff]  ;;  %3215 = vperm.xlu1 %6643, %v2133_v18   ;;  %v2896_v41 = vpop.permute.xlu1 %2895  ;;  %v11156_v63 = vpop.permute.xlu0 %3090  ;;  %v2151_v10 = vsub.f32 %v1927_v21, %v2039_v35  ;;  %v13763_v13 = vld [vmem:[#allocation191_spill] sm:$0xff]  ;;  %v13764_v18 = vld [vmem:[#allocation25_spill] sm:$0xff]  ;;  %7312 = vrsqrt.f32 %v1485_v51  ;;  %v1492_v30 = vadd.f32 1e-05, %v1380_v2 }
 0x34d   :  { %v11153_v0 = vmul.f32 0.020408163, %v13759_v62  ;;  %v13760_v36 = vld [vmem:[#allocation162_spill] sm:$0xff]  ;;  %v3413_v5 = vadd.f32 %v2896_v41, %v2741_v1  ;;  %3330 = vperm.xlu0 %6642, %v2156_v15   ;;  %v1712_v35 = vld [vmem:[%s12795_s1 + $0x328] sm:$0xff]  ;;  %v13766_v41 = vld [vmem:[#allocation181_spill] sm:$0xff]  ;;  %v2158_v51 = vsub.f32 %v1934_v60, %v2046_v54 }
 0x34e   :  { %v1151_v22 = vmul.f32 0.020408163, %v13760_v36  ;;  %v13761_v47 = vld [vmem:[#allocation198_spill] sm:$0xff]  ;;  %v6080_v48 = vpack.c.bf16 %v3542_v37, %v3541_v6  ;;  %v3526_v37 = vmax.f32 %v3414_v52, 0.0  ;;  %v13765_v21 = vld [vmem:[#allocation167_spill] sm:$0xff]  ;;  %v1824_v2 = vmul.f32 %v7309_v53, %v1712_v35  ;;  %v13772_v60 = vld [vmem:[#allocation200_spill] sm:$0xff] }
 0x34f   :  { %v2760_v45 = vmul.f32 %v7390_v14, %v13761_v47  ;;  %v13762_v23 = vld [vmem:[#allocation130_spill] sm:$0xff]  ;;  %v3525_v15 = vmax.f32 %v3413_v5, 0.0  ;;  %v1270_v52 = vmul.f32 %v11153_v0, %v11153_v0  ;;  %v1158_v62 = vmul.f32 0.020408163, %v13765_v21  ;;  %v7392_v36 = vld [vmem:[%s12794_s0 + $0x68] sm:$0xff] }
 0x350   :  { %v2023_v49 = vmul.f32 %v13763_v13, %v13762_v23  ;;  %v7391_v19 = vld [vmem:[%s12794_s0 + $0xe0] sm:$0xff]  ;;  %6260 = vmatprep.subr.msk.bf16.mxu0 %vm10876_vm2, %v6080_v48  ;;  %3305 = vperm.xlu1 %6643, %v2151_v10   ;;  %v2986_v32 = vpop.permute.xlu1 %2985  ;;  %v11188_v1 = vpop.permute.xlu0 %3010  ;;  %v2744_v14 = vmul.f32 %v7392_v36, %v13766_v41  ;;  %v13767_v5 = vld [vmem:[#allocation3_spill] sm:$0xff]  ;;  %v13769_v23 = vld [vmem:[#allocation192_spill] sm:$0xff]  ;;  %7314 = vrsqrt.f32 %v1492_v30 }
 0x351   :  { %v2759_v39 = vmul.f32 %v7391_v19, %v13764_v18  ;;  %v3432_v6 = vadd.f32 %v11037_v46, %v2760_v45  ;;  %v1911_v25 = vld [vmem:[%s12796_s2 + $0x260] sm:$0xff]  ;;  %v1375_v46 = vsub.f32 %v1151_v22, %v11095_v26  ;;  %v6056_v47 = vpack.c.bf16 %v3526_v37, %v3525_v15  ;;  %2668 = vperm.xlu0 %6642, %v1822_v8   ;;  %v1929_v8 = vld [vmem:[%s12796_s2 + $0x2f0] sm:$0xff]  ;;  %v13773_v41 = vld [vmem:[#allocation13_spill] sm:$0xff] }
 0x352   :  { %v2135_v48 = vsub.f32 %v1911_v25, %v2023_v49  ;;  %v13768_v26 = vld [vmem:[#allocation202_spill] sm:$0xff]  ;;  %v3416_v18 = vadd.f32 %v11069_v4, %v2744_v14  ;;  %v13770_v49 = vld [vmem:[#allocation16_spill] sm:$0xff]  ;;  %v1382_v4 = vsub.f32 %v1158_v62, %v1270_v52  ;;  %v7394_v25 = vld [vmem:[%s12794_s0 + $0xf8] sm:$0xff]  ;;  %v11218_v14 = vmul.f32 0.020408163, %v13773_v41 }
 0x353   :  { %v3431_v45 = vadd.f32 %v2986_v32, %v2759_v39  ;;  %v2041_v22 = vmul.f32 %v13768_v26, %v13767_v5  ;;  %v7393_v10 = vld [vmem:[%s12794_s0 + $0x60] sm:$0xff]  ;;  %v3544_v19 = vmax.f32 %v3432_v6, 0.0  ;;  %6261 = vmatpush3.bf16.msk.msra.mxu0 %vm10876_vm2, %v6056_v47  ;;  %v11208_v54 = vmul.f32 0.020408163, %v13770_v49  ;;  %v13771_v39 = vld [vmem:[#allocation164_spill] sm:$0xff]  ;;  %v13775_v30 = vld [vmem:[#allocation193_spill] sm:$0xff] }
 0x354   :  { %v2743_v13 = vmul.f32 %v7393_v10, %v13769_v23  ;;  %v1487_v53 = vadd.f32 1e-05, %v1375_v46  ;;  %v1153_v37 = vmul.f32 0.020408163, %v13771_v39  ;;  %3225 = vperm.xlu1 %6643, %v2135_v48   ;;  %v2906_v15 = vpop.permute.xlu1 %2905  ;;  %v11211_v6 = vpop.permute.xlu0 %3100  ;;  %v2762_v35 = vmul.f32 %v7394_v25, %v13772_v60  ;;  %v13774_v47 = vld [vmem:[#allocation132_spill] sm:$0xff]  ;;  %v13776_v62 = vld [vmem:[#allocation61_spill] sm:$0xff] }
 0x355   :  { %v3543_v21 = vmax.f32 %v3431_v45, 0.0  ;;  %3340 = vperm.xlu0 %6642, %v2158_v51   ;;  %v2153_v46 = vsub.f32 %v1929_v8, %v2041_v22  ;;  %v2025_v45 = vmul.f32 %v13775_v30, %v13774_v47  ;;  %v2048_v48 = vmul.f32 %v1824_v2, %v10960_v9  ;;  %v7311_v5 = vpop.eup %7310  ;;  %v7395_v52 = vld [vmem:[%s12794_s0 + $0xf0] sm:$0xff]  ;;  %v1936_v9 = vld [vmem:[%s12796_s2 + $0x328] sm:$0xff]  ;;  %v13780_v47 = vld [vmem:[#allocation194_spill] sm:$0xff] }
 0x356   :  { %v3415_v36 = vadd.f32 %v2906_v15, %v2743_v13  ;;  %v2761_v26 = vmul.f32 %v7395_v52, %v13776_v62  ;;  %v3528_v10 = vmax.f32 %v3416_v18, 0.0  ;;  %v3434_v23 = vadd.f32 %v11101_v7, %v2762_v35  ;;  %v1913_v22 = vld [vmem:[%s12796_s2 + $0x270] sm:$0xff]  ;;  %v1714_v13 = vld [vmem:[%s12795_s1 + $0x338] sm:$0xff]  ;;  %v13777_v18 = vld [vmem:[#allocation170_spill] sm:$0xff] }
 0x357   :  { %v6083_v32 = vpack.c.bf16 %v3544_v19, %v3543_v21  ;;  %v1272_v19 = vmul.f32 %v11208_v54, %v11208_v54  ;;  %7316 = vrsqrt.f32 %v1487_v53  ;;  %v1377_v7 = vsub.f32 %v1153_v37, %v11164_v28  ;;  %v7396_v15 = vld [vmem:[%s12794_s0 + $0x78] sm:$0xff]  ;;  %v13778_v25 = vld [vmem:[#allocation184_spill] sm:$0xff] }
 0x358   :  { %v3527_v51 = vmax.f32 %v3415_v36, 0.0  ;;  %v1160_v21 = vmul.f32 0.020408163, %v13777_v18  ;;  %3315 = vperm.xlu1 %6643, %v2153_v46   ;;  %v2996_v8 = vpop.permute.xlu1 %2995  ;;  %v11243_v49 = vpop.permute.xlu0 %3020  ;;  %v1494_v39 = vadd.f32 1e-05, %v1382_v4  ;;  %v2746_v60 = vmul.f32 %v7396_v15, %v13778_v25  ;;  %v13779_v28 = vld [vmem:[#allocation5_spill] sm:$0xff] }
 0x359   :  { %6262 = vmatprep.subr.msk.bf16.mxu0 %vm10876_vm2, %v6083_v32  ;;  %v3433_v32 = vadd.f32 %v2996_v8, %v2761_v26  ;;  %2678 = vperm.xlu0 %6642, %v1824_v2   ;;  %v7313_v36 = vpop.eup %7312  ;;  %v2137_v53 = vsub.f32 %v1913_v22, %v2025_v45  ;;  %v2160_v41 = vsub.f32 %v1936_v9, %v2048_v48  ;;  %v7397_v4 = vld [vmem:[%s12794_s0 + $0x70] sm:$0xff]  ;;  %v3546_v52 = vmax.f32 %v3434_v23, 0.0  ;;  %v1931_v2 = vld [vmem:[%s12796_s2 + $0x300] sm:$0xff]  ;;  %v7030_v45 = vld [vmem:[%s12797_s3 + $0xc] ss:$28 sps:$4 sm:$0xff]  }
 0x35a   :  { %v6059_v35 = vpack.c.bf16 %v3528_v10, %v3527_v51  ;;  %v2043_v37 = vmul.f32 %v10368_v16, %v13779_v28  ;;  %v1826_v46 = vmul.f32 %v7311_v5, %v1714_v13  ;;  %v2745_v30 = vmul.f32 %v7397_v4, %v13780_v47  ;;  %v1709_v16 = vld [vmem:[%s12795_s1 + $0x310] sm:$0xff]  ;;  %v13781_v5 = vld [vmem:[#allocation166_spill] sm:$0xff]  ;;  %v7398_v22 = vld [vmem:[%s12794_s0 + $0x188] sm:$0xff]  ;;  %4278 = vmatprep.mubr.bf16.mxu1 %v7030_v45  ;;  %v7315_v15 = vpop.eup %7314 }
 0x35b   :  { %v3418_v62 = vadd.f32 %v11134_v59, %v2746_v60  ;;  %v3545_v18 = vmax.f32 %v3433_v32, 0.0  ;;  %v1267_v48 = vmul.f32 %v11218_v14, %v11218_v14  ;;  %v1489_v59 = vadd.f32 1e-05, %v1377_v7  ;;  %v13782_v7 = vld [vmem:[#allocation18_spill] sm:$0xff] }
 0x35c   :  { %6263 = vmatpush3.bf16.msk.msra.mxu0 %vm10876_vm2, %v6059_v35  ;;  %v1155_v26 = vmul.f32 0.020408163, %v13781_v5  ;;  %v1384_v10 = vsub.f32 %v1160_v21, %v1272_v19  ;;  %3235 = vperm.xlu1 %6643, %v2137_v53   ;;  %v2916_v23 = vpop.permute.xlu1 %2915  ;;  %v11270_v51 = vpop.permute.xlu0 %3110  ;;  %7318 = vrsqrt.f32 %v1494_v39  ;;  %v2780_v9 = vmul.f32 %v7398_v22, %v10422_v61  ;;  %v7399_v39 = vld [vmem:[%s12794_s0 + $0x180] sm:$0xff]  ;;  %v13783_v35 = vld [vmem:[#allocation28_spill] sm:$0xff] }
 0x35d   :  { %v6086_v13 = vpack.c.bf16 %v3546_v52, %v3545_v18  ;;  %v3417_v8 = vadd.f32 %v2916_v23, %v2745_v30  ;;  %3350 = vperm.xlu0 %6642, %v2160_v41   ;;  %v11277_v25 = vmul.f32 0.020408163, %v13782_v7  ;;  %v2155_v19 = vsub.f32 %v1931_v2, %v2043_v37  ;;  %v1938_v41 = vld [vmem:[%s12796_s2 + $0x338] sm:$0xff]  ;;  %v7400_v18 = vld [vmem:[%s12794_s0 + $0x108] sm:$0xff] }
 0x35e   :  { %v1821_v21 = vmul.f32 %v7313_v36, %v1709_v16  ;;  %v2050_v60 = vmul.f32 %v1826_v46, %v10986_v57  ;;  %v2779_v32 = vmul.f32 %v7399_v39, %v13783_v35  ;;  %v3530_v53 = vmax.f32 %v3418_v62, 0.0  ;;  %v1716_v57 = vld [vmem:[%s12795_s1 + $0x348] sm:$0xff]  ;;  %v13785_v52 = vld [vmem:[#allocation133_spill] sm:$0xff]  ;;  %v13788_v35 = vld [vmem:[#allocation168_spill] sm:$0xff] }
 0x35f   :  { %v3452_v61 = vadd.f32 %v11156_v63, %v2780_v9  ;;  %v3529_v28 = vmax.f32 %v3417_v8, 0.0  ;;  %6264 = vmatprep.subr.msk.bf16.mxu0 %vm10876_vm2, %v6086_v13  ;;  %v13784_v36 = vld [vmem:[#allocation15_spill] sm:$0xff]  ;;  %7320 = vrsqrt.f32 %v1489_v59  ;;  %v1379_v4 = vsub.f32 %v1155_v26, %v1267_v48  ;;  %v13786_v2 = vld [vmem:[#allocation45_spill] sm:$0xff]  ;;  %v7401_v9 = vld [vmem:[%s12794_s0 + $0x100] sm:$0xff] }
 0x360   :  { %v11294_v37 = vmul.f32 0.020408163, %v13784_v36  ;;  %v1496_v47 = vadd.f32 1e-05, %v1384_v10  ;;  %v3086_v30 = vpop.permute.xlu1 %3085  ;;  %3325 = vperm.xlu1 %6643, %v2155_v19   ;;  %v11296_v63 = vpop.permute.xlu0 %3030  ;;  %v1162_v62 = vmul.f32 0.020408163, %v13785_v52  ;;  %v2764_v16 = vmul.f32 %v7400_v18, %v13786_v2 }
 0x361   :  { %v6062_v45 = vpack.c.bf16 %v3530_v53, %v3529_v28  ;;  %v3451_v5 = vadd.f32 %v3086_v30, %v2779_v32  ;;  %2688 = vperm.xlu0 %6642, %v1826_v46   ;;  %v7317_v23 = vpop.eup %7316  ;;  %v1274_v48 = vmul.f32 %v11277_v25, %v11277_v25  ;;  %v2162_v59 = vsub.f32 %v1938_v41, %v2050_v60  ;;  %v7004_v22 = vld [vmem:[%s12797_s3] ss:$28 sps:$4 sm:$0xff]   ;;  %v13787_v13 = vld [vmem:[#allocation84_spill] sm:$0xff] }
 0x362   :  { %v2045_v26 = vmul.f32 %v1821_v21, %v10931_v44  ;;  %v1828_v10 = vmul.f32 %v7315_v15, %v1716_v57  ;;  %v2763_v8 = vmul.f32 %v7401_v9, %v13787_v13  ;;  %v3564_v7 = vmax.f32 %v3452_v61, 0.0  ;;  %v1933_v44 = vld [vmem:[%s12796_s2 + $0x310] sm:$0xff]  ;;  %v1711_v15 = vld [vmem:[%s12795_s1 + $0x320] sm:$0xff]  ;;  %v7007_v60 = vld [vmem:[%s12797_s3 + $0x3c] ss:$28 sps:$4 sm:$0xff]  }
 0x363   :  { %v3436_v46 = vadd.f32 %v11188_v1, %v2764_v16  ;;  %v3563_v19 = vmax.f32 %v3451_v5, 0.0  ;;  %6265 = vmatpush3.bf16.msk.msra.mxu0 %vm10876_vm2, %v6062_v45  ;;  %v1491_v39 = vadd.f32 1e-05, %v1379_v4  ;;  %v1157_v32 = vmul.f32 0.020408163, %v13788_v35  ;;  %v7402_v28 = vld [vmem:[%s12794_s0 + $0x198] sm:$0xff] }
 0x364   :  { %7322 = vrsqrt.f32 %v1496_v47  ;;  %v3006_v1 = vpop.permute.xlu1 %3005  ;;  %2663 = vperm.xlu1 %6643, %v1821_v21   ;;  %v11326_v53 = vpop.permute.xlu0 %3120  ;;  %v1386_v61 = vsub.f32 %v1162_v62, %v1274_v48  ;;  %v13789_v41 = vld [vmem:[#allocation96_spill] sm:$0xff]  ;;  %v1269_v4 = vmul.f32 %v11294_v37, %v11294_v37  ;;  %v2157_v52 = vsub.f32 %v1933_v44, %v2045_v26  ;;  %v13790_v2 = vld [vmem:[#allocation29_spill] sm:$0xff]  ;;  %v13791_v13 = vld [vmem:[#allocation26_spill] sm:$0xff] }
 0x365   :  { %v2782_v57 = vmul.f32 %v7402_v28, %v13789_v41  ;;  %v3435_v36 = vadd.f32 %v3006_v1, %v2763_v8  ;;  %3360 = vperm.xlu0 %6642, %v2162_v59   ;;  %v6113_v30 = vpack.c.bf16 %v3564_v7, %v3563_v19  ;;  %v1823_v18 = vmul.f32 %v7317_v23, %v1711_v15  ;;  %v7403_v62 = vld [vmem:[%s12794_s0 + $0x190] sm:$0xff]  ;;  %v1940_v23 = vld [vmem:[%s12796_s2 + $0x348] sm:$0xff]  ;;  %v7404_v9 = vld [vmem:[%s12794_s0 + $0x118] sm:$0xff] }
 0x366   :  { %v2052_v47 = vmul.f32 %v1828_v10, %v11098_v33  ;;  %4182 = vmatmul.mubr.bf16.vlgmr.msra.gmra.mrb[0].mxu0 %v7004_v22  ;;  %v7319_v21 = vpop.eup %7318  ;;  %v2781_v16 = vmul.f32 %v7403_v62, %v13790_v2  ;;  %v3548_v45 = vmax.f32 %v3436_v46, 0.0  ;;  %v1718_v33 = vld [vmem:[%s12795_s1 + $0x358] sm:$0xff]  ;;  %7324 = vrsqrt.f32 %v1491_v39  ;;  %v7405_v1 = vld [vmem:[%s12794_s0 + $0x110] sm:$0xff]  ;;  %v7406_v62 = vld [vmem:[%s12794_s0 + $0x1a8] sm:$0xff] }
 0x367   :  { %v3454_v5 = vadd.f32 %v11211_v6, %v2782_v57  ;;  %v3547_v48 = vmax.f32 %v3435_v36, 0.0  ;;  %6314 = vmatprep.subr.msk.bf16.mxu1 %vm10876_vm2, %v6113_v30  ;;  %4189 = vmatprep.mubr.bf16.mxu0 %v7007_v60  ;;  %v1381_v59 = vsub.f32 %v1157_v32, %v1269_v4  ;;  %v1498_v6 = vadd.f32 1e-05, %v1386_v61  ;;  %v13792_v44 = vld [vmem:[#allocation17_spill] sm:$0xff]  ;;  %v1713_v36 = vld [vmem:[%s12795_s1 + $0x330] sm:$0xff] }
 0x368   :  { %v3096_v26 = vpop.permute.xlu1 %3095  ;;  %3335 = vperm.xlu1 %6643, %v2157_v52   ;;  %v11348_v22 = vpop.permute.xlu0 %3040  ;;  %v2766_v8 = vmul.f32 %v7404_v9, %v13791_v13  ;;  %v11355_v15 = vmul.f32 0.020408163, %v13792_v44  ;;  %v2164_v60 = vsub.f32 %v1940_v23, %v2052_v47  ;;  %v2047_v39 = vmul.f32 %v1823_v18, %v11065_v56  ;;  %v7009_v32 = vld [vmem:[%s12797_s3 + $0x38] ss:$28 sps:$4 sm:$0xff]   ;;  %v1935_v56 = vld [vmem:[%s12796_s2 + $0x320] sm:$0xff]  ;;  %v13794_v52 = vld [vmem:[#allocation171_spill] sm:$0xff] }
 0x369   :  { %v3453_v7 = vadd.f32 %v3096_v26, %v2781_v16  ;;  %2698 = vperm.xlu0 %6642, %v1828_v10   ;;  %v6089_v46 = vpack.c.bf16 %v3548_v45, %v3547_v48  ;;  %v7321_v19 = vpop.eup %7320  ;;  %v1830_v35 = vmul.f32 %v7319_v21, %v1718_v33  ;;  %v13793_v61 = vld [vmem:[#allocation85_spill] sm:$0xff]  ;;  %v3566_v10 = vmax.f32 %v3454_v5, 0.0  ;;  %v7010_v30 = vld [vmem:[%s12797_s3 + $0x74] ss:$28 sps:$4 sm:$0xff]   ;;  %v7407_v26 = vld [vmem:[%s12794_s0 + $0x1a0] sm:$0xff] }
 0x36a   :  { %v2765_v28 = vmul.f32 %v7405_v1, %v13793_v61  ;;  %v3438_v41 = vadd.f32 %v11243_v49, %v2766_v8  ;;  %v1493_v4 = vadd.f32 1e-05, %v1381_v59  ;;  %v1159_v47 = vmul.f32 0.020408163, %v13794_v52  ;;  %v13795_v2 = vld [vmem:[#allocation60_spill] sm:$0xff] }
 0x36b   :  { %v3565_v57 = vmax.f32 %v3453_v7, 0.0  ;;  %6315 = vmatpush3.bf16.msk.msra.mxu1 %vm10876_vm2, %v6089_v46  ;;  %7326 = vrsqrt.f32 %v1498_v6  ;;  %v2784_v16 = vmul.f32 %v7406_v62, %v13795_v2  ;;  %v1271_v23 = vmul.f32 %v11355_v15, %v11355_v15  ;;  %v13796_v6 = vld [vmem:[#allocation88_spill] sm:$0xff]  ;;  %v1942_v46 = vld [vmem:[%s12796_s2 + $0x358] sm:$0xff]  ;;  %v1715_v2 = vld [vmem:[%s12795_s1 + $0x340] sm:$0xff] }
 0x36c   :  { %v3016_v49 = vpop.permute.xlu1 %3015  ;;  %2673 = vperm.xlu1 %6643, %v1823_v18   ;;  %v11378_v21 = vpop.permute.xlu0 %3130  ;;  %v2159_v33 = vsub.f32 %v1935_v56, %v2047_v39  ;;  %v1825_v59 = vmul.f32 %v7321_v19, %v1713_v36  ;;  %v2054_v18 = vmul.f32 %v1830_v35, %v11153_v0  ;;  %v2783_v9 = vmul.f32 %v7407_v26, %v13796_v6  ;;  %v1720_v0 = vld [vmem:[%s12795_s1 + $0x368] sm:$0xff]  ;;  %v13797_v39 = vld [vmem:[#allocation53_spill] sm:$0xff]  ;;  %v13799_v52 = vld [vmem:[#allocation64_spill] sm:$0xff] }
 0x36d   :  { %v6116_v45 = vpack.c.bf16 %v3566_v10, %v3565_v57  ;;  %v3437_v5 = vadd.f32 %v3016_v49, %v2765_v28  ;;  %3370 = vperm.xlu0 %6642, %v2164_v60   ;;  %v3550_v13 = vmax.f32 %v3438_v41, 0.0  ;;  %v3456_v8 = vadd.f32 %v11270_v51, %v2784_v16  ;;  %v7408_v51 = vld [vmem:[%s12794_s0 + $0x128] sm:$0xff] }
 0x36e   :  { %v7323_v48 = vpop.eup %7322  ;;  %4190 = vmatmul.mubr.bf16.gmra.mrb[4].mxu0 %v7009_v32  ;;  %v1383_v19 = vsub.f32 %v1159_v47, %v1271_v23  ;;  %7328 = vrsqrt.f32 %v1493_v4  ;;  %v2768_v32 = vmul.f32 %v7408_v51, %v13797_v39  ;;  %v13798_v10 = vld [vmem:[#allocation19_spill] sm:$0xff]  ;;  %v2166_v57 = vsub.f32 %v1942_v46, %v2054_v18  ;;  %v7409_v4 = vld [vmem:[%s12794_s0 + $0x120] sm:$0xff] }
 0x36f   :  { %v3549_v7 = vmax.f32 %v3437_v5, 0.0  ;;  %6316 = vmatprep.subr.msk.bf16.mxu1 %vm10876_vm2, %v6116_v45  ;;  %4197 = vmatprep.mubr.bf16.mxu0 %v7010_v30  ;;  %v11407_v41 = vmul.f32 0.020408163, %v13798_v10  ;;  %v2049_v56 = vmul.f32 %v1825_v59, %v11128_v24  ;;  %v1832_v36 = vmul.f32 %v7323_v48, %v1720_v0  ;;  %v7012_v30 = vld [vmem:[%s12797_s3 + $0x70] ss:$28 sps:$4 sm:$0xff]   ;;  %v13801_v18 = vld [vmem:[#allocation66_spill] sm:$0xff] }
 0x370   :  { %v3106_v44 = vpop.permute.xlu1 %3105  ;;  %3345 = vperm.xlu1 %6643, %v2159_v33   ;;  %v11400_v60 = vpop.permute.xlu0 %3050  ;;  %v2767_v47 = vmul.f32 %v7409_v4, %v13799_v52  ;;  %v3568_v49 = vmax.f32 %v3456_v8, 0.0  ;;  %v1937_v24 = vld [vmem:[%s12796_s2 + $0x330] sm:$0xff]  ;;  %v7013_v16 = vld [vmem:[%s12797_s3 + $0xac] ss:$28 sps:$4 sm:$0xff]   ;;  %v1495_v45 = vadd.f32 1e-05, %v1383_v19 }
 0x371   :  { %v6092_v1 = vpack.c.bf16 %v3550_v13, %v3549_v7  ;;  %v3455_v61 = vadd.f32 %v3106_v44, %v2783_v9  ;;  %2708 = vperm.xlu0 %6642, %v1830_v35   ;;  %v7325_v28 = vpop.eup %7324  ;;  %v3440_v35 = vadd.f32 %v11296_v63, %v2768_v32  ;;  %v13800_v48 = vld [vmem:[#allocation135_spill] sm:$0xff]  ;;  %v7410_v33 = vld [vmem:[%s12794_s0 + $0x1b8] sm:$0xff]  ;;  %v1273_v13 = vmul.f32 %v11407_v41, %v11407_v41  ;;  %v7411_v0 = vld [vmem:[%s12794_s0 + $0x1b0] sm:$0xff] }
 0x372   :  { %v1161_v23 = vmul.f32 0.020408163, %v13800_v48  ;;  %v2786_v26 = vmul.f32 %v7410_v33, %v13801_v18  ;;  %v2161_v8 = vsub.f32 %v1937_v24, %v2049_v56  ;;  %v1827_v7 = vmul.f32 %v7325_v28, %v1715_v2  ;;  %v13802_v19 = vld [vmem:[#allocation38_spill] sm:$0xff]  ;;  %v7413_v24 = vld [vmem:[%s12794_s0 + $0x130] sm:$0xff]  ;;  %v13804_v2 = vld [vmem:[#allocation27_spill] sm:$0xff] }
 0x373   :  { %v3567_v62 = vmax.f32 %v3455_v61, 0.0  ;;  %6317 = vmatpush3.bf16.msk.msra.mxu1 %vm10876_vm2, %v6092_v1  ;;  %v2785_v44 = vmul.f32 %v7411_v0, %v13802_v19  ;;  %v3552_v51 = vmax.f32 %v3440_v35, 0.0  ;;  %v1944_v1 = vld [vmem:[%s12796_s2 + $0x368] sm:$0xff]  ;;  %7330 = vrsqrt.f32 %v1495_v45  ;;  %v13806_v19 = vld [vmem:[#allocation32_spill] sm:$0xff] }
 0x374   :  { %v3026_v5 = vpop.permute.xlu1 %3025  ;;  %2683 = vperm.xlu1 %6643, %v1825_v59   ;;  %v11429_v63 = vpop.permute.xlu0 %3140  ;;  %v2056_v59 = vmul.f32 %v1832_v36, %v11208_v54  ;;  %v3458_v39 = vadd.f32 %v11326_v53, %v2786_v26  ;;  %v1722_v54 = vld [vmem:[%s12795_s1 + $0x378] sm:$0xff]  ;;  %v1385_v10 = vsub.f32 %v1161_v23, %v1273_v13  ;;  %v7015_v35 = vld [vmem:[%s12797_s3 + $0xa8] ss:$28 sps:$4 sm:$0xff]  }
 0x375   :  { %v6119_v6 = vpack.c.bf16 %v3568_v49, %v3567_v62  ;;  %v3439_v9 = vadd.f32 %v3026_v5, %v2767_v47  ;;  %3380 = vperm.xlu0 %6642, %v2166_v57   ;;  %v7327_v46 = vpop.eup %7326  ;;  %v7412_v53 = vld [vmem:[%s12794_s0 + $0x138] sm:$0xff]  ;;  %v2051_v47 = vmul.f32 %v1827_v7, %v11218_v14  ;;  %v1939_v14 = vld [vmem:[%s12796_s2 + $0x340] sm:$0xff]  ;;  %v7414_v26 = vld [vmem:[%s12794_s0 + $0x1c8] sm:$0xff] }
 0x376   :  { %4198 = vmatmul.mubr.bf16.gmra.mrb[8].mxu0 %v7012_v30  ;;  %v13803_v57 = vld [vmem:[#allocation69_spill] sm:$0xff]  ;;  %v2168_v52 = vsub.f32 %v1944_v1, %v2056_v59  ;;  %v1834_v49 = vmul.f32 %v7327_v46, %v1722_v54  ;;  %v3570_v45 = vmax.f32 %v3458_v39, 0.0  ;;  %v7016_v23 = vld [vmem:[%s12797_s3 + $0xe4] ss:$28 sps:$4 sm:$0xff]  }
 0x377   :  { %v3551_v32 = vmax.f32 %v3439_v9, 0.0  ;;  %6318 = vmatprep.subr.msk.bf16.mxu1 %vm10876_vm2, %v6119_v6  ;;  %4205 = vmatprep.mubr.bf16.mxu0 %v7013_v16  ;;  %v2770_v56 = vmul.f32 %v7412_v53, %v13803_v57  ;;  %v2769_v16 = vmul.f32 %v7413_v24, %v13804_v2  ;;  %v13805_v6 = vld [vmem:[#allocation82_spill] sm:$0xff]  ;;  %v2163_v59 = vsub.f32 %v1939_v14, %v2051_v47  ;;  %v1946_v1 = vld [vmem:[%s12796_s2 + $0x378] sm:$0xff] }
 0x378   :  { %v3116_v61 = vpop.permute.xlu1 %3115  ;;  %3355 = vperm.xlu1 %6643, %v2161_v8   ;;  %v11452_v28 = vpop.permute.xlu0 %3060  ;;  %v2788_v9 = vmul.f32 %v7414_v26, %v13805_v6  ;;  %v2058_v0 = vmul.f32 %v1834_v49, %v11277_v25  ;;  %v7417_v47 = vld [vmem:[%s12794_s0 + $0x140] sm:$0xff]  ;;  %v13809_v14 = vld [vmem:[#allocation73_spill] sm:$0xff]  ;;  %v7419_v6 = vld [vmem:[%s12794_s0 + $0x1d0] sm:$0xff] }
 0x379   :  { %v6095_v30 = vpack.c.bf16 %v3552_v51, %v3551_v32  ;;  %v3457_v4 = vadd.f32 %v3116_v61, %v2785_v44  ;;  %2718 = vperm.xlu0 %6642, %v1832_v36   ;;  %v7329_v62 = vpop.eup %7328  ;;  %v3442_v5 = vadd.f32 %v11348_v22, %v2770_v56  ;;  %v1717_v36 = vld [vmem:[%s12795_s1 + $0x350] sm:$0xff]  ;;  %v1497_v22 = vadd.f32 1e-05, %v1385_v10  ;;  %v7416_v61 = vld [vmem:[%s12794_s0 + $0x148] sm:$0xff]  ;;  %v13807_v10 = vld [vmem:[#allocation34_spill] sm:$0xff] }
 0x37a   :  { %v1829_v46 = vmul.f32 %v7329_v62, %v1717_v36  ;;  %v3460_v39 = vadd.f32 %v11378_v21, %v2788_v9  ;;  %v2772_v21 = vmul.f32 %v7416_v61, %v13807_v10  ;;  %v13810_v9 = vld [vmem:[#allocation37_spill] sm:$0xff]  ;;  %v7421_v61 = vld [vmem:[%s12794_s0 + $0x150] sm:$0xff] }
 0x37b   :  { %v3569_v48 = vmax.f32 %v3457_v4, 0.0  ;;  %6319 = vmatpush3.bf16.msk.msra.mxu1 %vm10876_vm2, %v6095_v30  ;;  %v3554_v51 = vmax.f32 %v3442_v5, 0.0  ;;  %7332 = vrsqrt.f32 %v1497_v22  ;;  %v2170_v30 = vsub.f32 %v1946_v1, %v2058_v0  ;;  %v13812_v10 = vld [vmem:[#allocation21_spill] sm:$0xff] }
 0x37c   :  { %v3036_v33 = vpop.permute.xlu1 %3035  ;;  %2693 = vperm.xlu1 %6643, %v1827_v7   ;;  %v11478_v18 = vpop.permute.xlu0 %3150  ;;  %v7415_v7 = vld [vmem:[%s12794_s0 + $0x1c0] sm:$0xff]  ;;  %v2053_v4 = vmul.f32 %v1829_v46, %v11294_v37  ;;  %v3572_v24 = vmax.f32 %v3460_v39, 0.0  ;;  %v3444_v2 = vadd.f32 %v11400_v60, %v2772_v21  ;;  %v1941_v37 = vld [vmem:[%s12796_s2 + $0x350] sm:$0xff]  ;;  %v7418_v60 = vld [vmem:[%s12794_s0 + $0x1d8] sm:$0xff]  ;;  %v2773_v21 = vmul.f32 %v7421_v61, %v13812_v10 }
 0x37d   :  { %v6122_v13 = vpack.c.bf16 %v3570_v45, %v3569_v48  ;;  %v3441_v8 = vadd.f32 %v3036_v33, %v2769_v16  ;;  %3390 = vperm.xlu0 %6642, %v2168_v52   ;;  %v2787_v44 = vmul.f32 %v7415_v7, %v13806_v19  ;;  %v7331_v56 = vpop.eup %7330  ;;  %v7018_v52 = vld [vmem:[%s12797_s3 + $0xe0] ss:$28 sps:$4 sm:$0xff]   ;;  %v2790_v36 = vmul.f32 %v7418_v60, %v13809_v14  ;;  %v7427_v10 = vld [vmem:[%s12794_s0 + $0x1f0] sm:$0xff] }
 0x37e   :  { %4206 = vmatmul.mubr.bf16.gmra.mrb[12].mxu0 %v7015_v35  ;;  %v13808_v35 = vld [vmem:[#allocation44_spill] sm:$0xff]  ;;  %v7019_v45 = vld [vmem:[%s12797_s3 + $0x11c] ss:$28 sps:$4 sm:$0xff]   ;;  %v2165_v22 = vsub.f32 %v1941_v37, %v2053_v4 }
 0x37f   :  { %v3553_v32 = vmax.f32 %v3441_v8, 0.0  ;;  %6320 = vmatprep.subr.msk.bf16.mxu1 %vm10876_vm2, %v6122_v13  ;;  %4213 = vmatprep.mubr.bf16.mxu0 %v7016_v23  ;;  %v2771_v62 = vmul.f32 %v7417_v47, %v13808_v35  ;;  %v2789_v13 = vmul.f32 %v7419_v6, %v13810_v9  ;;  %v3556_v8 = vmax.f32 %v3444_v2, 0.0  ;;  %v7420_v19 = vld [vmem:[%s12794_s0 + $0x158] sm:$0xff]  ;;  %v7022_v4 = vld [vmem:[%s12797_s3 + $0x154] ss:$28 sps:$4 sm:$0xff]  }
 0x380   :  { %v3126_v25 = vpop.permute.xlu1 %3125  ;;  %3365 = vperm.xlu1 %6643, %v2163_v59   ;;  %v11495_v54 = vpop.permute.xlu0 %3070  ;;  %v3462_v59 = vadd.f32 %v11429_v63, %v2790_v36  ;;  %v7021_v63 = vld [vmem:[%s12797_s3 + $0x118] ss:$28 sps:$4 sm:$0xff]  }
 0x381   :  { %v6098_v53 = vpack.c.bf16 %v3554_v51, %v3553_v32  ;;  %v3459_v57 = vadd.f32 %v3126_v25, %v2787_v44  ;;  %2728 = vperm.xlu0 %6642, %v1834_v49   ;;  %v1719_v49 = vld [vmem:[%s12795_s1 + $0x360] sm:$0xff]  ;;  %v13811_v44 = vld [vmem:[#allocation33_spill] sm:$0xff] }
 0x382   :  { %v1831_v26 = vmul.f32 %v7331_v56, %v1719_v49  ;;  %v2774_v51 = vmul.f32 %v7420_v19, %v13811_v44  ;;  %v13813_v35 = vld [vmem:[#allocation77_spill] sm:$0xff]  ;;  %v7423_v49 = vld [vmem:[%s12794_s0 + $0x1e0] sm:$0xff]  ;;  %v7025_v44 = vld [vmem:[%s12797_s3 + $0x18c] ss:$28 sps:$4 sm:$0xff]  }
 0x383   :  { %v3571_v16 = vmax.f32 %v3459_v57, 0.0  ;;  %6321 = vmatpush3.bf16.msk.msra.mxu1 %vm10876_vm2, %v6098_v53  ;;  %v3574_v53 = vmax.f32 %v3462_v59, 0.0 }
 0x384   :  { %v3046_v5 = vpop.permute.xlu1 %3045  ;;  %2703 = vperm.xlu1 %6643, %v1829_v46   ;;  %v11521_v48 = vpop.permute.xlu0 %3160  ;;  %v2055_v1 = vmul.f32 %v1831_v26, %v11355_v15  ;;  %v3446_v57 = vadd.f32 %v11452_v28, %v2774_v51  ;;  %v1943_v15 = vld [vmem:[%s12796_s2 + $0x360] sm:$0xff]  ;;  %v7422_v28 = vld [vmem:[%s12794_s0 + $0x1e8] sm:$0xff] }
 0x385   :  { %v6125_v23 = vpack.c.bf16 %v3572_v24, %v3571_v16  ;;  %v3443_v33 = vadd.f32 %v3046_v5, %v2771_v62  ;;  %3400 = vperm.xlu0 %6642, %v2170_v30   ;;  %v7333_v25 = vpop.eup %7332  ;;  %v1721_v30 = vld [vmem:[%s12795_s1 + $0x370] sm:$0xff]  ;;  %v2792_v62 = vmul.f32 %v7422_v28, %v13813_v35 }
 0x386   :  { %4214 = vmatmul.mubr.bf16.gmra.mrb[16].mxu0 %v7018_v52  ;;  %v2167_v16 = vsub.f32 %v1943_v15, %v2055_v1  ;;  %v1833_v37 = vmul.f32 %v7333_v25, %v1721_v30  ;;  %v3558_v5 = vmax.f32 %v3446_v57, 0.0 }
 0x387   :  { %v3555_v46 = vmax.f32 %v3443_v33, 0.0  ;;  %6322 = vmatprep.subr.msk.bf16.mxu1 %vm10876_vm2, %v6125_v23  ;;  %4221 = vmatprep.mubr.bf16.mxu0 %v7019_v45  ;;  %v2791_v45 = vmul.f32 %v7423_v49, %v10574_v12  ;;  %v3464_v60 = vadd.f32 %v11478_v18, %v2792_v62  ;;  %v7424_v33 = vld [vmem:[%s12794_s0 + $0x168] sm:$0xff]  ;;  %v7429_v62 = vld [vmem:[%s12794_s0 + $0x170] sm:$0xff] }
 0x388   :  { %v3136_v0 = vpop.permute.xlu1 %3135  ;;  %3375 = vperm.xlu1 %6643, %v2165_v22   ;;  %v11534_v7 = vpop.permute.xlu0 %3080  ;;  %v13814_v22 = vld [vmem:[#allocation24_spill] sm:$0xff]  ;;  %v2057_v9 = vmul.f32 %v1833_v37, %v11407_v41 }
 0x389   :  { %v6101_v39 = vpack.c.bf16 %v3556_v8, %v3555_v46  ;;  %v3461_v32 = vadd.f32 %v3136_v0, %v2789_v13  ;;  %v7024_v18 = vld [vmem:[%s12797_s3 + $0x150] ss:$28 sps:$4 sm:$0xff]   ;;  %v7425_v13 = vld [vmem:[%s12794_s0 + $0x160] sm:$0xff]  ;;  %v3576_v46 = vmax.f32 %v3464_v60, 0.0 }
 0x38a   :  { %v13815_v8 = vld [vmem:[#allocation80_spill] sm:$0xff] }
 0x38b   :  { %v3573_v56 = vmax.f32 %v3461_v32, 0.0  ;;  %6323 = vmatpush3.bf16.msk.msra.mxu1 %vm10876_vm2, %v6101_v39  ;;  %v2775_v59 = vmul.f32 %v7425_v13, %v13815_v8  ;;  %v1945_v41 = vld [vmem:[%s12796_s2 + $0x370] sm:$0xff]  ;;  %v13816_v32 = vld [vmem:[#allocation55_spill] sm:$0xff]  ;;  %v13819_v8 = vld [vmem:[#allocation90_spill] sm:$0xff] }
 0x38c   :  { %v3056_v52 = vpop.permute.xlu1 %3055  ;;  %2713 = vperm.xlu1 %6643, %v1831_v26   ;;  %v11560_v47 = vpop.permute.xlu0 %3250  ;;  %v2776_v26 = vmul.f32 %v7424_v33, %v13814_v22  ;;  %v2169_v61 = vsub.f32 %v1945_v41, %v2057_v9 }
 0x38d   :  { %v6128_v24 = vpack.c.bf16 %v3574_v53, %v3573_v56  ;;  %v3445_v2 = vadd.f32 %v3056_v52, %v2773_v21  ;;  %v2793_v21 = vmul.f32 %v7427_v10, %v10588_v27  ;;  %v13817_v52 = vld [vmem:[#allocation72_spill] sm:$0xff] }
 0x38e   :  { %4222 = vmatmul.mubr.bf16.gmra.mrb[20].mxu0 %v7021_v63  ;;  %v3448_v0 = vadd.f32 %v11495_v54, %v2776_v26  ;;  %v7426_v54 = vld [vmem:[%s12794_s0 + $0x1f8] sm:$0xff] }
 0x38f   :  { %v3557_v14 = vmax.f32 %v3445_v2, 0.0  ;;  %6324 = vmatprep.subr.msk.bf16.mxu1 %vm10876_vm2, %v6128_v24  ;;  %4229 = vmatprep.mubr.bf16.mxu0 %v7022_v4  ;;  %v2794_v1 = vmul.f32 %v7426_v54, %v13816_v32  ;;  %v7428_v4 = vld [vmem:[%s12794_s0 + $0x178] sm:$0xff]  ;;  %v13818_v24 = vld [vmem:[#allocation23_spill] sm:$0xff]  ;;  %v7034_v54 = vld [vmem:[%s12797_s3 + $0x44] ss:$28 sps:$4 sm:$0xff]  }
 0x390   :  { %v3146_v36 = vpop.permute.xlu1 %3145  ;;  %3385 = vperm.xlu1 %6643, %v2167_v16   ;;  %v11573_v23 = vpop.permute.xlu0 %3170  ;;  %v3560_v53 = vmax.f32 %v3448_v0, 0.0  ;;  %v2778_v28 = vmul.f32 %v7428_v4, %v13817_v52  ;;  %v2777_v2 = vmul.f32 %v7429_v62, %v13818_v24  ;;  %v13820_v4 = vld [vmem:[#allocation81_spill] sm:$0xff] }
 0x391   :  { %v6104_v6 = vpack.c.bf16 %v3558_v5, %v3557_v14  ;;  %v3463_v12 = vadd.f32 %v3146_v36, %v2791_v45  ;;  %v3466_v57 = vadd.f32 %v11521_v48, %v2794_v1  ;;  %v7027_v48 = vld [vmem:[%s12797_s3 + $0x188] ss:$28 sps:$4 sm:$0xff]   ;;  %v7033_v45 = vld [vmem:[%s12797_s3 + $0x14] ss:$28 sps:$4 sm:$0xff]  }
 0x392   :  { %v7430_v14 = vld [vmem:[%s12794_s0 + $0x288] sm:$0xff] }
 0x393   :  { %v3575_v19 = vmax.f32 %v3463_v12, 0.0  ;;  %6325 = vmatpush3.bf16.msk.msra.mxu1 %vm10876_vm2, %v6104_v6  ;;  %v3578_v16 = vmax.f32 %v3466_v57, 0.0  ;;  %v2812_v36 = vmul.f32 %v7430_v14, %v10646_v40  ;;  %v7432_v40 = vld [vmem:[%s12794_s0 + $0x208] sm:$0xff] }
 0x394   :  { %v3066_v51 = vpop.permute.xlu1 %3065  ;;  %2723 = vperm.xlu1 %6643, %v1833_v37   ;;  %v11596_v39 = vpop.permute.xlu0 %3260  ;;  %v3450_v37 = vadd.f32 %v11534_v7, %v2778_v28  ;;  %v7431_v7 = vld [vmem:[%s12794_s0 + $0x280] sm:$0xff] }
 0x395   :  { %v6131_v63 = vpack.c.bf16 %v3576_v46, %v3575_v19  ;;  %v3447_v25 = vadd.f32 %v3066_v51, %v2775_v59  ;;  %v2811_v26 = vmul.f32 %v7431_v7, %v10714_v31  ;;  %v3484_v12 = vadd.f32 %v11560_v47, %v2812_v36  ;;  %v7028_v31 = vld [vmem:[%s12797_s3 + $0x8] ss:$28 sps:$4 sm:$0xff]  }
 0x396   :  { %4230 = vmatmul.mubr.bf16.gmra.mrb[24].mxu0 %v7024_v18  ;;  %v3562_v6 = vmax.f32 %v3450_v37, 0.0  ;;  %v2796_v59 = vmul.f32 %v7432_v40, %v13819_v8  ;;  %v7433_v47 = vld [vmem:[%s12794_s0 + $0x200] sm:$0xff] }
 0x397   :  { %v3559_v56 = vmax.f32 %v3447_v25, 0.0  ;;  %6326 = vmatprep.subr.msk.bf16.mxu1 %vm10876_vm2, %v6131_v63  ;;  %4237 = vmatprep.mubr.bf16.mxu0 %v7025_v44  ;;  %v2795_v19 = vmul.f32 %v7433_v47, %v10602_v29  ;;  %v3596_v41 = vmax.f32 %v3484_v12, 0.0  ;;  %v7434_v63 = vld [vmem:[%s12794_s0 + $0x298] sm:$0xff] }
 0x398   :  { %v3156_v15 = vpop.permute.xlu1 %3155  ;;  %3395 = vperm.xlu1 %6643, %v2169_v61   ;;  %v11609_v30 = vpop.permute.xlu0 %3180  ;;  %v3468_v44 = vadd.f32 %v11573_v23, %v2796_v59  ;;  %v2814_v29 = vmul.f32 %v7434_v63, %v10660_v34  ;;  %v7435_v23 = vld [vmem:[%s12794_s0 + $0x290] sm:$0xff]  ;;  %v7436_v34 = vld [vmem:[%s12794_s0 + $0x218] sm:$0xff] }
 0x399   :  { %v6107_v35 = vpack.c.bf16 %v3560_v53, %v3559_v56  ;;  %v3465_v27 = vadd.f32 %v3156_v15, %v2793_v21  ;;  %v2813_v10 = vmul.f32 %v7435_v23, %v10728_v58  ;;  %v2798_v52 = vmul.f32 %v7436_v34, %v13820_v4  ;;  %v7036_v58 = vld [vmem:[%s12797_s3 + $0x40] ss:$28 sps:$4 sm:$0xff]  }
 0x39a   :  { %v3580_v21 = vmax.f32 %v3468_v44, 0.0  ;;  %v3486_v53 = vadd.f32 %v11596_v39, %v2814_v29  ;;  %v7437_v39 = vld [vmem:[%s12794_s0 + $0x210] sm:$0xff] }
 0x39b   :  { %v3577_v49 = vmax.f32 %v3465_v27, 0.0  ;;  %6327 = vmatpush3.bf16.msk.msra.mxu1 %vm10876_vm2, %v6107_v35  ;;  %v2797_v27 = vmul.f32 %v7437_v39, %v10616_v50  ;;  %v3470_v62 = vadd.f32 %v11609_v30, %v2798_v52  ;;  %v7439_v30 = vld [vmem:[%s12794_s0 + $0x2a0] sm:$0xff]  ;;  %v7052_v52 = vld [vmem:[%s12797_s3 + $0xec] ss:$28 sps:$4 sm:$0xff]  }
 0x39c   :  { %v3076_v5 = vpop.permute.xlu1 %3075  ;;  %v11628_v60 = vpop.permute.xlu0 %3270  ;;  %v2815_v14 = vmul.f32 %v7439_v30, %v10742_v42  ;;  %v7042_v42 = vld [vmem:[%s12797_s3 + $0x78] ss:$28 sps:$4 sm:$0xff]  }
 0x39d   :  { %v6134_v33 = vpack.c.bf16 %v3578_v16, %v3577_v49  ;;  %v3449_v22 = vadd.f32 %v3076_v5, %v2777_v2  ;;  %v7040_v2 = vld [vmem:[%s12797_s3 + $0x7c] ss:$28 sps:$4 sm:$0xff]   ;;  %v7438_v49 = vld [vmem:[%s12794_s0 + $0x2a8] sm:$0xff]  ;;  %v3582_v36 = vmax.f32 %v3470_v62, 0.0 }
 0x39e   :  { %4238 = vmatmul.mubr.bf16.gmra.mrb[28].mxu0 %v7027_v48  ;;  %v3598_v48 = vmax.f32 %v3486_v53, 0.0  ;;  %v2816_v50 = vmul.f32 %v7438_v49, %v10674_v3  ;;  %v7440_v3 = vld [vmem:[%s12794_s0 + $0x228] sm:$0xff]  ;;  %v13823_v53 = vld [vmem:[#allocation89_spill] sm:$0xff] }
 0x39f   :  { %v3561_v9 = vmax.f32 %v3449_v22, 0.0  ;;  %6328 = vmatprep.subr.msk.bf16.mxu1 %vm10876_vm2, %v6134_v33  ;;  %4375 = vmatprep.mubr.bf16.mxu0 %v7033_v45 }
 0x3a0   :  { %v3246_v18 = vpop.permute.xlu1 %3245  ;;  %v11641_v13 = vpop.permute.xlu0 %3190  ;;  %v3488_v33 = vadd.f32 %v11628_v60, %v2816_v50  ;;  %v7441_v60 = vld [vmem:[%s12794_s0 + $0x220] sm:$0xff] }
 0x3a1   :  { %v6110_v46 = vpack.c.bf16 %v3562_v6, %v3561_v9  ;;  %v3483_v0 = vadd.f32 %v3246_v18, %v2811_v26  ;;  %v13821_v6 = vld [vmem:[#allocation92_spill] sm:$0xff]  ;;  %v2799_v40 = vmul.f32 %v7441_v60, %v10630_v20 }
 0x3a2   :  { %v2800_v12 = vmul.f32 %v7440_v3, %v13821_v6  ;;  %v3600_v8 = vmax.f32 %v3488_v33, 0.0  ;;  %v7058_v6 = vld [vmem:[%s12797_s3 + $0x124] ss:$28 sps:$4 sm:$0xff]  }
 0x3a3   :  { %v3595_v51 = vmax.f32 %v3483_v0, 0.0  ;;  %6329 = vmatpush3.bf16.msk.msra.mxu1 %vm10876_vm2, %v6110_v46  ;;  %v7046_v0 = vld [vmem:[%s12797_s3 + $0xb4] ss:$28 sps:$4 sm:$0xff]  }
 0x3a4   :  { %v3166_v32 = vpop.permute.xlu1 %3165  ;;  %v11660_v1 = vpop.permute.xlu0 %3280  ;;  %v3472_v59 = vadd.f32 %v11641_v13, %v2800_v12  ;;  %v7443_v13 = vld [vmem:[%s12794_s0 + $0x2b0] sm:$0xff] }
 0x3a5   :  { %v6161_v25 = vpack.c.bf16 %v3596_v41, %v3595_v51  ;;  %v3467_v61 = vadd.f32 %v3166_v32, %v2795_v19  ;;  %v7442_v19 = vld [vmem:[%s12794_s0 + $0x2b8] sm:$0xff]  ;;  %v2817_v51 = vmul.f32 %v7443_v13, %v10756_v55  ;;  %v7048_v55 = vld [vmem:[%s12797_s3 + $0xb0] ss:$28 sps:$4 sm:$0xff]   ;;  %v13828_v13 = vld [vmem:[#allocation46_spill] sm:$0xff] }
 0x3a6   :  { %4279 = vmatmul.mubr.bf16.vlgmr.msra.gmra.mrb[0].mxu1 %v7028_v31  ;;  %v2818_v20 = vmul.f32 %v7442_v19, %v10688_v17  ;;  %v7444_v17 = vld [vmem:[%s12794_s0 + $0x238] sm:$0xff] }
 0x3a7   :  { %v3579_v57 = vmax.f32 %v3467_v61, 0.0  ;;  %6378 = vmatprep.subr.msk.bf16.mxu0 %vm10876_vm2, %v6161_v25  ;;  %4286 = vmatprep.mubr.bf16.mxu1 %v7034_v54  ;;  %v3584_v54 = vmax.f32 %v3472_v59, 0.0  ;;  %v13822_v61 = vld [vmem:[#allocation93_spill] sm:$0xff] }
 0x3a8   :  { %v3256_v56 = vpop.permute.xlu1 %3255  ;;  %v11673_v15 = vpop.permute.xlu0 %3200  ;;  %v3490_v32 = vadd.f32 %v11660_v1, %v2818_v20  ;;  %v2802_v23 = vmul.f32 %v7444_v17, %v13822_v61  ;;  %v7445_v1 = vld [vmem:[%s12794_s0 + $0x230] sm:$0xff]  ;;  %v13827_v59 = vld [vmem:[#allocation57_spill] sm:$0xff] }
 0x3a9   :  { %v6137_v28 = vpack.c.bf16 %v3580_v21, %v3579_v57  ;;  %v3485_v35 = vadd.f32 %v3256_v56, %v2813_v10  ;;  %v2801_v57 = vmul.f32 %v7445_v1, %v13823_v53  ;;  %v7454_v53 = vld [vmem:[%s12794_s0 + $0x2e8] sm:$0xff] }
 0x3aa   :  { %v3602_v56 = vmax.f32 %v3490_v32, 0.0  ;;  %v3474_v34 = vadd.f32 %v11673_v15, %v2802_v23  ;;  %v7447_v15 = vld [vmem:[%s12794_s0 + $0x2c0] sm:$0xff] }
 0x3ab   :  { %v3597_v24 = vmax.f32 %v3485_v35, 0.0  ;;  %6379 = vmatpush3.bf16.msk.msra.mxu0 %vm10876_vm2, %v6137_v28  ;;  %v2819_v62 = vmul.f32 %v7447_v15, %v10770_v43  ;;  %v7054_v43 = vld [vmem:[%s12797_s3 + $0xe8] ss:$28 sps:$4 sm:$0xff]  }
 0x3ac   :  { %v3176_v16 = vpop.permute.xlu1 %3175  ;;  %v11692_v37 = vpop.permute.xlu0 %3290 }
 0x3ad   :  { %v6164_v45 = vpack.c.bf16 %v3598_v48, %v3597_v24  ;;  %v3469_v5 = vadd.f32 %v3176_v16, %v2797_v27  ;;  %v3586_v24 = vmax.f32 %v3474_v34, 0.0 }
 0x3ae   :  { %4287 = vmatmul.mubr.bf16.gmra.mrb[4].mxu1 %v7036_v58  ;;  %v7446_v58 = vld [vmem:[%s12794_s0 + $0x2c8] sm:$0xff] }
 0x3af   :  { %v3581_v22 = vmax.f32 %v3469_v5, 0.0  ;;  %6380 = vmatprep.subr.msk.bf16.mxu0 %vm10876_vm2, %v6164_v45  ;;  %4294 = vmatprep.mubr.bf16.mxu1 %v7040_v2  ;;  %v2820_v39 = vmul.f32 %v7446_v58, %v10702_v38  ;;  %v7448_v38 = vld [vmem:[%s12794_s0 + $0x248] sm:$0xff]  ;;  %v13824_v45 = vld [vmem:[#allocation78_spill] sm:$0xff] }
 0x3b0   :  { %v3266_v7 = vpop.permute.xlu1 %3265  ;;  %v11705_v26 = vpop.permute.xlu0 %3210  ;;  %v2804_v5 = vmul.f32 %v7448_v38, %v13824_v45  ;;  %v7457_v38 = vld [vmem:[%s12794_s0 + $0x260] sm:$0xff]  ;;  %v13833_v45 = vld [vmem:[#allocation97_spill] sm:$0xff] }
 0x3b1   :  { %v6140_v9 = vpack.c.bf16 %v3582_v36, %v3581_v22  ;;  %v3487_v18 = vadd.f32 %v3266_v7, %v2815_v14  ;;  %v3492_v2 = vadd.f32 %v11692_v37, %v2820_v39  ;;  %v7449_v37 = vld [vmem:[%s12794_s0 + $0x240] sm:$0xff]  ;;  %v13825_v36 = vld [vmem:[#allocation49_spill] sm:$0xff] }
 0x3b2   :  { %v2803_v33 = vmul.f32 %v7449_v37, %v13825_v36  ;;  %v3476_v7 = vadd.f32 %v11705_v26, %v2804_v5  ;;  %v7451_v26 = vld [vmem:[%s12794_s0 + $0x2d0] sm:$0xff]  ;;  %v2807_v5 = vmul.f32 %v7457_v38, %v13833_v45 }
 0x3b3   :  { %v3599_v46 = vmax.f32 %v3487_v18, 0.0  ;;  %6381 = vmatpush3.bf16.msk.msra.mxu0 %vm10876_vm2, %v6140_v9  ;;  %v3604_v22 = vmax.f32 %v3492_v2, 0.0  ;;  %v7450_v18 = vld [vmem:[%s12794_s0 + $0x2d8] sm:$0xff]  ;;  %v7070_v37 = vld [vmem:[%s12797_s3 + $0x194] ss:$28 sps:$4 sm:$0xff]  }
 0x3b4   :  { %v3186_v31 = vpop.permute.xlu1 %3185  ;;  %v11724_v47 = vpop.permute.xlu0 %3300  ;;  %v7465_v38 = vld [vmem:[%s12794_s0 + $0x310] sm:$0xff] }
 0x3b5   :  { %v6167_v41 = vpack.c.bf16 %v3600_v8, %v3599_v46  ;;  %v3471_v44 = vadd.f32 %v3186_v31, %v2799_v40  ;;  %v2821_v46 = vmul.f32 %v7451_v26, %v13827_v59 }
 0x3b6   :  { %4295 = vmatmul.mubr.bf16.gmra.mrb[8].mxu1 %v7042_v42  ;;  %v13826_v42 = vld [vmem:[#allocation54_spill] sm:$0xff] }
 0x3b7   :  { %v3583_v63 = vmax.f32 %v3471_v44, 0.0  ;;  %6382 = vmatprep.subr.msk.bf16.mxu0 %vm10876_vm2, %v6167_v41  ;;  %4302 = vmatprep.mubr.bf16.mxu1 %v7046_v0  ;;  %v2822_v60 = vmul.f32 %v7450_v18, %v13826_v42  ;;  %v3588_v0 = vmax.f32 %v3476_v7, 0.0  ;;  %v7452_v44 = vld [vmem:[%s12794_s0 + $0x258] sm:$0xff]  ;;  %v13834_v7 = vld [vmem:[#allocation40_spill] sm:$0xff]  ;;  %v13835_v18 = vld [vmem:[#allocation83_spill] sm:$0xff] }
 0x3b8   :  { %v3276_v29 = vpop.permute.xlu1 %3275  ;;  %v11737_v25 = vpop.permute.xlu0 %3220 }
 0x3b9   :  { %v6143_v10 = vpack.c.bf16 %v3584_v54, %v3583_v63  ;;  %v3489_v21 = vadd.f32 %v3276_v29, %v2817_v51  ;;  %v3494_v31 = vadd.f32 %v11724_v47, %v2822_v60  ;;  %v2806_v51 = vmul.f32 %v7452_v44, %v13828_v13  ;;  %v7060_v47 = vld [vmem:[%s12797_s3 + $0x120] ss:$28 sps:$4 sm:$0xff]   ;;  %v7453_v63 = vld [vmem:[%s12794_s0 + $0x250] sm:$0xff]  ;;  %v13829_v29 = vld [vmem:[#allocation31_spill] sm:$0xff] }
 0x3ba   :  { %v2805_v17 = vmul.f32 %v7453_v63, %v13829_v29  ;;  %v7072_v44 = vld [vmem:[%s12797_s3 + $0x190] ss:$28 sps:$4 sm:$0xff]   ;;  %v13837_v13 = vld [vmem:[#allocation86_spill] sm:$0xff]  ;;  %v7076_v63 = vld [vmem:[%s12797_s3 + $0x18] ss:$28 sps:$4 sm:$0xff]  }
 0x3bb   :  { %v3601_v4 = vmax.f32 %v3489_v21, 0.0  ;;  %6383 = vmatpush3.bf16.msk.msra.mxu0 %vm10876_vm2, %v6143_v10  ;;  %v3606_v61 = vmax.f32 %v3494_v31, 0.0  ;;  %v3478_v23 = vadd.f32 %v11737_v25, %v2806_v51  ;;  %v7064_v21 = vld [vmem:[%s12797_s3 + $0x15c] ss:$28 sps:$4 sm:$0xff]   ;;  %v7455_v25 = vld [vmem:[%s12794_s0 + $0x2e0] sm:$0xff] }
 0x3bc   :  { %v3196_v28 = vpop.permute.xlu1 %3195  ;;  %v11756_v35 = vpop.permute.xlu0 %3310 }
 0x3bd   :  { %v6170_v27 = vpack.c.bf16 %v3602_v56, %v3601_v4  ;;  %v3473_v48 = vadd.f32 %v3196_v28, %v2801_v57  ;;  %v13830_v57 = vld [vmem:[#allocation95_spill] sm:$0xff]  ;;  %v3590_v58 = vmax.f32 %v3478_v23, 0.0  ;;  %v13838_v23 = vld [vmem:[#allocation22_spill] sm:$0xff] }
 0x3be   :  { %4303 = vmatmul.mubr.bf16.gmra.mrb[12].mxu1 %v7048_v55  ;;  %v2824_v56 = vmul.f32 %v7454_v53, %v13830_v57  ;;  %v13839_v53 = vld [vmem:[#allocation155_spill] sm:$0xff] }
 0x3bf   :  { %v3585_v16 = vmax.f32 %v3473_v48, 0.0  ;;  %6384 = vmatprep.subr.msk.bf16.mxu0 %vm10876_vm2, %v6170_v27  ;;  %4310 = vmatprep.mubr.bf16.mxu1 %v7052_v52  ;;  %v13831_v52 = vld [vmem:[#allocation35_spill] sm:$0xff] }
 0x3c0   :  { %v3286_v49 = vpop.permute.xlu1 %3285  ;;  %v11769_v50 = vpop.permute.xlu0 %3230  ;;  %v2823_v28 = vmul.f32 %v7455_v25, %v13831_v52  ;;  %v3496_v39 = vadd.f32 %v11756_v35, %v2824_v56  ;;  %v7066_v35 = vld [vmem:[%s12797_s3 + $0x158] ss:$28 sps:$4 sm:$0xff]  }
 0x3c1   :  { %v6146_v30 = vpack.c.bf16 %v3586_v24, %v3585_v16  ;;  %v3491_v14 = vadd.f32 %v3286_v49, %v2819_v62  ;;  %v7456_v62 = vld [vmem:[%s12794_s0 + $0x268] sm:$0xff]  ;;  %v13832_v24 = vld [vmem:[#allocation98_spill] sm:$0xff] }
 0x3c2   :  { %v2808_v2 = vmul.f32 %v7456_v62, %v13832_v24 }
 0x3c3   :  { %v3603_v3 = vmax.f32 %v3491_v14, 0.0  ;;  %6385 = vmatpush3.bf16.msk.msra.mxu0 %vm10876_vm2, %v6146_v30  ;;  %v3608_v30 = vmax.f32 %v3496_v39, 0.0  ;;  %v7031_v39 = vld [vmem:[%s12797_s3 + $0x10] ss:$28 sps:$4 sm:$0xff]  }
 0x3c4   :  { %v3206_v12 = vpop.permute.xlu1 %3205  ;;  %v11788_v9 = vpop.permute.xlu0 %3320  ;;  %v3480_v14 = vadd.f32 %v11769_v50, %v2808_v2  ;;  %v7459_v50 = vld [vmem:[%s12794_s0 + $0x2f0] sm:$0xff]  ;;  %v7464_v2 = vld [vmem:[%s12794_s0 + $0x318] sm:$0xff] }
 0x3c5   :  { %v6173_v40 = vpack.c.bf16 %v3604_v22, %v3603_v3  ;;  %v3475_v8 = vadd.f32 %v3206_v12, %v2803_v33  ;;  %v7458_v22 = vld [vmem:[%s12794_s0 + $0x2f8] sm:$0xff]  ;;  %v2825_v42 = vmul.f32 %v7459_v50, %v13835_v18 }
 0x3c6   :  { %4311 = vmatmul.mubr.bf16.gmra.mrb[16].mxu1 %v7054_v43  ;;  %v2826_v3 = vmul.f32 %v7458_v22, %v13834_v7  ;;  %v3592_v60 = vmax.f32 %v3480_v14, 0.0  ;;  %v7466_v22 = vld [vmem:[%s12794_s0 + $0x328] sm:$0xff] }
 0x3c7   :  { %v3587_v19 = vmax.f32 %v3475_v8, 0.0  ;;  %6386 = vmatprep.subr.msk.bf16.mxu0 %vm10876_vm2, %v6173_v40  ;;  %4318 = vmatprep.mubr.bf16.mxu1 %v7058_v6 }
 0x3c8   :  { %v3296_v20 = vpop.permute.xlu1 %3295  ;;  %v11801_v41 = vpop.permute.xlu0 %3240  ;;  %v3498_v40 = vadd.f32 %v11788_v9, %v2826_v3  ;;  %v7461_v9 = vld [vmem:[%s12794_s0 + $0x270] sm:$0xff] }
 0x3c9   :  { %v6149_v54 = vpack.c.bf16 %v3588_v0, %v3587_v19  ;;  %v3493_v32 = vadd.f32 %v3296_v20, %v2821_v46  ;;  %v7460_v46 = vld [vmem:[%s12794_s0 + $0x278] sm:$0xff]  ;;  %v13836_v0 = vld [vmem:[#allocation36_spill] sm:$0xff]  ;;  %v2809_v51 = vmul.f32 %v7461_v9, %v13837_v13 }
 0x3ca   :  { %v2810_v31 = vmul.f32 %v7460_v46, %v13836_v0  ;;  %v7468_v0 = vld [vmem:[%s12794_s0 + $0x338] sm:$0xff]  ;;  %v7469_v9 = vld [vmem:[%s12794_s0 + $0x330] sm:$0xff] }
 0x3cb   :  { %v3605_v10 = vmax.f32 %v3493_v32, 0.0  ;;  %6387 = vmatpush3.bf16.msk.msra.mxu0 %vm10876_vm2, %v6149_v54  ;;  %v3610_v54 = vmax.f32 %v3498_v40, 0.0  ;;  %v7045_v40 = vld [vmem:[%s12797_s3 + $0x80] ss:$28 sps:$4 sm:$0xff]  }
 0x3cc   :  { %v3216_v55 = vpop.permute.xlu1 %3215  ;;  %v11820_v1 = vpop.permute.xlu0 %3330  ;;  %v3482_v32 = vadd.f32 %v11801_v41, %v2810_v31  ;;  %v7463_v41 = vld [vmem:[%s12794_s0 + $0x300] sm:$0xff] }
 0x3cd   :  { %v6176_v34 = vpack.c.bf16 %v3606_v61, %v3605_v10  ;;  %v3477_v4 = vadd.f32 %v3216_v55, %v2805_v17  ;;  %v7462_v61 = vld [vmem:[%s12794_s0 + $0x308] sm:$0xff]  ;;  %v2827_v57 = vmul.f32 %v7463_v41, %v13839_v53  ;;  %v7471_v41 = vld [vmem:[%s12794_s0 + $0x340] sm:$0xff] }
 0x3ce   :  { %4319 = vmatmul.mubr.bf16.gmra.mrb[20].mxu1 %v7060_v47  ;;  %v2828_v10 = vmul.f32 %v7462_v61, %v13838_v23  ;;  %v3594_v56 = vmax.f32 %v3482_v32, 0.0  ;;  %v7051_v32 = vld [vmem:[%s12797_s3 + $0xb8] ss:$28 sps:$4 sm:$0xff]   ;;  %v7470_v23 = vld [vmem:[%s12794_s0 + $0x348] sm:$0xff] }
 0x3cf   :  { %v3589_v27 = vmax.f32 %v3477_v4, 0.0  ;;  %6388 = vmatprep.subr.msk.bf16.mxu0 %vm10876_vm2, %v6176_v34  ;;  %4326 = vmatprep.mubr.bf16.mxu1 %v7064_v21 }
 0x3d0   :  { %v3306_v48 = vpop.permute.xlu1 %3305  ;;  %v11833_v15 = vpop.permute.xlu0 %2668  ;;  %v3500_v34 = vadd.f32 %v11820_v1, %v2828_v10  ;;  %v7037_v1 = vld [vmem:[%s12797_s3 + $0x4c] ss:$28 sps:$4 sm:$0xff]  }
 0x3d1   :  { %v6152_v16 = vpack.c.bf16 %v3590_v58, %v3589_v27  ;;  %v3495_v49 = vadd.f32 %v3306_v48, %v2823_v28 }
 0x3d2   :  { %v3612_v27 = vmax.f32 %v3500_v34, 0.0 }
 0x3d3   :  { %v3607_v43 = vmax.f32 %v3495_v49, 0.0  ;;  %6389 = vmatpush3.bf16.msk.msra.mxu0 %vm10876_vm2, %v6152_v16  ;;  %v2830_v16 = vmul.f32 %v7464_v2, %v11833_v15  ;;  %v7039_v15 = vld [vmem:[%s12797_s3 + $0x48] ss:$28 sps:$4 sm:$0xff]  }
 0x3d4   :  { %v3226_v36 = vpop.permute.xlu1 %3225  ;;  %v3341_v33 = vpop.permute.xlu0 %3340 }
 0x3d5   :  { %v6179_v6 = vpack.c.bf16 %v3608_v30, %v3607_v43  ;;  %v3479_v12 = vadd.f32 %v3226_v36, %v2807_v5  ;;  %v7043_v36 = vld [vmem:[%s12797_s3 + $0x84] ss:$28 sps:$4 sm:$0xff]  }
 0x3d6   :  { %4327 = vmatmul.mubr.bf16.gmra.mrb[24].mxu1 %v7066_v35  ;;  %v3502_v35 = vadd.f32 %v3341_v33, %v2830_v16 }
 0x3d7   :  { %v3591_v8 = vmax.f32 %v3479_v12, 0.0  ;;  %6390 = vmatprep.subr.msk.bf16.mxu0 %vm10876_vm2, %v6179_v6  ;;  %4334 = vmatprep.mubr.bf16.mxu1 %v7070_v37  ;;  %v7467_v12 = vld [vmem:[%s12794_s0 + $0x320] sm:$0xff] }
 0x3d8   :  { %v3316_v26 = vpop.permute.xlu1 %3315  ;;  %v2679_v59 = vpop.permute.xlu0 %2678  ;;  %v3614_v43 = vmax.f32 %v3502_v35, 0.0  ;;  %v7063_v35 = vld [vmem:[%s12797_s3 + $0x128] ss:$28 sps:$4 sm:$0xff]  }
 0x3d9   :  { %v6155_v19 = vpack.c.bf16 %v3592_v60, %v3591_v8  ;;  %v3497_v20 = vadd.f32 %v3316_v26, %v2825_v42  ;;  %v2832_v7 = vmul.f32 %v7466_v22, %v2679_v59  ;;  %v7049_v59 = vld [vmem:[%s12797_s3 + $0xbc] ss:$28 sps:$4 sm:$0xff]  }
 0x3db   :  { %v3609_v47 = vmax.f32 %v3497_v20, 0.0  ;;  %6391 = vmatpush3.bf16.msk.msra.mxu0 %vm10876_vm2, %v6155_v19 }
 0x3dc   :  { %v3236_v29 = vpop.permute.xlu1 %3235  ;;  %v3351_v17 = vpop.permute.xlu0 %3350 }
 0x3dd   :  { %v6182_v21 = vpack.c.bf16 %v3610_v54, %v3609_v47  ;;  %v3481_v55 = vadd.f32 %v3236_v29, %v2809_v51  ;;  %v3504_v6 = vadd.f32 %v3351_v17, %v2832_v7  ;;  %v7055_v29 = vld [vmem:[%s12797_s3 + $0xf4] ss:$28 sps:$4 sm:$0xff]  }
 0x3de   :  { %4335 = vmatmul.mubr.bf16.gmra.mrb[28].mxu1 %v7072_v44 }
 0x3df   :  { %v3593_v4 = vmax.f32 %v3481_v55, 0.0  ;;  %6392 = vmatprep.subr.msk.bf16.mxu0 %vm10876_vm2, %v6182_v21  ;;  %6596 = vmatprep.mubr.bf16.mxu1 %v7076_v63  ;;  %v3616_v8 = vmax.f32 %v3504_v6, 0.0  ;;  %v7069_v6 = vld [vmem:[%s12797_s3 + $0x160] ss:$28 sps:$4 sm:$0xff]  }
 0x3e0   :  { %v3326_v25 = vpop.permute.xlu1 %3325  ;;  %v2689_v52 = vpop.permute.xlu0 %2688 }
 0x3e1   :  { %v6158_v28 = vpack.c.bf16 %v3594_v56, %v3593_v4  ;;  %v3499_v58 = vadd.f32 %v3326_v25, %v2827_v57  ;;  %v2834_v31 = vmul.f32 %v7468_v0, %v2689_v52  ;;  %v7057_v4 = vld [vmem:[%s12797_s3 + $0xf0] ss:$28 sps:$4 sm:$0xff]  }
 0x3e3   :  { %v3611_v48 = vmax.f32 %v3499_v58, 0.0  ;;  %6393 = vmatpush3.bf16.msk.msra.mxu0 %vm10876_vm2, %v6158_v28  ;;  %v7061_v28 = vld [vmem:[%s12797_s3 + $0x12c] ss:$28 sps:$4 sm:$0xff]  }
 0x3e4   :  { %v2664_v62 = vpop.permute.xlu1 %2663  ;;  %v3361_v24 = vpop.permute.xlu0 %3360 }
 0x3e5   :  { %v6185_v49 = vpack.c.bf16 %v3612_v27, %v3611_v48  ;;  %v2829_v45 = vmul.f32 %v7465_v38, %v2664_v62  ;;  %v3506_v44 = vadd.f32 %v3361_v24, %v2834_v31  ;;  %v7473_v62 = vld [vmem:[%s12794_s0 + $0x350] sm:$0xff] }
 0x3e6   :  { %4376 = vmatmul.mubr.bf16.vlgmr.msra.gmra.mrb[32].mxu0 %v7031_v39  ;;  %v7472_v39 = vld [vmem:[%s12794_s0 + $0x358] sm:$0xff] }
 0x3e7   :  { %6580 = vmatprep.subr.msk.bf16.mxu1 %vm10876_vm2, %v6185_v49  ;;  %4383 = vmatprep.mubr.bf16.mxu0 %v7037_v1  ;;  %v3618_v47 = vmax.f32 %v3506_v44, 0.0 }
 0x3e8   :  { %v3336_v5 = vpop.permute.xlu1 %3335  ;;  %6581 = vmatpush3.bf16.msk.msra.mxu1 %vm10876_vm2, %v6185_v49  ;;  %v2699_v14 = vpop.permute.xlu0 %2698 }
 0x3e9   :  { %v3501_v30 = vadd.f32 %v3336_v5, %v2829_v45  ;;  %v2836_v10 = vmul.f32 %v7470_v23, %v2699_v14  ;;  %v7067_v5 = vld [vmem:[%s12797_s3 + $0x164] ss:$28 sps:$4 sm:$0xff]   ;;  %v7474_v14 = vld [vmem:[%s12794_s0 + $0x368] sm:$0xff] }
 0x3eb   :  { %v3613_v37 = vmax.f32 %v3501_v30, 0.0 }
 0x3ec   :  { %v2674_v33 = vpop.permute.xlu1 %2673  ;;  %v3371_v18 = vpop.permute.xlu0 %3370 }
 0x3ed   :  { %v6188_v3 = vpack.c.bf16 %v3614_v43, %v3613_v37  ;;  %v2831_v50 = vmul.f32 %v7467_v12, %v2674_v33  ;;  %v3508_v55 = vadd.f32 %v3371_v18, %v2836_v10  ;;  %v7475_v33 = vld [vmem:[%s12794_s0 + $0x360] sm:$0xff]  ;;  %v7073_v18 = vld [vmem:[%s12797_s3 + $0x19c] ss:$28 sps:$4 sm:$0xff]  }
 0x3ee   :  { %4384 = vmatmul.mubr.bf16.gmra.mrb[36].mxu0 %v7039_v15 }
 0x3ef   :  { %6582 = vmatprep.subr.msk.bf16.mxu1 %vm10876_vm2, %v6188_v3  ;;  %4391 = vmatprep.mubr.bf16.mxu0 %v7043_v36  ;;  %v3620_v25 = vmax.f32 %v3508_v55, 0.0 }
 0x3f0   :  { %v3346_v42 = vpop.permute.xlu1 %3345  ;;  %6583 = vmatpush3.bf16.msk.msra.mxu1 %vm10876_vm2, %v6188_v3  ;;  %v2709_v20 = vpop.permute.xlu0 %2708 }
 0x3f1   :  { %v3503_v60 = vadd.f32 %v3346_v42, %v2831_v50  ;;  %v2838_v27 = vmul.f32 %v7472_v39, %v2709_v20  ;;  %v7075_v20 = vld [vmem:[%s12797_s3 + $0x198] ss:$28 sps:$4 sm:$0xff]  }
 0x3f3   :  { %v3615_v26 = vmax.f32 %v3503_v60, 0.0 }
 0x3f4   :  { %v2684_v46 = vpop.permute.xlu1 %2683  ;;  %v3381_v17 = vpop.permute.xlu0 %3380 }
 0x3f5   :  { %v6191_v19 = vpack.c.bf16 %v3616_v8, %v3615_v26  ;;  %v2833_v13 = vmul.f32 %v7469_v9, %v2684_v46  ;;  %v3510_v1 = vadd.f32 %v3381_v17, %v2838_v27  ;;  %v7477_v46 = vld [vmem:[%s12794_s0 + $0x370] sm:$0xff] }
 0x3f6   :  { %4392 = vmatmul.mubr.bf16.gmra.mrb[40].mxu0 %v7045_v40  ;;  %v7476_v40 = vld [vmem:[%s12794_s0 + $0x378] sm:$0xff] }
 0x3f7   :  { %6584 = vmatprep.subr.msk.bf16.mxu1 %vm10876_vm2, %v6191_v19  ;;  %4399 = vmatprep.mubr.bf16.mxu0 %v7049_v59  ;;  %v3622_v38 = vmax.f32 %v3510_v1, 0.0 }
 0x3f8   :  { %v3356_v51 = vpop.permute.xlu1 %3355  ;;  %6585 = vmatpush3.bf16.msk.msra.mxu1 %vm10876_vm2, %v6191_v19  ;;  %v2719_v34 = vpop.permute.xlu0 %2718 }
 0x3f9   :  { %v3505_v54 = vadd.f32 %v3356_v51, %v2833_v13  ;;  %v2840_v15 = vmul.f32 %v7474_v14, %v2719_v34  ;;  %v7077_v51 = vld [vmem:[%s12797_s3 + $0x50] ss:$28 sps:$4 sm:$0xff]  }
 0x3fb   :  { %v3617_v63 = vmax.f32 %v3505_v54, 0.0  ;;  %v7078_v54 = vld [vmem:[%s12797_s3 + $0x88] ss:$28 sps:$4 sm:$0xff]  }
 0x3fc   :  { %v2694_v61 = vpop.permute.xlu1 %2693  ;;  %v3391_v2 = vpop.permute.xlu0 %3390 }
 0x3fd   :  { %v6194_v21 = vpack.c.bf16 %v3618_v47, %v3617_v63  ;;  %v2835_v53 = vmul.f32 %v7471_v41, %v2694_v61  ;;  %v3512_v36 = vadd.f32 %v3391_v2, %v2840_v15  ;;  %v7080_v47 = vld [vmem:[%s12797_s3 + $0xf8] ss:$28 sps:$4 sm:$0xff]   ;;  %v7082_v63 = vld [vmem:[%s12797_s3 + $0x168] ss:$28 sps:$4 sm:$0xff]  }
 0x3fe   :  { %4400 = vmatmul.mubr.bf16.gmra.mrb[44].mxu0 %v7051_v32  ;;  %v7079_v32 = vld [vmem:[%s12797_s3 + $0xc0] ss:$28 sps:$4 sm:$0xff]  }
 0x3ff   :  { %6586 = vmatprep.subr.msk.bf16.mxu1 %vm10876_vm2, %v6194_v21  ;;  %4407 = vmatprep.mubr.bf16.mxu0 %v7055_v29  ;;  %v3624_v12 = vmax.f32 %v3512_v36, 0.0  ;;  %v7083_v29 = vld [vmem:[%s12797_s3 + $0x1a0] ss:$28 sps:$4 sm:$0xff]  }
 0x400   :  { %v3366_v57 = vpop.permute.xlu1 %3365  ;;  %6587 = vmatpush3.bf16.msk.msra.mxu1 %vm10876_vm2, %v6194_v21  ;;  %v2729_v37 = vpop.permute.xlu0 %2728 }
 0x401   :  { %v3507_v56 = vadd.f32 %v3366_v57, %v2835_v53  ;;  %v2842_v8 = vmul.f32 %v7476_v40, %v2729_v37 }
 0x403   :  { %v3619_v52 = vmax.f32 %v3507_v56, 0.0 }
 0x404   :  { %v2704_v58 = vpop.permute.xlu1 %2703  ;;  %v3401_v42 = vpop.permute.xlu0 %3400 }
 0x405   :  { %v6197_v48 = vpack.c.bf16 %v3620_v25, %v3619_v52  ;;  %v2837_v24 = vmul.f32 %v7473_v62, %v2704_v58  ;;  %v3514_v59 = vadd.f32 %v3401_v42, %v2842_v8 }
 0x406   :  { %4408 = vmatmul.mubr.bf16.gmra.mrb[48].mxu0 %v7057_v4 }
 0x407   :  { %6588 = vmatprep.subr.msk.bf16.mxu1 %vm10876_vm2, %v6197_v48  ;;  %4415 = vmatprep.mubr.bf16.mxu0 %v7061_v28  ;;  %v3626_v44 = vmax.f32 %v3514_v59, 0.0 }
 0x408   :  { %v3376_v16 = vpop.permute.xlu1 %3375  ;;  %6589 = vmatpush3.bf16.msk.msra.mxu1 %vm10876_vm2, %v6197_v48 }
 0x409   :  { %v3509_v49 = vadd.f32 %v3376_v16, %v2837_v24 }
 0x40b   :  { %v3621_v45 = vmax.f32 %v3509_v49, 0.0 }
 0x40c   :  { %v2714_v30 = vpop.permute.xlu1 %2713 }
 0x40d   :  { %v6200_v43 = vpack.c.bf16 %v3622_v38, %v3621_v45  ;;  %v2839_v22 = vmul.f32 %v7475_v33, %v2714_v30 }
 0x40e   :  { %4416 = vmatmul.mubr.bf16.gmra.mrb[52].mxu0 %v7063_v35 }
 0x40f   :  { %6590 = vmatprep.subr.msk.bf16.mxu1 %vm10876_vm2, %v6200_v43  ;;  %4423 = vmatprep.mubr.bf16.mxu0 %v7067_v5 }
 0x410   :  { %v3386_v7 = vpop.permute.xlu1 %3385  ;;  %6591 = vmatpush3.bf16.msk.msra.mxu1 %vm10876_vm2, %v6200_v43 }
 0x411   :  { %v3511_v3 = vadd.f32 %v3386_v7, %v2839_v22 }
 0x413   :  { %v3623_v50 = vmax.f32 %v3511_v3, 0.0 }
 0x414   :  { %v2724_v60 = vpop.permute.xlu1 %2723 }
 0x415   :  { %v6203_v26 = vpack.c.bf16 %v3624_v12, %v3623_v50  ;;  %v2841_v0 = vmul.f32 %v7477_v46, %v2724_v60 }
 0x416   :  { %4424 = vmatmul.mubr.bf16.gmra.mrb[56].mxu0 %v7069_v6 }
 0x417   :  { %6592 = vmatprep.subr.msk.bf16.mxu1 %vm10876_vm2, %v6203_v26  ;;  %4431 = vmatprep.mubr.bf16.mxu0 %v7073_v18 }
 0x418   :  { %v3396_v31 = vpop.permute.xlu1 %3395  ;;  %6593 = vmatpush3.bf16.msk.msra.mxu1 %vm10876_vm2, %v6203_v26 }
 0x419   :  { %v3513_v19 = vadd.f32 %v3396_v31, %v2841_v0 }
 0x41b   :  { %v3625_v9 = vmax.f32 %v3513_v19, 0.0 }
 0x41d   :  { %v6206_v13 = vpack.c.bf16 %v3626_v44, %v3625_v9 }
 0x41e   :  { %4432 = vmatmul.mubr.bf16.gmra.mrb[60].mxu0 %v7075_v20 }
 0x41f   :  { %6594 = vmatprep.subr.msk.bf16.mxu1 %vm10876_vm2, %v6206_v13 }
 0x420   :  { %6595 = vmatpush3.bf16.msk.msra.mxu1 %vm10876_vm2, %v6206_v13 }
 0x423   :  { %6597 = vmatmul.mubr.bf16.vlgmr.msra.gmra.mrb[32].mxu1 %v7077_v51 }
 0x424   :  { %6600 = vmatprep.mubr.bf16.mxu1 %v7078_v54 }
 0x42b   :  { %6601 = vmatmul.mubr.bf16.gmra.mrb[36].mxu1 %v7079_v32 }
 0x42c   :  { %6604 = vmatprep.mubr.bf16.mxu1 %v7080_v47 }
 0x433   :  { %6605 = vmatmul.mubr.bf16.gmra.mrb[40].mxu1 %v7081_v11 }
 0x434   :  { %6608 = vmatprep.mubr.bf16.mxu1 %v7082_v63 }
 0x439   :  { %v6266_v17 = vpop.f32.mrb[0].mxu0 }
 0x43a   :  { %v6267_v61 = vpop.f32.mrb[1].mxu0 }
 0x43b   :  { %6609 = vmatmul.mubr.bf16.gmra.mrb[44].mxu1 %v7083_v29  ;;  %v6268_v23 = vadd.f32 %v6267_v61, %v6266_v17  ;;  %v6269_v10 = vpop.f32.mrb[2].mxu0 }
 0x43c   :  { %v6270_v21 = vpop.f32.mrb[3].mxu0 }
 0x43d   :  { %v6271_v55 = vadd.f32 %v6270_v21, %v6269_v10 }
 0x441   :  { %v6272_v41 = vpop.f32.mrb[4].mxu0 }
 0x442   :  { %v6273_v53 = vpop.f32.mrb[5].mxu0 }
 0x443   :  { %v6274_v57 = vadd.f32 %v6273_v53, %v6272_v41  ;;  %v6275_v56 = vpop.f32.mrb[6].mxu0 }
 0x444   :  { %v6276_v34 = vpop.f32.mrb[7].mxu0 }
 0x445   :  { %v6277_v4 = vadd.f32 %v6276_v34, %v6275_v56 }
 0x449   :  { %v6278_v25 = vpop.f32.mrb[8].mxu0 }
 0x44a   :  { %v6279_v52 = vpop.f32.mrb[9].mxu0 }
 0x44b   :  { %v6280_v28 = vadd.f32 %v6279_v52, %v6278_v25  ;;  %v6281_v58 = vpop.f32.mrb[10].mxu0 }
 0x44c   :  { %v6282_v39 = vpop.f32.mrb[11].mxu0 }
 0x44d   :  { %v6283_v27 = vadd.f32 %v6282_v39, %v6281_v58 }
 0x451   :  { %v6284_v48 = vpop.f32.mrb[12].mxu0 }
 0x452   :  { %v6285_v1 = vpop.f32.mrb[13].mxu0 }
 0x453   :  { %v6286_v62 = vadd.f32 %v6285_v1, %v6284_v48  ;;  %v6287_v24 = vpop.f32.mrb[14].mxu0 }
 0x454   :  { %v6288_v2 = vpop.f32.mrb[15].mxu0 }
 0x455   :  { %v6289_v16 = vadd.f32 %v6288_v2, %v6287_v24 }
 0x459   :  { %v6290_v49 = vpop.f32.mrb[16].mxu0 }
 0x45a   :  { %v6291_v35 = vpop.f32.mrb[17].mxu0 }
 0x45b   :  { %v6292_v38 = vadd.f32 %v6291_v35, %v6290_v49  ;;  %v6293_v45 = vpop.f32.mrb[18].mxu0 }
 0x45c   :  { %v6294_v5 = vpop.f32.mrb[19].mxu0 }
 0x45d   :  { %v6295_v30 = vadd.f32 %v6294_v5, %v6293_v45 }
 0x461   :  { %v6296_v14 = vpop.f32.mrb[20].mxu0 }
 0x462   :  { %v6297_v15 = vpop.f32.mrb[21].mxu0 }
 0x463   :  { %v6298_v43 = vadd.f32 %v6297_v15, %v6296_v14  ;;  %v6299_v37 = vpop.f32.mrb[22].mxu0 }
 0x464   :  { %v6300_v36 = vpop.f32.mrb[23].mxu0 }
 0x465   :  { %v6301_v33 = vadd.f32 %v6300_v36, %v6299_v37 }
 0x469   :  { %v6302_v22 = vpop.f32.mrb[24].mxu0 }
 0x46a   :  { %v6303_v7 = vpop.f32.mrb[25].mxu0 }
 0x46b   :  { %v12034_v3 = vadd.f32 %v6303_v7, %v6302_v22  ;;  %v6305_v6 = vpop.f32.mrb[26].mxu0 }
 0x46c   :  { %v6306_v12 = vpop.f32.mrb[27].mxu0 }
 0x46d   :  { %v6307_v50 = vadd.f32 %v6306_v12, %v6305_v6 }
 0x471   :  { %v6308_v18 = vpop.f32.mrb[28].mxu0 }
 0x472   :  { %v6309_v42 = vpop.f32.mrb[29].mxu0 }
 0x473   :  { %v12036_v60 = vadd.f32 %v6309_v42, %v6308_v18  ;;  %v6311_v40 = vpop.f32.mrb[30].mxu0 }
 0x474   :  { %v6312_v8 = vpop.f32.mrb[31].mxu0 }
 0x475   :  { %v12038_v26 = vadd.f32 %v6312_v8, %v6311_v40 }
 0x479   :  { %v6330_v59 = vpop.f32.mrb[0].mxu1 }
 0x47a   :  { %v6331_v46 = vpop.f32.mrb[1].mxu1 }
 0x47b   :  { %v6332_v0 = vadd.f32 %v6331_v46, %v6330_v59  ;;  %v6333_v31 = vpop.f32.mrb[2].mxu1 }
 0x47c   :  { %v6334_v19 = vpop.f32.mrb[3].mxu1 }
 0x47d   :  { %v12040_v20 = vadd.f32 %v6332_v0, %v6268_v23  ;;  %v6335_v44 = vadd.f32 %v6334_v19, %v6333_v31 }
 0x47f   :  { %v12042_v9 = vadd.f32 %v6335_v44, %v6271_v55 }
 0x481   :  { %v6336_v13 = vpop.f32.mrb[4].mxu1 }
 0x482   :  { %v6337_v51 = vpop.f32.mrb[5].mxu1 }
 0x483   :  { %v6338_v54 = vadd.f32 %v6337_v51, %v6336_v13  ;;  %v6339_v32 = vpop.f32.mrb[6].mxu1 }
 0x484   :  { %v6340_v47 = vpop.f32.mrb[7].mxu1 }
 0x485   :  { %v12044_v11 = vadd.f32 %v6338_v54, %v6274_v57  ;;  %v6341_v63 = vadd.f32 %v6340_v47, %v6339_v32 }
 0x487   :  { %v12046_v29 = vadd.f32 %v6341_v63, %v6277_v4 }
 0x489   :  { %v6342_v17 = vpop.f32.mrb[8].mxu1 }
 0x48a   :  { %v6343_v61 = vpop.f32.mrb[9].mxu1 }
 0x48b   :  { %v6344_v10 = vadd.f32 %v6343_v61, %v6342_v17  ;;  %v6345_v21 = vpop.f32.mrb[10].mxu1 }
 0x48c   :  { %v6346_v41 = vpop.f32.mrb[11].mxu1 }
 0x48d   :  { %v12048_v23 = vadd.f32 %v6344_v10, %v6280_v28  ;;  %v6347_v53 = vadd.f32 %v6346_v41, %v6345_v21 }
 0x48f   :  { %v12050_v55 = vadd.f32 %v6347_v53, %v6283_v27 }
 0x491   :  { %v6348_v56 = vpop.f32.mrb[12].mxu1 }
 0x492   :  { %v6349_v34 = vpop.f32.mrb[13].mxu1 }
 0x493   :  { %v6350_v25 = vadd.f32 %v6349_v34, %v6348_v56  ;;  %v6351_v52 = vpop.f32.mrb[14].mxu1 }
 0x494   :  { %v6352_v58 = vpop.f32.mrb[15].mxu1 }
 0x495   :  { %v12052_v57 = vadd.f32 %v6350_v25, %v6286_v62  ;;  %v6353_v39 = vadd.f32 %v6352_v58, %v6351_v52 }
 0x497   :  { %v12054_v4 = vadd.f32 %v6353_v39, %v6289_v16 }
 0x499   :  { %v6354_v48 = vpop.f32.mrb[16].mxu1 }
 0x49a   :  { %v6355_v1 = vpop.f32.mrb[17].mxu1 }
 0x49b   :  { %v6356_v24 = vadd.f32 %v6355_v1, %v6354_v48  ;;  %v6357_v2 = vpop.f32.mrb[18].mxu1 }
 0x49c   :  { %v6358_v49 = vpop.f32.mrb[19].mxu1 }
 0x49d   :  { %v12056_v28 = vadd.f32 %v6356_v24, %v6292_v38  ;;  %v6359_v35 = vadd.f32 %v6358_v49, %v6357_v2 }
 0x49f   :  { %v12058_v27 = vadd.f32 %v6359_v35, %v6295_v30 }
 0x4a1   :  { %v6360_v45 = vpop.f32.mrb[20].mxu1 }
 0x4a2   :  { %v6361_v5 = vpop.f32.mrb[21].mxu1 }
 0x4a3   :  { %v6362_v14 = vadd.f32 %v6361_v5, %v6360_v45  ;;  %v6363_v15 = vpop.f32.mrb[22].mxu1 }
 0x4a4   :  { %v6364_v37 = vpop.f32.mrb[23].mxu1 }
 0x4a5   :  { %v12060_v62 = vadd.f32 %v6362_v14, %v6298_v43  ;;  %v6365_v36 = vadd.f32 %v6364_v37, %v6363_v15 }
 0x4a7   :  { %v12062_v16 = vadd.f32 %v6365_v36, %v6301_v33 }
 0x4a9   :  { %v6366_v22 = vpop.f32.mrb[24].mxu1 }
 0x4aa   :  { %v6367_v7 = vpop.f32.mrb[25].mxu1 }
 0x4ab   :  { %v6368_v6 = vadd.f32 %v6367_v7, %v6366_v22  ;;  %v6369_v12 = vpop.f32.mrb[26].mxu1 }
 0x4ac   :  { %v6370_v18 = vpop.f32.mrb[27].mxu1 }
 0x4ad   :  { %v12065_v38 = vadd.f32 %v6368_v6, %v12034_v3  ;;  %v6371_v30 = vadd.f32 %v6370_v18, %v6369_v12 }
 0x4af   :  { %v12067_v42 = vadd.f32 %v6371_v30, %v6307_v50 }
 0x4b1   :  { %v6372_v40 = vpop.f32.mrb[28].mxu1 }
 0x4b2   :  { %v6373_v8 = vpop.f32.mrb[29].mxu1 }
 0x4b3   :  { %v6374_v59 = vadd.f32 %v6373_v8, %v6372_v40  ;;  %v6375_v46 = vpop.f32.mrb[30].mxu1 }
 0x4b4   :  { %v6376_v43 = vpop.f32.mrb[31].mxu1 }
 0x4b5   :  { %v12070_v0 = vadd.f32 %v6374_v59, %v12036_v60  ;;  %v6377_v33 = vadd.f32 %v6376_v43, %v6375_v46 }
 0x4b7   :  { %v12073_v31 = vadd.f32 %v6377_v33, %v12038_v26 }
 0x4b9   :  { %v6394_v19 = vpop.f32.mrb[32].mxu0 }
 0x4ba   :  { %v6395_v44 = vpop.f32.mrb[33].mxu0 }
 0x4bb   :  { %v6396_v13 = vadd.f32 %v6395_v44, %v6394_v19  ;;  %v6397_v3 = vpop.f32.mrb[34].mxu0 }
 0x4bc   :  { %v6398_v51 = vpop.f32.mrb[35].mxu0 }
 0x4bd   :  { %v6399_v54 = vadd.f32 %v6398_v51, %v6397_v3  ;;  %v4378_v50 = vadd.f32 %v6396_v13, %v12040_v20 }
 0x4bf   :  { %v12077_v32 = vadd.f32 %v6399_v54, %v12042_v9 }
 0x4c1   :  { %v6400_v47 = vpop.f32.mrb[36].mxu0 }
 0x4c2   :  { %v6401_v63 = vpop.f32.mrb[37].mxu0 }
 0x4c3   :  { %v6402_v17 = vadd.f32 %v6401_v63, %v6400_v47  ;;  %v6403_v60 = vpop.f32.mrb[38].mxu0 }
 0x4c4   :  { %v6404_v61 = vpop.f32.mrb[39].mxu0 }
 0x4c5   :  { %v6405_v10 = vadd.f32 %v6404_v61, %v6403_v60  ;;  %v4386_v26 = vadd.f32 %v6402_v17, %v12044_v11 }
 0x4c7   :  { %v4389_v21 = vadd.f32 %v6405_v10, %v12046_v29 }
 0x4c9   :  { %v6406_v41 = vpop.f32.mrb[40].mxu0 }
 0x4ca   :  { %v6407_v53 = vpop.f32.mrb[41].mxu0 }
 0x4cb   :  { %v6408_v56 = vadd.f32 %v6407_v53, %v6406_v41  ;;  %v6409_v34 = vpop.f32.mrb[42].mxu0 }
 0x4cc   :  { %v6410_v25 = vpop.f32.mrb[43].mxu0 }
 0x4cd   :  { %v6411_v52 = vadd.f32 %v6410_v25, %v6409_v34  ;;  %v4394_v20 = vadd.f32 %v6408_v56, %v12048_v23 }
 0x4cf   :  { %v12083_v9 = vadd.f32 %v6411_v52, %v12050_v55 }
 0x4d1   :  { %v6412_v58 = vpop.f32.mrb[44].mxu0 }
 0x4d2   :  { %v6413_v39 = vpop.f32.mrb[45].mxu0 }
 0x4d3   :  { %v6414_v48 = vadd.f32 %v6413_v39, %v6412_v58  ;;  %v6415_v1 = vpop.f32.mrb[46].mxu0 }
 0x4d4   :  { %v6416_v24 = vpop.f32.mrb[47].mxu0 }
 0x4d5   :  { %v6417_v2 = vadd.f32 %v6416_v24, %v6415_v1  ;;  %v4402_v11 = vadd.f32 %v6414_v48, %v12052_v57 }
 0x4d7   :  { %v4405_v29 = vadd.f32 %v6417_v2, %v12054_v4 }
 0x4d9   :  { %v6418_v49 = vpop.f32.mrb[48].mxu0 }
 0x4da   :  { %v6419_v35 = vpop.f32.mrb[49].mxu0 }
 0x4db   :  { %v6420_v45 = vadd.f32 %v6419_v35, %v6418_v49  ;;  %v6421_v5 = vpop.f32.mrb[50].mxu0 }
 0x4dc   :  { %v6422_v14 = vpop.f32.mrb[51].mxu0 }
 0x4dd   :  { %v6423_v15 = vadd.f32 %v6422_v14, %v6421_v5  ;;  %v12088_v23 = vadd.f32 %v6420_v45, %v12056_v28 }
 0x4df   :  { %v12091_v55 = vadd.f32 %v6423_v15, %v12058_v27 }
 0x4e1   :  { %v6424_v37 = vpop.f32.mrb[52].mxu0 }
 0x4e2   :  { %v6425_v36 = vpop.f32.mrb[53].mxu0 }
 0x4e3   :  { %v6426_v22 = vadd.f32 %v6425_v36, %v6424_v37  ;;  %v6427_v7 = vpop.f32.mrb[54].mxu0 }
 0x4e4   :  { %v6428_v6 = vpop.f32.mrb[55].mxu0 }
 0x4e5   :  { %v6429_v57 = vadd.f32 %v6428_v6, %v6427_v7  ;;  %v4418_v4 = vadd.f32 %v6426_v22, %v12060_v62 }
 0x4e7   :  { %v4421_v12 = vadd.f32 %v6429_v57, %v12062_v16 }
 0x4e9   :  { %v6430_v18 = vpop.f32.mrb[56].mxu0 }
 0x4ea   :  { %v6431_v30 = vpop.f32.mrb[57].mxu0 }
 0x4eb   :  { %v6432_v40 = vadd.f32 %v6431_v30, %v6430_v18  ;;  %v6433_v8 = vpop.f32.mrb[58].mxu0 }
 0x4ec   :  { %v6434_v59 = vpop.f32.mrb[59].mxu0 }
 0x4ed   :  { %v6435_v28 = vadd.f32 %v6434_v59, %v6433_v8  ;;  %v12096_v46 = vadd.f32 %v6432_v40, %v12065_v38 }
 0x4ef   :  { %v12099_v27 = vadd.f32 %v6435_v28, %v12067_v42 }
 0x4f1   :  { %v6436_v43 = vpop.f32.mrb[60].mxu0 }
 0x4f2   :  { %v6437_v33 = vpop.f32.mrb[61].mxu0 }
 0x4f3   :  { %v6438_v19 = vadd.f32 %v6437_v33, %v6436_v43  ;;  %v6439_v44 = vpop.f32.mrb[62].mxu0 }
 0x4f4   :  { %v6440_v13 = vpop.f32.mrb[63].mxu0 }
 0x4f5   :  { %v6441_v62 = vadd.f32 %v6440_v13, %v6439_v44  ;;  %v4434_v16 = vadd.f32 %v6438_v19, %v12070_v0 }
 0x4f6   :  { %v6598_v3 = vpop.f32.mrb[32].mxu1 }
 0x4f7   :  { %v12102_v51 = vadd.f32 %v6598_v3, %v4386_v26  ;;  %v4474_v54 = vpop.f32.mrb[33].mxu1  ;;  %v4437_v47 = vadd.f32 %v6441_v62, %v12073_v31 }
 0x4f8   :  { %v12105_v63 = vadd.f32 %v4474_v54, %v4378_v50  ;;  %v6599_v38 = vpop.f32.mrb[34].mxu1 }
 0x4f9   :  { %v12107_v17 = vadd.f32 %v6599_v38, %v4389_v21  ;;  %v4477_v42 = vpop.f32.mrb[35].mxu1  ;;  %v4603_v48 = vmul.f32 %v12102_v51, %v12102_v51 }
 0x4fa   :  { %v12110_v60 = vadd.f32 %v4477_v42, %v12077_v32  ;;  %v4537_v61 = vsel %vm154_vm0, %v12105_v63, 0.0  ;;  %v4601_v31 = vmul.f32 %v12105_v63, %v12105_v63 }
 0x4fb   :  { %4538 = vadd.xlane.f32.xlu1 %v4537_v61  ;;  %v4546_v58 = vsel %vm154_vm0, %v12107_v17, 0.0  ;;  %v4604_v39 = vmul.f32 %v12107_v17, %v12107_v17  ;;  %v4623_v49 = vsel %vm154_vm0, %v4603_v48, 0.0 }
 0x4fc   :  { %v4540_v0 = vsel %vm154_vm0, %v12110_v60, 0.0  ;;  %v4602_v10 = vmul.f32 %v12110_v60, %v12110_v60  ;;  %v4617_v56 = vsel %vm154_vm0, %v4601_v31, 0.0 }
 0x4fd   :  { %4541 = vadd.xlane.f32.xlu0 %v4540_v0  ;;  %v4626_v24 = vsel %vm154_vm0, %v4604_v39, 0.0 }
 0x4fe   :  { %v6602_v50 = vpop.f32.mrb[36].mxu1  ;;  %v4620_v26 = vsel %vm154_vm0, %v4602_v10, 0.0 }
 0x4ff   :  { %v12121_v21 = vadd.f32 %v6602_v50, %v4402_v11  ;;  %v4490_v32 = vpop.f32.mrb[37].mxu1  ;;  %4621 = vadd.xlane.f32.xlu1 %v4620_v26 }
 0x500   :  { %v12123_v41 = vadd.f32 %v4490_v32, %v4394_v20  ;;  %v6603_v53 = vpop.f32.mrb[38].mxu1  ;;  %v4543_v20 = vsel %vm154_vm0, %v12102_v51, 0.0 }
 0x501   :  { %v12126_v34 = vadd.f32 %v6603_v53, %v4405_v29  ;;  %v4493_v25 = vpop.f32.mrb[39].mxu1  ;;  %4618 = vadd.xlane.f32.xlu0 %v4617_v56  ;;  %v4555_v59 = vsel %vm154_vm0, %v12121_v21, 0.0  ;;  %v4607_v28 = vmul.f32 %v12121_v21, %v12121_v21 }
 0x502   :  { %v12129_v52 = vadd.f32 %v4493_v25, %v12083_v9  ;;  %v4605_v37 = vmul.f32 %v12123_v41, %v12123_v41 }
 0x503   :  { %4547 = vadd.xlane.f32.xlu1 %v4546_v58  ;;  %v4558_v40 = vsel %vm154_vm0, %v12126_v34, 0.0  ;;  %v4608_v8 = vmul.f32 %v12126_v34, %v12126_v34 }
 0x504   :  { %v4552_v14 = vsel %vm154_vm0, %v12129_v52, 0.0  ;;  %v4606_v15 = vmul.f32 %v12129_v52, %v12129_v52 }
 0x505   :  { %4544 = vadd.xlane.f32.xlu0 %v4543_v20 }
 0x506   :  { %v6606_v1 = vpop.f32.mrb[40].mxu1  ;;  %v4632_v22 = vsel %vm154_vm0, %v4606_v15, 0.0 }
 0x507   :  { %v12140_v2 = vadd.f32 %v6606_v1, %v4418_v4  ;;  %v4506_v9 = vpop.f32.mrb[41].mxu1  ;;  %4627 = vadd.xlane.f32.xlu1 %v4626_v24  ;;  %v4629_v4 = vsel %vm154_vm0, %v4605_v37, 0.0 }
 0x508   :  { %v12143_v11 = vadd.f32 %v4506_v9, %v12088_v23  ;;  %v6607_v29 = vpop.f32.mrb[42].mxu1  ;;  %v4549_v23 = vsel %vm154_vm0, %v12123_v41, 0.0 }
 0x509   :  { %v12146_v35 = vadd.f32 %v6607_v29, %v4421_v12  ;;  %v4509_v45 = vpop.f32.mrb[43].mxu1  ;;  %4624 = vadd.xlane.f32.xlu0 %v4623_v49  ;;  %v4567_v54 = vsel %vm154_vm0, %v12140_v2, 0.0 }
 0x50a   :  { %v12149_v5 = vadd.f32 %v4509_v45, %v12091_v55  ;;  %v4561_v19 = vsel %vm154_vm0, %v12143_v11, 0.0  ;;  %v4609_v44 = vmul.f32 %v12143_v11, %v12143_v11 }
 0x50b   :  { %4553 = vadd.xlane.f32.xlu1 %v4552_v14  ;;  %v4612_v3 = vmul.f32 %v12146_v35, %v12146_v35 }
 0x50c   :  { %v4564_v43 = vsel %vm154_vm0, %v12149_v5, 0.0  ;;  %v4610_v33 = vmul.f32 %v12149_v5, %v12149_v5  ;;  %v4641_v62 = vsel %vm154_vm0, %v4609_v44, 0.0 }
 0x50d   :  { %4550 = vadd.xlane.f32.xlu0 %v4549_v23  ;;  %v4650_v38 = vsel %vm154_vm0, %v4612_v3, 0.0 }
 0x50e   :  { %v6610_v36 = vpop.f32.mrb[44].mxu1  ;;  %v4644_v13 = vsel %vm154_vm0, %v4610_v33, 0.0 }
 0x50f   :  { %v12160_v7 = vadd.f32 %v6610_v36, %v4434_v16  ;;  %v4522_v55 = vpop.f32.mrb[45].mxu1  ;;  %4633 = vadd.xlane.f32.xlu1 %v4632_v22  ;;  %v4570_v16 = vsel %vm154_vm0, %v12146_v35, 0.0 }
 0x510   :  { %v12163_v6 = vadd.f32 %v4522_v55, %v12096_v46  ;;  %v6611_v57 = vpop.f32.mrb[46].mxu1  ;;  %v4638_v46 = vsel %vm154_vm0, %v4608_v8, 0.0 }
 0x511   :  { %v12166_v12 = vadd.f32 %v6611_v57, %v4437_v47  ;;  %v4525_v18 = vpop.f32.mrb[47].mxu1  ;;  %4630 = vadd.xlane.f32.xlu0 %v4629_v4  ;;  %v4611_v47 = vmul.f32 %v12140_v2, %v12140_v2  ;;  %v4579_v56 = vsel %vm154_vm0, %v12160_v7, 0.0  ;;  %v4615_v25 = vmul.f32 %v12160_v7, %v12160_v7 }
 0x512   :  { %v12169_v30 = vadd.f32 %v4525_v18, %v12099_v27  ;;  %v4635_v27 = vsel %vm154_vm0, %v4607_v28, 0.0  ;;  %v4573_v10 = vsel %vm154_vm0, %v12163_v6, 0.0  ;;  %v4613_v31 = vmul.f32 %v12163_v6, %v12163_v6 }
 0x513   :  { %4559 = vadd.xlane.f32.xlu1 %v4558_v40  ;;  %v4647_v42 = vsel %vm154_vm0, %v4611_v47, 0.0  ;;  %v4582_v32 = vsel %vm154_vm0, %v12166_v12, 0.0  ;;  %v4616_v53 = vmul.f32 %v12166_v12, %v12166_v12  ;;  %v4659_v39 = vsel %vm154_vm0, %v4615_v25, 0.0 }
 0x514   :  { %v4576_v61 = vsel %vm154_vm0, %v12169_v30, 0.0  ;;  %v4614_v0 = vmul.f32 %v12169_v30, %v12169_v30  ;;  %v4653_v26 = vsel %vm154_vm0, %v4613_v31, 0.0 }
 0x515   :  { %4556 = vadd.xlane.f32.xlu0 %v4555_v59  ;;  %v4662_v58 = vsel %vm154_vm0, %v4616_v53, 0.0 }
 0x516   :  { %v4656_v50 = vsel %vm154_vm0, %v4614_v0, 0.0  ;;  %v4745_v0 = vld [vmem:[%s12798_s4] sm:$0xff] }
 0x517   :  { %4639 = vadd.xlane.f32.xlu1 %v4638_v46 }
 0x519   :  { %4636 = vadd.xlane.f32.xlu0 %v4635_v27 }
 0x51b   :  { %4565 = vadd.xlane.f32.xlu1 %v4564_v43 }
 0x51d   :  { %4562 = vadd.xlane.f32.xlu0 %v4561_v19 }
 0x51f   :  { %4645 = vadd.xlane.f32.xlu1 %v4644_v13 }
 0x521   :  { %4642 = vadd.xlane.f32.xlu0 %v4641_v62 }
 0x523   :  { %4571 = vadd.xlane.f32.xlu1 %v4570_v16 }
 0x525   :  { %4568 = vadd.xlane.f32.xlu0 %v4567_v54  ;;  %v4746_v54 = vld [vmem:[%s12798_s4 + $0x8] sm:$0xff] }
 0x527   :  { %4651 = vadd.xlane.f32.xlu1 %v4650_v38 }
 0x529   :  { %4648 = vadd.xlane.f32.xlu0 %v4647_v42 }
 0x52b   :  { %4577 = vadd.xlane.f32.xlu1 %v4576_v61 }
 0x52d   :  { %4574 = vadd.xlane.f32.xlu0 %v4573_v10 }
 0x52f   :  { %4657 = vadd.xlane.f32.xlu1 %v4656_v50 }
 0x531   :  { %4654 = vadd.xlane.f32.xlu0 %v4653_v26 }
 0x533   :  { %4583 = vadd.xlane.f32.xlu1 %v4582_v32 }
 0x535   :  { %4580 = vadd.xlane.f32.xlu0 %v4579_v56 }
 0x537   :  { %4663 = vadd.xlane.f32.xlu1 %v4662_v58 }
 0x539   :  { %4660 = vadd.xlane.f32.xlu0 %v4659_v39 }
 0x588   :  { %v4539_v20 = vpop.xlane.xlu1 %4538 }
 0x589   :  { %v4585_v1 = vmul.f32 0.020408163, %v4539_v20 }
 0x58a   :  { %v4542_v48 = vpop.xlane.xlu0 %4541 }
 0x58b   :  { %v4586_v24 = vmul.f32 0.020408163, %v4542_v48  ;;  %v4681_v14 = vmul.f32 %v4585_v1, %v4585_v1 }
 0x58c   :  { %v4622_v9 = vpop.xlane.xlu1 %4621 }
 0x58d   :  { %v4682_v29 = vmul.f32 %v4586_v24, %v4586_v24  ;;  %v4666_v49 = vmul.f32 0.020408163, %v4622_v9  ;;  %v4777_v9 = vld [vmem:[%s12799_s5] sm:$0xff] }
 0x58e   :  { %v4619_v45 = vpop.xlane.xlu0 %4618 }
 0x58f   :  { %v4698_v15 = vsub.f32 %v4666_v49, %v4682_v29  ;;  %v4665_v23 = vmul.f32 0.020408163, %v4619_v45  ;;  %v4778_v29 = vld [vmem:[%s12799_s5 + $0x8] sm:$0xff] }
 0x590   :  { %v4548_v37 = vpop.xlane.xlu1 %4547 }
 0x591   :  { %v4714_v36 = vadd.f32 1e-05, %v4698_v15  ;;  %v4697_v22 = vsub.f32 %v4665_v23, %v4681_v14  ;;  %v12221_v55 = vmul.f32 0.020408163, %v4548_v37 }
 0x592   :  { %v4545_v57 = vpop.xlane.xlu0 %4544 }
 0x593   :  { %7334 = vrsqrt.f32 %v4714_v36  ;;  %v4713_v4 = vadd.f32 1e-05, %v4697_v22  ;;  %v12223_v18 = vmul.f32 0.020408163, %v4545_v57  ;;  %v4684_v8 = vmul.f32 %v12221_v55, %v12221_v55 }
 0x594   :  { %v4628_v40 = vpop.xlane.xlu1 %4627 }
 0x595   :  { %7336 = vrsqrt.f32 %v4713_v4  ;;  %v4668_v59 = vmul.f32 0.020408163, %v4628_v40  ;;  %v4683_v46 = vmul.f32 %v12223_v18, %v12223_v18 }
 0x596   :  { %v4625_v28 = vpop.xlane.xlu0 %4624 }
 0x597   :  { %v4700_v27 = vsub.f32 %v4668_v59, %v4684_v8  ;;  %v4667_v43 = vmul.f32 0.020408163, %v4625_v28 }
 0x598   :  { %v4554_v33 = vpop.xlane.xlu1 %4553 }
 0x599   :  { %v4716_v19 = vadd.f32 1e-05, %v4700_v27  ;;  %v4699_v44 = vsub.f32 %v4667_v43, %v4683_v46  ;;  %v12229_v13 = vmul.f32 0.020408163, %v4554_v33 }
 0x59a   :  { %v4551_v62 = vpop.xlane.xlu0 %4550 }
 0x59b   :  { %7338 = vrsqrt.f32 %v4716_v19  ;;  %v4715_v16 = vadd.f32 1e-05, %v4699_v44  ;;  %v12231_v3 = vmul.f32 0.020408163, %v4551_v62  ;;  %v4686_v42 = vmul.f32 %v12229_v13, %v12229_v13 }
 0x59c   :  { %v4634_v47 = vpop.xlane.xlu1 %4633 }
 0x59d   :  { %v7335_v38 = vpop.eup %7334  ;;  %7340 = vrsqrt.f32 %v4715_v16  ;;  %v4670_v61 = vmul.f32 0.020408163, %v4634_v47  ;;  %v4685_v26 = vmul.f32 %v12231_v3, %v12231_v3  ;;  %v4780_v47 = vld [vmem:[%s12799_s5 + $0x18] sm:$0xff] }
 0x59e   :  { %v4631_v10 = vpop.xlane.xlu0 %4630  ;;  %v4762_v31 = vmul.f32 %v7335_v38, %v4746_v54  ;;  %v4779_v54 = vld [vmem:[%s12799_s5 + $0x10] sm:$0xff] }
 0x59f   :  { %v7337_v50 = vpop.eup %7336  ;;  %v4702_v32 = vsub.f32 %v4670_v61, %v4686_v42  ;;  %v4669_v53 = vmul.f32 0.020408163, %v4631_v10 }
 0x5a0   :  { %4832 = vperm.xlu1 %6643, %v4762_v31   ;;  %v4560_v56 = vpop.xlane.xlu1 %4559  ;;  %v4761_v25 = vmul.f32 %v7337_v50, %v4745_v0  ;;  %v4794_v58 = vmul.f32 %v4762_v31, %v4586_v24  ;;  %v4748_v24 = vld [vmem:[%s12798_s4 + $0x18] sm:$0xff]  ;;  %v4750_v0 = vld [vmem:[%s12798_s4 + $0x28] sm:$0xff] }
 0x5a1   :  { %v4718_v39 = vadd.f32 1e-05, %v4702_v32  ;;  %v4701_v20 = vsub.f32 %v4669_v53, %v4685_v26  ;;  %v12243_v48 = vmul.f32 0.020408163, %v4560_v56 }
 0x5a2   :  { %v4557_v49 = vpop.xlane.xlu0 %4556  ;;  %4827 = vperm.xlu0 %6642, %v4761_v25   ;;  %v4793_v45 = vmul.f32 %v4761_v25, %v4585_v1  ;;  %v4810_v36 = vsub.f32 %v4778_v29, %v4794_v58  ;;  %v4747_v1 = vld [vmem:[%s12798_s4 + $0x10] sm:$0xff] }
 0x5a3   :  { %7342 = vrsqrt.f32 %v4718_v39  ;;  %v4717_v14 = vadd.f32 1e-05, %v4701_v20  ;;  %v12251_v15 = vmul.f32 0.020408163, %v4557_v49  ;;  %v4688_v57 = vmul.f32 %v12243_v48, %v12243_v48 }
 0x5a4   :  { %v4640_v23 = vpop.xlane.xlu1 %4639  ;;  %v4809_v37 = vsub.f32 %v4777_v9, %v4793_v45 }
 0x5a5   :  { %v7339_v22 = vpop.eup %7338  ;;  %7344 = vrsqrt.f32 %v4717_v14  ;;  %v4672_v4 = vmul.f32 0.020408163, %v4640_v23  ;;  %v4687_v28 = vmul.f32 %v12251_v15, %v12251_v15 }
 0x5a6   :  { %v4637_v40 = vpop.xlane.xlu0 %4636  ;;  %4923 = vperm.xlu1 %6643, %v4809_v37   ;;  %4928 = vperm.xlu0 %6642, %v4810_v36   ;;  %v4764_v8 = vmul.f32 %v7339_v22, %v4748_v24  ;;  %v4781_v37 = vld [vmem:[%s12799_s5 + $0x20] sm:$0xff]  ;;  %v4782_v36 = vld [vmem:[%s12799_s5 + $0x28] sm:$0xff] }
 0x5a7   :  { %v7341_v59 = vpop.eup %7340  ;;  %v4704_v46 = vsub.f32 %v4672_v4, %v4688_v57  ;;  %v4671_v27 = vmul.f32 0.020408163, %v4637_v40 }
 0x5a8   :  { %v4566_v43 = vpop.xlane.xlu1 %4565  ;;  %v4763_v33 = vmul.f32 %v7341_v59, %v4747_v1  ;;  %v4796_v19 = vmul.f32 %v4764_v8, %v12221_v55  ;;  %v4752_v1 = vld [vmem:[%s12798_s4 + $0x38] sm:$0xff] }
 0x5a9   :  { %v4720_v44 = vadd.f32 1e-05, %v4704_v46  ;;  %v4703_v62 = vsub.f32 %v4671_v27, %v4687_v28  ;;  %v12264_v16 = vmul.f32 0.020408163, %v4566_v43 }
 0x5aa   :  { %v4563_v38 = vpop.xlane.xlu0 %4562  ;;  %4837 = vperm.xlu1 %6643, %v4763_v33   ;;  %4842 = vperm.xlu0 %6642, %v4764_v8   ;;  %v4795_v42 = vmul.f32 %v4763_v33, %v12223_v18  ;;  %v4812_v50 = vsub.f32 %v4780_v47, %v4796_v19  ;;  %v4749_v18 = vld [vmem:[%s12798_s4 + $0x20] sm:$0xff] }
 0x5ab   :  { %7346 = vrsqrt.f32 %v4720_v44  ;;  %v4719_v61 = vadd.f32 1e-05, %v4703_v62  ;;  %v12273_v55 = vmul.f32 0.020408163, %v4563_v38  ;;  %v4690_v32 = vmul.f32 %v12264_v16, %v12264_v16 }
 0x5ac   :  { %v4646_v10 = vpop.xlane.xlu1 %4645  ;;  %v4811_v31 = vsub.f32 %v4779_v54, %v4795_v42 }
 0x5ad   :  { %v7343_v26 = vpop.eup %7342  ;;  %7348 = vrsqrt.f32 %v4719_v61  ;;  %v4674_v53 = vmul.f32 0.020408163, %v4646_v10  ;;  %v4689_v39 = vmul.f32 %v12273_v55, %v12273_v55 }
 0x5ae   :  { %v4643_v56 = vpop.xlane.xlu0 %4642  ;;  %4933 = vperm.xlu1 %6643, %v4811_v31   ;;  %4938 = vperm.xlu0 %6642, %v4812_v50   ;;  %v4766_v25 = vmul.f32 %v7343_v26, %v4750_v0  ;;  %v4783_v31 = vld [vmem:[%s12799_s5 + $0x30] sm:$0xff]  ;;  %v4784_v50 = vld [vmem:[%s12799_s5 + $0x38] sm:$0xff] }
 0x5af   :  { %v7345_v58 = vpop.eup %7344  ;;  %v4706_v20 = vsub.f32 %v4674_v53, %v4690_v32  ;;  %v4673_v9 = vmul.f32 0.020408163, %v4643_v56 }
 0x5b0   :  { %v4572_v29 = vpop.xlane.xlu1 %4571  ;;  %v4765_v49 = vmul.f32 %v7345_v58, %v4749_v18  ;;  %v4798_v45 = vmul.f32 %v4766_v25, %v12229_v13  ;;  %v4754_v18 = vld [vmem:[%s12798_s4 + $0x48] sm:$0xff] }
 0x5b1   :  { %v4722_v14 = vadd.f32 1e-05, %v4706_v20  ;;  %v4705_v24 = vsub.f32 %v4673_v9, %v4689_v39  ;;  %v12286_v23 = vmul.f32 0.020408163, %v4572_v29 }
 0x5b2   :  { %v4569_v22 = vpop.xlane.xlu0 %4568  ;;  %4847 = vperm.xlu1 %6643, %v4765_v49   ;;  %4852 = vperm.xlu0 %6642, %v4766_v25   ;;  %v4797_v57 = vmul.f32 %v4765_v49, %v12231_v3  ;;  %v4814_v59 = vsub.f32 %v4782_v36, %v4798_v45  ;;  %v4751_v3 = vld [vmem:[%s12798_s4 + $0x30] sm:$0xff] }
 0x5b3   :  { %7350 = vrsqrt.f32 %v4722_v14  ;;  %v4721_v4 = vadd.f32 1e-05, %v4705_v24  ;;  %v12295_v13 = vmul.f32 0.020408163, %v4569_v22  ;;  %v4692_v46 = vmul.f32 %v12286_v23, %v12286_v23 }
 0x5b4   :  { %v4652_v40 = vpop.xlane.xlu1 %4651  ;;  %v4813_v8 = vsub.f32 %v4781_v37, %v4797_v57 }
 0x5b5   :  { %v7347_v28 = vpop.eup %7346  ;;  %7352 = vrsqrt.f32 %v4721_v4  ;;  %v4676_v27 = vmul.f32 0.020408163, %v4652_v40  ;;  %v4691_v44 = vmul.f32 %v12295_v13, %v12295_v13 }
 0x5b6   :  { %v4649_v43 = vpop.xlane.xlu0 %4648  ;;  %4943 = vperm.xlu1 %6643, %v4813_v8   ;;  %4948 = vperm.xlu0 %6642, %v4814_v59   ;;  %v4768_v33 = vmul.f32 %v7347_v28, %v4752_v1  ;;  %v4785_v8 = vld [vmem:[%s12799_s5 + $0x40] sm:$0xff]  ;;  %v4786_v59 = vld [vmem:[%s12799_s5 + $0x48] sm:$0xff] }
 0x5b7   :  { %v7349_v19 = vpop.eup %7348  ;;  %v4708_v62 = vsub.f32 %v4676_v27, %v4692_v46  ;;  %v4675_v54 = vmul.f32 0.020408163, %v4649_v43 }
 0x5b8   :  { %v4578_v47 = vpop.xlane.xlu1 %4577  ;;  %v4767_v38 = vmul.f32 %v7349_v19, %v4751_v3  ;;  %v4800_v42 = vmul.f32 %v4768_v33, %v12243_v48  ;;  %v4756_v3 = vld [vmem:[%s12798_s4 + $0x58] sm:$0xff] }
 0x5b9   :  { %v4724_v61 = vadd.f32 1e-05, %v4708_v62  ;;  %v4707_v0 = vsub.f32 %v4675_v54, %v4691_v44  ;;  %v12308_v10 = vmul.f32 0.020408163, %v4578_v47 }
 0x5ba   :  { %v4575_v26 = vpop.xlane.xlu0 %4574  ;;  %4857 = vperm.xlu1 %6643, %v4767_v38   ;;  %4862 = vperm.xlu0 %6642, %v4768_v33   ;;  %v4799_v32 = vmul.f32 %v4767_v38, %v12251_v15  ;;  %v4816_v58 = vsub.f32 %v4784_v50, %v4800_v42  ;;  %v4753_v15 = vld [vmem:[%s12798_s4 + $0x40] sm:$0xff] }
 0x5bb   :  { %7354 = vrsqrt.f32 %v4724_v61  ;;  %v4723_v53 = vadd.f32 1e-05, %v4707_v0  ;;  %v12317_v48 = vmul.f32 0.020408163, %v4575_v26  ;;  %v4694_v20 = vmul.f32 %v12308_v10, %v12308_v10 }
 0x5bc   :  { %v4658_v56 = vpop.xlane.xlu1 %4657  ;;  %v4815_v25 = vsub.f32 %v4783_v31, %v4799_v32 }
 0x5bd   :  { %v7351_v39 = vpop.eup %7350  ;;  %7356 = vrsqrt.f32 %v4723_v53  ;;  %v4678_v9 = vmul.f32 0.020408163, %v4658_v56  ;;  %v4693_v14 = vmul.f32 %v12317_v48, %v12317_v48  ;;  %v4788_v56 = vld [vmem:[%s12799_s5 + $0x58] sm:$0xff] }
 0x5be   :  { %v4655_v29 = vpop.xlane.xlu0 %4654  ;;  %4953 = vperm.xlu1 %6643, %v4815_v25   ;;  %4958 = vperm.xlu0 %6642, %v4816_v58   ;;  %v4770_v49 = vmul.f32 %v7351_v39, %v4754_v18  ;;  %v4787_v18 = vld [vmem:[%s12799_s5 + $0x50] sm:$0xff] }
 0x5bf   :  { %v7353_v45 = vpop.eup %7352  ;;  %v4710_v24 = vsub.f32 %v4678_v9, %v4694_v20  ;;  %v4677_v37 = vmul.f32 0.020408163, %v4655_v29 }
 0x5c0   :  { %v4584_v36 = vpop.xlane.xlu1 %4583  ;;  %v4769_v22 = vmul.f32 %v7353_v45, %v4753_v15  ;;  %v4802_v57 = vmul.f32 %v4770_v49, %v12264_v16  ;;  %v4757_v15 = vld [vmem:[%s12798_s4 + $0x60] sm:$0xff] }
 0x5c1   :  { %v4726_v4 = vadd.f32 1e-05, %v4710_v24  ;;  %v4709_v1 = vsub.f32 %v4677_v37, %v4693_v14  ;;  %v12330_v40 = vmul.f32 0.020408163, %v4584_v36  ;;  %v4789_v14 = vld [vmem:[%s12799_s5 + $0x60] sm:$0xff]  ;;  %v4790_v24 = vld [vmem:[%s12799_s5 + $0x68] sm:$0xff] }
 0x5c2   :  { %v4581_v28 = vpop.xlane.xlu0 %4580  ;;  %4867 = vperm.xlu1 %6643, %v4769_v22   ;;  %4872 = vperm.xlu0 %6642, %v4770_v49   ;;  %v4801_v46 = vmul.f32 %v4769_v22, %v12273_v55  ;;  %v4818_v19 = vsub.f32 %v4786_v59, %v4802_v57  ;;  %v4755_v55 = vld [vmem:[%s12798_s4 + $0x50] sm:$0xff]  ;;  %v4760_v36 = vld [vmem:[%s12798_s4 + $0x78] sm:$0xff] }
 0x5c3   :  { %7358 = vrsqrt.f32 %v4726_v4  ;;  %v4725_v27 = vadd.f32 1e-05, %v4709_v1  ;;  %v4599_v16 = vmul.f32 0.020408163, %v4581_v28  ;;  %v4696_v62 = vmul.f32 %v12330_v40, %v12330_v40 }
 0x5c4   :  { %v4664_v43 = vpop.xlane.xlu1 %4663  ;;  %v4817_v33 = vsub.f32 %v4785_v8, %v4801_v46  ;;  %v4792_v46 = vld [vmem:[%s12799_s5 + $0x78] sm:$0xff] }
 0x5c5   :  { %v7355_v44 = vpop.eup %7354  ;;  %7360 = vrsqrt.f32 %v4725_v27  ;;  %v4680_v54 = vmul.f32 0.020408163, %v4664_v43  ;;  %v4695_v61 = vmul.f32 %v4599_v16, %v4599_v16 }
 0x5c6   :  { %v4661_v47 = vpop.xlane.xlu0 %4660  ;;  %4963 = vperm.xlu1 %6643, %v4817_v33   ;;  %4968 = vperm.xlu0 %6642, %v4818_v19   ;;  %v4772_v38 = vmul.f32 %v7355_v44, %v4756_v3 }
 0x5c7   :  { %v7357_v42 = vpop.eup %7356  ;;  %v4712_v0 = vsub.f32 %v4680_v54, %v4696_v62  ;;  %v4679_v31 = vmul.f32 0.020408163, %v4661_v47 }
 0x5c8   :  { %v4771_v50 = vmul.f32 %v7357_v42, %v4755_v55  ;;  %v4804_v26 = vmul.f32 %v4772_v38, %v12286_v23  ;;  %v4758_v23 = vld [vmem:[%s12798_s4 + $0x68] sm:$0xff] }
 0x5c9   :  { %v4728_v32 = vadd.f32 1e-05, %v4712_v0  ;;  %v4711_v53 = vsub.f32 %v4679_v31, %v4695_v61 }
 0x5ca   :  { %4877 = vperm.xlu1 %6643, %v4771_v50   ;;  %4882 = vperm.xlu0 %6642, %v4772_v38   ;;  %v4803_v25 = vmul.f32 %v4771_v50, %v12295_v13  ;;  %v4820_v20 = vsub.f32 %v4788_v56, %v4804_v26 }
 0x5cb   :  { %7362 = vrsqrt.f32 %v4728_v32  ;;  %v4727_v58 = vadd.f32 1e-05, %v4711_v53 }
 0x5cc   :  { %v4819_v39 = vsub.f32 %v4787_v18, %v4803_v25 }
 0x5cd   :  { %v7359_v9 = vpop.eup %7358  ;;  %7364 = vrsqrt.f32 %v4727_v58 }
 0x5ce   :  { %4973 = vperm.xlu1 %6643, %v4819_v39   ;;  %4978 = vperm.xlu0 %6642, %v4820_v20   ;;  %v4774_v29 = vmul.f32 %v7359_v9, %v4758_v23 }
 0x5cf   :  { %v7361_v49 = vpop.eup %7360 }
 0x5d0   :  { %v4773_v45 = vmul.f32 %v7361_v49, %v4757_v15  ;;  %v4806_v13 = vmul.f32 %v4774_v29, %v12308_v10  ;;  %v4759_v10 = vld [vmem:[%s12798_s4 + $0x70] sm:$0xff]  ;;  %s7479_s4 = smov 9  }
 0x5d2   :  { %4887 = vperm.xlu1 %6643, %v4773_v45   ;;  %4892 = vperm.xlu0 %6642, %v4774_v29   ;;  %v4805_v37 = vmul.f32 %v4773_v45, %v12317_v48  ;;  %v4822_v57 = vsub.f32 %v4790_v24, %v4806_v13  ;;  %v4791_v48 = vld [vmem:[%s12799_s5 + $0x70] sm:$0xff]  ;;  %s7480_s5 = smov 127  }
 0x5d4   :  { %v4821_v22 = vsub.f32 %v4789_v14, %v4805_v37 }
 0x5d5   :  { %v7363_v4 = vpop.eup %7362 }
 0x5d6   :  { %4983 = vperm.xlu1 %6643, %v4821_v22   ;;  %4988 = vperm.xlu0 %6642, %v4822_v57   ;;  %v4776_v1 = vmul.f32 %v7363_v4, %v4760_v36 }
 0x5d7   :  { %v7365_v8 = vpop.eup %7364 }
 0x5d8   :  { %v4775_v59 = vmul.f32 %v7365_v8, %v4759_v10  ;;  %v4808_v28 = vmul.f32 %v4776_v1, %v12330_v40 }
 0x5da   :  { %4897 = vperm.xlu1 %6643, %v4775_v59   ;;  %4902 = vperm.xlu0 %6642, %v4776_v1   ;;  %v4807_v27 = vmul.f32 %v4775_v59, %v4599_v16  ;;  %v4824_v43 = vsub.f32 %v4792_v46, %v4808_v28 }
 0x5dc   :  { %v4823_v3 = vsub.f32 %v4791_v48, %v4807_v27 }
 0x5de   :  { %4993 = vperm.xlu1 %6643, %v4823_v3   ;;  %4998 = vperm.xlu0 %6642, %v4824_v43  }
 0x61f   :  { %v4833_v33 = vpop.permute.xlu1 %4832 }
 0x620   :  { %v4906_v44 = vmul.f32 %v4833_v33, %v12110_v60 }
 0x621   :  { %v4828_v19 = vpop.permute.xlu0 %4827 }
 0x622   :  { %v4905_v40 = vmul.f32 %v4828_v19, %v12105_v63 }
 0x625   :  { %v4929_v62 = vpop.permute.xlu0 %4928  ;;  %v4924_v54 = vpop.permute.xlu1 %4923 }
 0x626   :  { %v5002_v55 = vadd.f32 %v4929_v62, %v4906_v44  ;;  %v5001_v47 = vadd.f32 %v4924_v54, %v4905_v40 }
 0x628   :  { %v5018_v38 = vmax.f32 %v5002_v55, 0.0  ;;  %v5017_v42 = vmax.f32 %v5001_v47, 0.0 }
 0x629   :  { %v4843_v61 = vpop.permute.xlu0 %4842  ;;  %v4838_v0 = vpop.permute.xlu1 %4837 }
 0x62a   :  { %v5034_v16 = vsel %vm10853_vm1, %v5018_v38, 0.0  ;;  %v5033_v50 = vsel %vm10853_vm1, %v5017_v42, 0.0  ;;  %v4908_v32 = vmul.f32 %v4843_v61, %v12107_v17  ;;  %v4907_v60 = vmul.f32 %v4838_v0, %v12102_v51 }
 0x62b   :  { %v6644_v26 = vpack.i.bf16 %v5034_v16, %v5033_v50 }
 0x62d   :  { %v4939_v63 = vpop.permute.xlu0 %4938  ;;  %6645 = vrot.lane.b32.xlu1 %v6644_v26, %s7479_s4  ;;  %v4934_v53 = vpop.permute.xlu1 %4933 }
 0x62e   :  { %v5004_v18 = vadd.f32 %v4939_v63, %v4908_v32  ;;  %v5003_v56 = vadd.f32 %v4934_v53, %v4907_v60 }
 0x630   :  { %v5020_v25 = vmax.f32 %v5004_v18, 0.0  ;;  %v5019_v58 = vmax.f32 %v5003_v56, 0.0 }
 0x631   :  { %v4853_v23 = vpop.permute.xlu0 %4852  ;;  %v4848_v39 = vpop.permute.xlu1 %4847 }
 0x632   :  { %v5036_v20 = vsel %vm10853_vm1, %v5020_v25, 0.0  ;;  %v5035_v9 = vsel %vm10853_vm1, %v5019_v58, 0.0  ;;  %v4910_v51 = vmul.f32 %v4853_v23, %v12129_v52  ;;  %v4909_v15 = vmul.f32 %v4848_v39, %v12123_v41 }
 0x633   :  { %v6649_v17 = vpack.i.bf16 %v5036_v20, %v5035_v9 }
 0x635   :  { %v4949_v29 = vpop.permute.xlu0 %4948  ;;  %6650 = vrot.lane.b32.xlu0 %v6649_v17, %s7479_s4  ;;  %v4944_v49 = vpop.permute.xlu1 %4943 }
 0x636   :  { %v5006_v45 = vadd.f32 %v4949_v29, %v4910_v51  ;;  %v5005_v13 = vadd.f32 %v4944_v49, %v4909_v15 }
 0x638   :  { %v5022_v14 = vmax.f32 %v5006_v45, 0.0  ;;  %v5021_v24 = vmax.f32 %v5005_v13, 0.0 }
 0x639   :  { %v4863_v37 = vpop.permute.xlu0 %4862  ;;  %v4858_v36 = vpop.permute.xlu1 %4857 }
 0x63a   :  { %v5038_v22 = vsel %vm10853_vm1, %v5022_v14, 0.0  ;;  %v5037_v57 = vsel %vm10853_vm1, %v5021_v24, 0.0  ;;  %v4912_v52 = vmul.f32 %v4863_v37, %v12126_v34  ;;  %v4911_v41 = vmul.f32 %v4858_v36, %v12121_v21 }
 0x63b   :  { %v6654_v4 = vpack.i.bf16 %v5038_v22, %v5037_v57 }
 0x63d   :  { %v4959_v10 = vpop.permute.xlu0 %4958  ;;  %6655 = vrot.lane.b32.xlu1 %v6654_v4, %s7479_s4  ;;  %v4954_v1 = vpop.permute.xlu1 %4953 }
 0x63e   :  { %v5008_v8 = vadd.f32 %v4959_v10, %v4912_v52  ;;  %v5007_v59 = vadd.f32 %v4954_v1, %v4911_v41 }
 0x640   :  { %v5024_v28 = vmax.f32 %v5008_v8, 0.0  ;;  %v5023_v48 = vmax.f32 %v5007_v59, 0.0 }
 0x641   :  { %v4873_v46 = vpop.permute.xlu0 %4872  ;;  %v4868_v27 = vpop.permute.xlu1 %4867 }
 0x642   :  { %v5040_v3 = vsel %vm10853_vm1, %v5024_v28, 0.0  ;;  %v5039_v43 = vsel %vm10853_vm1, %v5023_v48, 0.0  ;;  %v4914_v34 = vmul.f32 %v4873_v46, %v12149_v5  ;;  %v4913_v21 = vmul.f32 %v4868_v27, %v12143_v11 }
 0x643   :  { %v6659_v33 = vpack.i.bf16 %v5040_v3, %v5039_v43 }
 0x645   :  { %v4969_v19 = vpop.permute.xlu0 %4968  ;;  %6660 = vrot.lane.b32.xlu0 %v6659_v33, %s7479_s4  ;;  %v4964_v44 = vpop.permute.xlu1 %4963 }
 0x646   :  { %v5010_v40 = vadd.f32 %v4969_v19, %v4914_v34  ;;  %v5009_v62 = vadd.f32 %v4964_v44, %v4913_v21 }
 0x648   :  { %v5026_v54 = vmax.f32 %v5010_v40, 0.0  ;;  %v5025_v55 = vmax.f32 %v5009_v62, 0.0 }
 0x649   :  { %v4883_v47 = vpop.permute.xlu0 %4882  ;;  %v4878_v38 = vpop.permute.xlu1 %4877 }
 0x64a   :  { %v5042_v42 = vsel %vm10853_vm1, %v5026_v54, 0.0  ;;  %v5041_v61 = vsel %vm10853_vm1, %v5025_v55, 0.0  ;;  %v4916_v5 = vmul.f32 %v4883_v47, %v12146_v35  ;;  %v4915_v11 = vmul.f32 %v4878_v38, %v12140_v2 }
 0x64b   :  { %v6664_v0 = vpack.i.bf16 %v5042_v42, %v5041_v61 }
 0x64d   :  { %v4979_v16 = vpop.permute.xlu0 %4978  ;;  %6665 = vrot.lane.b32.xlu1 %v6664_v0, %s7479_s4  ;;  %v4974_v50 = vpop.permute.xlu1 %4973 }
 0x64e   :  { %v5012_v26 = vadd.f32 %v4979_v16, %v4916_v5  ;;  %v5011_v32 = vadd.f32 %v4974_v50, %v4915_v11 }
 0x650   :  { %v5028_v60 = vmax.f32 %v5012_v26, 0.0  ;;  %v5027_v63 = vmax.f32 %v5011_v32, 0.0 }
 0x651   :  { %v4893_v53 = vpop.permute.xlu0 %4892  ;;  %v4888_v18 = vpop.permute.xlu1 %4887 }
 0x652   :  { %v5044_v56 = vsel %vm10853_vm1, %v5028_v60, 0.0  ;;  %v5043_v25 = vsel %vm10853_vm1, %v5027_v63, 0.0  ;;  %v4918_v35 = vmul.f32 %v4893_v53, %v12169_v30  ;;  %v4917_v2 = vmul.f32 %v4888_v18, %v12163_v6 }
 0x653   :  { %v6669_v58 = vpack.i.bf16 %v5044_v56, %v5043_v25 }
 0x655   :  { %v4989_v23 = vpop.permute.xlu0 %4988  ;;  %6670 = vrot.lane.b32.xlu0 %v6669_v58, %s7479_s4  ;;  %v4984_v39 = vpop.permute.xlu1 %4983 }
 0x656   :  { %v5014_v20 = vadd.f32 %v4989_v23, %v4918_v35  ;;  %v5013_v9 = vadd.f32 %v4984_v39, %v4917_v2 }
 0x658   :  { %v5030_v17 = vmax.f32 %v5014_v20, 0.0  ;;  %v5029_v51 = vmax.f32 %v5013_v9, 0.0 }
 0x659   :  { %v4903_v15 = vpop.permute.xlu0 %4902  ;;  %v4898_v29 = vpop.permute.xlu1 %4897 }
 0x65a   :  { %v5046_v49 = vsel %vm10853_vm1, %v5030_v17, 0.0  ;;  %v5045_v45 = vsel %vm10853_vm1, %v5029_v51, 0.0  ;;  %v4920_v30 = vmul.f32 %v4903_v15, %v12166_v12  ;;  %v4919_v6 = vmul.f32 %v4898_v29, %v12160_v7 }
 0x65b   :  { %v6674_v13 = vpack.i.bf16 %v5046_v49, %v5045_v45 }
 0x65d   :  { %v4999_v14 = vpop.permute.xlu0 %4998  ;;  %6675 = vrot.lane.b32.xlu1 %v6674_v13, %s7479_s4  ;;  %v4994_v24 = vpop.permute.xlu1 %4993 }
 0x65e   :  { %v5016_v37 = vadd.f32 %v4999_v14, %v4920_v30  ;;  %v5015_v36 = vadd.f32 %v4994_v24, %v4919_v6 }
 0x660   :  { %v5032_v22 = vmax.f32 %v5016_v37, 0.0  ;;  %v5031_v57 = vmax.f32 %v5015_v36, 0.0 }
 0x662   :  { %v5048_v4 = vsel %vm10853_vm1, %v5032_v22, 0.0  ;;  %v5047_v52 = vsel %vm10853_vm1, %v5031_v57, 0.0 }
 0x663   :  { %v6679_v41 = vpack.i.bf16 %v5048_v4, %v5047_v52 }
 0x665   :  { %6680 = vrot.lane.b32.xlu0 %v6679_v41, %s7479_s4 }
 0x69f   :  { %v6646_v12 = vpop.permute.xlu1 %6645 }
 0x6a0   :  { %v6648_v7 = vunpack.i.h.bf16 %v6646_v12  ;;  %v6647_v10 = vunpack.i.l.bf16 %v6646_v12 }
 0x6a2   :  { %v12439_v1 = vsel %vm5113_vm3, 0.0, %v6648_v7  ;;  %v12442_v8 = vsel %vm5113_vm3, 0.0, %v6647_v10 }
 0x6a3   :  { %v5132_v59 = vsel %vm5130_vm4, %v12439_v1, 0.0  ;;  %v5131_v31 = vsel %vm5130_vm4, %v12442_v8, 0.0  ;;  %v6227_v28 = vpack.c.bf16 %v12439_v1, %v12442_v8 }
 0x6a4   :  { %v12450_v48 = vpack.i.bf16 %v5132_v59, %v5131_v31 }
 0x6a6   :  { %6685 = vrot.lane.b32.xlu1 %v12450_v48, %s7480_s5 }
 0x6a7   :  { %v6651_v46 = vpop.permute.xlu0 %6650 }
 0x6a8   :  { %v6653_v27 = vunpack.i.h.bf16 %v6651_v46  ;;  %v6652_v3 = vunpack.i.l.bf16 %v6651_v46 }
 0x6aa   :  { %v12455_v43 = vsel %vm5113_vm3, 0.0, %v6653_v27  ;;  %v12458_v33 = vsel %vm5113_vm3, 0.0, %v6652_v3 }
 0x6ab   :  { %v5134_v34 = vsel %vm5130_vm4, %v12455_v43, 0.0  ;;  %v5133_v21 = vsel %vm5130_vm4, %v12458_v33, 0.0  ;;  %v6230_v19 = vpack.c.bf16 %v12455_v43, %v12458_v33 }
 0x6ac   :  { %v12466_v44 = vpack.i.bf16 %v5134_v34, %v5133_v21  ;;  %v7086_v34 = vld [vmem:[%s12800_s6 + $0x4] ss:$36 sps:$4 sm:$0xff]   ;;  %v7089_v21 = vld [vmem:[%s12800_s6 + $0xc] ss:$36 sps:$4 sm:$0xff]  }
 0x6ad   :  { %5763 = vmatprep.mubr.bf16.mxu1 %v7086_v34  ;;  %5812 = vmatprep.mubr.bf16.mxu0 %v7089_v21 }
 0x6ae   :  { %6690 = vrot.lane.b32.xlu0 %v12466_v44, %s7480_s5 }
 0x6af   :  { %v6656_v40 = vpop.permute.xlu1 %6655 }
 0x6b0   :  { %v6658_v62 = vunpack.i.h.bf16 %v6656_v40  ;;  %v6657_v54 = vunpack.i.l.bf16 %v6656_v40 }
 0x6b2   :  { %v12471_v55 = vsel %vm5113_vm3, 0.0, %v6658_v62  ;;  %v12474_v47 = vsel %vm5113_vm3, 0.0, %v6657_v54 }
 0x6b3   :  { %v5136_v38 = vsel %vm5130_vm4, %v12471_v55, 0.0  ;;  %v5135_v42 = vsel %vm5130_vm4, %v12474_v47, 0.0  ;;  %v6233_v61 = vpack.c.bf16 %v12471_v55, %v12474_v47 }
 0x6b4   :  { %v12482_v0 = vpack.i.bf16 %v5136_v38, %v5135_v42 }
 0x6b6   :  { %6695 = vrot.lane.b32.xlu1 %v12482_v0, %s7480_s5 }
 0x6b7   :  { %v6661_v5 = vpop.permute.xlu0 %6660 }
 0x6b8   :  { %v6663_v11 = vunpack.i.h.bf16 %v6661_v5  ;;  %v6662_v16 = vunpack.i.l.bf16 %v6661_v5 }
 0x6ba   :  { %v12487_v50 = vsel %vm5113_vm3, 0.0, %v6663_v11  ;;  %v12490_v26 = vsel %vm5113_vm3, 0.0, %v6662_v16 }
 0x6bb   :  { %v5138_v32 = vsel %vm5130_vm4, %v12487_v50, 0.0  ;;  %v5137_v60 = vsel %vm5130_vm4, %v12490_v26, 0.0  ;;  %v6236_v63 = vpack.c.bf16 %v12487_v50, %v12490_v26 }
 0x6bc   :  { %v12498_v53 = vpack.i.bf16 %v5138_v32, %v5137_v60 }
 0x6be   :  { %6700 = vrot.lane.b32.xlu0 %v12498_v53, %s7480_s5 }
 0x6bf   :  { %v6666_v18 = vpop.permute.xlu1 %6665 }
 0x6c0   :  { %v6668_v56 = vunpack.i.h.bf16 %v6666_v18  ;;  %v6667_v25 = vunpack.i.l.bf16 %v6666_v18 }
 0x6c2   :  { %v12503_v58 = vsel %vm5113_vm3, 0.0, %v6668_v56  ;;  %v12506_v35 = vsel %vm5113_vm3, 0.0, %v6667_v25 }
 0x6c3   :  { %v5140_v2 = vsel %vm5130_vm4, %v12503_v58, 0.0  ;;  %v5139_v23 = vsel %vm5130_vm4, %v12506_v35, 0.0  ;;  %v6239_v39 = vpack.c.bf16 %v12503_v58, %v12506_v35 }
 0x6c4   :  { %v12514_v20 = vpack.i.bf16 %v5140_v2, %v5139_v23 }
 0x6c6   :  { %6705 = vrot.lane.b32.xlu1 %v12514_v20, %s7480_s5 }
 0x6c7   :  { %v6671_v9 = vpop.permute.xlu0 %6670 }
 0x6c8   :  { %v6673_v17 = vunpack.i.h.bf16 %v6671_v9  ;;  %v6672_v51 = vunpack.i.l.bf16 %v6671_v9 }
 0x6ca   :  { %v12519_v15 = vsel %vm5113_vm3, 0.0, %v6673_v17  ;;  %v12522_v29 = vsel %vm5113_vm3, 0.0, %v6672_v51  ;;  %6715 = vrot.lane.b32.xlu1 %v12450_v48, %s7481_s11 }
 0x6cb   :  { %v5142_v49 = vsel %vm5130_vm4, %v12519_v15, 0.0  ;;  %v5141_v45 = vsel %vm5130_vm4, %v12522_v29, 0.0  ;;  %v6242_v13 = vpack.c.bf16 %v12519_v15, %v12522_v29 }
 0x6cc   :  { %v12532_v30 = vpack.i.bf16 %v5142_v49, %v5141_v45 }
 0x6ce   :  { %6710 = vrot.lane.b32.xlu0 %v12532_v30, %s7480_s5 }
 0x6cf   :  { %v6676_v6 = vpop.permute.xlu1 %6675 }
 0x6d0   :  { %v6678_v14 = vunpack.i.h.bf16 %v6676_v6  ;;  %v6677_v24 = vunpack.i.l.bf16 %v6676_v6 }
 0x6d2   :  { %v12537_v37 = vsel %vm5113_vm3, 0.0, %v6678_v14  ;;  %v12540_v36 = vsel %vm5113_vm3, 0.0, %v6677_v24  ;;  %6720 = vrot.lane.b32.xlu0 %v12450_v48, %s7482_s12 }
 0x6d3   :  { %v5144_v22 = vsel %vm5130_vm4, %v12537_v37, 0.0  ;;  %v5143_v57 = vsel %vm5130_vm4, %v12540_v36, 0.0  ;;  %v6245_v4 = vpack.c.bf16 %v12537_v37, %v12540_v36  ;;  %v7084_v37 = vld [vmem:[%s12800_s6] ss:$36 sps:$4 sm:$0xff]   ;;  %v7090_v36 = vld [vmem:[%s12800_s6 + $0x4c] ss:$36 sps:$4 sm:$0xff]  }
 0x6d4   :  { %v12550_v52 = vpack.i.bf16 %v5144_v22, %v5143_v57 }
 0x6d6   :  { %6730 = vrot.lane.b32.xlu0 %v12466_v44, %s7481_s11  ;;  %6725 = vrot.lane.b32.xlu1 %v12550_v52, %s7480_s5 }
 0x6d7   :  { %v6681_v41 = vpop.permute.xlu0 %6680 }
 0x6d8   :  { %v6683_v12 = vunpack.i.h.bf16 %v6681_v41  ;;  %v6682_v7 = vunpack.i.l.bf16 %v6681_v41 }
 0x6da   :  { %v12557_v10 = vsel %vm5113_vm3, 0.0, %v6683_v12  ;;  %v12560_v59 = vsel %vm5113_vm3, 0.0, %v6682_v7  ;;  %6735 = vrot.lane.b32.xlu1 %v12466_v44, %s7482_s12 }
 0x6db   :  { %v5146_v31 = vsel %vm5130_vm4, %v12557_v10, 0.0  ;;  %v5145_v46 = vsel %vm5130_vm4, %v12560_v59, 0.0  ;;  %v6248_v27 = vpack.c.bf16 %v12557_v10, %v12560_v59 }
 0x6dc   :  { %v12570_v3 = vpack.i.bf16 %v5146_v31, %v5145_v46 }
 0x6de   :  { %6740 = vrot.lane.b32.xlu0 %v12570_v3, %s7480_s5  ;;  %6745 = vrot.lane.b32.xlu1 %v12482_v0, %s7481_s11 }
 0x6e2   :  { %6750 = vrot.lane.b32.xlu0 %v12482_v0, %s7482_s12  ;;  %6755 = vrot.lane.b32.xlu1 %v12498_v53, %s7481_s11 }
 0x6e6   :  { %6760 = vrot.lane.b32.xlu0 %v12450_v48, %s7483_s14  ;;  %6765 = vrot.lane.b32.xlu1 %v12498_v53, %s7482_s12 }
 0x6ea   :  { %6770 = vrot.lane.b32.xlu0 %v12450_v48, %s7484_s15  ;;  %6775 = vrot.lane.b32.xlu1 %v12514_v20, %s7481_s11 }
 0x6ee   :  { %6780 = vrot.lane.b32.xlu0 %v12466_v44, %s7483_s14  ;;  %6785 = vrot.lane.b32.xlu1 %v12514_v20, %s7482_s12 }
 0x6f2   :  { %6790 = vrot.lane.b32.xlu0 %v12466_v44, %s7484_s15  ;;  %6795 = vrot.lane.b32.xlu1 %v12532_v30, %s7481_s11 }
 0x6f6   :  { %6800 = vrot.lane.b32.xlu0 %v12482_v0, %s7483_s14  ;;  %6805 = vrot.lane.b32.xlu1 %v12532_v30, %s7482_s12 }
 0x6fa   :  { %6810 = vrot.lane.b32.xlu0 %v12482_v0, %s7484_s15  ;;  %6815 = vrot.lane.b32.xlu1 %v12550_v52, %s7481_s11 }
 0x6fe   :  { %6820 = vrot.lane.b32.xlu0 %v12498_v53, %s7483_s14  ;;  %6825 = vrot.lane.b32.xlu1 %v12550_v52, %s7482_s12 }
 0x702   :  { %6830 = vrot.lane.b32.xlu0 %v12498_v53, %s7484_s15  ;;  %6835 = vrot.lane.b32.xlu1 %v12570_v3, %s7481_s11 }
 0x706   :  { %6840 = vrot.lane.b32.xlu0 %v12514_v20, %s7483_s14  ;;  %6845 = vrot.lane.b32.xlu1 %v12570_v3, %s7482_s12 }
 0x70a   :  { %6850 = vrot.lane.b32.xlu0 %v12514_v20, %s7484_s15  ;;  %6855 = vrot.lane.b32.xlu1 %v12532_v30, %s7483_s14 }
 0x70e   :  { %6860 = vrot.lane.b32.xlu0 %v12450_v48, %s7485_s18  ;;  %6865 = vrot.lane.b32.xlu1 %v12532_v30, %s7484_s15 }
 0x712   :  { %6870 = vrot.lane.b32.xlu0 %v12450_v48, %s7486_s19  ;;  %6875 = vrot.lane.b32.xlu1 %v12550_v52, %s7483_s14 }
 0x716   :  { %6880 = vrot.lane.b32.xlu0 %v12466_v44, %s7485_s18  ;;  %6885 = vrot.lane.b32.xlu1 %v12550_v52, %s7484_s15 }
 0x718   :  { %v6686_v40 = vpop.permute.xlu1 %6685 }
 0x719   :  { %v6688_v62 = vunpack.i.h.bf16 %v6686_v40  ;;  %v6687_v54 = vunpack.i.l.bf16 %v6686_v40 }
 0x71a   :  { %6890 = vrot.lane.b32.xlu0 %v12466_v44, %s7486_s19  ;;  %6895 = vrot.lane.b32.xlu1 %v12570_v3, %s7483_s14 }
 0x71b   :  { %v5555_v38 = vpack.c.bf16 %v6688_v62, %v6687_v54 }
 0x71d   :  { %6458 = vmatprep.subr.bf16.mxu1 %v5555_v38 }
 0x71e   :  { %6900 = vrot.lane.b32.xlu0 %v12482_v0, %s7485_s18  ;;  %6905 = vrot.lane.b32.xlu1 %v12570_v3, %s7484_s15 }
 0x71f   :  { %6459 = vmatpush3.bf16.msk.msra.mxu1 %vm12644_vm5, %v6227_v28 }
 0x720   :  { %v6691_v5 = vpop.permute.xlu0 %6690 }
 0x721   :  { %v6693_v11 = vunpack.i.h.bf16 %v6691_v5  ;;  %v6692_v16 = vunpack.i.l.bf16 %v6691_v5 }
 0x722   :  { %6910 = vrot.lane.b32.xlu0 %v12482_v0, %s7486_s19  ;;  %6915 = vrot.lane.b32.xlu1 %v12498_v53, %s7485_s18 }
 0x723   :  { %v5556_v32 = vpack.c.bf16 %v6693_v11, %v6692_v16 }
 0x725   :  { %6460 = vmatprep.subr.bf16.mxu1 %v5556_v32 }
 0x726   :  { %6920 = vrot.lane.b32.xlu0 %v12450_v48, %s7487_s20  ;;  %6925 = vrot.lane.b32.xlu1 %v12498_v53, %s7486_s19 }
 0x727   :  { %6461 = vmatpush3.bf16.msk.msra.mxu1 %vm12644_vm5, %v6230_v19 }
 0x728   :  { %v6696_v1 = vpop.permute.xlu1 %6695 }
 0x729   :  { %v6698_v8 = vunpack.i.h.bf16 %v6696_v1  ;;  %v6697_v28 = vunpack.i.l.bf16 %v6696_v1 }
 0x72a   :  { %6930 = vrot.lane.b32.xlu0 %v12514_v20, %s7485_s18  ;;  %6935 = vrot.lane.b32.xlu1 %v12466_v44, %s7487_s20 }
 0x72b   :  { %v5557_v60 = vpack.c.bf16 %v6698_v8, %v6697_v28 }
 0x72d   :  { %6462 = vmatprep.subr.bf16.mxu1 %v5557_v60 }
 0x72e   :  { %6940 = vrot.lane.b32.xlu0 %v12514_v20, %s7486_s19  ;;  %6945 = vrot.lane.b32.xlu1 %v12532_v30, %s7485_s18 }
 0x72f   :  { %6463 = vmatpush3.bf16.msk.msra.mxu1 %vm12644_vm5, %v6233_v61 }
 0x730   :  { %v6701_v48 = vpop.permute.xlu0 %6700 }
 0x731   :  { %v6703_v43 = vunpack.i.h.bf16 %v6701_v48  ;;  %v6702_v33 = vunpack.i.l.bf16 %v6701_v48  ;;  %v7092_v48 = vld [vmem:[%s12800_s6 + $0x48] ss:$36 sps:$4 sm:$0xff]  }
 0x732   :  { %6950 = vrot.lane.b32.xlu0 %v12482_v0, %s7487_s20  ;;  %6955 = vrot.lane.b32.xlu1 %v12532_v30, %s7486_s19 }
 0x733   :  { %v5558_v19 = vpack.c.bf16 %v6703_v43, %v6702_v33 }
 0x735   :  { %6464 = vmatprep.subr.bf16.mxu1 %v5558_v19  ;;  %v7095_v19 = vld [vmem:[%s12800_s6 + $0x14] ss:$36 sps:$4 sm:$0xff]  }
 0x736   :  { %6960 = vrot.lane.b32.xlu0 %v12550_v52, %s7485_s18  ;;  %6965 = vrot.lane.b32.xlu1 %v12498_v53, %s7487_s20 }
 0x737   :  { %6465 = vmatpush3.bf16.msk.msra.mxu1 %vm12644_vm5, %v6236_v63 }
 0x738   :  { %v6706_v44 = vpop.permute.xlu1 %6705 }
 0x739   :  { %v6708_v55 = vunpack.i.h.bf16 %v6706_v44  ;;  %v6707_v47 = vunpack.i.l.bf16 %v6706_v44 }
 0x73a   :  { %6970 = vrot.lane.b32.xlu0 %v12550_v52, %s7486_s19  ;;  %6975 = vrot.lane.b32.xlu1 %v12570_v3, %s7485_s18 }
 0x73b   :  { %v5559_v61 = vpack.c.bf16 %v6708_v55, %v6707_v47 }
 0x73c   :  { %v6716_v0 = vpop.permute.xlu1 %6715 }
 0x73d   :  { %v6718_v18 = vunpack.i.h.bf16 %v6716_v0  ;;  %v6717_v56 = vunpack.i.l.bf16 %v6716_v0  ;;  %6466 = vmatprep.subr.bf16.mxu1 %v5559_v61 }
 0x73e   :  { %6980 = vrot.lane.b32.xlu0 %v12514_v20, %s7487_s20  ;;  %6985 = vrot.lane.b32.xlu1 %v12570_v3, %s7486_s19 }
 0x73f   :  { %v5571_v50 = vpack.c.bf16 %v6718_v18, %v6717_v56  ;;  %6467 = vmatpush3.bf16.msk.msra.mxu1 %vm12644_vm5, %v6239_v39 }
 0x740   :  { %v6711_v26 = vpop.permute.xlu0 %6710 }
 0x741   :  { %v6713_v63 = vunpack.i.h.bf16 %v6711_v26  ;;  %v6712_v53 = vunpack.i.l.bf16 %v6711_v26  ;;  %6486 = vmatprep.subr.bf16.mxu0 %v5571_v50 }
 0x742   :  { %6990 = vrot.lane.b32.xlu0 %v12532_v30, %s7487_s20  ;;  %6995 = vrot.lane.b32.xlu1 %v12550_v52, %s7487_s20 }
 0x743   :  { %v5560_v25 = vpack.c.bf16 %v6713_v63, %v6712_v53 }
 0x744   :  { %v6721_v2 = vpop.permute.xlu0 %6720 }
 0x745   :  { %v6723_v23 = vunpack.i.h.bf16 %v6721_v2  ;;  %v6722_v20 = vunpack.i.l.bf16 %v6721_v2  ;;  %6468 = vmatprep.subr.bf16.mxu1 %v5560_v25 }
 0x746   :  { %7000 = vrot.lane.b32.xlu0 %v12570_v3, %s7487_s20  ;;  %6469 = vmatpush3.bf16.msk.msra.mxu1 %vm12644_vm5, %v6242_v13 }
 0x747   :  { %v5563_v58 = vpack.c.bf16 %v6723_v23, %v6722_v20 }
 0x748   :  { %v6731_v35 = vpop.permute.xlu0 %6730  ;;  %v6726_v39 = vpop.permute.xlu1 %6725 }
 0x749   :  { %v6733_v9 = vunpack.i.h.bf16 %v6731_v35  ;;  %v6732_v17 = vunpack.i.l.bf16 %v6731_v35  ;;  %v6728_v51 = vunpack.i.h.bf16 %v6726_v39  ;;  %v6727_v49 = vunpack.i.l.bf16 %v6726_v39  ;;  %6487 = vmatpush3.bf16.msra.mxu0 %v5563_v58 }
 0x74b   :  { %v5572_v45 = vpack.c.bf16 %v6733_v9, %v6732_v17  ;;  %v5561_v30 = vpack.c.bf16 %v6728_v51, %v6727_v49 }
 0x74c   :  { %v6736_v6 = vpop.permute.xlu1 %6735 }
 0x74d   :  { %v6738_v14 = vunpack.i.h.bf16 %v6736_v6  ;;  %v6737_v24 = vunpack.i.l.bf16 %v6736_v6  ;;  %6470 = vmatprep.subr.bf16.mxu1 %v5561_v30  ;;  %6488 = vmatprep.subr.bf16.mxu0 %v5572_v45 }
 0x74e   :  { %6471 = vmatpush3.bf16.msk.msra.mxu1 %vm12644_vm5, %v6245_v4 }
 0x74f   :  { %v5564_v15 = vpack.c.bf16 %v6738_v14, %v6737_v24 }
 0x750   :  { %v6741_v29 = vpop.permute.xlu0 %6740  ;;  %v6746_v13 = vpop.permute.xlu1 %6745 }
 0x751   :  { %v6743_v22 = vunpack.i.h.bf16 %v6741_v29  ;;  %v6742_v57 = vunpack.i.l.bf16 %v6741_v29  ;;  %v6748_v52 = vunpack.i.h.bf16 %v6746_v13  ;;  %v6747_v41 = vunpack.i.l.bf16 %v6746_v13  ;;  %6489 = vmatpush3.bf16.msra.mxu0 %v5564_v15 }
 0x753   :  { %v5562_v12 = vpack.c.bf16 %v6743_v22, %v6742_v57  ;;  %v5573_v7 = vpack.c.bf16 %v6748_v52, %v6747_v41 }
 0x754   :  { %v6751_v31 = vpop.permute.xlu0 %6750  ;;  %v6756_v46 = vpop.permute.xlu1 %6755 }
 0x755   :  { %v6753_v3 = vunpack.i.h.bf16 %v6751_v31  ;;  %v6752_v34 = vunpack.i.l.bf16 %v6751_v31  ;;  %v6758_v21 = vunpack.i.h.bf16 %v6756_v46  ;;  %v6757_v40 = vunpack.i.l.bf16 %v6756_v46  ;;  %6472 = vmatprep.subr.bf16.mxu1 %v5562_v12  ;;  %6490 = vmatprep.subr.bf16.mxu0 %v5573_v7 }
 0x756   :  { %6473 = vmatpush3.bf16.msk.msra.mxu1 %vm12644_vm5, %v6248_v27 }
 0x757   :  { %v5565_v4 = vpack.c.bf16 %v6753_v3, %v6752_v34  ;;  %v5574_v62 = vpack.c.bf16 %v6758_v21, %v6757_v40 }
 0x758   :  { %v6761_v54 = vpop.permute.xlu0 %6760  ;;  %v6766_v38 = vpop.permute.xlu1 %6765 }
 0x759   :  { %v6763_v5 = vunpack.i.h.bf16 %v6761_v54  ;;  %v6762_v11 = vunpack.i.l.bf16 %v6761_v54  ;;  %v6768_v16 = vunpack.i.h.bf16 %v6766_v38  ;;  %v6767_v32 = vunpack.i.l.bf16 %v6766_v38  ;;  %6491 = vmatpush3.bf16.msra.mxu0 %v5565_v4  ;;  %5764 = vmatmul.mubr.bf16.vlgmr.msra.gmra.mrb[48].mxu1 %v7084_v37 }
 0x75a   :  { %6492 = vmatprep.subr.bf16.mxu0 %v5574_v62  ;;  %5771 = vmatprep.mubr.bf16.mxu1 %v7090_v36 }
 0x75b   :  { %v5587_v10 = vpack.c.bf16 %v6763_v5, %v6762_v11  ;;  %v5566_v59 = vpack.c.bf16 %v6768_v16, %v6767_v32 }
 0x75c   :  { %v6771_v42 = vpop.permute.xlu0 %6770  ;;  %v6776_v27 = vpop.permute.xlu1 %6775 }
 0x75d   :  { %v6773_v1 = vunpack.i.h.bf16 %v6771_v42  ;;  %v6772_v8 = vunpack.i.l.bf16 %v6771_v42  ;;  %v6778_v28 = vunpack.i.h.bf16 %v6776_v27  ;;  %v6777_v60 = vunpack.i.l.bf16 %v6776_v27  ;;  %6493 = vmatpush3.bf16.msra.mxu0 %v5566_v59  ;;  %6514 = vmatprep.subr.bf16.mxu1 %v5587_v10 }
 0x75f   :  { %v5579_v43 = vpack.c.bf16 %v6773_v1, %v6772_v8  ;;  %v5575_v33 = vpack.c.bf16 %v6778_v28, %v6777_v60  ;;  %v7087_v28 = vld [vmem:[%s12800_s6 + $0x8] ss:$36 sps:$4 sm:$0xff]  }
 0x760   :  { %v6781_v44 = vpop.permute.xlu0 %6780  ;;  %v6786_v55 = vpop.permute.xlu1 %6785 }
 0x761   :  { %v6783_v47 = vunpack.i.h.bf16 %v6781_v44  ;;  %v6782_v61 = vunpack.i.l.bf16 %v6781_v44  ;;  %v6788_v0 = vunpack.i.h.bf16 %v6786_v55  ;;  %v6787_v18 = vunpack.i.l.bf16 %v6786_v55  ;;  %6494 = vmatprep.subr.bf16.mxu0 %v5575_v33  ;;  %6515 = vmatpush3.bf16.msra.mxu1 %v5579_v43 }
 0x762   :  { %5772 = vmatmul.mubr.bf16.gmra.mrb[52].mxu1 %v7092_v48 }
 0x763   :  { %v5588_v56 = vpack.c.bf16 %v6783_v47, %v6782_v61  ;;  %v5567_v50 = vpack.c.bf16 %v6788_v0, %v6787_v18  ;;  %5861 = vmatprep.mubr.bf16.mxu1 %v7095_v19  ;;  %v7096_v19 = vld [vmem:[%s12800_s6 + $0x54] ss:$36 sps:$4 sm:$0xff]  }
 0x764   :  { %v6791_v26 = vpop.permute.xlu0 %6790  ;;  %v6796_v63 = vpop.permute.xlu1 %6795 }
 0x765   :  { %v6793_v53 = vunpack.i.h.bf16 %v6791_v26  ;;  %v6792_v25 = vunpack.i.l.bf16 %v6791_v26  ;;  %v6798_v2 = vunpack.i.h.bf16 %v6796_v63  ;;  %v6797_v23 = vunpack.i.l.bf16 %v6796_v63  ;;  %6495 = vmatpush3.bf16.msra.mxu0 %v5567_v50  ;;  %6516 = vmatprep.subr.bf16.mxu1 %v5588_v56 }
 0x767   :  { %v5580_v20 = vpack.c.bf16 %v6793_v53, %v6792_v25  ;;  %v5576_v58 = vpack.c.bf16 %v6798_v2, %v6797_v23  ;;  %v7098_v2 = vld [vmem:[%s12800_s6 + $0x50] ss:$36 sps:$4 sm:$0xff]  }
 0x768   :  { %v6801_v35 = vpop.permute.xlu0 %6800  ;;  %v6806_v39 = vpop.permute.xlu1 %6805 }
 0x769   :  { %v6803_v9 = vunpack.i.h.bf16 %v6801_v35  ;;  %v6802_v17 = vunpack.i.l.bf16 %v6801_v35  ;;  %v6808_v51 = vunpack.i.h.bf16 %v6806_v39  ;;  %v6807_v49 = vunpack.i.l.bf16 %v6806_v39  ;;  %6496 = vmatprep.subr.bf16.mxu0 %v5576_v58  ;;  %6517 = vmatpush3.bf16.msra.mxu1 %v5580_v20  ;;  %v7104_v39 = vld [vmem:[%s12800_s6 + $0x1c] ss:$36 sps:$4 sm:$0xff]  }
 0x76b   :  { %v5589_v45 = vpack.c.bf16 %v6803_v9, %v6802_v17  ;;  %v5568_v30 = vpack.c.bf16 %v6808_v51, %v6807_v49 }
 0x76c   :  { %v6811_v6 = vpop.permute.xlu0 %6810  ;;  %v6816_v14 = vpop.permute.xlu1 %6815 }
 0x76d   :  { %v6813_v24 = vunpack.i.h.bf16 %v6811_v6  ;;  %v6812_v15 = vunpack.i.l.bf16 %v6811_v6  ;;  %v6818_v29 = vunpack.i.h.bf16 %v6816_v14  ;;  %v6817_v13 = vunpack.i.l.bf16 %v6816_v14  ;;  %6497 = vmatpush3.bf16.msra.mxu0 %v5568_v30  ;;  %6518 = vmatprep.subr.bf16.mxu1 %v5589_v45 }
 0x76f   :  { %v5581_v22 = vpack.c.bf16 %v6813_v24, %v6812_v15  ;;  %v5577_v57 = vpack.c.bf16 %v6818_v29, %v6817_v13 }
 0x770   :  { %v6821_v52 = vpop.permute.xlu0 %6820  ;;  %v6826_v41 = vpop.permute.xlu1 %6825 }
 0x771   :  { %v6823_v12 = vunpack.i.h.bf16 %v6821_v52  ;;  %v6822_v7 = vunpack.i.l.bf16 %v6821_v52  ;;  %v6828_v31 = vunpack.i.h.bf16 %v6826_v41  ;;  %v6827_v46 = vunpack.i.l.bf16 %v6826_v41  ;;  %6498 = vmatprep.subr.bf16.mxu0 %v5577_v57  ;;  %6519 = vmatpush3.bf16.msra.mxu1 %v5581_v22 }
 0x773   :  { %v5590_v3 = vpack.c.bf16 %v6823_v12, %v6822_v7  ;;  %v5569_v34 = vpack.c.bf16 %v6828_v31, %v6827_v46 }
 0x774   :  { %v6831_v21 = vpop.permute.xlu0 %6830  ;;  %v6836_v40 = vpop.permute.xlu1 %6835 }
 0x775   :  { %v6833_v37 = vunpack.i.h.bf16 %v6831_v21  ;;  %v6832_v36 = vunpack.i.l.bf16 %v6831_v21  ;;  %v6838_v4 = vunpack.i.h.bf16 %v6836_v40  ;;  %v6837_v62 = vunpack.i.l.bf16 %v6836_v40  ;;  %6499 = vmatpush3.bf16.msra.mxu0 %v5569_v34  ;;  %6520 = vmatprep.subr.bf16.mxu1 %v5590_v3 }
 0x777   :  { %v5582_v54 = vpack.c.bf16 %v6833_v37, %v6832_v36  ;;  %v5578_v38 = vpack.c.bf16 %v6838_v4, %v6837_v62 }
 0x778   :  { %v6841_v5 = vpop.permute.xlu0 %6840  ;;  %v6846_v11 = vpop.permute.xlu1 %6845 }
 0x779   :  { %v6843_v16 = vunpack.i.h.bf16 %v6841_v5  ;;  %v6842_v32 = vunpack.i.l.bf16 %v6841_v5  ;;  %v6848_v10 = vunpack.i.h.bf16 %v6846_v11  ;;  %v6847_v59 = vunpack.i.l.bf16 %v6846_v11  ;;  %6500 = vmatprep.subr.bf16.mxu0 %v5578_v38  ;;  %6521 = vmatpush3.bf16.msra.mxu1 %v5582_v54  ;;  %v7093_v54 = vld [vmem:[%s12800_s6 + $0x10] ss:$36 sps:$4 sm:$0xff]  }
 0x77b   :  { %v5591_v42 = vpack.c.bf16 %v6843_v16, %v6842_v32  ;;  %v5570_v27 = vpack.c.bf16 %v6848_v10, %v6847_v59  ;;  %v7099_v32 = vld [vmem:[%s12800_s6 + $0x5c] ss:$36 sps:$4 sm:$0xff]  }
 0x77c   :  { %v6851_v1 = vpop.permute.xlu0 %6850  ;;  %v6856_v8 = vpop.permute.xlu1 %6855 }
 0x77d   :  { %v6853_v60 = vunpack.i.h.bf16 %v6851_v1  ;;  %v6852_v48 = vunpack.i.l.bf16 %v6851_v1  ;;  %v6858_v43 = vunpack.i.h.bf16 %v6856_v8  ;;  %v6857_v33 = vunpack.i.l.bf16 %v6856_v8  ;;  %6501 = vmatpush3.bf16.msra.mxu0 %v5570_v27  ;;  %6522 = vmatprep.subr.bf16.mxu1 %v5591_v42 }
 0x77f   :  { %v5583_v44 = vpack.c.bf16 %v6853_v60, %v6852_v48  ;;  %v5592_v55 = vpack.c.bf16 %v6858_v43, %v6857_v33 }
 0x780   :  { %v6861_v47 = vpop.permute.xlu0 %6860  ;;  %v6866_v61 = vpop.permute.xlu1 %6865  ;;  %5813 = vmatmul.mubr.bf16.vlgmr.msra.gmra.mrb[64].mxu0 %v7087_v28 }
 0x781   :  { %v6863_v0 = vunpack.i.h.bf16 %v6861_v47  ;;  %v6862_v18 = vunpack.i.l.bf16 %v6861_v47  ;;  %v6868_v56 = vunpack.i.h.bf16 %v6866_v61  ;;  %v6867_v50 = vunpack.i.l.bf16 %v6866_v61  ;;  %6523 = vmatpush3.bf16.msra.mxu1 %v5583_v44  ;;  %5820 = vmatprep.mubr.bf16.mxu0 %v7096_v19  ;;  %v7101_v44 = vld [vmem:[%s12800_s6 + $0x58] ss:$36 sps:$4 sm:$0xff]  }
 0x782   :  { %6524 = vmatprep.subr.bf16.mxu1 %v5592_v55 }
 0x783   :  { %v5603_v26 = vpack.c.bf16 %v6863_v0, %v6862_v18  ;;  %v5584_v63 = vpack.c.bf16 %v6868_v56, %v6867_v50  ;;  %v7108_v18 = vld [vmem:[%s12800_s6 + $0x20] ss:$36 sps:$4 sm:$0xff]  }
 0x784   :  { %v6871_v53 = vpop.permute.xlu0 %6870  ;;  %v6876_v25 = vpop.permute.xlu1 %6875 }
 0x785   :  { %v6873_v23 = vunpack.i.h.bf16 %v6871_v53  ;;  %v6872_v20 = vunpack.i.l.bf16 %v6871_v53  ;;  %v6878_v58 = vunpack.i.h.bf16 %v6876_v25  ;;  %v6877_v35 = vunpack.i.l.bf16 %v6876_v25  ;;  %6525 = vmatpush3.bf16.msra.mxu1 %v5584_v63  ;;  %6542 = vmatprep.subr.bf16.mxu0 %v5603_v26 }
 0x787   :  { %v5595_v9 = vpack.c.bf16 %v6873_v23, %v6872_v20  ;;  %v5593_v17 = vpack.c.bf16 %v6878_v58, %v6877_v35 }
 0x788   :  { %v6881_v51 = vpop.permute.xlu0 %6880  ;;  %v6886_v49 = vpop.permute.xlu1 %6885  ;;  %5821 = vmatmul.mubr.bf16.gmra.mrb[68].mxu0 %v7098_v2 }
 0x789   :  { %v6883_v45 = vunpack.i.h.bf16 %v6881_v51  ;;  %v6882_v30 = vunpack.i.l.bf16 %v6881_v51  ;;  %v6888_v6 = vunpack.i.h.bf16 %v6886_v49  ;;  %v6887_v14 = vunpack.i.l.bf16 %v6886_v49  ;;  %6526 = vmatprep.subr.bf16.mxu1 %v5593_v17  ;;  %6543 = vmatpush3.bf16.msra.mxu0 %v5595_v9 }
 0x78a   :  { %5910 = vmatprep.mubr.bf16.mxu0 %v7104_v39 }
 0x78b   :  { %v5604_v24 = vpack.c.bf16 %v6883_v45, %v6882_v30  ;;  %v5585_v15 = vpack.c.bf16 %v6888_v6, %v6887_v14 }
 0x78c   :  { %v6891_v29 = vpop.permute.xlu0 %6890  ;;  %v6896_v13 = vpop.permute.xlu1 %6895 }
 0x78d   :  { %v6893_v22 = vunpack.i.h.bf16 %v6891_v29  ;;  %v6892_v57 = vunpack.i.l.bf16 %v6891_v29  ;;  %v6898_v52 = vunpack.i.h.bf16 %v6896_v13  ;;  %v6897_v41 = vunpack.i.l.bf16 %v6896_v13  ;;  %6527 = vmatpush3.bf16.msra.mxu1 %v5585_v15  ;;  %6544 = vmatprep.subr.bf16.mxu0 %v5604_v24 }
 0x78f   :  { %v5596_v12 = vpack.c.bf16 %v6893_v22, %v6892_v57  ;;  %v5594_v7 = vpack.c.bf16 %v6898_v52, %v6897_v41 }
 0x790   :  { %v6901_v31 = vpop.permute.xlu0 %6900  ;;  %v6906_v46 = vpop.permute.xlu1 %6905 }
 0x791   :  { %v6903_v3 = vunpack.i.h.bf16 %v6901_v31  ;;  %v6902_v34 = vunpack.i.l.bf16 %v6901_v31  ;;  %v6908_v21 = vunpack.i.h.bf16 %v6906_v46  ;;  %v6907_v40 = vunpack.i.l.bf16 %v6906_v46  ;;  %6528 = vmatprep.subr.bf16.mxu1 %v5594_v7  ;;  %6545 = vmatpush3.bf16.msra.mxu0 %v5596_v12 }
 0x793   :  { %v5605_v37 = vpack.c.bf16 %v6903_v3, %v6902_v34  ;;  %v5586_v36 = vpack.c.bf16 %v6908_v21, %v6907_v40 }
 0x794   :  { %v6911_v4 = vpop.permute.xlu0 %6910  ;;  %v6916_v62 = vpop.permute.xlu1 %6915 }
 0x795   :  { %v6913_v38 = vunpack.i.h.bf16 %v6911_v4  ;;  %v6912_v5 = vunpack.i.l.bf16 %v6911_v4  ;;  %v6918_v11 = vunpack.i.h.bf16 %v6916_v62  ;;  %v6917_v16 = vunpack.i.l.bf16 %v6916_v62  ;;  %6529 = vmatpush3.bf16.msra.mxu1 %v5586_v36  ;;  %6546 = vmatprep.subr.bf16.mxu0 %v5605_v37 }
 0x797   :  { %v5597_v10 = vpack.c.bf16 %v6913_v38, %v6912_v5  ;;  %v5606_v59 = vpack.c.bf16 %v6918_v11, %v6917_v16  ;;  %v7102_v16 = vld [vmem:[%s12800_s6 + $0x18] ss:$36 sps:$4 sm:$0xff]  }
 0x798   :  { %v6921_v42 = vpop.permute.xlu0 %6920  ;;  %v6926_v27 = vpop.permute.xlu1 %6925  ;;  %5862 = vmatmul.mubr.bf16.vlgmr.msra.gmra.mrb[56].mxu1 %v7093_v54 }
 0x799   :  { %v6923_v1 = vunpack.i.h.bf16 %v6921_v42  ;;  %v6922_v8 = vunpack.i.l.bf16 %v6921_v42  ;;  %v6928_v28 = vunpack.i.h.bf16 %v6926_v27  ;;  %v6927_v60 = vunpack.i.l.bf16 %v6926_v27  ;;  %6547 = vmatpush3.bf16.msra.mxu0 %v5597_v10  ;;  %5869 = vmatprep.mubr.bf16.mxu1 %v7099_v32  ;;  %v7105_v27 = vld [vmem:[%s12800_s6 + $0x64] ss:$36 sps:$4 sm:$0xff]  }
 0x79a   :  { %6548 = vmatprep.subr.bf16.mxu0 %v5606_v59 }
 0x79b   :  { %v5611_v48 = vpack.c.bf16 %v6923_v1, %v6922_v8  ;;  %v5598_v43 = vpack.c.bf16 %v6928_v28, %v6927_v60 }
 0x79c   :  { %v6931_v33 = vpop.permute.xlu0 %6930  ;;  %v6936_v19 = vpop.permute.xlu1 %6935 }
 0x79d   :  { %v6933_v55 = vunpack.i.h.bf16 %v6931_v33  ;;  %v6932_v47 = vunpack.i.l.bf16 %v6931_v33  ;;  %v6938_v61 = vunpack.i.h.bf16 %v6936_v19  ;;  %v6937_v0 = vunpack.i.l.bf16 %v6936_v19  ;;  %6549 = vmatpush3.bf16.msra.mxu0 %v5598_v43  ;;  %6612 = vmatprep.subr.bf16.mxu1 %v5611_v48  ;;  %v7107_v43 = vld [vmem:[%s12800_s6 + $0x60] ss:$36 sps:$4 sm:$0xff]   ;;  %v7109_v19 = vld [vmem:[%s12800_s6 + $0x68] ss:$36 sps:$4 sm:$0xff]  }
 0x79e   :  { %6613 = vmatpush3.bf16.msra.mxu1 %v5611_v48 }
 0x79f   :  { %v5607_v56 = vpack.c.bf16 %v6933_v55, %v6932_v47  ;;  %v5612_v50 = vpack.c.bf16 %v6938_v61, %v6937_v0 }
 0x7a0   :  { %v6941_v26 = vpop.permute.xlu0 %6940  ;;  %v6946_v63 = vpop.permute.xlu1 %6945  ;;  %5870 = vmatmul.mubr.bf16.gmra.mrb[60].mxu1 %v7101_v44 }
 0x7a1   :  { %v6943_v53 = vunpack.i.h.bf16 %v6941_v26  ;;  %v6942_v25 = vunpack.i.l.bf16 %v6941_v26  ;;  %v6948_v2 = vunpack.i.h.bf16 %v6946_v63  ;;  %v6947_v23 = vunpack.i.l.bf16 %v6946_v63  ;;  %6550 = vmatprep.subr.bf16.mxu0 %v5607_v56  ;;  %6614 = vmatprep.subr.bf16.mxu1 %v5612_v50 }
 0x7a2   :  { %6615 = vmatpush3.bf16.msra.mxu1 %v5612_v50  ;;  %6628 = vmatprep.mubr.bf16.mxu1 %v7108_v18 }
 0x7a3   :  { %v5599_v20 = vpack.c.bf16 %v6943_v53, %v6942_v25  ;;  %v5608_v58 = vpack.c.bf16 %v6948_v2, %v6947_v23 }
 0x7a4   :  { %v6951_v35 = vpop.permute.xlu0 %6950  ;;  %v6956_v39 = vpop.permute.xlu1 %6955 }
 0x7a5   :  { %v6953_v9 = vunpack.i.h.bf16 %v6951_v35  ;;  %v6952_v17 = vunpack.i.l.bf16 %v6951_v35  ;;  %v6958_v51 = vunpack.i.h.bf16 %v6956_v39  ;;  %v6957_v49 = vunpack.i.l.bf16 %v6956_v39  ;;  %6551 = vmatpush3.bf16.msra.mxu0 %v5599_v20 }
 0x7a6   :  { %6552 = vmatprep.subr.bf16.mxu0 %v5608_v58 }
 0x7a7   :  { %v5613_v45 = vpack.c.bf16 %v6953_v9, %v6952_v17  ;;  %v5600_v30 = vpack.c.bf16 %v6958_v51, %v6957_v49 }
 0x7a8   :  { %v6961_v6 = vpop.permute.xlu0 %6960  ;;  %v6966_v14 = vpop.permute.xlu1 %6965 }
 0x7a9   :  { %v6963_v24 = vunpack.i.h.bf16 %v6961_v6  ;;  %v6962_v15 = vunpack.i.l.bf16 %v6961_v6  ;;  %v6968_v29 = vunpack.i.h.bf16 %v6966_v14  ;;  %v6967_v13 = vunpack.i.l.bf16 %v6966_v14  ;;  %6553 = vmatpush3.bf16.msra.mxu0 %v5600_v30  ;;  %6616 = vmatprep.subr.bf16.mxu1 %v5613_v45 }
 0x7aa   :  { %6617 = vmatpush3.bf16.msra.mxu1 %v5613_v45 }
 0x7ab   :  { %v5609_v22 = vpack.c.bf16 %v6963_v24, %v6962_v15  ;;  %v5614_v57 = vpack.c.bf16 %v6968_v29, %v6967_v13 }
 0x7ac   :  { %v6971_v52 = vpop.permute.xlu0 %6970  ;;  %v6976_v41 = vpop.permute.xlu1 %6975 }
 0x7ad   :  { %v6973_v12 = vunpack.i.h.bf16 %v6971_v52  ;;  %v6972_v7 = vunpack.i.l.bf16 %v6971_v52  ;;  %v6978_v31 = vunpack.i.h.bf16 %v6976_v41  ;;  %v6977_v46 = vunpack.i.l.bf16 %v6976_v41  ;;  %6554 = vmatprep.subr.bf16.mxu0 %v5609_v22  ;;  %6618 = vmatprep.subr.bf16.mxu1 %v5614_v57 }
 0x7ae   :  { %6619 = vmatpush3.bf16.msra.mxu1 %v5614_v57 }
 0x7af   :  { %v5601_v3 = vpack.c.bf16 %v6973_v12, %v6972_v7  ;;  %v5610_v34 = vpack.c.bf16 %v6978_v31, %v6977_v46 }
 0x7b0   :  { %v6981_v21 = vpop.permute.xlu0 %6980  ;;  %v6986_v40 = vpop.permute.xlu1 %6985 }
 0x7b1   :  { %v6983_v37 = vunpack.i.h.bf16 %v6981_v21  ;;  %v6982_v36 = vunpack.i.l.bf16 %v6981_v21  ;;  %v6988_v4 = vunpack.i.h.bf16 %v6986_v40  ;;  %v6987_v62 = vunpack.i.l.bf16 %v6986_v40  ;;  %6555 = vmatpush3.bf16.msra.mxu0 %v5601_v3 }
 0x7b2   :  { %6556 = vmatprep.subr.bf16.mxu0 %v5610_v34 }
 0x7b3   :  { %v5615_v54 = vpack.c.bf16 %v6983_v37, %v6982_v36  ;;  %v5602_v38 = vpack.c.bf16 %v6988_v4, %v6987_v62 }
 0x7b4   :  { %v6991_v5 = vpop.permute.xlu0 %6990  ;;  %v6996_v11 = vpop.permute.xlu1 %6995 }
 0x7b5   :  { %v6993_v32 = vunpack.i.h.bf16 %v6991_v5  ;;  %v6992_v10 = vunpack.i.l.bf16 %v6991_v5  ;;  %v6998_v59 = vunpack.i.h.bf16 %v6996_v11  ;;  %v6997_v42 = vunpack.i.l.bf16 %v6996_v11  ;;  %6557 = vmatpush3.bf16.msra.mxu0 %v5602_v38  ;;  %6620 = vmatprep.subr.bf16.mxu1 %v5615_v54 }
 0x7b6   :  { %6621 = vmatpush3.bf16.msra.mxu1 %v5615_v54 }
 0x7b7   :  { %v5616_v1 = vpack.c.bf16 %v6993_v32, %v6992_v10  ;;  %v5617_v28 = vpack.c.bf16 %v6998_v59, %v6997_v42 }
 0x7b8   :  { %v7001_v8 = vpop.permute.xlu0 %7000  ;;  %5911 = vmatmul.mubr.bf16.vlgmr.msra.gmra.mrb[72].mxu0 %v7102_v16 }
 0x7b9   :  { %v7003_v60 = vunpack.i.h.bf16 %v7001_v8  ;;  %v7002_v48 = vunpack.i.l.bf16 %v7001_v8  ;;  %6622 = vmatprep.subr.bf16.mxu1 %v5616_v1  ;;  %5918 = vmatprep.mubr.bf16.mxu0 %v7105_v27 }
 0x7ba   :  { %6623 = vmatpush3.bf16.msra.mxu1 %v5616_v1 }
 0x7bb   :  { %6624 = vmatprep.subr.bf16.mxu1 %v5617_v28  ;;  %v5618_v33 = vpack.c.bf16 %v7003_v60, %v7002_v48 }
 0x7be   :  { %6625 = vmatpush3.bf16.msra.mxu1 %v5617_v28 }
 0x7bf   :  { %6626 = vmatprep.subr.bf16.mxu1 %v5618_v33 }
 0x7c0   :  { %5919 = vmatmul.mubr.bf16.gmra.mrb[76].mxu0 %v7107_v43 }
 0x7c2   :  { %6627 = vmatpush3.bf16.msra.mxu1 %v5618_v33 }
 0x7c5   :  { %6629 = vmatmul.mubr.bf16.vlgmr.msra.gmra.mrb[64].mxu1 %v7109_v19 }
 0x82c   :  { %v6474_v44 = vpop.f32.mrb[48].mxu1 }
 0x82d   :  { %v6475_v55 = vpop.f32.mrb[49].mxu1 }
 0x82e   :  { %v6476_v47 = vadd.f32 %v6475_v55, %v6474_v44  ;;  %v6477_v61 = vpop.f32.mrb[50].mxu1 }
 0x82f   :  { %v6478_v0 = vpop.f32.mrb[51].mxu1 }
 0x830   :  { %v6479_v18 = vadd.f32 %v6478_v0, %v6477_v61 }
 0x835   :  { %v6480_v56 = vpop.f32.mrb[52].mxu1 }
 0x836   :  { %v6481_v50 = vpop.f32.mrb[53].mxu1 }
 0x837   :  { %v6482_v26 = vadd.f32 %v6481_v50, %v6480_v56  ;;  %v6483_v63 = vpop.f32.mrb[54].mxu1 }
 0x838   :  { %v6484_v53 = vpop.f32.mrb[55].mxu1 }
 0x839   :  { %v6485_v25 = vadd.f32 %v6484_v53, %v6483_v63 }
 0x853   :  { %v6502_v2 = vpop.f32.mrb[64].mxu0 }
 0x854   :  { %v6503_v23 = vpop.f32.mrb[65].mxu0 }
 0x855   :  { %v6504_v20 = vadd.f32 %v6503_v23, %v6502_v2  ;;  %v6505_v58 = vpop.f32.mrb[66].mxu0 }
 0x856   :  { %v6506_v35 = vpop.f32.mrb[67].mxu0 }
 0x857   :  { %v5815_v39 = vadd.f32 %v6504_v20, %v6476_v47  ;;  %v6507_v9 = vadd.f32 %v6506_v35, %v6505_v58 }
 0x859   :  { %v5818_v17 = vadd.f32 %v6507_v9, %v6479_v18 }
 0x85b   :  { %v6508_v51 = vpop.f32.mrb[68].mxu0 }
 0x85c   :  { %v6509_v49 = vpop.f32.mrb[69].mxu0 }
 0x85d   :  { %v6510_v45 = vadd.f32 %v6509_v49, %v6508_v51  ;;  %v6511_v30 = vpop.f32.mrb[70].mxu0 }
 0x85e   :  { %v6512_v6 = vpop.f32.mrb[71].mxu0 }
 0x85f   :  { %v5823_v14 = vadd.f32 %v6510_v45, %v6482_v26  ;;  %v6513_v24 = vadd.f32 %v6512_v6, %v6511_v30 }
 0x861   :  { %v5826_v15 = vadd.f32 %v6513_v24, %v6485_v25 }
 0x86b   :  { %v6530_v29 = vpop.f32.mrb[56].mxu1 }
 0x86c   :  { %v6531_v13 = vpop.f32.mrb[57].mxu1 }
 0x86d   :  { %v6532_v22 = vadd.f32 %v6531_v13, %v6530_v29  ;;  %v6533_v57 = vpop.f32.mrb[58].mxu1 }
 0x86e   :  { %v6534_v52 = vpop.f32.mrb[59].mxu1 }
 0x86f   :  { %v5864_v41 = vadd.f32 %v6532_v22, %v5815_v39  ;;  %v6535_v12 = vadd.f32 %v6534_v52, %v6533_v57 }
 0x871   :  { %v5867_v7 = vadd.f32 %v6535_v12, %v5818_v17 }
 0x873   :  { %v6536_v31 = vpop.f32.mrb[60].mxu1 }
 0x874   :  { %v6537_v46 = vpop.f32.mrb[61].mxu1 }
 0x875   :  { %v6538_v3 = vadd.f32 %v6537_v46, %v6536_v31  ;;  %v6539_v34 = vpop.f32.mrb[62].mxu1 }
 0x876   :  { %v6540_v21 = vpop.f32.mrb[63].mxu1 }
 0x877   :  { %v5872_v40 = vadd.f32 %v6538_v3, %v5823_v14  ;;  %v6541_v37 = vadd.f32 %v6540_v21, %v6539_v34 }
 0x879   :  { %v5875_v36 = vadd.f32 %v6541_v37, %v5826_v15 }
 0x88b   :  { %v6558_v4 = vpop.f32.mrb[72].mxu0 }
 0x88c   :  { %v6559_v62 = vpop.f32.mrb[73].mxu0 }
 0x88d   :  { %v6560_v54 = vadd.f32 %v6559_v62, %v6558_v4  ;;  %v6561_v38 = vpop.f32.mrb[74].mxu0 }
 0x88e   :  { %v6562_v5 = vpop.f32.mrb[75].mxu0 }
 0x88f   :  { %v6563_v11 = vadd.f32 %v6562_v5, %v6561_v38  ;;  %v5913_v16 = vadd.f32 %v6560_v54, %v5864_v41 }
 0x891   :  { %v5916_v32 = vadd.f32 %v6563_v11, %v5867_v7 }
 0x893   :  { %v6564_v10 = vpop.f32.mrb[76].mxu0 }
 0x894   :  { %v6565_v59 = vpop.f32.mrb[77].mxu0 }
 0x895   :  { %v6566_v42 = vadd.f32 %v6565_v59, %v6564_v10  ;;  %v6567_v27 = vpop.f32.mrb[78].mxu0 }
 0x896   :  { %v6568_v1 = vpop.f32.mrb[79].mxu0 }
 0x897   :  { %v6569_v8 = vadd.f32 %v6568_v1, %v6567_v27  ;;  %v5921_v28 = vadd.f32 %v6566_v42, %v5872_v40 }
 0x898   :  { %v6630_v60 = vpop.f32.mrb[64].mxu1 }
 0x899   :  { %v5970_v48 = vadd.f32 %v6630_v60, %v5921_v28  ;;  %v5961_v43 = vpop.f32.mrb[65].mxu1  ;;  %v5924_v33 = vadd.f32 %v6569_v8, %v5875_v36 }
 0x89a   :  { %v5962_v19 = vadd.f32 %v5961_v43, %v5913_v16  ;;  %v6631_v44 = vpop.f32.mrb[66].mxu1 }
 0x89b   :  { %5978 = vst.msk [vmem:[%s12801_s7 + $0x10] sm:$0xff] %vm154_vm0, %v5970_v48  ;;  %v5973_v55 = vadd.f32 %v6631_v44, %v5924_v33  ;;  %v5964_v47 = vpop.f32.mrb[67].mxu1 }
 0x89c   :  { %5976 = vst.msk [vmem:[%s12801_s7] sm:$0xff] %vm154_vm0, %v5962_v19  ;;  %v5965_v61 = vadd.f32 %v5964_v47, %v5916_v32 }
 0x89d   :  { %5979 = vst.msk [vmem:[%s12801_s7 + $0x18] sm:$0xff] %vm154_vm0, %v5973_v55 }
 0x89e   :  { %5977 = vst.msk [vmem:[%s12801_s7 + $0x8] sm:$0xff] %vm154_vm0, %v5965_v61 }

</bundles_post_ra>
